<compile_context>
chip_gen: v5e
topology: v5e:2x2
jax: 0.10.0
libtpu: 0.0.40
codegen_flags: <defaults>
</compile_context>

<pallas_src>
import functools

import jax
import jax.numpy as jnp
from jax.experimental import pallas as pl
from jax.experimental.pallas import tpu as pltpu


def _round_up(n: int, m: int) -> int:
    return ((n + m - 1) // m) * m


def _mlp_kernel(x_ref, w1_ref, b1_ref, w2_ref, b2_ref, o_ref):
    # fc1: (TB, D_in) @ (D_in, H), f32 accumulation on the MXU.
    h = jnp.dot(x_ref[...], w1_ref[...], preferred_element_type=jnp.float32)
    h = h + b1_ref[...].astype(jnp.float32)
    # ReLU (f32 on the VPU).
    h = jnp.maximum(h, 0.0)
    # fc2: (TB, H) @ (H, D_out); cast h to the weight dtype so a bf16 weight
    # path runs the MXU at bf16 rate while still accumulating in f32.
    y = jnp.dot(h.astype(w2_ref.dtype), w2_ref[...],
                preferred_element_type=jnp.float32)
    y = y + b2_ref[...].astype(jnp.float32)
    # Sigmoid (EUP) and cast to the output dtype.
    o_ref[...] = jax.nn.sigmoid(y).astype(o_ref.dtype)


@functools.partial(jax.jit, static_argnames=("block_b", "compute_dtype"))
def mlp_forward(x, w1, b1, w2, b2, *, block_b=None, compute_dtype=None):
    """x: (B, D_in). w1: (D_in, H), b1: (1, H), w2: (H, D_out), b2: (1, D_out).

    block_b: batch rows fed to the MXU per grid step (default 256).
    compute_dtype: optionally jnp.bfloat16 to run the matmuls at bf16 MXU
      rate (accumulation, bias add and activations stay in f32).
    """
    B, D_in = x.shape
    H = w1.shape[1]
    D_out = w2.shape[1]
    out_dtype = x.dtype

    if compute_dtype is not None:
        x = x.astype(compute_dtype)
        w1 = w1.astype(compute_dtype)
        w2 = w2.astype(compute_dtype)
        # Biases stay f32; the kernel accumulates / activates in f32.

    if block_b is None:
        # 256 rows fill the v6e/v7x MXU (2x256^2) and are a 128-multiple for
        # v5e; for small batches fall back to the 8-aligned batch size.
        # (At these dims, VMEM use stays far below the default scoped limit;
        # if block_b is pushed past ~1024 on v5e, set vmem_limit_bytes.)
        block_b = min(256, _round_up(B, 8))

    # Pad the batch to a tile multiple instead of asserting divisibility.
    B_pad = _round_up(B, block_b)
    if B_pad != B:
        x = jnp.pad(x, ((0, B_pad - B), (0, 0)))

    grid = (B_pad // block_b,)

    flops = 2 * B_pad * D_in * H + 2 * B_pad * H * D_out
    bytes_accessed = (
        B_pad * D_in * x.dtype.itemsize
        + D_in * H * w1.dtype.itemsize + H * b1.dtype.itemsize
        + H * D_out * w2.dtype.itemsize + D_out * b2.dtype.itemsize
        + B_pad * D_out * jnp.dtype(out_dtype).itemsize)
    cost = pl.CostEstimate(flops=int(flops),
                           transcendentals=int(B_pad * D_out),
                           bytes_accessed=int(bytes_accessed))

    out = pl.pallas_call(
        _mlp_kernel,
        out_shape=jax.ShapeDtypeStruct((B_pad, D_out), out_dtype),
        grid_spec=pltpu.PrefetchScalarGridSpec(
            num_scalar_prefetch=0,
            grid=grid,
            in_specs=[
                # x: batch-tiled, double-buffered by the pipeline.
                pl.BlockSpec((block_b, D_in), lambda i: (i, 0)),
                # Weights / biases are constant across the grid: keep whole
                # arrays resident in VMEM (single copy, no per-step DMA, no
                # second pipeline buffer for the 1.5 MiB w1).
                pl.BlockSpec(memory_space=pltpu.MemorySpace.VMEM),  # w1
                pl.BlockSpec(memory_space=pltpu.MemorySpace.VMEM),  # b1
                pl.BlockSpec(memory_space=pltpu.MemorySpace.VMEM),  # w2
                pl.BlockSpec(memory_space=pltpu.MemorySpace.VMEM),  # b2
            ],
            out_specs=pl.BlockSpec((block_b, D_out), lambda i: (i, 0)),
        ),
        compiler_params=pltpu.CompilerParams(
            dimension_semantics=("parallel",),
        ),
        cost_estimate=cost,
    )(x, w1, b1, w2, b2)

    return out[:B] if B_pad != B else out


def _init_linear(key, fan_in, fan_out, dtype=jnp.float32):
    """PyTorch nn.Linear default init: U(-1/sqrt(fan_in), 1/sqrt(fan_in)).
    Weight returned already transposed to (fan_in, fan_out)."""
    kw, kb = jax.random.split(key)
    bound = 1.0 / jnp.sqrt(fan_in)
    w = jax.random.uniform(kw, (fan_in, fan_out), dtype, minval=-bound, maxval=bound)
    b = jax.random.uniform(kb, (1, fan_out), dtype, minval=-bound, maxval=bound)
    return w, b


if __name__ == "__main__":
    input_dim, hidden_dim, output_dim = 1536, 256, 16
    batch = 300  # deliberately not a multiple of the tile: exercises padding

    key = jax.random.PRNGKey(0)
    kx, k1, k2 = jax.random.split(key, 3)

    x = jax.random.normal(kx, (batch, input_dim), jnp.float32)
    w1, b1 = _init_linear(k1, input_dim, hidden_dim)
    w2, b2 = _init_linear(k2, hidden_dim, output_dim)

    out = mlp_forward(x, w1, b1, w2, b2)
    out = jax.block_until_ready(out)

    # Reference check in plain JAX (f32 path).
    ref = jax.nn.sigmoid(jnp.maximum(x @ w1 + b1, 0.0) @ w2 + b2)
    assert out.shape == (batch, output_dim)
    assert jnp.allclose(out, ref, atol=2e-5, rtol=2e-5), "mismatch vs reference"

    print("KERNEL_OK")
</pallas_src>

<mosaic_0001>
module attributes {stable_mosaic.version = 11 : i64} {
  func.func @_mlp_kernel(%arg0: i32, %arg1: memref<256x1536xf32, #tpu.memory_space<vmem>>, %arg2: memref<1536x256xf32, #tpu.memory_space<vmem>>, %arg3: memref<1x256xf32, #tpu.memory_space<vmem>>, %arg4: memref<256x16xf32, #tpu.memory_space<vmem>>, %arg5: memref<1x16xf32, #tpu.memory_space<vmem>>, %arg6: memref<256x16xf32, #tpu.memory_space<vmem>>) attributes {dimension_semantics = [#tpu.dimension_semantics<parallel>], iteration_bounds = array<i64: 2>, scalar_prefetch = 0 : i64, scratch_operands = 0 : i64, tpu.core_type = #tpu.core_type<tc>, window_params = [{transform_indices = @transform_0, window_bounds = array<i64: 256, 1536>}, {pipeline_mode = #tpu.pipeline_mode<synchronous>, transform_indices = @transform_1, window_bounds = array<i64: 1536, 256>}, {pipeline_mode = #tpu.pipeline_mode<synchronous>, transform_indices = @transform_2, window_bounds = array<i64: 1, 256>}, {pipeline_mode = #tpu.pipeline_mode<synchronous>, transform_indices = @transform_3, window_bounds = array<i64: 256, 16>}, {pipeline_mode = #tpu.pipeline_mode<synchronous>, transform_indices = @transform_4, window_bounds = array<i64: 1, 16>}, {transform_indices = @transform_5, window_bounds = array<i64: 256, 16>}]} {
    %c0 = arith.constant 0 : index
    %c0_0 = arith.constant 0 : index
    %0 = vector.load %arg1[%c0, %c0_0] : memref<256x1536xf32, #tpu.memory_space<vmem>>, vector<256x1536xf32>
    %c0_1 = arith.constant 0 : index
    %c0_2 = arith.constant 0 : index
    %1 = vector.load %arg2[%c0_1, %c0_2] : memref<1536x256xf32, #tpu.memory_space<vmem>>, vector<1536x256xf32>
    %cst = arith.constant dense<0.000000e+00> : vector<256x256xf32>
    %2 = tpu.matmul %0, %1, %cst {dimension_numbers = #tpu.dot_dimension_numbers<[1], [0], [0], [1], [0, 0, 1, 1], [], []>} : vector<256x1536xf32>, vector<1536x256xf32>, vector<256x256xf32> -> vector<256x256xf32>
    %c0_3 = arith.constant 0 : index
    %c0_4 = arith.constant 0 : index
    %3 = vector.load %arg3[%c0_3, %c0_4] : memref<1x256xf32, #tpu.memory_space<vmem>>, vector<1x256xf32>
    %4 = vector.broadcast %3 : vector<1x256xf32> to vector<256x256xf32>
    %5 = arith.addf %2, %4 : vector<256x256xf32>
    %cst_5 = arith.constant 0.000000e+00 : f32
    %6 = vector.broadcast %cst_5 : f32 to vector<256x256xf32>
    %7 = arith.maximumf %5, %6 : vector<256x256xf32>
    %c0_6 = arith.constant 0 : index
    %c0_7 = arith.constant 0 : index
    %8 = vector.load %arg4[%c0_6, %c0_7] : memref<256x16xf32, #tpu.memory_space<vmem>>, vector<256x16xf32>
    %cst_8 = arith.constant dense<0.000000e+00> : vector<256x16xf32>
    %9 = tpu.matmul %7, %8, %cst_8 {dimension_numbers = #tpu.dot_dimension_numbers<[1], [0], [0], [1], [0, 0, 1, 1], [], []>} : vector<256x256xf32>, vector<256x16xf32>, vector<256x16xf32> -> vector<256x16xf32>
    %c0_9 = arith.constant 0 : index
    %c0_10 = arith.constant 0 : index
    %10 = vector.load %arg5[%c0_9, %c0_10] : memref<1x16xf32, #tpu.memory_space<vmem>>, vector<1x16xf32>
    %11 = vector.broadcast %10 : vector<1x16xf32> to vector<256x16xf32>
    %12 = arith.addf %9, %11 : vector<256x16xf32>
    %13 = arith.negf %12 : vector<256x16xf32>
    %14 = math.exp %13 : vector<256x16xf32>
    %cst_11 = arith.constant 1.000000e+00 : f32
    %15 = vector.broadcast %cst_11 : f32 to vector<256x16xf32>
    %16 = arith.addf %15, %14 : vector<256x16xf32>
    %17 = arith.divf %15, %16 : vector<256x16xf32>
    %c0_12 = arith.constant 0 : index
    %c0_13 = arith.constant 0 : index
    %18 = vector.load %arg6[%c0_12, %c0_13] : memref<256x16xf32, #tpu.memory_space<vmem>>, vector<256x16xf32>
    tpu.vector_store %arg6[%c0_12, %c0_13], %17 {strides = array<i32>} : memref<256x16xf32, #tpu.memory_space<vmem>>, vector<256x16xf32>,
    return
  }
  func.func @transform_0(%arg0: i32) -> (i32, i32) {
    %c0_i32 = arith.constant 0 : i32
    %c0_i32_0 = arith.constant 0 : i32
    return %arg0, %c0_i32 : i32, i32
  }
  func.func @transform_1(%arg0: i32) -> (i32, i32) {
    %c0_i32 = arith.constant 0 : i32
    %c0_i32_0 = arith.constant 0 : i32
    %c0_i32_1 = arith.constant 0 : i32
    return %c0_i32, %c0_i32_0 : i32, i32
  }
  func.func @transform_2(%arg0: i32) -> (i32, i32) {
    %c0_i32 = arith.constant 0 : i32
    %c0_i32_0 = arith.constant 0 : i32
    %c0_i32_1 = arith.constant 0 : i32
    return %c0_i32, %c0_i32_0 : i32, i32
  }
  func.func @transform_3(%arg0: i32) -> (i32, i32) {
    %c0_i32 = arith.constant 0 : i32
    %c0_i32_0 = arith.constant 0 : i32
    %c0_i32_1 = arith.constant 0 : i32
    return %c0_i32, %c0_i32_0 : i32, i32
  }
  func.func @transform_4(%arg0: i32) -> (i32, i32) {
    %c0_i32 = arith.constant 0 : i32
    %c0_i32_0 = arith.constant 0 : i32
    %c0_i32_1 = arith.constant 0 : i32
    return %c0_i32, %c0_i32_0 : i32, i32
  }
  func.func @transform_5(%arg0: i32) -> (i32, i32) {
    %c0_i32 = arith.constant 0 : i32
    %c0_i32_0 = arith.constant 0 : i32
    return %arg0, %c0_i32 : i32, i32
  }
}

</mosaic_0001>

<bundles_post_ra>
// kernel: mlp_forward.1
= control target key start
LH: loop header
LB: loop body
LE: loop exit
PB: predicated region body
PF: predicated region fallthrough
CT: control target
= control target key end

     0   :  { %s5377_s18 = smov 0   ;;  %s8638_s0 = inlined_call_operand.vmem [shape: f32[512,1536], index: 0, kind: input, shape index: {}]   ;;  %s8639_s1 = inlined_call_operand.vmem [shape: f32[1536,256], index: 1, kind: input, shape index: {}]   ;;  %s8640_s2 = inlined_call_operand.vmem [shape: f32[1,256], index: 2, kind: input, shape index: {}]   ;;  %s8641_s3 = inlined_call_operand.vmem [shape: f32[256,16], index: 3, kind: input, shape index: {}]   ;;  %s8642_s4 = inlined_call_operand.vmem [shape: f32[1,16], index: 4, kind: input, shape index: {}]   ;;  %s8643_s5 = inlined_call_operand.vmem [shape: f32[512,16], index: 5, kind: output, shape index: {}]  }
   0x1 LB: > { %s4740_s19 = sadd.s32 4294967295, %s5345_s18   ;;  %p4744_p0 = scmp.ge.s32.totalorder %s5345_s18, 1  ;;  %s5345_s18 = sphi %s5377_s18, %s15_s18  }
   0x2   : > { %p189_p1 = scmp.lt.s32.totalorder %s5345_s18, 3 }
   0x4   : > { %p190_p2 = pnand %p4744_p0, %p189_p1 }
   0x6   : > { %193 = sbr.rel (%p190_p2) target bundleno = 1994 (0x7ca), region = 40 }
   0xb   : > { %v645_v0 = vld [vmem:[%s8639_s1 + $0xf0] sm:$0xff]  ;;  %v643_v1 = vld [vmem:[%s8639_s1 + $0xe0] sm:$0xff]  ;;  %s4745_s25 = sshll.u32 %s4740_s19, 5  ;;  %vm4651_vm3 = vcmask 130048  }
   0xc   : > { %v677_v2 = vld [vmem:[%s8639_s1 + $0x1f0] sm:$0xff]  ;;  %1005 = vmatpush.msra.mxu0 %v645_v0  ;;  %4783 = vmatpush.msra.mxu2 %v645_v0  ;;  %v675_v3 = vld [vmem:[%s8639_s1 + $0x1e0] sm:$0xff]  ;;  %p219_p3 = scmp.lt.s32.totalorder %s4745_s25, 63 }
   0xd   : > { %4799 = vmatpush.msra.mxu3 %v677_v2  ;;  %v641_v4 = vld [vmem:[%s8639_s1 + $0xd0] sm:$0xff]  ;;  %1118 = vmatpush.msra.mxu1 %v677_v2  ;;  %v639_v6 = vld [vmem:[%s8639_s1 + $0xc0] sm:$0xff] }
   0xe   : > { %1006 = vmatpush.msra.mxu0 %v643_v1  ;;  %4784 = vmatpush.msra.mxu2 %v643_v1  ;;  %v673_v5 = vld [vmem:[%s8639_s1 + $0x1d0] sm:$0xff]  ;;  %v671_v7 = vld [vmem:[%s8639_s1 + $0x1c0] sm:$0xff]  ;;  %s8737_s25 = smov (!%p219_p3, %s4745_s25), 63 }
   0xf   : > { %4800 = vmatpush.msra.mxu3 %v675_v3  ;;  %1119 = vmatpush.msra.mxu1 %v675_v3  ;;  %v637_v8 = vld [vmem:[%s8639_s1 + $0xb0] sm:$0xff]  ;;  %v635_v10 = vld [vmem:[%s8639_s1 + $0xa0] sm:$0xff]  ;;  %s4815_s24 = smul.u32 96, %s8737_s25 }
  0x10   : > { %1007 = vmatpush.msra.mxu0 %v641_v4  ;;  %4785 = vmatpush.msra.mxu2 %v641_v4  ;;  %v669_v9 = vld [vmem:[%s8639_s1 + $0x1b0] sm:$0xff]  ;;  %v667_v11 = vld [vmem:[%s8639_s1 + $0x1a0] sm:$0xff] }
  0x11   : > { %4801 = vmatpush.msra.mxu3 %v673_v5  ;;  %1120 = vmatpush.msra.mxu1 %v673_v5  ;;  %v633_v12 = vld [vmem:[%s8639_s1 + $0x90] sm:$0xff]  ;;  %v631_v14 = vld [vmem:[%s8639_s1 + $0x80] sm:$0xff]  ;;  %s5480_s10 = scalar_lea.vmem %s8638_s0, %s4815_s24 }
  0x12   : > { %1008 = vmatpush.msra.mxu0 %v639_v6  ;;  %4786 = vmatpush.msra.mxu2 %v639_v6  ;;  %v665_v13 = vld [vmem:[%s8639_s1 + $0x190] sm:$0xff]  ;;  %v663_v15 = vld [vmem:[%s8639_s1 + $0x180] sm:$0xff]  ;;  %v424_v35 = vld [vmem:[%s5480_s10 + $0x608] sm:$0xff] }
  0x13   : > { %4802 = vmatpush.msra.mxu3 %v671_v7  ;;  %1121 = vmatpush.msra.mxu1 %v671_v7  ;;  %v629_v16 = vld [vmem:[%s8639_s1 + $0x70] sm:$0xff]  ;;  %v627_v18 = vld [vmem:[%s8639_s1 + $0x60] sm:$0xff]  ;;  %v232_v38 = vld [vmem:[%s5480_s10 + $0x8] sm:$0xff] }
  0x14   : > { %1009 = vmatpush.msra.mxu0 %v637_v8  ;;  %4787 = vmatpush.msra.mxu2 %v637_v8  ;;  %v661_v17 = vld [vmem:[%s8639_s1 + $0x170] sm:$0xff]  ;;  %v659_v19 = vld [vmem:[%s8639_s1 + $0x160] sm:$0xff]  ;;  %v436_v47 = vld [vmem:[%s5480_s10 + $0x668] sm:$0xff] }
  0x15   : > { %4803 = vmatpush.msra.mxu3 %v669_v9  ;;  %1122 = vmatpush.msra.mxu1 %v669_v9  ;;  %v625_v20 = vld [vmem:[%s8639_s1 + $0x50] sm:$0xff]  ;;  %v623_v22 = vld [vmem:[%s8639_s1 + $0x40] sm:$0xff]  ;;  %v244_v50 = vld [vmem:[%s5480_s10 + $0x68] sm:$0xff] }
  0x16   : > { %1010 = vmatpush.msra.mxu0 %v635_v10  ;;  %4788 = vmatpush.msra.mxu2 %v635_v10  ;;  %v657_v21 = vld [vmem:[%s8639_s1 + $0x150] sm:$0xff]  ;;  %v655_v23 = vld [vmem:[%s8639_s1 + $0x140] sm:$0xff]  ;;  %v448_v54 = vld [vmem:[%s5480_s10 + $0x6c8] sm:$0xff] }
  0x17   : > { %4804 = vmatpush.msra.mxu3 %v667_v11  ;;  %1123 = vmatpush.msra.mxu1 %v667_v11  ;;  %v621_v24 = vld [vmem:[%s8639_s1 + $0x30] sm:$0xff]  ;;  %v619_v26 = vld [vmem:[%s8639_s1 + $0x20] sm:$0xff]  ;;  %v256_v56 = vld [vmem:[%s5480_s10 + $0xc8] sm:$0xff] }
  0x18   : > { %1011 = vmatpush.msra.mxu0 %v633_v12  ;;  %4789 = vmatpush.msra.mxu2 %v633_v12  ;;  %v653_v25 = vld [vmem:[%s8639_s1 + $0x130] sm:$0xff]  ;;  %v651_v27 = vld [vmem:[%s8639_s1 + $0x120] sm:$0xff]  ;;  %v460_v60 = vld [vmem:[%s5480_s10 + $0x728] sm:$0xff] }
  0x19   : > { %4805 = vmatpush.msra.mxu3 %v665_v13  ;;  %1124 = vmatpush.msra.mxu1 %v665_v13  ;;  %v617_v28 = vld [vmem:[%s8639_s1 + $0x10] sm:$0xff]  ;;  %v615_v30 = vld [vmem:[%s8639_s1] sm:$0xff]  ;;  %v268_v62 = vld [vmem:[%s5480_s10 + $0x128] sm:$0xff] }
  0x1a   : > { %1012 = vmatpush.msra.mxu0 %v631_v14  ;;  %4790 = vmatpush.msra.mxu2 %v631_v14  ;;  %v649_v29 = vld [vmem:[%s8639_s1 + $0x110] sm:$0xff]  ;;  %v231_v31 = vld [vmem:[%s5480_s10] sm:$0xff]  ;;  %v472_v2 = vld [vmem:[%s5480_s10 + $0x788] sm:$0xff] }
  0x1b   : > { %4806 = vmatpush.msra.mxu3 %v663_v15  ;;  %1125 = vmatpush.msra.mxu1 %v663_v15  ;;  %v423_v32 = vld [vmem:[%s5480_s10 + $0x600] sm:$0xff]  ;;  %v709_v33 = vld [vmem:[%s8639_s1 + $0x2f0] sm:$0xff]  ;;  %v280_v4 = vld [vmem:[%s5480_s10 + $0x188] sm:$0xff] }
  0x1c   : > { %1013 = vmatpush.msra.mxu0 %v629_v16  ;;  %4791 = vmatpush.msra.mxu2 %v629_v16  ;;  %v647_v34 = vld [vmem:[%s8639_s1 + $0x100] sm:$0xff]  ;;  %v741_v36 = vld [vmem:[%s8639_s1 + $0x3f0] sm:$0xff]  ;;  %v484_v8 = vld [vmem:[%s5480_s10 + $0x7e8] sm:$0xff] }
  0x1d   : > { %4807 = vmatpush.msra.mxu3 %v661_v17  ;;  %1126 = vmatpush.msra.mxu1 %v661_v17  ;;  %v707_v37 = vld [vmem:[%s8639_s1 + $0x2e0] sm:$0xff]  ;;  %v705_v40 = vld [vmem:[%s8639_s1 + $0x2d0] sm:$0xff]  ;;  %v292_v10 = vld [vmem:[%s5480_s10 + $0x1e8] sm:$0xff] }
  0x1e   : > { %1014 = vmatpush.msra.mxu0 %v627_v18  ;;  %4792 = vmatpush.msra.mxu2 %v627_v18  ;;  %v739_v39 = vld [vmem:[%s8639_s1 + $0x3e0] sm:$0xff]  ;;  %v737_v41 = vld [vmem:[%s8639_s1 + $0x3d0] sm:$0xff]  ;;  %v496_v14 = vld [vmem:[%s5480_s10 + $0x848] sm:$0xff] }
  0x1f   : > { %4808 = vmatpush.msra.mxu3 %v659_v19  ;;  %1127 = vmatpush.msra.mxu1 %v659_v19  ;;  %v703_v42 = vld [vmem:[%s8639_s1 + $0x2c0] sm:$0xff]  ;;  %v701_v46 = vld [vmem:[%s8639_s1 + $0x2b0] sm:$0xff]  ;;  %v304_v16 = vld [vmem:[%s5480_s10 + $0x248] sm:$0xff] }
  0x20   : > { %1015 = vmatpush.msra.mxu0 %v625_v20  ;;  %4793 = vmatpush.msra.mxu2 %v625_v20  ;;  %v243_v43 = vld [vmem:[%s5480_s10 + $0x60] sm:$0xff]  ;;  %v733_v48 = vld [vmem:[%s8639_s1 + $0x3b0] sm:$0xff]  ;;  %v508_v20 = vld [vmem:[%s5480_s10 + $0x8a8] sm:$0xff] }
  0x21   : > { %4809 = vmatpush.msra.mxu3 %v657_v21  ;;  %1128 = vmatpush.msra.mxu1 %v657_v21  ;;  %v435_v44 = vld [vmem:[%s5480_s10 + $0x660] sm:$0xff]  ;;  %v697_v55 = vld [vmem:[%s8639_s1 + $0x290] sm:$0xff] }
  0x22   : > { %1016 = vmatpush.msra.mxu0 %v623_v22  ;;  %4794 = vmatpush.msra.mxu2 %v623_v22  ;;  %v735_v45 = vld [vmem:[%s8639_s1 + $0x3c0] sm:$0xff]  ;;  %v729_v57 = vld [vmem:[%s8639_s1 + $0x390] sm:$0xff]  ;;  %v316_v22 = vld [vmem:[%s5480_s10 + $0x2a8] sm:$0xff] }
  0x23   : > { %4810 = vmatpush.msra.mxu3 %v655_v23  ;;  %1129 = vmatpush.msra.mxu1 %v655_v23  ;;  %v699_v49 = vld [vmem:[%s8639_s1 + $0x2a0] sm:$0xff]  ;;  %v693_v3 = vld [vmem:[%s8639_s1 + $0x270] sm:$0xff] }
  0x24   : > { %1017 = vmatpush.msra.mxu0 %v621_v24  ;;  %4795 = vmatpush.msra.mxu2 %v621_v24  ;;  %v731_v51 = vld [vmem:[%s8639_s1 + $0x3a0] sm:$0xff]  ;;  %v725_v5 = vld [vmem:[%s8639_s1 + $0x370] sm:$0xff] }
  0x25   : > { %4811 = vmatpush.msra.mxu3 %v653_v25  ;;  %1130 = vmatpush.msra.mxu1 %v653_v25  ;;  %v255_v52 = vld [vmem:[%s5480_s10 + $0xc0] sm:$0xff]  ;;  %v689_v15 = vld [vmem:[%s8639_s1 + $0x250] sm:$0xff] }
  0x26   : > { %1018 = vmatpush.msra.mxu0 %v619_v26  ;;  %4796 = vmatpush.msra.mxu2 %v619_v26  ;;  %v447_v53 = vld [vmem:[%s5480_s10 + $0x6c0] sm:$0xff]  ;;  %v721_v17 = vld [vmem:[%s8639_s1 + $0x350] sm:$0xff]  ;;  %v520_v26 = vld [vmem:[%s5480_s10 + $0x908] sm:$0xff] }
  0x27   : > { %4812 = vmatpush.msra.mxu3 %v651_v27  ;;  %1131 = vmatpush.msra.mxu1 %v651_v27  ;;  %v267_v58 = vld [vmem:[%s5480_s10 + $0x120] sm:$0xff]  ;;  %v685_v27 = vld [vmem:[%s8639_s1 + $0x230] sm:$0xff] }
  0x28   : > { %1019 = vmatpush.msra.mxu0 %v617_v28  ;;  %4797 = vmatpush.msra.mxu2 %v617_v28  ;;  %v459_v59 = vld [vmem:[%s5480_s10 + $0x720] sm:$0xff]  ;;  %v773_v28 = vld [vmem:[%s8639_s1 + $0x4f0] sm:$0xff] }
  0x29   : > { %4813 = vmatpush.msra.mxu3 %v649_v29  ;;  %1132 = vmatpush.msra.mxu1 %v649_v29  ;;  %v695_v61 = vld [vmem:[%s8639_s1 + $0x280] sm:$0xff]  ;;  %v328_v29 = vld [vmem:[%s5480_s10 + $0x308] sm:$0xff] }
  0x2a   : > { %1020 = vmatpush.msra.mxu0 %v615_v30  ;;  %4798 = vmatpush.msra.mxu2 %v615_v30  ;;  %v727_v63 = vld [vmem:[%s8639_s1 + $0x380] sm:$0xff]  ;;  %v717_v30 = vld [vmem:[%s8639_s1 + $0x330] sm:$0xff] }
  0x2b   : > { %1021 = vmatmul.f32.vlgmr.msra.gmra.mxu0 %v231_v31  ;;  %1069 = vmatmul.f32.vlgmr.msra.gmra.mxu2 %v423_v32  ;;  %v279_v0 = vld [vmem:[%s5480_s10 + $0x180] sm:$0xff]  ;;  %v769_v32 = vld [vmem:[%s8639_s1 + $0x4d0] sm:$0xff] }
  0x2c   : > { %1231 = vmatpush.msrb.mxu2 %v709_v33  ;;  %4814 = vmatpush.msra.mxu3 %v647_v34  ;;  %v471_v1 = vld [vmem:[%s5480_s10 + $0x780] sm:$0xff] }
  0x2d   : > { %1182 = vmatmul.f32.vlgmr.msra.gmra.mxu3 %v424_v35  ;;  %1133 = vmatpush.msra.mxu1 %v647_v34  ;;  %v291_v6 = vld [vmem:[%s5480_s10 + $0x1e0] sm:$0xff] }
  0x2e   : > { %1344 = vmatpush.msrb.mxu3 %v741_v36  ;;  %1232 = vmatpush.msrb.mxu2 %v707_v37  ;;  %v483_v7 = vld [vmem:[%s5480_s10 + $0x7e0] sm:$0xff]  ;;  %v532_v36 = vld [vmem:[%s5480_s10 + $0x968] sm:$0xff] }
  0x2f   : > { %1134 = vmatmul.f32.vlgmr.msra.gmra.mxu1 %v232_v38  ;;  %v691_v9 = vld [vmem:[%s8639_s1 + $0x260] sm:$0xff]  ;;  %1457 = vmatpush.msrb.mxu0 %v773_v28  ;;  %v765_v38 = vld [vmem:[%s8639_s1 + $0x4b0] sm:$0xff]  ;;  %v592_v28 = vld [vmem:[%s5480_s10 + $0xb48] sm:$0xff] }
  0x30   : > { %1345 = vmatpush.msrb.mxu3 %v739_v39  ;;  %1233 = vmatpush.msrb.mxu2 %v705_v40  ;;  %v723_v11 = vld [vmem:[%s8639_s1 + $0x360] sm:$0xff]  ;;  %v340_v39 = vld [vmem:[%s5480_s10 + $0x368] sm:$0xff] }
  0x31   : > { %v303_v12 = vld [vmem:[%s5480_s10 + $0x240] sm:$0xff] }
  0x32   : > { %1346 = vmatpush.msrb.mxu3 %v737_v41  ;;  %1234 = vmatpush.msrb.mxu2 %v703_v42  ;;  %v495_v13 = vld [vmem:[%s5480_s10 + $0x840] sm:$0xff]  ;;  %v761_v42 = vld [vmem:[%s8639_s1 + $0x490] sm:$0xff] }
  0x33   : > { %1024 = vmatmul.f32.gmra.mxu0 %v243_v43  ;;  %1072 = vmatmul.f32.gmra.mxu2 %v435_v44  ;;  %v315_v18 = vld [vmem:[%s5480_s10 + $0x2a0] sm:$0xff]  ;;  %v805_v43 = vld [vmem:[%s8639_s1 + $0x5f0] sm:$0xff] }
  0x34   : > { %1347 = vmatpush.msrb.mxu3 %v735_v45  ;;  %1235 = vmatpush.msrb.mxu2 %v701_v46  ;;  %v507_v19 = vld [vmem:[%s5480_s10 + $0x8a0] sm:$0xff] }
  0x35   : > { %1185 = vmatmul.f32.gmra.mxu3 %v436_v47  ;;  %v687_v21 = vld [vmem:[%s8639_s1 + $0x240] sm:$0xff]  ;;  %1570 = vmatpush.msrb.mxu1 %v805_v43 }
  0x36   : > { %1348 = vmatpush.msrb.mxu3 %v733_v48  ;;  %1236 = vmatpush.msrb.mxu2 %v699_v49  ;;  %v719_v23 = vld [vmem:[%s8639_s1 + $0x340] sm:$0xff]  ;;  %v544_v48 = vld [vmem:[%s5480_s10 + $0x9c8] sm:$0xff]  ;;  %v681_v49 = vld [vmem:[%s8639_s1 + $0x210] sm:$0xff] }
  0x37   : > { %1137 = vmatmul.f32.gmra.mxu1 %v244_v50  ;;  %v327_v24 = vld [vmem:[%s5480_s10 + $0x300] sm:$0xff]  ;;  %v757_v50 = vld [vmem:[%s8639_s1 + $0x470] sm:$0xff] }
  0x38   : > { %1349 = vmatpush.msrb.mxu3 %v731_v51  ;;  %1237 = vmatpush.msrb.mxu2 %v697_v55  ;;  %v519_v25 = vld [vmem:[%s5480_s10 + $0x900] sm:$0xff]  ;;  %v801_v51 = vld [vmem:[%s8639_s1 + $0x5d0] sm:$0xff] }
  0x39   : > { %v771_v31 = vld [vmem:[%s8639_s1 + $0x4e0] sm:$0xff] }
  0x3a   : > { %1350 = vmatpush.msrb.mxu3 %v729_v57  ;;  %1238 = vmatpush.msrb.mxu2 %v695_v61  ;;  %v767_v33 = vld [vmem:[%s8639_s1 + $0x4c0] sm:$0xff]  ;;  %v797_v57 = vld [vmem:[%s8639_s1 + $0x5b0] sm:$0xff] }
  0x3b   : > { %1027 = vmatmul.f32.gmra.mxu0 %v255_v52  ;;  %1075 = vmatmul.f32.gmra.mxu2 %v447_v53  ;;  %v339_v34 = vld [vmem:[%s5480_s10 + $0x360] sm:$0xff]  ;;  %v352_v52 = vld [vmem:[%s5480_s10 + $0x3c8] sm:$0xff]  ;;  %v713_v53 = vld [vmem:[%s8639_s1 + $0x310] sm:$0xff] }
  0x3c   : > { %1351 = vmatpush.msrb.mxu3 %v727_v63  ;;  %1239 = vmatpush.msrb.mxu2 %v693_v3  ;;  %v531_v35 = vld [vmem:[%s5480_s10 + $0x960] sm:$0xff] }
  0x3d   : > { %1188 = vmatmul.f32.gmra.mxu3 %v448_v54  ;;  %1458 = vmatpush.msrb.mxu0 %v771_v31  ;;  %v683_v37 = vld [vmem:[%s8639_s1 + $0x220] sm:$0xff] }
  0x3e   : > { %1352 = vmatpush.msrb.mxu3 %v725_v5  ;;  %1240 = vmatpush.msrb.mxu2 %v691_v9  ;;  %v715_v40 = vld [vmem:[%s8639_s1 + $0x320] sm:$0xff] }
  0x3f   : > { %1140 = vmatmul.f32.gmra.mxu1 %v256_v56  ;;  %1459 = vmatpush.msrb.mxu0 %v769_v32  ;;  %v763_v41 = vld [vmem:[%s8639_s1 + $0x4a0] sm:$0xff]  ;;  %v753_v56 = vld [vmem:[%s8639_s1 + $0x450] sm:$0xff] }
  0x40   : > { %1353 = vmatpush.msrb.mxu3 %v723_v11  ;;  %1241 = vmatpush.msrb.mxu2 %v689_v15  ;;  %v759_v44 = vld [vmem:[%s8639_s1 + $0x480] sm:$0xff]  ;;  %v376_v15 = vld [vmem:[%s5480_s10 + $0x488] sm:$0xff] }
  0x41   : > { %1460 = vmatpush.msrb.mxu0 %v767_v33  ;;  %v803_v45 = vld [vmem:[%s8639_s1 + $0x5e0] sm:$0xff] }
  0x42   : > { %1354 = vmatpush.msrb.mxu3 %v721_v17  ;;  %1242 = vmatpush.msrb.mxu2 %v687_v21  ;;  %v351_v46 = vld [vmem:[%s5480_s10 + $0x3c0] sm:$0xff] }
  0x43   : > { %1030 = vmatmul.f32.gmra.mxu0 %v267_v58  ;;  %1078 = vmatmul.f32.gmra.mxu2 %v459_v59  ;;  %v543_v47 = vld [vmem:[%s5480_s10 + $0x9c0] sm:$0xff] }
  0x44   : > { %1355 = vmatpush.msrb.mxu3 %v719_v23  ;;  %1243 = vmatpush.msrb.mxu2 %v685_v27  ;;  %v755_v54 = vld [vmem:[%s8639_s1 + $0x460] sm:$0xff]  ;;  %v777_v23 = vld [vmem:[%s8639_s1 + $0x510] sm:$0xff] }
  0x45   : > { %1191 = vmatmul.f32.gmra.mxu3 %v460_v60  ;;  %1461 = vmatpush.msrb.mxu0 %v765_v38  ;;  %v799_v55 = vld [vmem:[%s8639_s1 + $0x5c0] sm:$0xff]  ;;  %v233_v38 = vld [vmem:[%s5480_s10 + $0x10] sm:$0xff] }
  0x46   : > { %1356 = vmatpush.msrb.mxu3 %v717_v30  ;;  %1244 = vmatpush.msrb.mxu2 %v683_v37  ;;  %v751_v58 = vld [vmem:[%s8639_s1 + $0x440] sm:$0xff]  ;;  %v400_v30 = vld [vmem:[%s5480_s10 + $0x548] sm:$0xff] }
  0x47   : > { %1143 = vmatmul.f32.gmra.mxu1 %v268_v62  ;;  %1462 = vmatpush.msrb.mxu0 %v763_v41  ;;  %v363_v59 = vld [vmem:[%s5480_s10 + $0x420] sm:$0xff]  ;;  %v556_v62 = vld [vmem:[%s5480_s10 + $0xa28] sm:$0xff] }
  0x48   : > { %1357 = vmatpush.msrb.mxu3 %v715_v40  ;;  %1571 = vmatpush.msrb.mxu1 %v803_v45  ;;  %v555_v60 = vld [vmem:[%s5480_s10 + $0xa20] sm:$0xff]  ;;  %v234_v40 = vld [vmem:[%s5480_s10 + $0x18] sm:$0xff]  ;;  %v865_v45 = vld [vmem:[%s8639_s1 + $0x7d0] sm:$0xff] }
  0x49   : > { %1463 = vmatpush.msrb.mxu0 %v761_v42  ;;  %1245 = vmatpush.msrb.mxu2 %v681_v49  ;;  %v795_v61 = vld [vmem:[%s8639_s1 + $0x5a0] sm:$0xff]  ;;  %v833_v42 = vld [vmem:[%s8639_s1 + $0x6d0] sm:$0xff] }
  0x4a   : > { %1572 = vmatpush.msrb.mxu1 %v801_v51  ;;  %1358 = vmatpush.msrb.mxu3 %v713_v53  ;;  %v679_v63 = vld [vmem:[%s8639_s1 + $0x200] sm:$0xff]  ;;  %v246_v53 = vld [vmem:[%s5480_s10 + $0x78] sm:$0xff] }
  0x4b   : > { %1033 = vmatmul.f32.gmra.mxu0 %v279_v0  ;;  %1081 = vmatmul.f32.gmra.mxu2 %v471_v1  ;;  %v749_v0 = vld [vmem:[%s8639_s1 + $0x430] sm:$0xff]  ;;  %v711_v3 = vld [vmem:[%s8639_s1 + $0x300] sm:$0xff] }
  0x4c   : > { %1464 = vmatpush.msrb.mxu0 %v759_v44  ;;  %1573 = vmatpush.msrb.mxu1 %v799_v55  ;;  %v793_v1 = vld [vmem:[%s8639_s1 + $0x590] sm:$0xff]  ;;  %v791_v5 = vld [vmem:[%s8639_s1 + $0x580] sm:$0xff]  ;;  %v236_v44 = vld [vmem:[%s5480_s10 + $0x28] sm:$0xff] }
  0x4d   : > { %1194 = vmatmul.f32.gmra.mxu3 %v472_v2  ;;  %v364_v2 = vld [vmem:[%s5480_s10 + $0x428] sm:$0xff]  ;;  %1246 = vmatpush.msrb.mxu2 %v679_v63  ;;  %v567_v9 = vld [vmem:[%s5480_s10 + $0xa80] sm:$0xff]  ;;  %v258_v63 = vld [vmem:[%s5480_s10 + $0xd8] sm:$0xff] }
  0x4e   : > { %1465 = vmatpush.msrb.mxu0 %v757_v50  ;;  %1574 = vmatpush.msrb.mxu1 %v797_v57  ;;  %v787_v11 = vld [vmem:[%s8639_s1 + $0x560] sm:$0xff]  ;;  %v245_v50 = vld [vmem:[%s5480_s10 + $0x70] sm:$0xff]  ;;  %v248_v55 = vld [vmem:[%s5480_s10 + $0x88] sm:$0xff] }
  0x4f   : > { %1146 = vmatmul.f32.gmra.mxu1 %v280_v4  ;;  %v747_v4 = vld [vmem:[%s8639_s1 + $0x420] sm:$0xff]  ;;  %1359 = vmatpush.msrb.mxu3 %v711_v3 }
  0x50   : > { %1466 = vmatpush.msrb.mxu0 %v755_v54  ;;  %1575 = vmatpush.msrb.mxu1 %v795_v61  ;;  %v783_v17 = vld [vmem:[%s8639_s1 + $0x540] sm:$0xff] }
  0x51   : > { %v779_v21 = vld [vmem:[%s8639_s1 + $0x520] sm:$0xff] }
  0x52   : > { %1467 = vmatpush.msrb.mxu0 %v753_v56  ;;  %1576 = vmatpush.msrb.mxu1 %v793_v1  ;;  %v591_v27 = vld [vmem:[%s5480_s10 + $0xb40] sm:$0xff] }
  0x53   : > { %1036 = vmatmul.f32.gmra.mxu0 %v291_v6  ;;  %1084 = vmatmul.f32.gmra.mxu2 %v483_v7  ;;  %v745_v6 = vld [vmem:[%s8639_s1 + $0x410] sm:$0xff]  ;;  %v867_v31 = vld [vmem:[%s8639_s1 + $0x7e0] sm:$0xff] }
  0x54   : > { %1468 = vmatpush.msrb.mxu0 %v751_v58  ;;  %v789_v7 = vld [vmem:[%s8639_s1 + $0x570] sm:$0xff]  ;;  %1577 = vmatpush.msrb.mxu1 %v791_v5  ;;  %v411_v32 = vld [vmem:[%s5480_s10 + $0x5a0] sm:$0xff] }
  0x55   : > { %1197 = vmatmul.f32.gmra.mxu3 %v484_v8  ;;  %v375_v8 = vld [vmem:[%s5480_s10 + $0x480] sm:$0xff] }
  0x56   : > { %1469 = vmatpush.msrb.mxu0 %v749_v0  ;;  %1578 = vmatpush.msrb.mxu1 %v789_v7  ;;  %v603_v33 = vld [vmem:[%s5480_s10 + $0xba0] sm:$0xff] }
  0x57   : > { %1149 = vmatmul.f32.gmra.mxu1 %v292_v10  ;;  %v743_v10 = vld [vmem:[%s8639_s1 + $0x400] sm:$0xff] }
  0x58   : > { %1470 = vmatpush.msrb.mxu0 %v747_v4  ;;  %1579 = vmatpush.msrb.mxu1 %v787_v11  ;;  %v247_v51 = vld [vmem:[%s5480_s10 + $0x80] sm:$0xff]  ;;  %v270_v11 = vld [vmem:[%s5480_s10 + $0x138] sm:$0xff] }
  0x59   : > { %v259_v61 = vld [vmem:[%s5480_s10 + $0xe0] sm:$0xff] }
  0x5a   : > { %1471 = vmatpush.msrb.mxu0 %v745_v6  ;;  %v831_v0 = vld [vmem:[%s8639_s1 + $0x6c0] sm:$0xff] }
  0x5b   : > { %1039 = vmatmul.f32.gmra.mxu0 %v303_v12  ;;  %1087 = vmatmul.f32.gmra.mxu2 %v495_v13  ;;  %v568_v12 = vld [vmem:[%s5480_s10 + $0xa88] sm:$0xff]  ;;  %v837_v13 = vld [vmem:[%s8639_s1 + $0x6f0] sm:$0xff]  ;;  %v863_v3 = vld [vmem:[%s8639_s1 + $0x7c0] sm:$0xff] }
  0x5c   : > { %1472 = vmatpush.msrb.mxu0 %v743_v10  ;;  %1683 = vmatpush.msra.mxu2 %v837_v13  ;;  %v272_v13 = vld [vmem:[%s5480_s10 + $0x148] sm:$0xff] }
  0x5d   : > { %1200 = vmatmul.f32.gmra.mxu3 %v496_v14  ;;  %v785_v14 = vld [vmem:[%s8639_s1 + $0x550] sm:$0xff] }
  0x5e   : > { %1580 = vmatpush.msrb.mxu1 %v785_v14 }
  0x5f   : > { %1152 = vmatmul.f32.gmra.mxu1 %v304_v16  ;;  %v869_v16 = vld [vmem:[%s8639_s1 + $0x7f0] sm:$0xff] }
  0x60   : > { %1796 = vmatpush.msra.mxu3 %v869_v16  ;;  %1581 = vmatpush.msrb.mxu1 %v783_v17 }
  0x62   : > { %1797 = vmatpush.msra.mxu3 %v867_v31  ;;  %v295_v31 = vld [vmem:[%s5480_s10 + $0x200] sm:$0xff] }
  0x63   : > { %1042 = vmatmul.f32.gmra.mxu0 %v315_v18  ;;  %1090 = vmatmul.f32.gmra.mxu2 %v507_v19  ;;  %v781_v18 = vld [vmem:[%s8639_s1 + $0x530] sm:$0xff]  ;;  %v387_v19 = vld [vmem:[%s5480_s10 + $0x4e0] sm:$0xff] }
  0x64   : > { %1582 = vmatpush.msrb.mxu1 %v781_v18  ;;  %1798 = vmatpush.msra.mxu3 %v865_v45  ;;  %v281_v18 = vld [vmem:[%s5480_s10 + $0x190] sm:$0xff] }
  0x65   : > { %1203 = vmatmul.f32.gmra.mxu3 %v508_v20  ;;  %v579_v20 = vld [vmem:[%s5480_s10 + $0xae0] sm:$0xff] }
  0x66   : > { %1583 = vmatpush.msrb.mxu1 %v779_v21  ;;  %1799 = vmatpush.msra.mxu3 %v863_v3  ;;  %v282_v21 = vld [vmem:[%s5480_s10 + $0x198] sm:$0xff] }
  0x67   : > { %1155 = vmatmul.f32.gmra.mxu1 %v316_v22  ;;  %v580_v22 = vld [vmem:[%s5480_s10 + $0xae8] sm:$0xff] }
  0x68   : > { %1584 = vmatpush.msrb.mxu1 %v777_v23 }
  0x6b   : > { %1045 = vmatmul.f32.gmra.mxu0 %v327_v24  ;;  %1093 = vmatmul.f32.gmra.mxu2 %v519_v25  ;;  %v388_v24 = vld [vmem:[%s5480_s10 + $0x4e8] sm:$0xff]  ;;  %v775_v25 = vld [vmem:[%s8639_s1 + $0x500] sm:$0xff] }
  0x6c   : > { %1585 = vmatpush.msrb.mxu1 %v775_v25  ;;  %v861_v25 = vld [vmem:[%s8639_s1 + $0x7b0] sm:$0xff] }
  0x6d   : > { %1206 = vmatmul.f32.gmra.mxu3 %v520_v26  ;;  %v399_v26 = vld [vmem:[%s5480_s10 + $0x540] sm:$0xff] }
  0x6e   : > { %1800 = vmatpush.msra.mxu3 %v861_v25  ;;  %v341_v25 = vld [vmem:[%s5480_s10 + $0x370] sm:$0xff] }
  0x6f   : > { %1158 = vmatmul.f32.gmra.mxu1 %v328_v29  ;;  %v835_v29 = vld [vmem:[%s8639_s1 + $0x6e0] sm:$0xff] }
  0x70   : > { %1684 = vmatpush.msra.mxu2 %v835_v29 }
  0x72   : > { %1685 = vmatpush.msra.mxu2 %v833_v42  ;;  %v305_v42 = vld [vmem:[%s5480_s10 + $0x250] sm:$0xff] }
  0x73   : > { %1048 = vmatmul.f32.gmra.mxu0 %v339_v34  ;;  %1096 = vmatmul.f32.gmra.mxu2 %v531_v35  ;;  %v604_v34 = vld [vmem:[%s5480_s10 + $0xba8] sm:$0xff] }
  0x74   : > { %v412_v35 = vld [vmem:[%s5480_s10 + $0x5a8] sm:$0xff]  ;;  %1686 = vmatpush.msra.mxu2 %v831_v0 }
  0x75   : > { %1209 = vmatmul.f32.gmra.mxu3 %v532_v36  ;;  %v999_v36 = vld [vmem:[%s8640_s2] sm:$0x3] }
  0x76   : > { %v5767_v41 = vperm.slane %v999_v36, 0 }
  0x77   : > { %1161 = vmatmul.f32.gmra.mxu1 %v340_v39  ;;  %v235_v39 = vld [vmem:[%s5480_s10 + $0x20] sm:$0xff] }
  0x7b   : > { %1051 = vmatmul.f32.gmra.mxu0 %v351_v46  ;;  %1099 = vmatmul.f32.gmra.mxu2 %v543_v47 }
  0x7d   : > { %1212 = vmatmul.f32.gmra.mxu3 %v544_v48 }
  0x7f   : > { %1164 = vmatmul.f32.gmra.mxu1 %v352_v52 }
  0x83   : > { %1054 = vmatmul.f32.gmra.mxu0 %v363_v59  ;;  %1102 = vmatmul.f32.gmra.mxu2 %v555_v60  ;;  %v257_v60 = vld [vmem:[%s5480_s10 + $0xd0] sm:$0xff] }
  0x85   : > { %1215 = vmatmul.f32.gmra.mxu3 %v556_v62 }
  0x87   : > { %1167 = vmatmul.f32.gmra.mxu1 %v364_v2  ;;  %v260_v2 = vld [vmem:[%s5480_s10 + $0xe8] sm:$0xff] }
  0x8b   : > { %1057 = vmatmul.f32.gmra.mxu0 %v375_v8  ;;  %1105 = vmatmul.f32.gmra.mxu2 %v567_v9  ;;  %v269_v8 = vld [vmem:[%s5480_s10 + $0x130] sm:$0xff]  ;;  %v271_v9 = vld [vmem:[%s5480_s10 + $0x140] sm:$0xff] }
  0x8d   : > { %1218 = vmatmul.f32.gmra.mxu3 %v568_v12 }
  0x8f   : > { %1170 = vmatmul.f32.gmra.mxu1 %v376_v15 }
  0x93   : > { %1060 = vmatmul.f32.gmra.mxu0 %v387_v19  ;;  %1108 = vmatmul.f32.gmra.mxu2 %v579_v20  ;;  %v283_v19 = vld [vmem:[%s5480_s10 + $0x1a0] sm:$0xff] }
  0x95   : > { %1221 = vmatmul.f32.gmra.mxu3 %v580_v22  ;;  %v829_v22 = vld [vmem:[%s8639_s1 + $0x6b0] sm:$0xff] }
  0x96   : > { %1687 = vmatpush.msra.mxu2 %v829_v22 }
  0x97   : > { %1173 = vmatmul.f32.gmra.mxu1 %v388_v24  ;;  %v284_v24 = vld [vmem:[%s5480_s10 + $0x1a8] sm:$0xff] }
  0x9b   : > { %1063 = vmatmul.f32.gmra.mxu0 %v399_v26  ;;  %1111 = vmatmul.f32.gmra.mxu2 %v591_v27 }
  0x9d   : > { %1224 = vmatmul.f32.gmra.mxu3 %v592_v28 }
  0x9f   : > { %1176 = vmatmul.f32.gmra.mxu1 %v400_v30  ;;  %v293_v30 = vld [vmem:[%s5480_s10 + $0x1f0] sm:$0xff] }
  0xa3   : > { %1066 = vmatmul.f32.gmra.mxu0 %v411_v32  ;;  %1114 = vmatmul.f32.gmra.mxu2 %v603_v33  ;;  %v294_v33 = vld [vmem:[%s5480_s10 + $0x1f8] sm:$0xff] }
  0xa5   : > { %1227 = vmatmul.f32.gmra.mxu3 %v604_v34 }
  0xa7   : > { %1179 = vmatmul.f32.gmra.mxu1 %v412_v35  ;;  %v296_v35 = vld [vmem:[%s5480_s10 + $0x208] sm:$0xff] }
  0xa8   : > { %v5762_v37 = vpop.f32.mrf.mxu0 }
  0xab   : > { %1247 = vmatmul.f32.vlgmr.msrb.gmra.mxu2 %v233_v38  ;;  %1473 = vmatmul.f32.vlgmr.msrb.gmra.mxu0 %v235_v39 }
  0xac   : > { %v5772_v43 = vpop.f32.mrf.mxu1 }
  0xad   : > { %1360 = vmatmul.f32.vlgmr.msrb.gmra.mxu3 %v234_v40 }
  0xae   : > { %v1070_v46 = vpop.f32.mrf.mxu2 }
  0xaf   : > { %v1071_v47 = vadd.f32 %v1070_v46, %v5767_v41  ;;  %1586 = vmatmul.f32.vlgmr.msrb.gmra.mxu1 %v236_v44  ;;  %v307_v44 = vld [vmem:[%s5480_s10 + $0x260] sm:$0xff]  ;;  %v306_v46 = vld [vmem:[%s5480_s10 + $0x258] sm:$0xff] }
  0xb0   : > { %v5779_v48 = vpop.f32.mrf.mxu0  ;;  %v1183_v49 = vpop.f32.mrf.mxu3 }
  0xb1   : > { %v5783_v52 = vadd.f32 %v1183_v49, %v1071_v47  ;;  %v827_v47 = vld [vmem:[%s8639_s1 + $0x6a0] sm:$0xff] }
  0xb2   : > { %1688 = vmatpush.msra.mxu2 %v827_v47  ;;  %v823_v47 = vld [vmem:[%s8639_s1 + $0x680] sm:$0xff] }
  0xb3   : > { %1250 = vmatmul.f32.gmra.mxu2 %v245_v50  ;;  %1476 = vmatmul.f32.gmra.mxu0 %v247_v51  ;;  %v308_v50 = vld [vmem:[%s5480_s10 + $0x268] sm:$0xff]  ;;  %v859_v51 = vld [vmem:[%s8639_s1 + $0x7a0] sm:$0xff] }
  0xb4   : > { %v5786_v54 = vpop.f32.mrf.mxu1  ;;  %1801 = vmatpush.msra.mxu3 %v859_v51  ;;  %v356_v51 = vld [vmem:[%s5480_s10 + $0x3e8] sm:$0xff] }
  0xb5   : > { %1363 = vmatmul.f32.gmra.mxu3 %v246_v53 }
  0xb6   : > { %v1073_v56 = vpop.f32.mrf.mxu2 }
  0xb7   : > { %v1074_v57 = vadd.f32 %v1073_v56, %v5767_v41  ;;  %1589 = vmatmul.f32.gmra.mxu1 %v248_v55 }
  0xb8   : > { %v5790_v58 = vpop.f32.mrf.mxu0  ;;  %v1186_v59 = vpop.f32.mrf.mxu3 }
  0xb9   : > { %v5794_v62 = vadd.f32 %v1186_v59, %v1074_v57  ;;  %v317_v59 = vld [vmem:[%s5480_s10 + $0x2b0] sm:$0xff] }
  0xbb   : > { %1253 = vmatmul.f32.gmra.mxu2 %v257_v60  ;;  %1479 = vmatmul.f32.gmra.mxu0 %v259_v61  ;;  %v319_v60 = vld [vmem:[%s5480_s10 + $0x2c0] sm:$0xff] }
  0xbc   : > { %v5800_v1 = vpop.f32.mrf.mxu1 }
  0xbd   : > { %1366 = vmatmul.f32.gmra.mxu3 %v258_v63  ;;  %v318_v63 = vld [vmem:[%s5480_s10 + $0x2b8] sm:$0xff] }
  0xbe   : > { %v1076_v4 = vpop.f32.mrf.mxu2 }
  0xbf   : > { %v1077_v5 = vadd.f32 %v1076_v4, %v5767_v41  ;;  %1592 = vmatmul.f32.gmra.mxu1 %v260_v2  ;;  %v320_v2 = vld [vmem:[%s5480_s10 + $0x2c8] sm:$0xff] }
  0xc0   : > { %v5807_v6 = vpop.f32.mrf.mxu0  ;;  %v1189_v7 = vpop.f32.mrf.mxu3 }
  0xc1   : > { %v5811_v10 = vadd.f32 %v1189_v7, %v1077_v5 }
  0xc3   : > { %1256 = vmatmul.f32.gmra.mxu2 %v269_v8  ;;  %1482 = vmatmul.f32.gmra.mxu0 %v271_v9  ;;  %v329_v8 = vld [vmem:[%s5480_s10 + $0x310] sm:$0xff]  ;;  %v331_v9 = vld [vmem:[%s5480_s10 + $0x320] sm:$0xff] }
  0xc4   : > { %v5814_v12 = vpop.f32.mrf.mxu1 }
  0xc5   : > { %1369 = vmatmul.f32.gmra.mxu3 %v270_v11 }
  0xc6   : > { %v1079_v14 = vpop.f32.mrf.mxu2 }
  0xc7   : > { %v1080_v15 = vadd.f32 %v1079_v14, %v5767_v41  ;;  %1595 = vmatmul.f32.gmra.mxu1 %v272_v13  ;;  %v330_v13 = vld [vmem:[%s5480_s10 + $0x318] sm:$0xff]  ;;  %v825_v14 = vld [vmem:[%s8639_s1 + $0x690] sm:$0xff] }
  0xc8   : > { %v5818_v16 = vpop.f32.mrf.mxu0  ;;  %v1192_v17 = vpop.f32.mrf.mxu3  ;;  %1689 = vmatpush.msra.mxu2 %v825_v14 }
  0xc9   : > { %v5822_v20 = vadd.f32 %v1192_v17, %v1080_v15  ;;  %v332_v17 = vld [vmem:[%s5480_s10 + $0x328] sm:$0xff] }
  0xca   : > { %1690 = vmatpush.msra.mxu2 %v823_v47 }
  0xcb   : > { %1259 = vmatmul.f32.gmra.mxu2 %v281_v18  ;;  %1485 = vmatmul.f32.gmra.mxu0 %v283_v19  ;;  %v857_v18 = vld [vmem:[%s8639_s1 + $0x790] sm:$0xff] }
  0xcc   : > { %v5828_v23 = vpop.f32.mrf.mxu1  ;;  %1802 = vmatpush.msra.mxu3 %v857_v18  ;;  %v377_v18 = vld [vmem:[%s5480_s10 + $0x490] sm:$0xff] }
  0xcd   : > { %1372 = vmatmul.f32.gmra.mxu3 %v282_v21 }
  0xce   : > { %v1082_v26 = vpop.f32.mrf.mxu2 }
  0xcf   : > { %v1083_v27 = vadd.f32 %v1082_v26, %v5767_v41  ;;  %1598 = vmatmul.f32.gmra.mxu1 %v284_v24  ;;  %v343_v26 = vld [vmem:[%s5480_s10 + $0x380] sm:$0xff] }
  0xd0   : > { %v5835_v28 = vpop.f32.mrf.mxu0  ;;  %v1195_v29 = vpop.f32.mrf.mxu3 }
  0xd1   : > { %v5839_v32 = vadd.f32 %v1195_v29, %v1083_v27  ;;  %v342_v29 = vld [vmem:[%s5480_s10 + $0x378] sm:$0xff] }
  0xd3   : > { %1262 = vmatmul.f32.gmra.mxu2 %v293_v30  ;;  %1488 = vmatmul.f32.gmra.mxu0 %v295_v31  ;;  %v344_v31 = vld [vmem:[%s5480_s10 + $0x388] sm:$0xff] }
  0xd4   : > { %v5842_v34 = vpop.f32.mrf.mxu1 }
  0xd5   : > { %1375 = vmatmul.f32.gmra.mxu3 %v294_v33 }
  0xd6   : > { %v1085_v36 = vpop.f32.mrf.mxu2 }
  0xd7   : > { %v1086_v38 = vadd.f32 %v1085_v36, %v5767_v41  ;;  %1601 = vmatmul.f32.gmra.mxu1 %v296_v35 }
  0xd8   : > { %v5846_v39 = vpop.f32.mrf.mxu0  ;;  %v1198_v40 = vpop.f32.mrf.mxu3 }
  0xd9   : > { %v5850_v45 = vadd.f32 %v1198_v40, %v1086_v38  ;;  %v353_v40 = vld [vmem:[%s5480_s10 + $0x3d0] sm:$0xff] }
  0xdb   : > { %1265 = vmatmul.f32.gmra.mxu2 %v305_v42  ;;  %1491 = vmatmul.f32.gmra.mxu0 %v307_v44  ;;  %v355_v42 = vld [vmem:[%s5480_s10 + $0x3e0] sm:$0xff] }
  0xdc   : > { %v5856_v49 = vpop.f32.mrf.mxu1 }
  0xdd   : > { %1378 = vmatmul.f32.gmra.mxu3 %v306_v46  ;;  %v354_v46 = vld [vmem:[%s5480_s10 + $0x3d8] sm:$0xff] }
  0xde   : > { %v1088_v53 = vpop.f32.mrf.mxu2 }
  0xdf   : > { %v1089_v55 = vadd.f32 %v1088_v53, %v5767_v41  ;;  %1604 = vmatmul.f32.gmra.mxu1 %v308_v50  ;;  %v855_v53 = vld [vmem:[%s8639_s1 + $0x780] sm:$0xff] }
  0xe0   : > { %v5863_v56 = vpop.f32.mrf.mxu0  ;;  %v1201_v57 = vpop.f32.mrf.mxu3  ;;  %1803 = vmatpush.msra.mxu3 %v855_v53  ;;  %v901_v53 = vld [vmem:[%s8639_s1 + $0x8f0] sm:$0xff] }
  0xe1   : > { %v5867_v61 = vadd.f32 %v1201_v57, %v1089_v55  ;;  %1909 = vmatpush.msra.mxu0 %v901_v53  ;;  %v414_v53 = vld [vmem:[%s5480_s10 + $0x5b8] sm:$0xff] }
  0xe3   : > { %1268 = vmatmul.f32.gmra.mxu2 %v317_v59  ;;  %1494 = vmatmul.f32.gmra.mxu0 %v319_v60 }
  0xe4   : > { %v5870_v0 = vpop.f32.mrf.mxu1 }
  0xe5   : > { %1381 = vmatmul.f32.gmra.mxu3 %v318_v63  ;;  %v365_v63 = vld [vmem:[%s5480_s10 + $0x430] sm:$0xff] }
  0xe6   : > { %v1091_v3 = vpop.f32.mrf.mxu2 }
  0xe7   : > { %v1092_v4 = vadd.f32 %v1091_v3, %v5767_v41  ;;  %1607 = vmatmul.f32.gmra.mxu1 %v320_v2  ;;  %v367_v2 = vld [vmem:[%s5480_s10 + $0x440] sm:$0xff] }
  0xe8   : > { %v5874_v5 = vpop.f32.mrf.mxu0  ;;  %v1204_v7 = vpop.f32.mrf.mxu3 }
  0xe9   : > { %v5878_v11 = vadd.f32 %v1204_v7, %v1092_v4  ;;  %v366_v4 = vld [vmem:[%s5480_s10 + $0x438] sm:$0xff] }
  0xeb   : > { %1271 = vmatmul.f32.gmra.mxu2 %v329_v8  ;;  %1497 = vmatmul.f32.gmra.mxu0 %v331_v9  ;;  %v368_v8 = vld [vmem:[%s5480_s10 + $0x448] sm:$0xff] }
  0xec   : > { %v5884_v15 = vpop.f32.mrf.mxu1 }
  0xed   : > { %1384 = vmatmul.f32.gmra.mxu3 %v330_v13 }
  0xee   : > { %v1094_v19 = vpop.f32.mrf.mxu2 }
  0xef   : > { %v1095_v21 = vadd.f32 %v1094_v19, %v5767_v41  ;;  %1610 = vmatmul.f32.gmra.mxu1 %v332_v17  ;;  %v379_v19 = vld [vmem:[%s5480_s10 + $0x4a0] sm:$0xff] }
  0xf0   : > { %v5891_v22 = vpop.f32.mrf.mxu0  ;;  %v1207_v24 = vpop.f32.mrf.mxu3 }
  0xf1   : > { %v5895_v27 = vadd.f32 %v1207_v24, %v1095_v21  ;;  %v378_v24 = vld [vmem:[%s5480_s10 + $0x498] sm:$0xff] }
  0xf3   : > { %1274 = vmatmul.f32.gmra.mxu2 %v341_v25  ;;  %1500 = vmatmul.f32.gmra.mxu0 %v343_v26  ;;  %v821_v25 = vld [vmem:[%s8639_s1 + $0x670] sm:$0xff] }
  0xf4   : > { %v5898_v30 = vpop.f32.mrf.mxu1  ;;  %1691 = vmatpush.msra.mxu2 %v821_v25  ;;  %v404_v25 = vld [vmem:[%s5480_s10 + $0x568] sm:$0xff] }
  0xf5   : > { %1387 = vmatmul.f32.gmra.mxu3 %v342_v29  ;;  %v380_v29 = vld [vmem:[%s5480_s10 + $0x4a8] sm:$0xff] }
  0xf6   : > { %v1097_v33 = vpop.f32.mrf.mxu2 }
  0xf7   : > { %v1098_v35 = vadd.f32 %v1097_v33, %v5767_v41  ;;  %1613 = vmatmul.f32.gmra.mxu1 %v344_v31  ;;  %v853_v31 = vld [vmem:[%s8639_s1 + $0x770] sm:$0xff] }
  0xf8   : > { %v5902_v36 = vpop.f32.mrf.mxu0  ;;  %v1210_v38 = vpop.f32.mrf.mxu3  ;;  %1804 = vmatpush.msra.mxu3 %v853_v31 }
  0xf9   : > { %v5906_v44 = vadd.f32 %v1210_v38, %v1098_v35 }
  0xfb   : > { %1277 = vmatmul.f32.gmra.mxu2 %v353_v40  ;;  %1503 = vmatmul.f32.gmra.mxu0 %v355_v42  ;;  %v389_v42 = vld [vmem:[%s5480_s10 + $0x4f0] sm:$0xff] }
  0xfc   : > { %v5912_v50 = vpop.f32.mrf.mxu1 }
  0xfd   : > { %1390 = vmatmul.f32.gmra.mxu3 %v354_v46  ;;  %v391_v46 = vld [vmem:[%s5480_s10 + $0x500] sm:$0xff] }
  0xfe   : > { %v1100_v55 = vpop.f32.mrf.mxu2 }
  0xff   : > { %v1101_v57 = vadd.f32 %v1100_v55, %v5767_v41  ;;  %1616 = vmatmul.f32.gmra.mxu1 %v356_v51  ;;  %v390_v51 = vld [vmem:[%s5480_s10 + $0x4f8] sm:$0xff] }
 0x100   : > { %v5919_v59 = vpop.f32.mrf.mxu0  ;;  %v1213_v60 = vpop.f32.mrf.mxu3 }
 0x101   : > { %v5923_v3 = vadd.f32 %v1213_v60, %v1101_v57  ;;  %v392_v57 = vld [vmem:[%s5480_s10 + $0x508] sm:$0xff]  ;;  %v933_v60 = vld [vmem:[%s8639_s1 + $0x9f0] sm:$0xff] }
 0x102   : > { %2022 = vmatpush.msra.mxu1 %v933_v60 }
 0x103   : > { %1280 = vmatmul.f32.gmra.mxu2 %v365_v63  ;;  %1506 = vmatmul.f32.gmra.mxu0 %v367_v2 }
 0x104   : > { %v5926_v7 = vpop.f32.mrf.mxu1 }
 0x105   : > { %1393 = vmatmul.f32.gmra.mxu3 %v366_v4 }
 0x106   : > { %v1103_v9 = vpop.f32.mrf.mxu2 }
 0x107   : > { %v1104_v13 = vadd.f32 %v1103_v9, %v5767_v41  ;;  %1619 = vmatmul.f32.gmra.mxu1 %v368_v8  ;;  %v401_v9 = vld [vmem:[%s5480_s10 + $0x550] sm:$0xff] }
 0x108   : > { %v5930_v14 = vpop.f32.mrf.mxu0  ;;  %v1216_v17 = vpop.f32.mrf.mxu3 }
 0x109   : > { %v5934_v21 = vadd.f32 %v1216_v17, %v1104_v13  ;;  %v403_v13 = vld [vmem:[%s5480_s10 + $0x560] sm:$0xff] }
 0x10b   : > { %1283 = vmatmul.f32.gmra.mxu2 %v377_v18  ;;  %1509 = vmatmul.f32.gmra.mxu0 %v379_v19  ;;  %v402_v18 = vld [vmem:[%s5480_s10 + $0x558] sm:$0xff]  ;;  %v819_v19 = vld [vmem:[%s8639_s1 + $0x660] sm:$0xff] }
 0x10c   : > { %v5940_v26 = vpop.f32.mrf.mxu1  ;;  %1692 = vmatpush.msra.mxu2 %v819_v19 }
 0x10d   : > { %1396 = vmatmul.f32.gmra.mxu3 %v378_v24 }
 0x10e   : > { %v1106_v33 = vpop.f32.mrf.mxu2 }
 0x10f   : > { %v1107_v35 = vadd.f32 %v1106_v33, %v5767_v41  ;;  %1622 = vmatmul.f32.gmra.mxu1 %v380_v29  ;;  %v851_v29 = vld [vmem:[%s8639_s1 + $0x760] sm:$0xff] }
 0x110   : > { %v5947_v38 = vpop.f32.mrf.mxu0  ;;  %v1219_v40 = vpop.f32.mrf.mxu3  ;;  %1805 = vmatpush.msra.mxu3 %v851_v29  ;;  %v427_v29 = vld [vmem:[%s5480_s10 + $0x620] sm:$0xff] }
 0x111   : > { %v5951_v47 = vadd.f32 %v1219_v40, %v1107_v35 }
 0x113   : > { %1286 = vmatmul.f32.gmra.mxu2 %v389_v42  ;;  %1512 = vmatmul.f32.gmra.mxu0 %v391_v46  ;;  %v413_v42 = vld [vmem:[%s5480_s10 + $0x5b0] sm:$0xff]  ;;  %v415_v46 = vld [vmem:[%s5480_s10 + $0x5c0] sm:$0xff] }
 0x114   : > { %v5957_v55 = vpop.f32.mrf.mxu1 }
 0x115   : > { %1399 = vmatmul.f32.gmra.mxu3 %v390_v51 }
 0x116   : > { %v1109_v63 = vpop.f32.mrf.mxu2 }
 0x117   : > { %v1110_v2 = vadd.f32 %v1109_v63, %v5767_v41  ;;  %1625 = vmatmul.f32.gmra.mxu1 %v392_v57  ;;  %v899_v57 = vld [vmem:[%s8639_s1 + $0x8e0] sm:$0xff]  ;;  %v416_v63 = vld [vmem:[%s5480_s10 + $0x5c8] sm:$0xff] }
 0x118   : > { %v5964_v4 = vpop.f32.mrf.mxu0  ;;  %v1222_v8 = vpop.f32.mrf.mxu3  ;;  %1910 = vmatpush.msra.mxu0 %v899_v57 }
 0x119   : > { %v5968_v17 = vadd.f32 %v1222_v8, %v1110_v2  ;;  %v931_v2 = vld [vmem:[%s8639_s1 + $0x9e0] sm:$0xff] }
 0x11a   : > { %2023 = vmatpush.msra.mxu1 %v931_v2 }
 0x11b   : > { %1289 = vmatmul.f32.gmra.mxu2 %v401_v9  ;;  %1515 = vmatmul.f32.gmra.mxu0 %v403_v13  ;;  %v1023_v9 = vadd.f32 %v5762_v37, %v5767_v41  ;;  %v817_v37 = vld [vmem:[%s8639_s1 + $0x650] sm:$0xff] }
 0x11c   : > { %v5974_v24 = vpop.f32.mrf.mxu1  ;;  %1693 = vmatpush.msra.mxu2 %v817_v37  ;;  %v897_v37 = vld [vmem:[%s8639_s1 + $0x8d0] sm:$0xff] }
 0x11d   : > { %1402 = vmatmul.f32.gmra.mxu3 %v402_v18  ;;  %1911 = vmatpush.msra.mxu0 %v897_v37 }
 0x11e   : > { %v1112_v31 = vpop.f32.mrf.mxu2 }
 0x11f   : > { %v1113_v33 = vadd.f32 %v1112_v31, %v5767_v41  ;;  %1628 = vmatmul.f32.gmra.mxu1 %v404_v25  ;;  %v425_v25 = vld [vmem:[%s5480_s10 + $0x610] sm:$0xff] }
 0x120   : > { %v5981_v35 = vpop.f32.mrf.mxu0  ;;  %v1225_v40 = vpop.f32.mrf.mxu3 }
 0x121   : > { %v5985_v51 = vadd.f32 %v1225_v40, %v1113_v33  ;;  %v426_v33 = vld [vmem:[%s5480_s10 + $0x618] sm:$0xff]  ;;  %v1136_v40 = vadd.f32 %v5772_v43, %v1023_v9  ;;  %v1026_v43 = vadd.f32 %v5779_v48, %v5767_v41  ;;  %v437_v9 = vld [vmem:[%s5480_s10 + $0x670] sm:$0xff] }
 0x123   : > { %1292 = vmatmul.f32.gmra.mxu2 %v413_v42  ;;  %1518 = vmatmul.f32.gmra.mxu0 %v415_v46  ;;  %v428_v46 = vld [vmem:[%s5480_s10 + $0x628] sm:$0xff] }
 0x124   : > { %v5991_v60 = vpop.f32.mrf.mxu1 }
 0x125   : > { %1405 = vmatmul.f32.gmra.mxu3 %v414_v53  ;;  %v849_v53 = vld [vmem:[%s8639_s1 + $0x750] sm:$0xff] }
 0x126   : > { %v1115_v8 = vpop.f32.mrf.mxu2  ;;  %1806 = vmatpush.msra.mxu3 %v849_v53 }
 0x127   : > { %v1116_v13 = vadd.f32 %v1115_v8, %v5767_v41  ;;  %1631 = vmatmul.f32.gmra.mxu1 %v416_v63 }
 0x128   : > { %v1228_v18 = vpop.f32.mrf.mxu3  ;;  %v1474_v19 = vpop.f32.mrf.mxu0 }
 0x129   : > { %v6002_v31 = vadd.f32 %v1228_v18, %v1116_v13  ;;  %v439_v13 = vld [vmem:[%s5480_s10 + $0x680] sm:$0xff] }
 0x12b   : > { %1295 = vmatmul.f32.gmra.mxu2 %v425_v25  ;;  %1521 = vmatmul.f32.gmra.mxu0 %v427_v29  ;;  %v438_v25 = vld [vmem:[%s5480_s10 + $0x678] sm:$0xff]  ;;  %v1139_v29 = vadd.f32 %v5786_v54, %v1026_v43  ;;  %v929_v54 = vld [vmem:[%s8639_s1 + $0x9d0] sm:$0xff] }
 0x12c   : > { %v1587_v42 = vpop.f32.mrf.mxu1  ;;  %2024 = vmatpush.msra.mxu1 %v929_v54 }
 0x12d   : > { %1408 = vmatmul.f32.gmra.mxu3 %v426_v33 }
 0x12e   : > { %v1248_v57 = vpop.f32.mrf.mxu2 }
 0x12f   : > { %v1249_v63 = vadd.f32 %v1248_v57, %v1136_v40  ;;  %1634 = vmatmul.f32.gmra.mxu1 %v428_v46  ;;  %v440_v40 = vld [vmem:[%s5480_s10 + $0x688] sm:$0xff] }
 0x130   : > { %v1361_v2 = vpop.f32.mrf.mxu3  ;;  %v1477_v8 = vpop.f32.mrf.mxu0 }
 0x131   : > { %v1362_v18 = vadd.f32 %v1361_v2, %v1249_v63  ;;  %v449_v2 = vld [vmem:[%s5480_s10 + $0x6d0] sm:$0xff] }
 0x133   : > { %1298 = vmatmul.f32.gmra.mxu2 %v437_v9  ;;  %1524 = vmatmul.f32.gmra.mxu0 %v439_v13  ;;  %v1475_v33 = vadd.f32 %v1474_v19, %v1362_v18  ;;  %v1029_v19 = vadd.f32 %v5790_v58, %v5767_v41  ;;  %v451_v9 = vld [vmem:[%s5480_s10 + $0x6e0] sm:$0xff] }
 0x134   : > { %v1590_v48 = vpop.f32.mrf.mxu1 }
 0x135   : > { %v6023_v46 = vadd.f32 %v1587_v42, %v1475_v33  ;;  %1411 = vmatmul.f32.gmra.mxu3 %v438_v25  ;;  %v450_v42 = vld [vmem:[%s5480_s10 + $0x6d8] sm:$0xff]  ;;  %v1142_v18 = vadd.f32 %v5800_v1, %v1029_v19  ;;  %v815_v33 = vld [vmem:[%s8639_s1 + $0x640] sm:$0xff] }
 0x136   : > { %v1251_v53 = vpop.f32.mrf.mxu2  ;;  %1694 = vmatpush.msra.mxu2 %v815_v33  ;;  %v847_v1 = vld [vmem:[%s8639_s1 + $0x740] sm:$0xff] }
 0x137   : > { %v1252_v57 = vadd.f32 %v1251_v53, %v1139_v29  ;;  %1637 = vmatmul.f32.gmra.mxu1 %v440_v40  ;;  %v452_v29 = vld [vmem:[%s5480_s10 + $0x6e8] sm:$0xff]  ;;  %1807 = vmatpush.msra.mxu3 %v847_v1 }
 0x138   : > { %v1364_v43 = vpop.f32.mrf.mxu3  ;;  %v1480_v63 = vpop.f32.mrf.mxu0 }
 0x139   : > { %v1365_v13 = vadd.f32 %v1364_v43, %v1252_v57  ;;  %v461_v57 = vld [vmem:[%s5480_s10 + $0x730] sm:$0xff]  ;;  %v463_v43 = vld [vmem:[%s5480_s10 + $0x740] sm:$0xff] }
 0x13b   : > { %1301 = vmatmul.f32.gmra.mxu2 %v449_v2  ;;  %1527 = vmatmul.f32.gmra.mxu0 %v451_v9  ;;  %v1478_v25 = vadd.f32 %v1477_v8, %v1365_v13  ;;  %v1032_v8 = vadd.f32 %v5807_v6, %v5767_v41 }
 0x13c   : > { %v1593_v58 = vpop.f32.mrf.mxu1 }
 0x13d   : > { %v6038_v37 = vadd.f32 %v1590_v48, %v1478_v25  ;;  %1414 = vmatmul.f32.gmra.mxu3 %v450_v42  ;;  %v462_v48 = vld [vmem:[%s5480_s10 + $0x738] sm:$0xff]  ;;  %v1145_v9 = vadd.f32 %v5814_v12, %v1032_v8  ;;  %v895_v42 = vld [vmem:[%s8639_s1 + $0x8c0] sm:$0xff]  ;;  %v473_v8 = vld [vmem:[%s5480_s10 + $0x790] sm:$0xff] }
 0x13e   : > { %v1254_v40 = vpop.f32.mrf.mxu2  ;;  %1912 = vmatpush.msra.mxu0 %v895_v42  ;;  %v927_v12 = vld [vmem:[%s8639_s1 + $0x9c0] sm:$0xff] }
 0x13f   : > { %v1255_v54 = vadd.f32 %v1254_v40, %v1142_v18  ;;  %1640 = vmatmul.f32.gmra.mxu1 %v452_v29  ;;  %v464_v18 = vld [vmem:[%s5480_s10 + $0x748] sm:$0xff] }
 0x140   : > { %v1367_v53 = vpop.f32.mrf.mxu3  ;;  %v1483_v19 = vpop.f32.mrf.mxu0  ;;  %2025 = vmatpush.msra.mxu1 %v927_v12 }
 0x141   : > { %v1368_v2 = vadd.f32 %v1367_v53, %v1255_v54  ;;  %v475_v54 = vld [vmem:[%s5480_s10 + $0x7a0] sm:$0xff] }
 0x143   : > { %1304 = vmatmul.f32.gmra.mxu2 %v461_v57  ;;  %1530 = vmatmul.f32.gmra.mxu0 %v463_v43  ;;  %v1481_v13 = vadd.f32 %v1480_v63, %v1368_v2  ;;  %v1035_v63 = vadd.f32 %v5818_v16, %v5767_v41  ;;  %v813_v2 = vld [vmem:[%s8639_s1 + $0x630] sm:$0xff] }
 0x144   : > { %v1596_v6 = vpop.f32.mrf.mxu1  ;;  %1695 = vmatpush.msra.mxu2 %v813_v2 }
 0x145   : > { %v6053_v25 = vadd.f32 %v1593_v58, %v1481_v13  ;;  %1417 = vmatmul.f32.gmra.mxu3 %v462_v48  ;;  %v474_v58 = vld [vmem:[%s5480_s10 + $0x798] sm:$0xff]  ;;  %v1148_v57 = vadd.f32 %v5828_v23, %v1035_v63  ;;  %v476_v48 = vld [vmem:[%s5480_s10 + $0x7a8] sm:$0xff]  ;;  %v845_v23 = vld [vmem:[%s8639_s1 + $0x730] sm:$0xff] }
 0x146   : > { %v1257_v33 = vpop.f32.mrf.mxu2  ;;  %1808 = vmatpush.msra.mxu3 %v845_v23  ;;  %v487_v63 = vld [vmem:[%s5480_s10 + $0x800] sm:$0xff]  ;;  %v497_v23 = vld [vmem:[%s5480_s10 + $0x850] sm:$0xff] }
 0x147   : > { %v1258_v29 = vadd.f32 %v1257_v33, %v1145_v9  ;;  %1643 = vmatmul.f32.gmra.mxu1 %v464_v18  ;;  %v485_v33 = vld [vmem:[%s5480_s10 + $0x7f0] sm:$0xff] }
 0x148   : > { %v1370_v1 = vpop.f32.mrf.mxu3  ;;  %v1486_v40 = vpop.f32.mrf.mxu0 }
 0x149   : > { %v1371_v53 = vadd.f32 %v1370_v1, %v1258_v29 }
 0x14b   : > { %1307 = vmatmul.f32.gmra.mxu2 %v473_v8  ;;  %1533 = vmatmul.f32.gmra.mxu0 %v475_v54  ;;  %v1484_v43 = vadd.f32 %v1483_v19, %v1371_v53  ;;  %v1038_v19 = vadd.f32 %v5835_v28, %v5767_v41  ;;  %v893_v54 = vld [vmem:[%s8639_s1 + $0x8b0] sm:$0xff]  ;;  %v488_v53 = vld [vmem:[%s5480_s10 + $0x808] sm:$0xff] }
 0x14c   : > { %v1599_v16 = vpop.f32.mrf.mxu1  ;;  %1913 = vmatpush.msra.mxu0 %v893_v54 }
 0x14d   : > { %v6068_v9 = vadd.f32 %v1596_v6, %v1484_v43  ;;  %1420 = vmatmul.f32.gmra.mxu3 %v474_v58  ;;  %v486_v6 = vld [vmem:[%s5480_s10 + $0x7f8] sm:$0xff]  ;;  %v1151_v1 = vadd.f32 %v5842_v34, %v1038_v19  ;;  %v925_v34 = vld [vmem:[%s8639_s1 + $0x9b0] sm:$0xff] }
 0x14e   : > { %v1260_v13 = vpop.f32.mrf.mxu2  ;;  %2026 = vmatpush.msra.mxu1 %v925_v34  ;;  %v511_v34 = vld [vmem:[%s5480_s10 + $0x8c0] sm:$0xff] }
 0x14f   : > { %v1261_v42 = vadd.f32 %v1260_v13, %v1148_v57  ;;  %1646 = vmatmul.f32.gmra.mxu1 %v476_v48  ;;  %v499_v13 = vld [vmem:[%s5480_s10 + $0x860] sm:$0xff] }
 0x150   : > { %v1373_v18 = vpop.f32.mrf.mxu3  ;;  %v1489_v12 = vpop.f32.mrf.mxu0 }
 0x151   : > { %v1374_v29 = vadd.f32 %v1373_v18, %v1261_v42 }
 0x153   : > { %1310 = vmatmul.f32.gmra.mxu2 %v485_v33  ;;  %1536 = vmatmul.f32.gmra.mxu0 %v487_v63  ;;  %v1487_v8 = vadd.f32 %v1486_v40, %v1374_v29  ;;  %v1041_v40 = vadd.f32 %v5846_v39, %v5767_v41  ;;  %v811_v33 = vld [vmem:[%s8639_s1 + $0x620] sm:$0xff]  ;;  %v500_v63 = vld [vmem:[%s5480_s10 + $0x868] sm:$0xff] }
 0x154   : > { %v1602_v28 = vpop.f32.mrf.mxu1  ;;  %1696 = vmatpush.msra.mxu2 %v811_v33  ;;  %v521_v33 = vld [vmem:[%s5480_s10 + $0x910] sm:$0xff] }
 0x155   : > { %v6083_v58 = vadd.f32 %v1599_v16, %v1487_v8  ;;  %1423 = vmatmul.f32.gmra.mxu3 %v486_v6  ;;  %v498_v16 = vld [vmem:[%s5480_s10 + $0x858] sm:$0xff]  ;;  %v1154_v42 = vadd.f32 %v5856_v49, %v1041_v40  ;;  %v843_v49 = vld [vmem:[%s8639_s1 + $0x720] sm:$0xff] }
 0x156   : > { %v1263_v57 = vpop.f32.mrf.mxu2  ;;  %1809 = vmatpush.msra.mxu3 %v843_v49 }
 0x157   : > { %v1264_v43 = vadd.f32 %v1263_v57, %v1151_v1  ;;  %1649 = vmatmul.f32.gmra.mxu1 %v488_v53  ;;  %v509_v53 = vld [vmem:[%s5480_s10 + $0x8b0] sm:$0xff] }
 0x158   : > { %v1376_v2 = vpop.f32.mrf.mxu3  ;;  %v1492_v48 = vpop.f32.mrf.mxu0 }
 0x159   : > { %v1377_v19 = vadd.f32 %v1376_v2, %v1264_v43  ;;  %v891_v2 = vld [vmem:[%s8639_s1 + $0x8a0] sm:$0xff] }
 0x15a   : > { %1914 = vmatpush.msra.mxu0 %v891_v2  ;;  %v535_v2 = vld [vmem:[%s5480_s10 + $0x980] sm:$0xff] }
 0x15b   : > { %1313 = vmatmul.f32.gmra.mxu2 %v497_v23  ;;  %1539 = vmatmul.f32.gmra.mxu0 %v499_v13  ;;  %v1490_v18 = vadd.f32 %v1489_v12, %v1377_v19  ;;  %v1044_v12 = vadd.f32 %v5863_v56, %v5767_v41  ;;  %v512_v23 = vld [vmem:[%s5480_s10 + $0x8c8] sm:$0xff] }
 0x15c   : > { %v1605_v39 = vpop.f32.mrf.mxu1 }
 0x15d   : > { %v6098_v29 = vadd.f32 %v1602_v28, %v1490_v18  ;;  %1426 = vmatmul.f32.gmra.mxu3 %v498_v16  ;;  %v510_v28 = vld [vmem:[%s5480_s10 + $0x8b8] sm:$0xff]  ;;  %v1157_v40 = vadd.f32 %v5870_v0, %v1044_v12  ;;  %v923_v0 = vld [vmem:[%s8639_s1 + $0x9a0] sm:$0xff] }
 0x15e   : > { %v1266_v6 = vpop.f32.mrf.mxu2  ;;  %2027 = vmatpush.msra.mxu1 %v923_v0 }
 0x15f   : > { %v1267_v1 = vadd.f32 %v1266_v6, %v1154_v42  ;;  %1652 = vmatmul.f32.gmra.mxu1 %v500_v63  ;;  %v523_v63 = vld [vmem:[%s5480_s10 + $0x920] sm:$0xff] }
 0x160   : > { %v1379_v8 = vpop.f32.mrf.mxu3  ;;  %v1495_v54 = vpop.f32.mrf.mxu0 }
 0x161   : > { %v1380_v57 = vadd.f32 %v1379_v8, %v1267_v1  ;;  %v809_v1 = vld [vmem:[%s8639_s1 + $0x610] sm:$0xff]  ;;  %v524_v8 = vld [vmem:[%s5480_s10 + $0x928] sm:$0xff] }
 0x162   : > { %1697 = vmatpush.msra.mxu2 %v809_v1 }
 0x163   : > { %1316 = vmatmul.f32.gmra.mxu2 %v509_v53  ;;  %1542 = vmatmul.f32.gmra.mxu0 %v511_v34  ;;  %v1493_v43 = vadd.f32 %v1492_v48, %v1380_v57  ;;  %v1047_v48 = vadd.f32 %v5874_v5, %v5767_v41 }
 0x164   : > { %v1608_v56 = vpop.f32.mrf.mxu1 }
 0x165   : > { %v6113_v13 = vadd.f32 %v1605_v39, %v1493_v43  ;;  %1429 = vmatmul.f32.gmra.mxu3 %v510_v28  ;;  %v522_v39 = vld [vmem:[%s5480_s10 + $0x918] sm:$0xff]  ;;  %v1160_v6 = vadd.f32 %v5884_v15, %v1047_v48  ;;  %v841_v15 = vld [vmem:[%s8639_s1 + $0x710] sm:$0xff] }
 0x166   : > { %v1269_v19 = vpop.f32.mrf.mxu2  ;;  %1810 = vmatpush.msra.mxu3 %v841_v15  ;;  %v533_v43 = vld [vmem:[%s5480_s10 + $0x970] sm:$0xff] }
 0x167   : > { %v1270_v16 = vadd.f32 %v1269_v19, %v1157_v40  ;;  %1655 = vmatmul.f32.gmra.mxu1 %v512_v23  ;;  %v889_v48 = vld [vmem:[%s8639_s1 + $0x890] sm:$0xff] }
 0x168   : > { %v1382_v42 = vpop.f32.mrf.mxu3  ;;  %v1498_v18 = vpop.f32.mrf.mxu0  ;;  %1915 = vmatpush.msra.mxu0 %v889_v48 }
 0x169   : > { %v1383_v49 = vadd.f32 %v1382_v42, %v1270_v16  ;;  %v536_v16 = vld [vmem:[%s5480_s10 + $0x988] sm:$0xff] }
 0x16b   : > { %1319 = vmatmul.f32.gmra.mxu2 %v521_v33  ;;  %1545 = vmatmul.f32.gmra.mxu0 %v523_v63  ;;  %v1496_v12 = vadd.f32 %v1495_v54, %v1383_v49  ;;  %v1050_v54 = vadd.f32 %v5891_v22, %v5767_v41 }
 0x16c   : > { %v1611_v5 = vpop.f32.mrf.mxu1 }
 0x16d   : > { %v6128_v53 = vadd.f32 %v1608_v56, %v1496_v12  ;;  %1432 = vmatmul.f32.gmra.mxu3 %v522_v39  ;;  %v534_v56 = vld [vmem:[%s5480_s10 + $0x978] sm:$0xff]  ;;  %v1163_v0 = vadd.f32 %v5898_v30, %v1050_v54  ;;  %v921_v30 = vld [vmem:[%s8639_s1 + $0x990] sm:$0xff]  ;;  %v547_v12 = vld [vmem:[%s5480_s10 + $0x9e0] sm:$0xff] }
 0x16e   : > { %v1272_v34 = vpop.f32.mrf.mxu2  ;;  %2028 = vmatpush.msra.mxu1 %v921_v30  ;;  %v885_v54 = vld [vmem:[%s8639_s1 + $0x870] sm:$0xff] }
 0x16f   : > { %v1273_v57 = vadd.f32 %v1272_v34, %v1160_v6  ;;  %1658 = vmatmul.f32.gmra.mxu1 %v524_v8  ;;  %v545_v6 = vld [vmem:[%s5480_s10 + $0x9d0] sm:$0xff]  ;;  %v546_v8 = vld [vmem:[%s5480_s10 + $0x9d8] sm:$0xff] }
 0x170   : > { %v1385_v28 = vpop.f32.mrf.mxu3  ;;  %v1501_v40 = vpop.f32.mrf.mxu0 }
 0x171   : > { %v1386_v23 = vadd.f32 %v1385_v28, %v1273_v57  ;;  %v548_v28 = vld [vmem:[%s5480_s10 + $0x9e8] sm:$0xff] }
 0x173   : > { %1322 = vmatmul.f32.gmra.mxu2 %v533_v43  ;;  %1548 = vmatmul.f32.gmra.mxu0 %v535_v2  ;;  %v1499_v19 = vadd.f32 %v1498_v18, %v1386_v23  ;;  %v1053_v18 = vadd.f32 %v5902_v36, %v5767_v41  ;;  %v807_v36 = vld [vmem:[%s8639_s1 + $0x600] sm:$0xff]  ;;  %v1056_v23 = vadd.f32 %v5919_v59, %v5767_v41 }
 0x174   : > { %v1614_v22 = vpop.f32.mrf.mxu1  ;;  %1698 = vmatpush.msra.mxu2 %v807_v36  ;;  %v917_v36 = vld [vmem:[%s8639_s1 + $0x970] sm:$0xff] }
 0x175   : > { %v6143_v42 = vadd.f32 %v1611_v5, %v1499_v19  ;;  %1435 = vmatmul.f32.gmra.mxu3 %v534_v56  ;;  %v887_v5 = vld [vmem:[%s8639_s1 + $0x880] sm:$0xff]  ;;  %v1166_v15 = vadd.f32 %v5912_v50, %v1053_v18  ;;  %v558_v18 = vld [vmem:[%s5480_s10 + $0xa38] sm:$0xff]  ;;  %v1169_v59 = vadd.f32 %v5926_v7, %v1056_v23 }
 0x176   : > { %v1275_v33 = vpop.f32.mrf.mxu2  ;;  %1916 = vmatpush.msra.mxu0 %v887_v5  ;;  %v839_v50 = vld [vmem:[%s8639_s1 + $0x700] sm:$0xff]  ;;  %v570_v23 = vld [vmem:[%s5480_s10 + $0xa98] sm:$0xff] }
 0x177   : > { %v1276_v63 = vadd.f32 %v1275_v33, %v1163_v0  ;;  %1661 = vmatmul.f32.gmra.mxu1 %v536_v16  ;;  %1811 = vmatpush.msra.mxu3 %v839_v50  ;;  %v881_v0 = vld [vmem:[%s8639_s1 + $0x850] sm:$0xff]  ;;  %v559_v16 = vld [vmem:[%s5480_s10 + $0xa40] sm:$0xff] }
 0x178   : > { %v1388_v49 = vpop.f32.mrf.mxu3  ;;  %v1504_v39 = vpop.f32.mrf.mxu0  ;;  %1917 = vmatpush.msra.mxu0 %v885_v54  ;;  %v879_v33 = vld [vmem:[%s8639_s1 + $0x840] sm:$0xff] }
 0x179   : > { %v1389_v1 = vadd.f32 %v1388_v49, %v1276_v63  ;;  %v877_v49 = vld [vmem:[%s8639_s1 + $0x830] sm:$0xff]  ;;  %v919_v5 = vld [vmem:[%s8639_s1 + $0x980] sm:$0xff] }
 0x17a   : > { %v875_v7 = vld [vmem:[%s8639_s1 + $0x820] sm:$0xff]  ;;  %2029 = vmatpush.msra.mxu1 %v919_v5  ;;  %v581_v5 = vld [vmem:[%s5480_s10 + $0xaf0] sm:$0xff] }
 0x17b   : > { %1325 = vmatmul.f32.gmra.mxu2 %v545_v6  ;;  %1551 = vmatmul.f32.gmra.mxu0 %v547_v12  ;;  %v1502_v34 = vadd.f32 %v1501_v40, %v1389_v1  ;;  %v883_v40 = vld [vmem:[%s8639_s1 + $0x860] sm:$0xff]  ;;  %v560_v12 = vld [vmem:[%s5480_s10 + $0xa48] sm:$0xff] }
 0x17c   : > { %v1617_v57 = vpop.f32.mrf.mxu1  ;;  %1918 = vmatpush.msra.mxu0 %v883_v40  ;;  %v571_v50 = vld [vmem:[%s5480_s10 + $0xaa0] sm:$0xff]  ;;  %2030 = vmatpush.msra.mxu1 %v917_v36  ;;  %v905_v36 = vld [vmem:[%s8639_s1 + $0x910] sm:$0xff] }
 0x17d   : > { %v6164_v43 = vadd.f32 %v1614_v22, %v1502_v34  ;;  %1438 = vmatmul.f32.gmra.mxu3 %v546_v8  ;;  %v557_v22 = vld [vmem:[%s5480_s10 + $0xa30] sm:$0xff]  ;;  %v1059_v8 = vadd.f32 %v5930_v14, %v5767_v41  ;;  %v871_v14 = vld [vmem:[%s8639_s1 + $0x800] sm:$0xff] }
 0x17e   : > { %v1278_v2 = vpop.f32.mrf.mxu2  ;;  %1919 = vmatpush.msra.mxu0 %v881_v0  ;;  %v873_v34 = vld [vmem:[%s8639_s1 + $0x810] sm:$0xff] }
 0x17f   : > { %v1279_v56 = vadd.f32 %v1278_v2, %v1166_v15  ;;  %1664 = vmatmul.f32.gmra.mxu1 %v548_v28  ;;  %v569_v28 = vld [vmem:[%s5480_s10 + $0xa90] sm:$0xff]  ;;  %v915_v2 = vld [vmem:[%s8639_s1 + $0x960] sm:$0xff] }
 0x180   : > { %v1391_v19 = vpop.f32.mrf.mxu3  ;;  %v1507_v48 = vpop.f32.mrf.mxu0  ;;  %1920 = vmatpush.msra.mxu0 %v879_v33  ;;  %2031 = vmatpush.msra.mxu1 %v915_v2 }
 0x181   : > { %v1392_v30 = vadd.f32 %v1391_v19, %v1279_v56  ;;  %v1172_v56 = vadd.f32 %v5940_v26, %v1059_v8  ;;  %v965_v19 = vld [vmem:[%s8639_s1 + $0xaf0] sm:$0xff]  ;;  %v907_v8 = vld [vmem:[%s8639_s1 + $0x920] sm:$0xff] }
 0x182   : > { %1921 = vmatpush.msra.mxu0 %v877_v49  ;;  %2135 = vmatpush.msrb.mxu2 %v965_v19  ;;  %v997_v26 = vld [vmem:[%s8639_s1 + $0xbf0] sm:$0xff] }
 0x183   : > { %1328 = vmatmul.f32.gmra.mxu2 %v557_v22  ;;  %1554 = vmatmul.f32.gmra.mxu0 %v559_v16  ;;  %v1505_v63 = vadd.f32 %v1504_v39, %v1392_v30  ;;  %v913_v22 = vld [vmem:[%s8639_s1 + $0x950] sm:$0xff]  ;;  %v572_v30 = vld [vmem:[%s5480_s10 + $0xaa8] sm:$0xff] }
 0x184   : > { %v1620_v6 = vpop.f32.mrf.mxu1  ;;  %1922 = vmatpush.msra.mxu0 %v875_v7  ;;  %2032 = vmatpush.msra.mxu1 %v913_v22  ;;  %v909_v49 = vld [vmem:[%s8639_s1 + $0x930] sm:$0xff]  ;;  %v583_v7 = vld [vmem:[%s5480_s10 + $0xb00] sm:$0xff]  ;;  %v594_v22 = vld [vmem:[%s5480_s10 + $0xb58] sm:$0xff] }
 0x185   : > { %v6188_v1 = vadd.f32 %v1617_v57, %v1505_v63  ;;  %1441 = vmatmul.f32.gmra.mxu3 %v558_v18 }
 0x186   : > { %v1281_v39 = vpop.f32.mrf.mxu2  ;;  %1923 = vmatpush.msra.mxu0 %v873_v34  ;;  %2248 = vmatpush.msrb.mxu3 %v997_v26  ;;  %v963_v26 = vld [vmem:[%s8639_s1 + $0xae0] sm:$0xff] }
 0x187   : > { %v1282_v15 = vadd.f32 %v1281_v39, %v1169_v59  ;;  %1667 = vmatmul.f32.gmra.mxu1 %v560_v12  ;;  %v1062_v59 = vadd.f32 %v5947_v38, %v5767_v41  ;;  %2136 = vmatpush.msrb.mxu2 %v963_v26 }
 0x188   : > { %v1394_v54 = vpop.f32.mrf.mxu3  ;;  %v1510_v57 = vpop.f32.mrf.mxu0  ;;  %1924 = vmatpush.msra.mxu0 %v871_v14 }
 0x189   : > { %v1395_v40 = vadd.f32 %v1394_v54, %v1282_v15  ;;  %v582_v15 = vld [vmem:[%s5480_s10 + $0xaf8] sm:$0xff]  ;;  %v1175_v38 = vadd.f32 %v5957_v55, %v1062_v59  ;;  %v903_v55 = vld [vmem:[%s8639_s1 + $0x900] sm:$0xff] }
 0x18b   : > { %1331 = vmatmul.f32.gmra.mxu2 %v569_v28  ;;  %1557 = vmatmul.f32.gmra.mxu0 %v571_v50  ;;  %v1508_v0 = vadd.f32 %v1507_v48, %v1395_v40  ;;  %v911_v48 = vld [vmem:[%s8639_s1 + $0x940] sm:$0xff]  ;;  %v584_v28 = vld [vmem:[%s5480_s10 + $0xb08] sm:$0xff] }
 0x18c   : > { %v1623_v16 = vpop.f32.mrf.mxu1  ;;  %2033 = vmatpush.msra.mxu1 %v911_v48  ;;  %v596_v48 = vld [vmem:[%s5480_s10 + $0xb68] sm:$0xff] }
 0x18d   : > { %v6221_v33 = vadd.f32 %v1620_v6, %v1508_v0  ;;  %1444 = vmatmul.f32.gmra.mxu3 %v570_v23  ;;  %v595_v0 = vld [vmem:[%s5480_s10 + $0xb60] sm:$0xff] }
 0x18e   : > { %v1284_v18 = vpop.f32.mrf.mxu2  ;;  %2034 = vmatpush.msra.mxu1 %v909_v49 }
 0x18f   : > { %v1285_v63 = vadd.f32 %v1284_v18, %v1172_v56  ;;  %1670 = vmatmul.f32.gmra.mxu1 %v572_v30  ;;  %v593_v56 = vld [vmem:[%s5480_s10 + $0xb50] sm:$0xff] }
 0x190   : > { %v1397_v6 = vpop.f32.mrf.mxu3  ;;  %v1513_v12 = vpop.f32.mrf.mxu0  ;;  %2035 = vmatpush.msra.mxu1 %v907_v8  ;;  %v606_v8 = vld [vmem:[%s5480_s10 + $0xbb8] sm:$0xff] }
 0x191   : > { %v1398_v39 = vadd.f32 %v1397_v6, %v1285_v63  ;;  %v1068_v63 = vadd.f32 %v5981_v35, %v5767_v41 }
 0x192   : > { %2036 = vmatpush.msra.mxu1 %v905_v36  ;;  %v608_v36 = vld [vmem:[%s5480_s10 + $0xbc8] sm:$0xff] }
 0x193   : > { %1334 = vmatmul.f32.gmra.mxu2 %v581_v5  ;;  %1560 = vmatmul.f32.gmra.mxu0 %v583_v7  ;;  %v1511_v34 = vadd.f32 %v1510_v57, %v1398_v39  ;;  %v1065_v57 = vadd.f32 %v5964_v4, %v5767_v41  ;;  %v605_v5 = vld [vmem:[%s5480_s10 + $0xbb0] sm:$0xff]  ;;  %v607_v7 = vld [vmem:[%s5480_s10 + $0xbc0] sm:$0xff] }
 0x194   : > { %v1626_v54 = vpop.f32.mrf.mxu1  ;;  %2037 = vmatpush.msra.mxu1 %v903_v55 }
 0x195   : > { %v6245_v50 = vadd.f32 %v1623_v16, %v1511_v34  ;;  %1447 = vmatmul.f32.gmra.mxu3 %v582_v15  ;;  %v1178_v16 = vadd.f32 %v5974_v24, %v1065_v57  ;;  %v995_v24 = vld [vmem:[%s8639_s1 + $0xbe0] sm:$0xff]  ;;  %v1181_v15 = vadd.f32 %v5991_v60, %v1068_v63  ;;  %v250_v63 = vld [vmem:[%s5480_s10 + $0x98] sm:$0xff] }
 0x196   : > { %v1287_v40 = vpop.f32.mrf.mxu2  ;;  %2249 = vmatpush.msrb.mxu3 %v995_v24  ;;  %v239_v57 = vld [vmem:[%s5480_s10 + $0x40] sm:$0xff] }
 0x197   : > { %v1288_v14 = vadd.f32 %v1287_v40, %v1175_v38  ;;  %1673 = vmatmul.f32.gmra.mxu1 %v584_v28  ;;  %v237_v40 = vld [vmem:[%s5480_s10 + $0x30] sm:$0xff]  ;;  %v251_v24 = vld [vmem:[%s5480_s10 + $0xa0] sm:$0xff] }
 0x198   : > { %v1400_v2 = vpop.f32.mrf.mxu3  ;;  %v1516_v23 = vpop.f32.mrf.mxu0 }
 0x199   : > { %v1401_v19 = vadd.f32 %v1400_v2, %v1288_v14  ;;  %v238_v2 = vld [vmem:[%s5480_s10 + $0x38] sm:$0xff] }
 0x19b   : > { %1337 = vmatmul.f32.gmra.mxu2 %v593_v56  ;;  %1563 = vmatmul.f32.gmra.mxu0 %v595_v0  ;;  %v1514_v30 = vadd.f32 %v1513_v12, %v1401_v19  ;;  %v240_v0 = vld [vmem:[%s5480_s10 + $0x48] sm:$0xff] }
 0x19c   : > { %v1629_v4 = vpop.f32.mrf.mxu1 }
 0x19d   : > { %v6260_v18 = vadd.f32 %v1626_v54, %v1514_v30  ;;  %1450 = vmatmul.f32.gmra.mxu3 %v594_v22  ;;  %v993_v22 = vld [vmem:[%s8639_s1 + $0xbd0] sm:$0xff] }
 0x19e   : > { %v1290_v59 = vpop.f32.mrf.mxu2  ;;  %2250 = vmatpush.msrb.mxu3 %v993_v22  ;;  %v274_v22 = vld [vmem:[%s5480_s10 + $0x158] sm:$0xff] }
 0x19f   : > { %v1291_v49 = vadd.f32 %v1290_v59, %v1178_v16  ;;  %1676 = vmatmul.f32.gmra.mxu1 %v596_v48  ;;  %v249_v48 = vld [vmem:[%s5480_s10 + $0x90] sm:$0xff] }
 0x1a0   : > { %v1403_v6 = vpop.f32.mrf.mxu3  ;;  %v1519_v12 = vpop.f32.mrf.mxu0 }
 0x1a1   : > { %v1404_v39 = vadd.f32 %v1403_v6, %v1291_v49 }
 0x1a3   : > { %1340 = vmatmul.f32.gmra.mxu2 %v605_v5  ;;  %1566 = vmatmul.f32.gmra.mxu0 %v607_v7  ;;  %v1517_v38 = vadd.f32 %v1516_v23, %v1404_v39  ;;  %v961_v23 = vld [vmem:[%s8639_s1 + $0xad0] sm:$0xff] }
 0x1a4   : > { %v1632_v34 = vpop.f32.mrf.mxu1  ;;  %2137 = vmatpush.msrb.mxu2 %v961_v23  ;;  %v273_v23 = vld [vmem:[%s5480_s10 + $0x150] sm:$0xff] }
 0x1a5   : > { %v6272_v54 = vadd.f32 %v1629_v4, %v1517_v38  ;;  %1453 = vmatmul.f32.gmra.mxu3 %v606_v8  ;;  %v263_v38 = vld [vmem:[%s5480_s10 + $0x100] sm:$0xff] }
 0x1a6   : > { %v1293_v41 = vpop.f32.mrf.mxu2 }
 0x1a7   : > { %v1294_v35 = vadd.f32 %v1293_v41, %v1181_v15  ;;  %1679 = vmatmul.f32.gmra.mxu1 %v608_v36  ;;  %v261_v15 = vld [vmem:[%s5480_s10 + $0xf0] sm:$0xff]  ;;  %v262_v36 = vld [vmem:[%s5480_s10 + $0xf8] sm:$0xff] }
 0x1a8   : > { %v1406_v28 = vpop.f32.mrf.mxu3  ;;  %v1522_v55 = vpop.f32.mrf.mxu0 }
 0x1a9   : > { %v1407_v14 = vadd.f32 %v1406_v28, %v1294_v35  ;;  %v959_v35 = vld [vmem:[%s8639_s1 + $0xac0] sm:$0xff] }
 0x1aa   : > { %2138 = vmatpush.msrb.mxu2 %v959_v35  ;;  %v297_v35 = vld [vmem:[%s5480_s10 + $0x210] sm:$0xff] }
 0x1ab   : > { %1699 = vmatmul.f32.vlgmr.msra.gmra.mxu2 %v237_v40  ;;  %1925 = vmatmul.f32.vlgmr.msra.gmra.mxu0 %v239_v57  ;;  %v1520_v60 = vadd.f32 %v1519_v12, %v1407_v14  ;;  %v252_v12 = vld [vmem:[%s5480_s10 + $0xa8] sm:$0xff]  ;;  %v991_v40 = vld [vmem:[%s8639_s1 + $0xbc0] sm:$0xff] }
 0x1ac   : > { %v1635_v56 = vpop.f32.mrf.mxu1  ;;  %2251 = vmatpush.msrb.mxu3 %v991_v40  ;;  %v298_v40 = vld [vmem:[%s5480_s10 + $0x218] sm:$0xff] }
 0x1ad   : > { %v6281_v19 = vadd.f32 %v1632_v34, %v1520_v60  ;;  %1812 = vmatmul.f32.vlgmr.msra.gmra.mxu3 %v238_v2 }
 0x1ae   : > { %v1296_v16 = vpop.f32.mrf.mxu2 }
 0x1af   : > { %v1297_v30 = vadd.f32 %v1296_v16, %v5783_v52  ;;  %2038 = vmatmul.f32.vlgmr.msra.gmra.mxu1 %v240_v0 }
 0x1b0   : > { %v1409_v26 = vpop.f32.mrf.mxu3  ;;  %v1525_v4 = vpop.f32.mrf.mxu0 }
 0x1b1   : > { %v1410_v59 = vadd.f32 %v1409_v26, %v1297_v30  ;;  %v276_v26 = vld [vmem:[%s5480_s10 + $0x168] sm:$0xff] }
 0x1b3   : > { %1702 = vmatmul.f32.gmra.mxu2 %v249_v48  ;;  %1928 = vmatmul.f32.gmra.mxu0 %v251_v24  ;;  %v1523_v49 = vadd.f32 %v1522_v55, %v1410_v59  ;;  %v264_v55 = vld [vmem:[%s5480_s10 + $0x108] sm:$0xff] }
 0x1b4   : > { %v1638_v6 = vpop.f32.mrf.mxu1 }
 0x1b5   : > { %v6291_v5 = vadd.f32 %v1635_v56, %v1523_v49  ;;  %1815 = vmatmul.f32.gmra.mxu3 %v250_v63  ;;  %v275_v56 = vld [vmem:[%s5480_s10 + $0x160] sm:$0xff]  ;;  %v285_v63 = vld [vmem:[%s5480_s10 + $0x1b0] sm:$0xff] }
 0x1b6   : > { %v1299_v52 = vpop.f32.mrf.mxu2  ;;  %v287_v49 = vld [vmem:[%s5480_s10 + $0x1c0] sm:$0xff] }
 0x1b7   : > { %v1300_v7 = vadd.f32 %v1299_v52, %v5794_v62  ;;  %2041 = vmatmul.f32.gmra.mxu1 %v252_v12  ;;  %v286_v12 = vld [vmem:[%s5480_s10 + $0x1b8] sm:$0xff] }
 0x1b8   : > { %v1412_v39 = vpop.f32.mrf.mxu3  ;;  %v1528_v8 = vpop.f32.mrf.mxu0 }
 0x1b9   : > { %v1413_v34 = vadd.f32 %v1412_v39, %v1300_v7  ;;  %v957_v7 = vld [vmem:[%s8639_s1 + $0xab0] sm:$0xff] }
 0x1ba   : > { %2139 = vmatpush.msrb.mxu2 %v957_v7  ;;  %v321_v7 = vld [vmem:[%s5480_s10 + $0x2d0] sm:$0xff] }
 0x1bb   : > { %1705 = vmatmul.f32.gmra.mxu2 %v261_v15  ;;  %1931 = vmatmul.f32.gmra.mxu0 %v263_v38  ;;  %v1526_v41 = vadd.f32 %v1525_v4, %v1413_v34  ;;  %v989_v15 = vld [vmem:[%s8639_s1 + $0xbb0] sm:$0xff] }
 0x1bc   : > { %v1641_v28 = vpop.f32.mrf.mxu1  ;;  %2252 = vmatpush.msrb.mxu3 %v989_v15  ;;  %v322_v15 = vld [vmem:[%s5480_s10 + $0x2d8] sm:$0xff] }
 0x1bd   : > { %v6301_v62 = vadd.f32 %v1638_v6, %v1526_v41  ;;  %1818 = vmatmul.f32.gmra.mxu3 %v262_v36 }
 0x1be   : > { %v1302_v57 = vpop.f32.mrf.mxu2 }
 0x1bf   : > { %v1303_v14 = vadd.f32 %v1302_v57, %v5811_v10  ;;  %2044 = vmatmul.f32.gmra.mxu1 %v264_v55 }
 0x1c0   : > { %v1415_v2 = vpop.f32.mrf.mxu3  ;;  %v1531_v60 = vpop.f32.mrf.mxu0 }
 0x1c1   : > { %v1416_v0 = vadd.f32 %v1415_v2, %v1303_v14  ;;  %v300_v2 = vld [vmem:[%s5480_s10 + $0x228] sm:$0xff] }
 0x1c3   : > { %1708 = vmatmul.f32.gmra.mxu2 %v273_v23  ;;  %1934 = vmatmul.f32.gmra.mxu0 %v275_v56  ;;  %v1529_v16 = vadd.f32 %v1528_v8, %v1416_v0  ;;  %v288_v8 = vld [vmem:[%s5480_s10 + $0x1c8] sm:$0xff] }
 0x1c4   : > { %v1644_v30 = vpop.f32.mrf.mxu1 }
 0x1c5   : > { %v6311_v4 = vadd.f32 %v1641_v28, %v1529_v16  ;;  %1821 = vmatmul.f32.gmra.mxu3 %v274_v22  ;;  %v299_v28 = vld [vmem:[%s5480_s10 + $0x220] sm:$0xff]  ;;  %v309_v22 = vld [vmem:[%s5480_s10 + $0x270] sm:$0xff] }
 0x1c6   : > { %v1305_v10 = vpop.f32.mrf.mxu2  ;;  %v311_v16 = vld [vmem:[%s5480_s10 + $0x280] sm:$0xff] }
 0x1c7   : > { %v1306_v48 = vadd.f32 %v1305_v10, %v5822_v20  ;;  %2047 = vmatmul.f32.gmra.mxu1 %v276_v26  ;;  %v310_v26 = vld [vmem:[%s5480_s10 + $0x278] sm:$0xff] }
 0x1c8   : > { %v1418_v24 = vpop.f32.mrf.mxu3  ;;  %v1534_v59 = vpop.f32.mrf.mxu0 }
 0x1c9   : > { %v1419_v6 = vadd.f32 %v1418_v24, %v1306_v48  ;;  %v955_v48 = vld [vmem:[%s8639_s1 + $0xaa0] sm:$0xff] }
 0x1ca   : > { %2140 = vmatpush.msrb.mxu2 %v955_v48  ;;  %v345_v48 = vld [vmem:[%s5480_s10 + $0x390] sm:$0xff] }
 0x1cb   : > { %1711 = vmatmul.f32.gmra.mxu2 %v285_v63  ;;  %1937 = vmatmul.f32.gmra.mxu0 %v287_v49  ;;  %v1532_v52 = vadd.f32 %v1531_v60, %v1419_v6  ;;  %v987_v63 = vld [vmem:[%s8639_s1 + $0xba0] sm:$0xff] }
 0x1cc   : > { %v1647_v39 = vpop.f32.mrf.mxu1  ;;  %2253 = vmatpush.msrb.mxu3 %v987_v63  ;;  %v346_v63 = vld [vmem:[%s5480_s10 + $0x398] sm:$0xff] }
 0x1cd   : > { %v6321_v20 = vadd.f32 %v1644_v30, %v1532_v52  ;;  %1824 = vmatmul.f32.gmra.mxu3 %v286_v12 }
 0x1ce   : > { %v1308_v38 = vpop.f32.mrf.mxu2 }
 0x1cf   : > { %v1309_v34 = vadd.f32 %v1308_v38, %v5839_v32  ;;  %2050 = vmatmul.f32.gmra.mxu1 %v288_v8 }
 0x1d0   : > { %v1421_v36 = vpop.f32.mrf.mxu3  ;;  %v1537_v41 = vpop.f32.mrf.mxu0 }
 0x1d1   : > { %v1422_v55 = vadd.f32 %v1421_v36, %v1309_v34  ;;  %v324_v36 = vld [vmem:[%s5480_s10 + $0x2e8] sm:$0xff] }
 0x1d3   : > { %1714 = vmatmul.f32.gmra.mxu2 %v297_v35  ;;  %1940 = vmatmul.f32.gmra.mxu0 %v299_v28  ;;  %v1535_v57 = vadd.f32 %v1534_v59, %v1422_v55  ;;  %v312_v59 = vld [vmem:[%s5480_s10 + $0x288] sm:$0xff] }
 0x1d4   : > { %v1650_v14 = vpop.f32.mrf.mxu1 }
 0x1d5   : > { %v6331_v60 = vadd.f32 %v1647_v39, %v1535_v57  ;;  %1827 = vmatmul.f32.gmra.mxu3 %v298_v40  ;;  %v323_v39 = vld [vmem:[%s5480_s10 + $0x2e0] sm:$0xff]  ;;  %v333_v40 = vld [vmem:[%s5480_s10 + $0x330] sm:$0xff] }
 0x1d6   : > { %v1311_v32 = vpop.f32.mrf.mxu2  ;;  %v335_v57 = vld [vmem:[%s5480_s10 + $0x340] sm:$0xff] }
 0x1d7   : > { %v1312_v23 = vadd.f32 %v1311_v32, %v5850_v45  ;;  %2053 = vmatmul.f32.gmra.mxu1 %v300_v2  ;;  %v334_v2 = vld [vmem:[%s5480_s10 + $0x338] sm:$0xff] }
 0x1d8   : > { %v1424_v56 = vpop.f32.mrf.mxu3  ;;  %v1540_v0 = vpop.f32.mrf.mxu0 }
 0x1d9   : > { %v1425_v30 = vadd.f32 %v1424_v56, %v1312_v23  ;;  %v953_v23 = vld [vmem:[%s8639_s1 + $0xa90] sm:$0xff] }
 0x1da   : > { %2141 = vmatpush.msrb.mxu2 %v953_v23  ;;  %v369_v23 = vld [vmem:[%s5480_s10 + $0x450] sm:$0xff] }
 0x1db   : > { %1717 = vmatmul.f32.gmra.mxu2 %v309_v22  ;;  %1943 = vmatmul.f32.gmra.mxu0 %v311_v16  ;;  %v1538_v10 = vadd.f32 %v1537_v41, %v1425_v30  ;;  %v985_v22 = vld [vmem:[%s8639_s1 + $0xb90] sm:$0xff] }
 0x1dc   : > { %v1653_v24 = vpop.f32.mrf.mxu1  ;;  %2254 = vmatpush.msrb.mxu3 %v985_v22  ;;  %v370_v22 = vld [vmem:[%s5480_s10 + $0x458] sm:$0xff] }
 0x1dd   : > { %v6341_v45 = vadd.f32 %v1650_v14, %v1538_v10  ;;  %1830 = vmatmul.f32.gmra.mxu3 %v310_v26 }
 0x1de   : > { %v1314_v49 = vpop.f32.mrf.mxu2 }
 0x1df   : > { %v1315_v6 = vadd.f32 %v1314_v49, %v5867_v61  ;;  %2056 = vmatmul.f32.gmra.mxu1 %v312_v59 }
 0x1e0   : > { %v1427_v12 = vpop.f32.mrf.mxu3  ;;  %v1543_v52 = vpop.f32.mrf.mxu0 }
 0x1e1   : > { %v1428_v8 = vadd.f32 %v1427_v12, %v1315_v6  ;;  %v348_v12 = vld [vmem:[%s5480_s10 + $0x3a8] sm:$0xff] }
 0x1e3   : > { %1720 = vmatmul.f32.gmra.mxu2 %v321_v7  ;;  %1946 = vmatmul.f32.gmra.mxu0 %v323_v39  ;;  %v1541_v38 = vadd.f32 %v1540_v0, %v1428_v8  ;;  %v336_v0 = vld [vmem:[%s5480_s10 + $0x348] sm:$0xff] }
 0x1e4   : > { %v1656_v34 = vpop.f32.mrf.mxu1 }
 0x1e5   : > { %v6351_v41 = vadd.f32 %v1653_v24, %v1541_v38  ;;  %1833 = vmatmul.f32.gmra.mxu3 %v322_v15  ;;  %v347_v24 = vld [vmem:[%s5480_s10 + $0x3a0] sm:$0xff]  ;;  %v357_v15 = vld [vmem:[%s5480_s10 + $0x3f0] sm:$0xff] }
 0x1e6   : > { %v1317_v61 = vpop.f32.mrf.mxu2  ;;  %v359_v38 = vld [vmem:[%s5480_s10 + $0x400] sm:$0xff] }
 0x1e7   : > { %v1318_v35 = vadd.f32 %v1317_v61, %v5878_v11  ;;  %2059 = vmatmul.f32.gmra.mxu1 %v324_v36  ;;  %v358_v36 = vld [vmem:[%s5480_s10 + $0x3f8] sm:$0xff] }
 0x1e8   : > { %v1430_v28 = vpop.f32.mrf.mxu3  ;;  %v1546_v55 = vpop.f32.mrf.mxu0 }
 0x1e9   : > { %v1431_v14 = vadd.f32 %v1430_v28, %v1318_v35  ;;  %v951_v35 = vld [vmem:[%s8639_s1 + $0xa80] sm:$0xff] }
 0x1ea   : > { %2142 = vmatpush.msrb.mxu2 %v951_v35  ;;  %v393_v35 = vld [vmem:[%s5480_s10 + $0x510] sm:$0xff] }
 0x1eb   : > { %1723 = vmatmul.f32.gmra.mxu2 %v333_v40  ;;  %1949 = vmatmul.f32.gmra.mxu0 %v335_v57  ;;  %v1544_v32 = vadd.f32 %v1543_v52, %v1431_v14  ;;  %v983_v40 = vld [vmem:[%s8639_s1 + $0xb80] sm:$0xff] }
 0x1ec   : > { %v1659_v56 = vpop.f32.mrf.mxu1  ;;  %2255 = vmatpush.msrb.mxu3 %v983_v40  ;;  %v394_v40 = vld [vmem:[%s5480_s10 + $0x518] sm:$0xff] }
 0x1ed   : > { %v6361_v11 = vadd.f32 %v1656_v34, %v1544_v32  ;;  %1836 = vmatmul.f32.gmra.mxu3 %v334_v2 }
 0x1ee   : > { %v1320_v16 = vpop.f32.mrf.mxu2 }
 0x1ef   : > { %v1321_v30 = vadd.f32 %v1320_v16, %v5895_v27  ;;  %2062 = vmatmul.f32.gmra.mxu1 %v336_v0 }
 0x1f0   : > { %v1433_v26 = vpop.f32.mrf.mxu3  ;;  %v1549_v10 = vpop.f32.mrf.mxu0 }
 0x1f1   : > { %v1434_v59 = vadd.f32 %v1433_v26, %v1321_v30  ;;  %v372_v26 = vld [vmem:[%s5480_s10 + $0x468] sm:$0xff] }
 0x1f3   : > { %1726 = vmatmul.f32.gmra.mxu2 %v345_v48  ;;  %1952 = vmatmul.f32.gmra.mxu0 %v347_v24  ;;  %v1547_v49 = vadd.f32 %v1546_v55, %v1434_v59  ;;  %v360_v55 = vld [vmem:[%s5480_s10 + $0x408] sm:$0xff] }
 0x1f4   : > { %v1662_v6 = vpop.f32.mrf.mxu1 }
 0x1f5   : > { %v6371_v52 = vadd.f32 %v1659_v56, %v1547_v49  ;;  %1839 = vmatmul.f32.gmra.mxu3 %v346_v63  ;;  %v371_v56 = vld [vmem:[%s5480_s10 + $0x460] sm:$0xff]  ;;  %v381_v63 = vld [vmem:[%s5480_s10 + $0x4b0] sm:$0xff] }
 0x1f6   : > { %v1323_v27 = vpop.f32.mrf.mxu2  ;;  %v383_v49 = vld [vmem:[%s5480_s10 + $0x4c0] sm:$0xff] }
 0x1f7   : > { %v1324_v7 = vadd.f32 %v1323_v27, %v5906_v44  ;;  %2065 = vmatmul.f32.gmra.mxu1 %v348_v12  ;;  %v382_v12 = vld [vmem:[%s5480_s10 + $0x4b8] sm:$0xff] }
 0x1f8   : > { %v1436_v39 = vpop.f32.mrf.mxu3  ;;  %v1552_v8 = vpop.f32.mrf.mxu0 }
 0x1f9   : > { %v1437_v34 = vadd.f32 %v1436_v39, %v1324_v7  ;;  %v949_v7 = vld [vmem:[%s8639_s1 + $0xa70] sm:$0xff] }
 0x1fa   : > { %2143 = vmatpush.msrb.mxu2 %v949_v7 }
 0x1fb   : > { %1729 = vmatmul.f32.gmra.mxu2 %v357_v15  ;;  %1955 = vmatmul.f32.gmra.mxu0 %v359_v38  ;;  %v1550_v61 = vadd.f32 %v1549_v10, %v1437_v34  ;;  %v981_v15 = vld [vmem:[%s8639_s1 + $0xb70] sm:$0xff] }
 0x1fc   : > { %v1665_v28 = vpop.f32.mrf.mxu1  ;;  %2256 = vmatpush.msrb.mxu3 %v981_v15  ;;  %v419_v15 = vld [vmem:[%s5480_s10 + $0x5e0] sm:$0xff] }
 0x1fd   : > { %v6381_v44 = vadd.f32 %v1662_v6, %v1550_v61  ;;  %1842 = vmatmul.f32.gmra.mxu3 %v358_v36 }
 0x1fe   : > { %v1326_v57 = vpop.f32.mrf.mxu2 }
 0x1ff   : > { %v1327_v14 = vadd.f32 %v1326_v57, %v5923_v3  ;;  %2068 = vmatmul.f32.gmra.mxu1 %v360_v55 }
 0x200   : > { %v1439_v2 = vpop.f32.mrf.mxu3  ;;  %v1555_v32 = vpop.f32.mrf.mxu0 }
 0x201   : > { %v1440_v0 = vadd.f32 %v1439_v2, %v1327_v14  ;;  %v646_v14 = vld [vmem:[%s8639_s1 + $0xf8] sm:$0xff] }
 0x202   : > { %2361 = vmatpush.msrb.mxu0 %v646_v14 }
 0x203   : > { %1732 = vmatmul.f32.gmra.mxu2 %v369_v23  ;;  %1958 = vmatmul.f32.gmra.mxu0 %v371_v56  ;;  %v1553_v16 = vadd.f32 %v1552_v8, %v1440_v0  ;;  %v384_v8 = vld [vmem:[%s5480_s10 + $0x4c8] sm:$0xff]  ;;  %v678_v23 = vld [vmem:[%s8639_s1 + $0x1f8] sm:$0xff] }
 0x204   : > { %v1668_v30 = vpop.f32.mrf.mxu1  ;;  %2474 = vmatpush.msrb.mxu1 %v678_v23  ;;  %v431_v23 = vld [vmem:[%s5480_s10 + $0x640] sm:$0xff] }
 0x205   : > { %v6391_v10 = vadd.f32 %v1665_v28, %v1553_v16  ;;  %1845 = vmatmul.f32.gmra.mxu3 %v370_v22  ;;  %v395_v28 = vld [vmem:[%s5480_s10 + $0x520] sm:$0xff] }
 0x206   : > { %v1329_v3 = vpop.f32.mrf.mxu2 }
 0x207   : > { %v1330_v48 = vadd.f32 %v1329_v3, %v5934_v21  ;;  %2071 = vmatmul.f32.gmra.mxu1 %v372_v26  ;;  %v407_v26 = vld [vmem:[%s5480_s10 + $0x580] sm:$0xff] }
 0x208   : > { %v1442_v24 = vpop.f32.mrf.mxu3  ;;  %v1558_v59 = vpop.f32.mrf.mxu0 }
 0x209   : > { %v1443_v6 = vadd.f32 %v1442_v24, %v1330_v48  ;;  %v406_v48 = vld [vmem:[%s5480_s10 + $0x578] sm:$0xff] }
 0x20b   : > { %1735 = vmatmul.f32.gmra.mxu2 %v381_v63  ;;  %1961 = vmatmul.f32.gmra.mxu0 %v383_v49  ;;  %v1556_v27 = vadd.f32 %v1555_v32, %v1443_v6  ;;  %v396_v32 = vld [vmem:[%s5480_s10 + $0x528] sm:$0xff]  ;;  %v979_v6 = vld [vmem:[%s8639_s1 + $0xb60] sm:$0xff] }
 0x20c   : > { %v1671_v39 = vpop.f32.mrf.mxu1  ;;  %v408_v49 = vld [vmem:[%s5480_s10 + $0x588] sm:$0xff]  ;;  %2257 = vmatpush.msrb.mxu3 %v979_v6  ;;  %v443_v6 = vld [vmem:[%s5480_s10 + $0x6a0] sm:$0xff] }
 0x20d   : > { %v6401_v21 = vadd.f32 %v1668_v30, %v1556_v27  ;;  %1848 = vmatmul.f32.gmra.mxu3 %v382_v12  ;;  %v405_v30 = vld [vmem:[%s5480_s10 + $0x570] sm:$0xff] }
 0x20e   : > { %v1332_v38 = vpop.f32.mrf.mxu2 }
 0x20f   : > { %v1333_v34 = vadd.f32 %v1332_v38, %v5951_v47  ;;  %2074 = vmatmul.f32.gmra.mxu1 %v384_v8  ;;  %v417_v8 = vld [vmem:[%s5480_s10 + $0x5d0] sm:$0xff] }
 0x210   : > { %v1445_v36 = vpop.f32.mrf.mxu3  ;;  %v1561_v61 = vpop.f32.mrf.mxu0 }
 0x211   : > { %v1446_v55 = vadd.f32 %v1445_v36, %v1333_v34  ;;  %v418_v34 = vld [vmem:[%s5480_s10 + $0x5d8] sm:$0xff] }
 0x213   : > { %1738 = vmatmul.f32.gmra.mxu2 %v393_v35  ;;  %1964 = vmatmul.f32.gmra.mxu0 %v395_v28  ;;  %v1559_v57 = vadd.f32 %v1558_v59, %v1446_v55  ;;  %v947_v59 = vld [vmem:[%s8639_s1 + $0xa60] sm:$0xff]  ;;  %v420_v28 = vld [vmem:[%s5480_s10 + $0x5e8] sm:$0xff] }
 0x214   : > { %v1674_v2 = vpop.f32.mrf.mxu1  ;;  %2144 = vmatpush.msrb.mxu2 %v947_v59  ;;  %v676_v55 = vld [vmem:[%s8639_s1 + $0x1e8] sm:$0xff] }
 0x215   : > { %v6414_v47 = vadd.f32 %v1671_v39, %v1559_v57  ;;  %1851 = vmatmul.f32.gmra.mxu3 %v394_v40  ;;  %2475 = vmatpush.msrb.mxu1 %v676_v55  ;;  %v455_v55 = vld [vmem:[%s5480_s10 + $0x700] sm:$0xff] }
 0x216   : > { %v1335_v56 = vpop.f32.mrf.mxu2 }
 0x217   : > { %v1336_v0 = vadd.f32 %v1335_v56, %v5968_v17  ;;  %2077 = vmatmul.f32.gmra.mxu1 %v396_v32  ;;  %v429_v32 = vld [vmem:[%s5480_s10 + $0x630] sm:$0xff] }
 0x218   : > { %v1448_v22 = vpop.f32.mrf.mxu3  ;;  %v1564_v16 = vpop.f32.mrf.mxu0 }
 0x219   : > { %v1449_v3 = vadd.f32 %v1448_v22, %v1336_v0  ;;  %v430_v0 = vld [vmem:[%s5480_s10 + $0x638] sm:$0xff] }
 0x21b   : > { %1741 = vmatmul.f32.gmra.mxu2 %v405_v30  ;;  %1967 = vmatmul.f32.gmra.mxu0 %v407_v26  ;;  %v1562_v24 = vadd.f32 %v1561_v61, %v1449_v3  ;;  %v644_v61 = vld [vmem:[%s8639_s1 + $0xe8] sm:$0xff]  ;;  %v977_v3 = vld [vmem:[%s8639_s1 + $0xb50] sm:$0xff] }
 0x21c   : > { %v1677_v63 = vpop.f32.mrf.mxu1  ;;  %2362 = vmatpush.msrb.mxu0 %v644_v61  ;;  %v432_v26 = vld [vmem:[%s5480_s10 + $0x648] sm:$0xff]  ;;  %2258 = vmatpush.msrb.mxu3 %v977_v3  ;;  %v467_v3 = vld [vmem:[%s5480_s10 + $0x760] sm:$0xff] }
 0x21d   : > { %v6427_v17 = vadd.f32 %v1674_v2, %v1562_v24  ;;  %1854 = vmatmul.f32.gmra.mxu3 %v406_v48 }
 0x21e   : > { %v1338_v12 = vpop.f32.mrf.mxu2 }
 0x21f   : > { %v1339_v27 = vadd.f32 %v1338_v12, %v5985_v51  ;;  %2080 = vmatmul.f32.gmra.mxu1 %v408_v49  ;;  %v441_v49 = vld [vmem:[%s5480_s10 + $0x690] sm:$0xff] }
 0x220   : > { %v1451_v7 = vpop.f32.mrf.mxu3  ;;  %v1567_v39 = vpop.f32.mrf.mxu0 }
 0x221   : > { %v1452_v38 = vadd.f32 %v1451_v7, %v1339_v27  ;;  %v442_v27 = vld [vmem:[%s5480_s10 + $0x698] sm:$0xff] }
 0x223   : > { %1744 = vmatmul.f32.gmra.mxu2 %v417_v8  ;;  %1970 = vmatmul.f32.gmra.mxu0 %v419_v15  ;;  %v1565_v36 = vadd.f32 %v1564_v16, %v1452_v38  ;;  %v945_v16 = vld [vmem:[%s8639_s1 + $0xa50] sm:$0xff]  ;;  %v444_v15 = vld [vmem:[%s5480_s10 + $0x6a8] sm:$0xff]  ;;  %v674_v38 = vld [vmem:[%s8639_s1 + $0x1d8] sm:$0xff] }
 0x224   : > { %v1680_v35 = vpop.f32.mrf.mxu1  ;;  %2145 = vmatpush.msrb.mxu2 %v945_v16  ;;  %2476 = vmatpush.msrb.mxu1 %v674_v38  ;;  %v479_v38 = vld [vmem:[%s5480_s10 + $0x7c0] sm:$0xff] }
 0x225   : > { %v6440_v51 = vadd.f32 %v1677_v63, %v1565_v36  ;;  %1857 = vmatmul.f32.gmra.mxu3 %v418_v34 }
 0x226   : > { %v1341_v40 = vpop.f32.mrf.mxu2 }
 0x227   : > { %v1342_v57 = vadd.f32 %v1341_v40, %v6002_v31  ;;  %2083 = vmatmul.f32.gmra.mxu1 %v420_v28  ;;  %v453_v28 = vld [vmem:[%s5480_s10 + $0x6f0] sm:$0xff] }
 0x228   : > { %v1454_v14 = vpop.f32.mrf.mxu3  ;;  %v1926_v2 = vpop.f32.mrf.mxu0 }
 0x229   : > { %v1455_v56 = vadd.f32 %v1454_v14, %v1342_v57  ;;  %v454_v57 = vld [vmem:[%s5480_s10 + $0x6f8] sm:$0xff] }
 0x22b   : > { %1747 = vmatmul.f32.gmra.mxu2 %v429_v32  ;;  %1973 = vmatmul.f32.gmra.mxu0 %v431_v23  ;;  %v1568_v22 = vadd.f32 %v1567_v39, %v1455_v56  ;;  %v642_v39 = vld [vmem:[%s8639_s1 + $0xd8] sm:$0xff]  ;;  %v456_v23 = vld [vmem:[%s5480_s10 + $0x708] sm:$0xff]  ;;  %v975_v56 = vld [vmem:[%s8639_s1 + $0xb40] sm:$0xff] }
 0x22c   : > { %v2039_v30 = vpop.f32.mrf.mxu1  ;;  %2363 = vmatpush.msrb.mxu0 %v642_v39  ;;  %2259 = vmatpush.msrb.mxu3 %v975_v56  ;;  %v491_v56 = vld [vmem:[%s5480_s10 + $0x820] sm:$0xff] }
 0x22d   : > { %v6453_v31 = vadd.f32 %v1680_v35, %v1568_v22  ;;  %1860 = vmatmul.f32.gmra.mxu3 %v430_v0 }
 0x22e   : > { %v1700_v48 = vpop.f32.mrf.mxu2 }
 0x22f   : > { %v1701_v24 = vadd.f32 %v1700_v48, %v6023_v46  ;;  %2086 = vmatmul.f32.gmra.mxu1 %v432_v26  ;;  %v465_v26 = vld [vmem:[%s5480_s10 + $0x750] sm:$0xff] }
 0x230   : > { %v1813_v59 = vpop.f32.mrf.mxu3  ;;  %v1929_v63 = vpop.f32.mrf.mxu0 }
 0x231   : > { %v1814_v12 = vadd.f32 %v1813_v59, %v1701_v24  ;;  %v466_v24 = vld [vmem:[%s5480_s10 + $0x758] sm:$0xff] }
 0x233   : > { %1750 = vmatmul.f32.gmra.mxu2 %v441_v49  ;;  %1976 = vmatmul.f32.gmra.mxu0 %v443_v6  ;;  %v1927_v7 = vadd.f32 %v1926_v2, %v1814_v12  ;;  %v943_v2 = vld [vmem:[%s8639_s1 + $0xa40] sm:$0xff]  ;;  %v468_v6 = vld [vmem:[%s5480_s10 + $0x768] sm:$0xff] }
 0x234   : > { %v2042_v8 = vpop.f32.mrf.mxu1  ;;  %2146 = vmatpush.msrb.mxu2 %v943_v2  ;;  %v672_v12 = vld [vmem:[%s8639_s1 + $0x1c8] sm:$0xff] }
 0x235   : > { %v6466_v46 = vadd.f32 %v2039_v30, %v1927_v7  ;;  %1863 = vmatmul.f32.gmra.mxu3 %v442_v27  ;;  %2477 = vmatpush.msrb.mxu1 %v672_v12  ;;  %v503_v12 = vld [vmem:[%s5480_s10 + $0x880] sm:$0xff] }
 0x236   : > { %v1703_v34 = vpop.f32.mrf.mxu2 }
 0x237   : > { %v1704_v36 = vadd.f32 %v1703_v34, %v6038_v37  ;;  %2089 = vmatmul.f32.gmra.mxu1 %v444_v15  ;;  %v477_v15 = vld [vmem:[%s5480_s10 + $0x7b0] sm:$0xff] }
 0x238   : > { %v1816_v61 = vpop.f32.mrf.mxu3  ;;  %v1932_v35 = vpop.f32.mrf.mxu0 }
 0x239   : > { %v1817_v40 = vadd.f32 %v1816_v61, %v1704_v36  ;;  %v478_v36 = vld [vmem:[%s5480_s10 + $0x7b8] sm:$0xff] }
 0x23b   : > { %1753 = vmatmul.f32.gmra.mxu2 %v453_v28  ;;  %1979 = vmatmul.f32.gmra.mxu0 %v455_v55  ;;  %v1930_v14 = vadd.f32 %v1929_v63, %v1817_v40  ;;  %v640_v63 = vld [vmem:[%s8639_s1 + $0xc8] sm:$0xff]  ;;  %v973_v40 = vld [vmem:[%s8639_s1 + $0xb30] sm:$0xff] }
 0x23c   : > { %v2045_v32 = vpop.f32.mrf.mxu1  ;;  %2364 = vmatpush.msrb.mxu0 %v640_v63  ;;  %v480_v55 = vld [vmem:[%s5480_s10 + $0x7c8] sm:$0xff]  ;;  %2260 = vmatpush.msrb.mxu3 %v973_v40  ;;  %v515_v40 = vld [vmem:[%s5480_s10 + $0x8e0] sm:$0xff] }
 0x23d   : > { %v6479_v37 = vadd.f32 %v2042_v8, %v1930_v14  ;;  %1866 = vmatmul.f32.gmra.mxu3 %v454_v57 }
 0x23e   : > { %v1706_v0 = vpop.f32.mrf.mxu2 }
 0x23f   : > { %v1707_v22 = vadd.f32 %v1706_v0, %v6053_v25  ;;  %2092 = vmatmul.f32.gmra.mxu1 %v456_v23  ;;  %v489_v23 = vld [vmem:[%s5480_s10 + $0x810] sm:$0xff] }
 0x240   : > { %v1819_v16 = vpop.f32.mrf.mxu3  ;;  %v1935_v30 = vpop.f32.mrf.mxu0 }
 0x241   : > { %v1820_v48 = vadd.f32 %v1819_v16, %v1707_v22  ;;  %v490_v22 = vld [vmem:[%s5480_s10 + $0x818] sm:$0xff] }
 0x243   : > { %1756 = vmatmul.f32.gmra.mxu2 %v465_v26  ;;  %1982 = vmatmul.f32.gmra.mxu0 %v467_v3  ;;  %v1933_v59 = vadd.f32 %v1932_v35, %v1820_v48  ;;  %v941_v35 = vld [vmem:[%s8639_s1 + $0xa30] sm:$0xff]  ;;  %v492_v3 = vld [vmem:[%s5480_s10 + $0x828] sm:$0xff]  ;;  %v670_v48 = vld [vmem:[%s8639_s1 + $0x1b8] sm:$0xff] }
 0x244   : > { %v2048_v49 = vpop.f32.mrf.mxu1  ;;  %2147 = vmatpush.msrb.mxu2 %v941_v35  ;;  %2478 = vmatpush.msrb.mxu1 %v670_v48  ;;  %v527_v48 = vld [vmem:[%s5480_s10 + $0x940] sm:$0xff] }
 0x245   : > { %v6492_v25 = vadd.f32 %v2045_v32, %v1933_v59  ;;  %1869 = vmatmul.f32.gmra.mxu3 %v466_v24 }
 0x246   : > { %v1709_v27 = vpop.f32.mrf.mxu2 }
 0x247   : > { %v1710_v7 = vadd.f32 %v1709_v27, %v6068_v9  ;;  %2095 = vmatmul.f32.gmra.mxu1 %v468_v6  ;;  %v501_v6 = vld [vmem:[%s5480_s10 + $0x870] sm:$0xff] }
 0x248   : > { %v1822_v39 = vpop.f32.mrf.mxu3  ;;  %v1938_v8 = vpop.f32.mrf.mxu0 }
 0x249   : > { %v1823_v34 = vadd.f32 %v1822_v39, %v1710_v7  ;;  %v502_v7 = vld [vmem:[%s5480_s10 + $0x878] sm:$0xff] }
 0x24b   : > { %1759 = vmatmul.f32.gmra.mxu2 %v477_v15  ;;  %1985 = vmatmul.f32.gmra.mxu0 %v479_v38  ;;  %v1936_v61 = vadd.f32 %v1935_v30, %v1823_v34  ;;  %v638_v30 = vld [vmem:[%s8639_s1 + $0xb8] sm:$0xff]  ;;  %v504_v38 = vld [vmem:[%s5480_s10 + $0x888] sm:$0xff]  ;;  %v971_v34 = vld [vmem:[%s8639_s1 + $0xb20] sm:$0xff] }
 0x24c   : > { %v2051_v28 = vpop.f32.mrf.mxu1  ;;  %2365 = vmatpush.msrb.mxu0 %v638_v30  ;;  %2261 = vmatpush.msrb.mxu3 %v971_v34  ;;  %v539_v34 = vld [vmem:[%s5480_s10 + $0x9a0] sm:$0xff] }
 0x24d   : > { %v6505_v9 = vadd.f32 %v2048_v49, %v1936_v61  ;;  %1872 = vmatmul.f32.gmra.mxu3 %v478_v36 }
 0x24e   : > { %v1712_v57 = vpop.f32.mrf.mxu2 }
 0x24f   : > { %v1713_v14 = vadd.f32 %v1712_v57, %v6083_v58  ;;  %2098 = vmatmul.f32.gmra.mxu1 %v480_v55  ;;  %v513_v55 = vld [vmem:[%s5480_s10 + $0x8d0] sm:$0xff] }
 0x250   : > { %v1825_v2 = vpop.f32.mrf.mxu3  ;;  %v1941_v32 = vpop.f32.mrf.mxu0 }
 0x251   : > { %v1826_v0 = vadd.f32 %v1825_v2, %v1713_v14  ;;  %v514_v14 = vld [vmem:[%s5480_s10 + $0x8d8] sm:$0xff] }
 0x253   : > { %1762 = vmatmul.f32.gmra.mxu2 %v489_v23  ;;  %1988 = vmatmul.f32.gmra.mxu0 %v491_v56  ;;  %v1939_v16 = vadd.f32 %v1938_v8, %v1826_v0  ;;  %v939_v8 = vld [vmem:[%s8639_s1 + $0xa20] sm:$0xff]  ;;  %v516_v56 = vld [vmem:[%s5480_s10 + $0x8e8] sm:$0xff] }
 0x254   : > { %v2054_v26 = vpop.f32.mrf.mxu1  ;;  %2148 = vmatpush.msrb.mxu2 %v939_v8  ;;  %v668_v0 = vld [vmem:[%s8639_s1 + $0x1a8] sm:$0xff] }
 0x255   : > { %v6518_v58 = vadd.f32 %v2051_v28, %v1939_v16  ;;  %1875 = vmatmul.f32.gmra.mxu3 %v490_v22  ;;  %2479 = vmatpush.msrb.mxu1 %v668_v0  ;;  %v551_v0 = vld [vmem:[%s5480_s10 + $0xa00] sm:$0xff] }
 0x256   : > { %v1715_v24 = vpop.f32.mrf.mxu2 }
 0x257   : > { %v1716_v59 = vadd.f32 %v1715_v24, %v6098_v29  ;;  %2101 = vmatmul.f32.gmra.mxu1 %v492_v3  ;;  %v525_v3 = vld [vmem:[%s5480_s10 + $0x930] sm:$0xff] }
 0x258   : > { %v1828_v63 = vpop.f32.mrf.mxu3  ;;  %v1944_v49 = vpop.f32.mrf.mxu0 }
 0x259   : > { %v1829_v27 = vadd.f32 %v1828_v63, %v1716_v59  ;;  %v526_v59 = vld [vmem:[%s5480_s10 + $0x938] sm:$0xff] }
 0x25b   : > { %1765 = vmatmul.f32.gmra.mxu2 %v501_v6  ;;  %1991 = vmatmul.f32.gmra.mxu0 %v503_v12  ;;  %v1942_v39 = vadd.f32 %v1941_v32, %v1829_v27  ;;  %v636_v32 = vld [vmem:[%s8639_s1 + $0xa8] sm:$0xff]  ;;  %v969_v27 = vld [vmem:[%s8639_s1 + $0xb10] sm:$0xff] }
 0x25c   : > { %v2057_v15 = vpop.f32.mrf.mxu1  ;;  %2366 = vmatpush.msrb.mxu0 %v636_v32  ;;  %v528_v12 = vld [vmem:[%s5480_s10 + $0x948] sm:$0xff]  ;;  %2262 = vmatpush.msrb.mxu3 %v969_v27  ;;  %v626_v27 = vld [vmem:[%s8639_s1 + $0x58] sm:$0xff] }
 0x25d   : > { %v6531_v29 = vadd.f32 %v2054_v26, %v1942_v39  ;;  %1878 = vmatmul.f32.gmra.mxu3 %v502_v7 }
 0x25e   : > { %v1718_v36 = vpop.f32.mrf.mxu2 }
 0x25f   : > { %v1719_v61 = vadd.f32 %v1718_v36, %v6113_v13  ;;  %2104 = vmatmul.f32.gmra.mxu1 %v504_v38  ;;  %v537_v38 = vld [vmem:[%s5480_s10 + $0x990] sm:$0xff] }
 0x260   : > { %v1831_v35 = vpop.f32.mrf.mxu3  ;;  %v1947_v28 = vpop.f32.mrf.mxu0 }
 0x261   : > { %v1832_v57 = vadd.f32 %v1831_v35, %v1719_v61  ;;  %v538_v61 = vld [vmem:[%s5480_s10 + $0x998] sm:$0xff] }
 0x263   : > { %1768 = vmatmul.f32.gmra.mxu2 %v513_v55  ;;  %1994 = vmatmul.f32.gmra.mxu0 %v515_v40  ;;  %v1945_v2 = vadd.f32 %v1944_v49, %v1832_v57  ;;  %v937_v49 = vld [vmem:[%s8639_s1 + $0xa10] sm:$0xff]  ;;  %v540_v40 = vld [vmem:[%s5480_s10 + $0x9a8] sm:$0xff]  ;;  %v666_v57 = vld [vmem:[%s8639_s1 + $0x198] sm:$0xff] }
 0x264   : > { %v2060_v23 = vpop.f32.mrf.mxu1  ;;  %2149 = vmatpush.msrb.mxu2 %v937_v49  ;;  %2480 = vmatpush.msrb.mxu1 %v666_v57  ;;  %v628_v49 = vld [vmem:[%s8639_s1 + $0x68] sm:$0xff] }
 0x265   : > { %v6544_v13 = vadd.f32 %v2057_v15, %v1945_v2  ;;  %1881 = vmatmul.f32.gmra.mxu3 %v514_v14  ;;  %v620_v57 = vld [vmem:[%s8639_s1 + $0x28] sm:$0xff] }
 0x266   : > { %v1721_v22 = vpop.f32.mrf.mxu2 }
 0x267   : > { %v1722_v16 = vadd.f32 %v1721_v22, %v6128_v53  ;;  %2107 = vmatmul.f32.gmra.mxu1 %v516_v56  ;;  %v549_v56 = vld [vmem:[%s5480_s10 + $0x9f0] sm:$0xff] }
 0x268   : > { %v1834_v30 = vpop.f32.mrf.mxu3  ;;  %v1950_v26 = vpop.f32.mrf.mxu0 }
 0x269   : > { %v1835_v24 = vadd.f32 %v1834_v30, %v1722_v16  ;;  %v632_v16 = vld [vmem:[%s8639_s1 + $0x88] sm:$0xff]  ;;  %v550_v30 = vld [vmem:[%s5480_s10 + $0x9f8] sm:$0xff] }
 0x26b   : > { %1771 = vmatmul.f32.gmra.mxu2 %v525_v3  ;;  %1997 = vmatmul.f32.gmra.mxu0 %v527_v48  ;;  %v1948_v63 = vadd.f32 %v1947_v28, %v1835_v24  ;;  %v634_v28 = vld [vmem:[%s8639_s1 + $0x98] sm:$0xff]  ;;  %v552_v24 = vld [vmem:[%s5480_s10 + $0xa08] sm:$0xff] }
 0x26c   : > { %v2063_v6 = vpop.f32.mrf.mxu1  ;;  %2367 = vmatpush.msrb.mxu0 %v634_v28  ;;  %v630_v3 = vld [vmem:[%s8639_s1 + $0x78] sm:$0xff]  ;;  %v564_v28 = vld [vmem:[%s5480_s10 + $0xa68] sm:$0xff] }
 0x26d   : > { %v6557_v53 = vadd.f32 %v2060_v23, %v1948_v63  ;;  %1884 = vmatmul.f32.gmra.mxu3 %v526_v59  ;;  %v967_v63 = vld [vmem:[%s8639_s1 + $0xb00] sm:$0xff] }
 0x26e   : > { %v1724_v7 = vpop.f32.mrf.mxu2  ;;  %2368 = vmatpush.msrb.mxu0 %v632_v16  ;;  %2263 = vmatpush.msrb.mxu3 %v967_v63  ;;  %v575_v16 = vld [vmem:[%s5480_s10 + $0xac0] sm:$0xff] }
 0x26f   : > { %v1725_v39 = vadd.f32 %v1724_v7, %v6143_v42  ;;  %2110 = vmatmul.f32.gmra.mxu1 %v528_v12 }
 0x270   : > { %v1837_v8 = vpop.f32.mrf.mxu3  ;;  %v1953_v15 = vpop.f32.mrf.mxu0  ;;  %2369 = vmatpush.msrb.mxu0 %v630_v3 }
 0x271   : > { %v1838_v36 = vadd.f32 %v1837_v8, %v1725_v39  ;;  %v561_v8 = vld [vmem:[%s5480_s10 + $0xa50] sm:$0xff] }
 0x272   : > { %2370 = vmatpush.msrb.mxu0 %v628_v49  ;;  %v576_v49 = vld [vmem:[%s5480_s10 + $0xac8] sm:$0xff] }
 0x273   : > { %1774 = vmatmul.f32.gmra.mxu2 %v537_v38  ;;  %2000 = vmatmul.f32.gmra.mxu0 %v539_v34  ;;  %v1951_v35 = vadd.f32 %v1950_v26, %v1838_v36  ;;  %v624_v34 = vld [vmem:[%s8639_s1 + $0x48] sm:$0xff]  ;;  %v562_v36 = vld [vmem:[%s5480_s10 + $0xa58] sm:$0xff] }
 0x274   : > { %v2066_v55 = vpop.f32.mrf.mxu1  ;;  %2371 = vmatpush.msrb.mxu0 %v626_v27  ;;  %v656_v27 = vld [vmem:[%s8639_s1 + $0x148] sm:$0xff] }
 0x275   : > { %v6570_v42 = vadd.f32 %v2063_v6, %v1951_v35  ;;  %1887 = vmatmul.f32.gmra.mxu3 %v538_v61  ;;  %v622_v61 = vld [vmem:[%s8639_s1 + $0x38] sm:$0xff] }
 0x276   : > { %v1727_v14 = vpop.f32.mrf.mxu2  ;;  %2372 = vmatpush.msrb.mxu0 %v624_v34  ;;  %v585_v34 = vld [vmem:[%s5480_s10 + $0xb10] sm:$0xff] }
 0x277   : > { %v1728_v2 = vadd.f32 %v1727_v14, %v6164_v43  ;;  %2113 = vmatmul.f32.gmra.mxu1 %v540_v40  ;;  %v935_v43 = vld [vmem:[%s8639_s1 + $0xa00] sm:$0xff]  ;;  %v664_v40 = vld [vmem:[%s8639_s1 + $0x188] sm:$0xff] }
 0x278   : > { %v1840_v32 = vpop.f32.mrf.mxu3  ;;  %v1956_v23 = vpop.f32.mrf.mxu0  ;;  %2150 = vmatpush.msrb.mxu2 %v935_v43  ;;  %2373 = vmatpush.msrb.mxu0 %v622_v61  ;;  %v574_v43 = vld [vmem:[%s5480_s10 + $0xab8] sm:$0xff]  ;;  %v652_v61 = vld [vmem:[%s8639_s1 + $0x128] sm:$0xff] }
 0x279   : > { %v1841_v22 = vadd.f32 %v1840_v32, %v1728_v2  ;;  %2481 = vmatpush.msrb.mxu1 %v664_v40  ;;  %v618_v32 = vld [vmem:[%s8639_s1 + $0x18] sm:$0xff] }
 0x27a   : > { %2374 = vmatpush.msrb.mxu0 %v620_v57  ;;  %v588_v57 = vld [vmem:[%s5480_s10 + $0xb28] sm:$0xff] }
 0x27b   : > { %1777 = vmatmul.f32.gmra.mxu2 %v549_v56  ;;  %2003 = vmatmul.f32.gmra.mxu0 %v551_v0  ;;  %v1954_v26 = vadd.f32 %v1953_v15, %v1841_v22  ;;  %v563_v15 = vld [vmem:[%s5480_s10 + $0xa60] sm:$0xff]  ;;  %v573_v22 = vld [vmem:[%s5480_s10 + $0xab0] sm:$0xff] }
 0x27c   : > { %v2069_v48 = vpop.f32.mrf.mxu1  ;;  %2375 = vmatpush.msrb.mxu0 %v618_v32 }
 0x27d   : > { %v6589_v59 = vadd.f32 %v2066_v55, %v1954_v26  ;;  %1890 = vmatmul.f32.gmra.mxu3 %v550_v30  ;;  %v660_v26 = vld [vmem:[%s8639_s1 + $0x168] sm:$0xff] }
 0x27e   : > { %v1730_v6 = vpop.f32.mrf.mxu2 }
 0x27f   : > { %v1731_v12 = vadd.f32 %v1730_v6, %v6188_v1  ;;  %2116 = vmatmul.f32.gmra.mxu1 %v552_v24  ;;  %v658_v24 = vld [vmem:[%s8639_s1 + $0x158] sm:$0xff] }
 0x280   : > { %v1843_v7 = vpop.f32.mrf.mxu3  ;;  %v1959_v39 = vpop.f32.mrf.mxu0 }
 0x281   : > { %v1844_v38 = vadd.f32 %v1843_v7, %v1731_v12  ;;  %v742_v12 = vld [vmem:[%s8639_s1 + $0x3f8] sm:$0xff] }
 0x282   : > { %2700 = vmatpush.msra.mxu3 %v742_v12 }
 0x283   : > { %1780 = vmatmul.f32.gmra.mxu2 %v561_v8  ;;  %2006 = vmatmul.f32.gmra.mxu0 %v563_v15  ;;  %v1957_v1 = vadd.f32 %v1956_v23, %v1844_v38  ;;  %v662_v23 = vld [vmem:[%s8639_s1 + $0x178] sm:$0xff] }
 0x284   : > { %v2072_v35 = vpop.f32.mrf.mxu1  ;;  %2482 = vmatpush.msrb.mxu1 %v662_v23  ;;  %v654_v8 = vld [vmem:[%s8639_s1 + $0x138] sm:$0xff] }
 0x285   : > { %v6611_v55 = vadd.f32 %v2069_v48, %v1957_v1  ;;  %1893 = vmatmul.f32.gmra.mxu3 %v562_v36  ;;  %v710_v48 = vld [vmem:[%s8639_s1 + $0x2f8] sm:$0xff]  ;;  %v587_v36 = vld [vmem:[%s5480_s10 + $0xb20] sm:$0xff] }
 0x286   : > { %v1733_v14 = vpop.f32.mrf.mxu2  ;;  %2483 = vmatpush.msrb.mxu1 %v660_v26  ;;  %2587 = vmatpush.msra.mxu2 %v710_v48  ;;  %v600_v48 = vld [vmem:[%s5480_s10 + $0xb88] sm:$0xff] }
 0x287   : > { %v1734_v2 = vadd.f32 %v1733_v14, %v6221_v33  ;;  %2119 = vmatmul.f32.gmra.mxu1 %v564_v28  ;;  %v616_v33 = vld [vmem:[%s8639_s1 + $0x8] sm:$0xff]  ;;  %v650_v28 = vld [vmem:[%s8639_s1 + $0x118] sm:$0xff] }
 0x288   : > { %v1846_v56 = vpop.f32.mrf.mxu3  ;;  %v1962_v0 = vpop.f32.mrf.mxu0  ;;  %2376 = vmatpush.msrb.mxu0 %v616_v33  ;;  %2484 = vmatpush.msrb.mxu1 %v658_v24  ;;  %v598_v33 = vld [vmem:[%s5480_s10 + $0xb78] sm:$0xff]  ;;  %v740_v24 = vld [vmem:[%s8639_s1 + $0x3e8] sm:$0xff] }
 0x289   : > { %v1847_v30 = vadd.f32 %v1846_v56, %v1734_v2  ;;  %v648_v2 = vld [vmem:[%s8639_s1 + $0x108] sm:$0xff]  ;;  %2701 = vmatpush.msra.mxu3 %v740_v24  ;;  %v4955_v24 = vld [vmem:[%s5480_s10 + $0x60] sm:$0xff] }
 0x28a   : > { %2485 = vmatpush.msrb.mxu1 %v656_v27 }
 0x28b   : > { %1783 = vmatmul.f32.gmra.mxu2 %v573_v22  ;;  %2009 = vmatmul.f32.gmra.mxu0 %v575_v16  ;;  %v1960_v3 = vadd.f32 %v1959_v39, %v1847_v30  ;;  %v597_v22 = vld [vmem:[%s5480_s10 + $0xb70] sm:$0xff]  ;;  %v599_v16 = vld [vmem:[%s5480_s10 + $0xb80] sm:$0xff] }
 0x28c   : > { %v2075_v63 = vpop.f32.mrf.mxu1  ;;  %2486 = vmatpush.msrb.mxu1 %v654_v8 }
 0x28d   : > { %v6642_v6 = vadd.f32 %v2072_v35, %v1960_v3  ;;  %1896 = vmatmul.f32.gmra.mxu3 %v574_v43  ;;  %v586_v35 = vld [vmem:[%s5480_s10 + $0xb18] sm:$0xff]  ;;  %v708_v43 = vld [vmem:[%s8639_s1 + $0x2e8] sm:$0xff] }
 0x28e   : > { %v1736_v7 = vpop.f32.mrf.mxu2  ;;  %2487 = vmatpush.msrb.mxu1 %v652_v61  ;;  %2588 = vmatpush.msra.mxu2 %v708_v43  ;;  %v253_v43 = vld [vmem:[%s5480_s10 + $0xb0] sm:$0xff] }
 0x28f   : > { %v1737_v39 = vadd.f32 %v1736_v7, %v6245_v50  ;;  %2122 = vmatmul.f32.gmra.mxu1 %v576_v49  ;;  %v609_v7 = vld [vmem:[%s5480_s10 + $0xbd0] sm:$0xff] }
 0x290   : > { %v1849_v15 = vpop.f32.mrf.mxu3  ;;  %v1965_v38 = vpop.f32.mrf.mxu0  ;;  %2488 = vmatpush.msrb.mxu1 %v650_v28  ;;  %v241_v28 = vld [vmem:[%s5480_s10 + $0x50] sm:$0xff] }
 0x291   : > { %v1850_v1 = vadd.f32 %v1849_v15, %v1737_v39  ;;  %v611_v39 = vld [vmem:[%s5480_s10 + $0xbe0] sm:$0xff]  ;;  %v610_v15 = vld [vmem:[%s5480_s10 + $0xbd8] sm:$0xff] }
 0x292   : > { %2489 = vmatpush.msrb.mxu1 %v648_v2  ;;  %v4953_v2 = vld [vmem:[%s5480_s10] sm:$0xff] }
 0x293   : > { %1786 = vmatmul.f32.gmra.mxu2 %v585_v34  ;;  %2012 = vmatmul.f32.gmra.mxu0 %v587_v36  ;;  %v1963_v50 = vadd.f32 %v1962_v0, %v1850_v1  ;;  %v612_v36 = vld [vmem:[%s5480_s10 + $0xbe8] sm:$0xff] }
 0x294   : > { %v2078_v40 = vpop.f32.mrf.mxu1 }
 0x295   : > { %v6664_v14 = vadd.f32 %v2075_v63, %v1963_v50  ;;  %1899 = vmatmul.f32.gmra.mxu3 %v586_v35 }
 0x296   : > { %v1739_v32 = vpop.f32.mrf.mxu2 }
 0x297   : > { %v1740_v23 = vadd.f32 %v1739_v32, %v6260_v18  ;;  %2125 = vmatmul.f32.gmra.mxu1 %v588_v57  ;;  %v242_v57 = vld [vmem:[%s5480_s10 + $0x58] sm:$0xff] }
 0x298   : > { %v1852_v56 = vpop.f32.mrf.mxu3  ;;  %v1968_v0 = vpop.f32.mrf.mxu0 }
 0x299   : > { %v1853_v30 = vadd.f32 %v1852_v56, %v1740_v23  ;;  %v706_v23 = vld [vmem:[%s8639_s1 + $0x2d8] sm:$0xff] }
 0x29a   : > { %2589 = vmatpush.msra.mxu2 %v706_v23  ;;  %v277_v23 = vld [vmem:[%s5480_s10 + $0x170] sm:$0xff] }
 0x29b   : > { %1789 = vmatmul.f32.gmra.mxu2 %v597_v22  ;;  %2015 = vmatmul.f32.gmra.mxu0 %v599_v16  ;;  %v1966_v26 = vadd.f32 %v1965_v38, %v1853_v30  ;;  %v4954_v30 = vld [vmem:[%s5480_s10 + $0x8] sm:$0xff] }
 0x29c   : > { %v2081_v3 = vpop.f32.mrf.mxu1 }
 0x29d   : > { %v6677_v18 = vadd.f32 %v2078_v40, %v1966_v26  ;;  %1902 = vmatmul.f32.gmra.mxu3 %v598_v33 }
 0x29e   : > { %v1742_v63 = vpop.f32.mrf.mxu2 }
 0x29f   : > { %v1743_v49 = vadd.f32 %v1742_v63, %v6272_v54  ;;  %2128 = vmatmul.f32.gmra.mxu1 %v600_v48  ;;  %v254_v48 = vld [vmem:[%s5480_s10 + $0xb8] sm:$0xff] }
 0x2a0   : > { %v1855_v12 = vpop.f32.mrf.mxu3  ;;  %v1971_v27 = vpop.f32.mrf.mxu0 }
 0x2a1   : > { %v1856_v8 = vadd.f32 %v1855_v12, %v1743_v49 }
 0x2a3   : > { %1792 = vmatmul.f32.gmra.mxu2 %v609_v7  ;;  %2018 = vmatmul.f32.gmra.mxu0 %v611_v39  ;;  %v1969_v38 = vadd.f32 %v1968_v0, %v1856_v8  ;;  %v738_v0 = vld [vmem:[%s8639_s1 + $0x3d8] sm:$0xff]  ;;  %v4956_v7 = vld [vmem:[%s5480_s10 + $0x68] sm:$0xff] }
 0x2a4   : > { %v2084_v34 = vpop.f32.mrf.mxu1  ;;  %2702 = vmatpush.msra.mxu3 %v738_v0  ;;  %v278_v0 = vld [vmem:[%s5480_s10 + $0x178] sm:$0xff] }
 0x2a5   : > { %v6687_v1 = vadd.f32 %v2081_v3, %v1969_v38  ;;  %1905 = vmatmul.f32.gmra.mxu3 %v610_v15  ;;  %v265_v15 = vld [vmem:[%s5480_s10 + $0x110] sm:$0xff] }
 0x2a6   : > { %v1745_v61 = vpop.f32.mrf.mxu2 }
 0x2a7   : > { %v1746_v54 = vadd.f32 %v1745_v61, %v6281_v19  ;;  %2131 = vmatmul.f32.gmra.mxu1 %v612_v36  ;;  %v4957_v36 = vld [vmem:[%s5480_s10 + $0xc0] sm:$0xff] }
 0x2a8   : > { %v1858_v35 = vpop.f32.mrf.mxu3  ;;  %v1974_v50 = vpop.f32.mrf.mxu0 }
 0x2a9   : > { %v1859_v40 = vadd.f32 %v1858_v35, %v1746_v54  ;;  %v704_v54 = vld [vmem:[%s8639_s1 + $0x2c8] sm:$0xff] }
 0x2aa   : > { %2590 = vmatpush.msra.mxu2 %v704_v54  ;;  %v301_v54 = vld [vmem:[%s5480_s10 + $0x230] sm:$0xff] }
 0x2ab   : > { %2151 = vmatmul.f32.vlgmr.msrb.gmra.mxu2 %v241_v28  ;;  %2377 = vmatmul.f32.vlgmr.msrb.gmra.mxu0 %v4953_v2  ;;  %v1972_v32 = vadd.f32 %v1971_v27, %v1859_v40 }
 0x2ac   : > { %v2087_v56 = vpop.f32.mrf.mxu1 }
 0x2ad   : > { %v6696_v19 = vadd.f32 %v2084_v34, %v1972_v32  ;;  %2264 = vmatmul.f32.vlgmr.msrb.gmra.mxu3 %v242_v57  ;;  %v266_v34 = vld [vmem:[%s5480_s10 + $0x118] sm:$0xff]  ;;  %v4958_v57 = vld [vmem:[%s5480_s10 + $0xc8] sm:$0xff] }
 0x2ae   : > { %v1748_v22 = vpop.f32.mrf.mxu2 }
 0x2af   : > { %v1749_v16 = vadd.f32 %v1748_v22, %v6291_v5  ;;  %2490 = vmatmul.f32.vlgmr.msrb.gmra.mxu1 %v4954_v30  ;;  %v4959_v22 = vld [vmem:[%s5480_s10 + $0x120] sm:$0xff] }
 0x2b0   : > { %v1861_v33 = vpop.f32.mrf.mxu3  ;;  %v1977_v26 = vpop.f32.mrf.mxu0 }
 0x2b1   : > { %v1862_v3 = vadd.f32 %v1861_v33, %v1749_v16 }
 0x2b3   : > { %2154 = vmatmul.f32.gmra.mxu2 %v253_v43  ;;  %2380 = vmatmul.f32.gmra.mxu0 %v4955_v24  ;;  %v1975_v63 = vadd.f32 %v1974_v50, %v1862_v3  ;;  %v736_v50 = vld [vmem:[%s8639_s1 + $0x3c8] sm:$0xff]  ;;  %v289_v24 = vld [vmem:[%s5480_s10 + $0x1d0] sm:$0xff] }
 0x2b4   : > { %v2090_v49 = vpop.f32.mrf.mxu1  ;;  %2703 = vmatpush.msra.mxu3 %v736_v50  ;;  %v4960_v43 = vld [vmem:[%s5480_s10 + $0x128] sm:$0xff]  ;;  %v302_v50 = vld [vmem:[%s5480_s10 + $0x238] sm:$0xff] }
 0x2b5   : > { %v6706_v12 = vadd.f32 %v2087_v56, %v1975_v63  ;;  %2267 = vmatmul.f32.gmra.mxu3 %v254_v48 }
 0x2b6   : > { %v1751_v5 = vpop.f32.mrf.mxu2 }
 0x2b7   : > { %v1752_v27 = vadd.f32 %v1751_v5, %v6301_v62  ;;  %2493 = vmatmul.f32.gmra.mxu1 %v4956_v7  ;;  %v4961_v5 = vld [vmem:[%s5480_s10 + $0x180] sm:$0xff]  ;;  %v702_v7 = vld [vmem:[%s8639_s1 + $0x2b8] sm:$0xff] }
 0x2b8   : > { %v1864_v39 = vpop.f32.mrf.mxu3  ;;  %v1980_v8 = vpop.f32.mrf.mxu0  ;;  %2591 = vmatpush.msra.mxu2 %v702_v7  ;;  %v325_v7 = vld [vmem:[%s5480_s10 + $0x2f0] sm:$0xff] }
 0x2b9   : > { %v1865_v38 = vadd.f32 %v1864_v39, %v1752_v27 }
 0x2bb   : > { %2157 = vmatmul.f32.gmra.mxu2 %v265_v15  ;;  %2383 = vmatmul.f32.gmra.mxu0 %v4957_v36  ;;  %v1978_v61 = vadd.f32 %v1977_v26, %v1865_v38 }
 0x2bc   : > { %v2093_v35 = vpop.f32.mrf.mxu1 }
 0x2bd   : > { %v6716_v62 = vadd.f32 %v2090_v49, %v1978_v61  ;;  %2270 = vmatmul.f32.gmra.mxu3 %v266_v34  ;;  %v290_v49 = vld [vmem:[%s5480_s10 + $0x1d8] sm:$0xff]  ;;  %v4962_v34 = vld [vmem:[%s5480_s10 + $0x188] sm:$0xff] }
 0x2be   : > { %v1754_v28 = vpop.f32.mrf.mxu2 }
 0x2bf   : > { %v1755_v40 = vadd.f32 %v1754_v28, %v6311_v4  ;;  %2496 = vmatmul.f32.gmra.mxu1 %v4958_v57  ;;  %v4963_v28 = vld [vmem:[%s5480_s10 + $0x1e0] sm:$0xff] }
 0x2c0   : > { %v1867_v2 = vpop.f32.mrf.mxu3  ;;  %v1983_v32 = vpop.f32.mrf.mxu0 }
 0x2c1   : > { %v1868_v56 = vadd.f32 %v1867_v2, %v1755_v40 }
 0x2c3   : > { %2160 = vmatmul.f32.gmra.mxu2 %v277_v23  ;;  %2386 = vmatmul.f32.gmra.mxu0 %v4959_v22  ;;  %v1981_v16 = vadd.f32 %v1980_v8, %v1868_v56  ;;  %v734_v8 = vld [vmem:[%s8639_s1 + $0x3b8] sm:$0xff]  ;;  %v4964_v23 = vld [vmem:[%s5480_s10 + $0x1e8] sm:$0xff]  ;;  %v313_v22 = vld [vmem:[%s5480_s10 + $0x290] sm:$0xff] }
 0x2c4   : > { %v2096_v30 = vpop.f32.mrf.mxu1  ;;  %2704 = vmatpush.msra.mxu3 %v734_v8  ;;  %v326_v8 = vld [vmem:[%s5480_s10 + $0x2f8] sm:$0xff] }
 0x2c5   : > { %v6726_v33 = vadd.f32 %v2093_v35, %v1981_v16  ;;  %2273 = vmatmul.f32.gmra.mxu3 %v278_v0 }
 0x2c6   : > { %v1757_v4 = vpop.f32.mrf.mxu2 }
 0x2c7   : > { %v1758_v26 = vadd.f32 %v1757_v4, %v6321_v20  ;;  %2499 = vmatmul.f32.gmra.mxu1 %v4960_v43  ;;  %v4965_v4 = vld [vmem:[%s5480_s10 + $0x240] sm:$0xff]  ;;  %v700_v43 = vld [vmem:[%s8639_s1 + $0x2a8] sm:$0xff] }
 0x2c8   : > { %v1870_v3 = vpop.f32.mrf.mxu3  ;;  %v1986_v48 = vpop.f32.mrf.mxu0  ;;  %2592 = vmatpush.msra.mxu2 %v700_v43  ;;  %v349_v43 = vld [vmem:[%s5480_s10 + $0x3b0] sm:$0xff] }
 0x2c9   : > { %v1871_v63 = vadd.f32 %v1870_v3, %v1758_v26 }
 0x2cb   : > { %2163 = vmatmul.f32.gmra.mxu2 %v289_v24  ;;  %2389 = vmatmul.f32.gmra.mxu0 %v4961_v5  ;;  %v1984_v27 = vadd.f32 %v1983_v32, %v1871_v63 }
 0x2cc   : > { %v2099_v39 = vpop.f32.mrf.mxu1 }
 0x2cd   : > { %v6736_v20 = vadd.f32 %v2096_v30, %v1984_v27  ;;  %2276 = vmatmul.f32.gmra.mxu3 %v290_v49  ;;  %v314_v30 = vld [vmem:[%s5480_s10 + $0x298] sm:$0xff]  ;;  %v4966_v49 = vld [vmem:[%s5480_s10 + $0x248] sm:$0xff] }
 0x2ce   : > { %v1760_v15 = vpop.f32.mrf.mxu2 }
 0x2cf   : > { %v1761_v38 = vadd.f32 %v1760_v15, %v6331_v60  ;;  %2502 = vmatmul.f32.gmra.mxu1 %v4962_v34  ;;  %v4967_v15 = vld [vmem:[%s5480_s10 + $0x2a0] sm:$0xff] }
 0x2d0   : > { %v1873_v36 = vpop.f32.mrf.mxu3  ;;  %v1989_v61 = vpop.f32.mrf.mxu0 }
 0x2d1   : > { %v1874_v35 = vadd.f32 %v1873_v36, %v1761_v38 }
 0x2d3   : > { %2166 = vmatmul.f32.gmra.mxu2 %v301_v54  ;;  %2392 = vmatmul.f32.gmra.mxu0 %v4963_v28  ;;  %v1987_v40 = vadd.f32 %v1986_v48, %v1874_v35  ;;  %v732_v48 = vld [vmem:[%s8639_s1 + $0x3a8] sm:$0xff]  ;;  %v337_v28 = vld [vmem:[%s5480_s10 + $0x350] sm:$0xff] }
 0x2d4   : > { %v2102_v57 = vpop.f32.mrf.mxu1  ;;  %2705 = vmatpush.msra.mxu3 %v732_v48  ;;  %v4968_v54 = vld [vmem:[%s5480_s10 + $0x2a8] sm:$0xff]  ;;  %v350_v48 = vld [vmem:[%s5480_s10 + $0x3b8] sm:$0xff] }
 0x2d5   : > { %v6746_v2 = vadd.f32 %v2099_v39, %v1987_v40  ;;  %2279 = vmatmul.f32.gmra.mxu3 %v302_v50 }
 0x2d6   : > { %v1763_v60 = vpop.f32.mrf.mxu2 }
 0x2d7   : > { %v1764_v32 = vadd.f32 %v1763_v60, %v6341_v45  ;;  %2505 = vmatmul.f32.gmra.mxu1 %v4964_v23  ;;  %v4969_v60 = vld [vmem:[%s5480_s10 + $0x300] sm:$0xff]  ;;  %v698_v23 = vld [vmem:[%s8639_s1 + $0x298] sm:$0xff] }
 0x2d8   : > { %v1876_v56 = vpop.f32.mrf.mxu3  ;;  %v1992_v0 = vpop.f32.mrf.mxu0  ;;  %2593 = vmatpush.msra.mxu2 %v698_v23  ;;  %v373_v23 = vld [vmem:[%s5480_s10 + $0x470] sm:$0xff] }
 0x2d9   : > { %v1877_v16 = vadd.f32 %v1876_v56, %v1764_v32 }
 0x2db   : > { %2169 = vmatmul.f32.gmra.mxu2 %v313_v22  ;;  %2395 = vmatmul.f32.gmra.mxu0 %v4965_v4  ;;  %v1990_v26 = vadd.f32 %v1989_v61, %v1877_v16 }
 0x2dc   : > { %v2105_v3 = vpop.f32.mrf.mxu1 }
 0x2dd   : > { %v6756_v45 = vadd.f32 %v2102_v57, %v1990_v26  ;;  %2282 = vmatmul.f32.gmra.mxu3 %v314_v30  ;;  %v338_v57 = vld [vmem:[%s5480_s10 + $0x358] sm:$0xff]  ;;  %v4970_v30 = vld [vmem:[%s5480_s10 + $0x308] sm:$0xff] }
 0x2de   : > { %v1766_v24 = vpop.f32.mrf.mxu2 }
 0x2df   : > { %v1767_v63 = vadd.f32 %v1766_v24, %v6351_v41  ;;  %2508 = vmatmul.f32.gmra.mxu1 %v4966_v49  ;;  %v4971_v24 = vld [vmem:[%s5480_s10 + $0x360] sm:$0xff] }
 0x2e0   : > { %v1879_v5 = vpop.f32.mrf.mxu3  ;;  %v1995_v27 = vpop.f32.mrf.mxu0 }
 0x2e1   : > { %v1880_v39 = vadd.f32 %v1879_v5, %v1767_v63 }
 0x2e3   : > { %2172 = vmatmul.f32.gmra.mxu2 %v325_v7  ;;  %2398 = vmatmul.f32.gmra.mxu0 %v4967_v15  ;;  %v1993_v38 = vadd.f32 %v1992_v0, %v1880_v39  ;;  %v730_v0 = vld [vmem:[%s8639_s1 + $0x398] sm:$0xff]  ;;  %v4972_v7 = vld [vmem:[%s5480_s10 + $0x368] sm:$0xff]  ;;  %v361_v15 = vld [vmem:[%s5480_s10 + $0x410] sm:$0xff] }
 0x2e4   : > { %v2108_v34 = vpop.f32.mrf.mxu1  ;;  %2706 = vmatpush.msra.mxu3 %v730_v0  ;;  %v374_v0 = vld [vmem:[%s5480_s10 + $0x478] sm:$0xff] }
 0x2e5   : > { %v6766_v36 = vadd.f32 %v2105_v3, %v1993_v38  ;;  %2285 = vmatmul.f32.gmra.mxu3 %v326_v8 }
 0x2e6   : > { %v1769_v41 = vpop.f32.mrf.mxu2 }
 0x2e7   : > { %v1770_v61 = vadd.f32 %v1769_v41, %v6361_v11  ;;  %2511 = vmatmul.f32.gmra.mxu1 %v4968_v54  ;;  %v4973_v41 = vld [vmem:[%s5480_s10 + $0x3c0] sm:$0xff]  ;;  %v696_v54 = vld [vmem:[%s8639_s1 + $0x288] sm:$0xff] }
 0x2e8   : > { %v1882_v35 = vpop.f32.mrf.mxu3  ;;  %v1998_v50 = vpop.f32.mrf.mxu0  ;;  %2594 = vmatpush.msra.mxu2 %v696_v54  ;;  %v397_v54 = vld [vmem:[%s5480_s10 + $0x530] sm:$0xff] }
 0x2e9   : > { %v1883_v40 = vadd.f32 %v1882_v35, %v1770_v61 }
 0x2eb   : > { %2175 = vmatmul.f32.gmra.mxu2 %v337_v28  ;;  %2401 = vmatmul.f32.gmra.mxu0 %v4969_v60  ;;  %v1996_v32 = vadd.f32 %v1995_v27, %v1883_v40 }
 0x2ec   : > { %v2111_v56 = vpop.f32.mrf.mxu1 }
 0x2ed   : > { %v6776_v11 = vadd.f32 %v2108_v34, %v1996_v32  ;;  %2288 = vmatmul.f32.gmra.mxu3 %v338_v57  ;;  %v362_v34 = vld [vmem:[%s5480_s10 + $0x418] sm:$0xff]  ;;  %v4974_v57 = vld [vmem:[%s5480_s10 + $0x3c8] sm:$0xff] }
 0x2ee   : > { %v1772_v22 = vpop.f32.mrf.mxu2 }
 0x2ef   : > { %v1773_v16 = vadd.f32 %v1772_v22, %v6371_v52  ;;  %2514 = vmatmul.f32.gmra.mxu1 %v4970_v30  ;;  %v4975_v22 = vld [vmem:[%s5480_s10 + $0x420] sm:$0xff] }
 0x2f0   : > { %v1885_v4 = vpop.f32.mrf.mxu3  ;;  %v2001_v26 = vpop.f32.mrf.mxu0 }
 0x2f1   : > { %v1886_v3 = vadd.f32 %v1885_v4, %v1773_v16 }
 0x2f3   : > { %2178 = vmatmul.f32.gmra.mxu2 %v349_v43  ;;  %2404 = vmatmul.f32.gmra.mxu0 %v4971_v24  ;;  %v1999_v63 = vadd.f32 %v1998_v50, %v1886_v3  ;;  %v728_v50 = vld [vmem:[%s8639_s1 + $0x388] sm:$0xff]  ;;  %v385_v24 = vld [vmem:[%s5480_s10 + $0x4d0] sm:$0xff] }
 0x2f4   : > { %v2114_v49 = vpop.f32.mrf.mxu1  ;;  %2707 = vmatpush.msra.mxu3 %v728_v50  ;;  %v4976_v43 = vld [vmem:[%s5480_s10 + $0x428] sm:$0xff]  ;;  %v398_v50 = vld [vmem:[%s5480_s10 + $0x538] sm:$0xff] }
 0x2f5   : > { %v6786_v5 = vadd.f32 %v2111_v56, %v1999_v63  ;;  %2291 = vmatmul.f32.gmra.mxu3 %v350_v48 }
 0x2f6   : > { %v1775_v52 = vpop.f32.mrf.mxu2 }
 0x2f7   : > { %v1776_v27 = vadd.f32 %v1775_v52, %v6381_v44  ;;  %2517 = vmatmul.f32.gmra.mxu1 %v4972_v7  ;;  %v4977_v52 = vld [vmem:[%s5480_s10 + $0x480] sm:$0xff]  ;;  %v694_v7 = vld [vmem:[%s8639_s1 + $0x278] sm:$0xff] }
 0x2f8   : > { %v1888_v39 = vpop.f32.mrf.mxu3  ;;  %v2004_v8 = vpop.f32.mrf.mxu0  ;;  %2595 = vmatpush.msra.mxu2 %v694_v7 }
 0x2f9   : > { %v1889_v38 = vadd.f32 %v1888_v39, %v1776_v27 }
 0x2fb   : > { %2181 = vmatmul.f32.gmra.mxu2 %v361_v15  ;;  %2407 = vmatmul.f32.gmra.mxu0 %v4973_v41  ;;  %v2002_v61 = vadd.f32 %v2001_v26, %v1889_v38 }
 0x2fc   : > { %v2117_v35 = vpop.f32.mrf.mxu1 }
 0x2fd   : > { %v6796_v44 = vadd.f32 %v2114_v49, %v2002_v61  ;;  %2294 = vmatmul.f32.gmra.mxu3 %v362_v34  ;;  %v386_v49 = vld [vmem:[%s5480_s10 + $0x4d8] sm:$0xff]  ;;  %v4978_v34 = vld [vmem:[%s5480_s10 + $0x488] sm:$0xff] }
 0x2fe   : > { %v1778_v28 = vpop.f32.mrf.mxu2 }
 0x2ff   : > { %v1779_v40 = vadd.f32 %v1778_v28, %v6391_v10  ;;  %2520 = vmatmul.f32.gmra.mxu1 %v4974_v57  ;;  %v4979_v28 = vld [vmem:[%s5480_s10 + $0x4e0] sm:$0xff]  ;;  %v774_v57 = vld [vmem:[%s8639_s1 + $0x4f8] sm:$0xff] }
 0x300   : > { %v1891_v60 = vpop.f32.mrf.mxu3  ;;  %v2007_v32 = vpop.f32.mrf.mxu0  ;;  %2813 = vmatpush.msra.mxu0 %v774_v57 }
 0x301   : > { %v1892_v56 = vadd.f32 %v1891_v60, %v1779_v40 }
 0x303   : > { %2184 = vmatmul.f32.gmra.mxu2 %v373_v23  ;;  %2410 = vmatmul.f32.gmra.mxu0 %v4975_v22  ;;  %v2005_v16 = vadd.f32 %v2004_v8, %v1892_v56  ;;  %v726_v8 = vld [vmem:[%s8639_s1 + $0x378] sm:$0xff] }
 0x304   : > { %v2120_v30 = vpop.f32.mrf.mxu1  ;;  %2708 = vmatpush.msra.mxu3 %v726_v8  ;;  %v421_v8 = vld [vmem:[%s5480_s10 + $0x5f0] sm:$0xff] }
 0x305   : > { %v6806_v4 = vadd.f32 %v2117_v35, %v2005_v16  ;;  %2297 = vmatmul.f32.gmra.mxu3 %v374_v0  ;;  %v4980_v0 = vld [vmem:[%s5480_s10 + $0x4e8] sm:$0xff] }
 0x306   : > { %v1781_v10 = vpop.f32.mrf.mxu2 }
 0x307   : > { %v1782_v26 = vadd.f32 %v1781_v10, %v6401_v21  ;;  %2523 = vmatmul.f32.gmra.mxu1 %v4976_v43  ;;  %v4981_v43 = vld [vmem:[%s5480_s10 + $0x540] sm:$0xff] }
 0x308   : > { %v1894_v3 = vpop.f32.mrf.mxu3  ;;  %v2010_v48 = vpop.f32.mrf.mxu0 }
 0x309   : > { %v1895_v63 = vadd.f32 %v1894_v3, %v1782_v26  ;;  %v410_v26 = vld [vmem:[%s5480_s10 + $0x598] sm:$0xff] }
 0x30b   : > { %2187 = vmatmul.f32.gmra.mxu2 %v385_v24  ;;  %2413 = vmatmul.f32.gmra.mxu0 %v4977_v52  ;;  %v2008_v27 = vadd.f32 %v2007_v32, %v1895_v63  ;;  %v806_v32 = vld [vmem:[%s8639_s1 + $0x5f8] sm:$0xff]  ;;  %v724_v63 = vld [vmem:[%s8639_s1 + $0x368] sm:$0xff] }
 0x30c   : > { %v2123_v39 = vpop.f32.mrf.mxu1  ;;  %2926 = vmatpush.msra.mxu1 %v806_v32  ;;  %2709 = vmatpush.msra.mxu3 %v724_v63  ;;  %v433_v32 = vld [vmem:[%s5480_s10 + $0x650] sm:$0xff] }
 0x30d   : > { %v6816_v21 = vadd.f32 %v2120_v30, %v2008_v27  ;;  %2300 = vmatmul.f32.gmra.mxu3 %v386_v49  ;;  %v409_v30 = vld [vmem:[%s5480_s10 + $0x590] sm:$0xff]  ;;  %v4982_v27 = vld [vmem:[%s5480_s10 + $0x548] sm:$0xff] }
 0x30e   : > { %v1784_v15 = vpop.f32.mrf.mxu2  ;;  %v445_v63 = vld [vmem:[%s5480_s10 + $0x6b0] sm:$0xff] }
 0x30f   : > { %v1785_v38 = vadd.f32 %v1784_v15, %v6414_v47  ;;  %2526 = vmatmul.f32.gmra.mxu1 %v4978_v34  ;;  %v4983_v34 = vld [vmem:[%s5480_s10 + $0x5a0] sm:$0xff] }
 0x310   : > { %v1897_v41 = vpop.f32.mrf.mxu3  ;;  %v2013_v61 = vpop.f32.mrf.mxu0 }
 0x311   : > { %v1898_v35 = vadd.f32 %v1897_v41, %v1785_v38  ;;  %v422_v38 = vld [vmem:[%s5480_s10 + $0x5f8] sm:$0xff] }
 0x313   : > { %2190 = vmatmul.f32.gmra.mxu2 %v397_v54  ;;  %2416 = vmatmul.f32.gmra.mxu0 %v4979_v28  ;;  %v2011_v40 = vadd.f32 %v2010_v48, %v1898_v35  ;;  %v692_v48 = vld [vmem:[%s8639_s1 + $0x268] sm:$0xff] }
 0x314   : > { %v2126_v60 = vpop.f32.mrf.mxu1  ;;  %2596 = vmatpush.msra.mxu2 %v692_v48  ;;  %v804_v35 = vld [vmem:[%s8639_s1 + $0x5e8] sm:$0xff] }
 0x315   : > { %v6829_v47 = vadd.f32 %v2123_v39, %v2011_v40  ;;  %2303 = vmatmul.f32.gmra.mxu3 %v398_v50  ;;  %2927 = vmatpush.msra.mxu1 %v804_v35  ;;  %v4984_v40 = vld [vmem:[%s5480_s10 + $0x5a8] sm:$0xff]  ;;  %v458_v35 = vld [vmem:[%s5480_s10 + $0x718] sm:$0xff] }
 0x316   : > { %v1787_v23 = vpop.f32.mrf.mxu2 }
 0x317   : > { %v1788_v56 = vadd.f32 %v1787_v23, %v6427_v17  ;;  %2529 = vmatmul.f32.gmra.mxu1 %v4980_v0  ;;  %v4985_v0 = vld [vmem:[%s5480_s10 + $0x600] sm:$0xff] }
 0x318   : > { %v1900_v22 = vpop.f32.mrf.mxu3  ;;  %v2016_v16 = vpop.f32.mrf.mxu0 }
 0x319   : > { %v1901_v10 = vadd.f32 %v1900_v22, %v1788_v56  ;;  %v434_v56 = vld [vmem:[%s5480_s10 + $0x658] sm:$0xff] }
 0x31b   : > { %2193 = vmatmul.f32.gmra.mxu2 %v409_v30  ;;  %2419 = vmatmul.f32.gmra.mxu0 %v4981_v43  ;;  %v2014_v3 = vadd.f32 %v2013_v61, %v1901_v10  ;;  %v772_v61 = vld [vmem:[%s8639_s1 + $0x4e8] sm:$0xff]  ;;  %v722_v10 = vld [vmem:[%s8639_s1 + $0x358] sm:$0xff] }
 0x31c   : > { %v2129_v24 = vpop.f32.mrf.mxu1  ;;  %2814 = vmatpush.msra.mxu0 %v772_v61  ;;  %2710 = vmatpush.msra.mxu3 %v722_v10  ;;  %v457_v61 = vld [vmem:[%s5480_s10 + $0x710] sm:$0xff]  ;;  %v470_v10 = vld [vmem:[%s5480_s10 + $0x778] sm:$0xff] }
 0x31d   : > { %v6842_v17 = vadd.f32 %v2126_v60, %v2014_v3  ;;  %2306 = vmatmul.f32.gmra.mxu3 %v410_v26  ;;  %v4986_v3 = vld [vmem:[%s5480_s10 + $0x608] sm:$0xff] }
 0x31e   : > { %v1790_v49 = vpop.f32.mrf.mxu2 }
 0x31f   : > { %v1791_v52 = vadd.f32 %v1790_v49, %v6440_v51  ;;  %2532 = vmatmul.f32.gmra.mxu1 %v4982_v27  ;;  %v4987_v27 = vld [vmem:[%s5480_s10 + $0x660] sm:$0xff] }
 0x320   : > { %v1903_v7 = vpop.f32.mrf.mxu3  ;;  %v2019_v39 = vpop.f32.mrf.mxu0 }
 0x321   : > { %v1904_v15 = vadd.f32 %v1903_v7, %v1791_v52  ;;  %v446_v52 = vld [vmem:[%s5480_s10 + $0x6b8] sm:$0xff] }
 0x322   : > { %v770_v7 = vld [vmem:[%s8639_s1 + $0x4d8] sm:$0xff] }
 0x323   : > { %2196 = vmatmul.f32.gmra.mxu2 %v421_v8  ;;  %2422 = vmatmul.f32.gmra.mxu0 %v4983_v34  ;;  %v2017_v41 = vadd.f32 %v2016_v16, %v1904_v15  ;;  %v690_v16 = vld [vmem:[%s8639_s1 + $0x258] sm:$0xff] }
 0x324   : > { %v2132_v54 = vpop.f32.mrf.mxu1  ;;  %2597 = vmatpush.msra.mxu2 %v690_v16  ;;  %2815 = vmatpush.msra.mxu0 %v770_v7 }
 0x325   : > { %v6855_v51 = vadd.f32 %v2129_v24, %v2017_v41  ;;  %2309 = vmatmul.f32.gmra.mxu3 %v422_v38  ;;  %v4988_v38 = vld [vmem:[%s5480_s10 + $0x668] sm:$0xff] }
 0x326   : > { %v1793_v50 = vpop.f32.mrf.mxu2 }
 0x327   : > { %v1794_v28 = vadd.f32 %v1793_v50, %v6453_v31  ;;  %2535 = vmatmul.f32.gmra.mxu1 %v4984_v40  ;;  %v4989_v50 = vld [vmem:[%s5480_s10 + $0x6c0] sm:$0xff]  ;;  %v720_v40 = vld [vmem:[%s8639_s1 + $0x348] sm:$0xff] }
 0x328   : > { %v1906_v57 = vpop.f32.mrf.mxu3  ;;  %v6862_v60 = vpop.f32.mrf.mxu0  ;;  %2711 = vmatpush.msra.mxu3 %v720_v40 }
 0x329   : > { %v1907_v23 = vadd.f32 %v1906_v57, %v1794_v28  ;;  %v688_v28 = vld [vmem:[%s8639_s1 + $0x248] sm:$0xff] }
 0x32a   : > { %2598 = vmatpush.msra.mxu2 %v688_v28  ;;  %v4994_v28 = vld [vmem:[%s5480_s10 + $0x788] sm:$0xff] }
 0x32b   : > { %2199 = vmatmul.f32.gmra.mxu2 %v433_v32  ;;  %2425 = vmatmul.f32.gmra.mxu0 %v4985_v0  ;;  %v2020_v22 = vadd.f32 %v2019_v39, %v1907_v23  ;;  %v802_v39 = vld [vmem:[%s8639_s1 + $0x5d8] sm:$0xff]  ;;  %v4990_v23 = vld [vmem:[%s5480_s10 + $0x6c8] sm:$0xff] }
 0x32c   : > { %v6870_v31 = vpop.f32.mrf.mxu1  ;;  %2928 = vmatpush.msra.mxu1 %v802_v39  ;;  %v481_v39 = vld [vmem:[%s5480_s10 + $0x7d0] sm:$0xff] }
 0x32d   : > { %v6872_v30 = vadd.f32 %v2132_v54, %v2020_v22  ;;  %2312 = vmatmul.f32.gmra.mxu3 %v434_v56  ;;  %v469_v22 = vld [vmem:[%s5480_s10 + $0x770] sm:$0xff] }
 0x32e   : > { %v2152_v26 = vpop.f32.mrf.mxu2 }
 0x32f   : > { %v2153_v43 = vadd.f32 %v2152_v26, %v6466_v46  ;;  %2538 = vmatmul.f32.gmra.mxu1 %v4986_v3  ;;  %v4991_v26 = vld [vmem:[%s5480_s10 + $0x720] sm:$0xff]  ;;  %v800_v3 = vld [vmem:[%s8639_s1 + $0x5c8] sm:$0xff] }
 0x330   : > { %v2265_v48 = vpop.f32.mrf.mxu3  ;;  %v6879_v24 = vpop.f32.mrf.mxu0  ;;  %2929 = vmatpush.msra.mxu1 %v800_v3 }
 0x331   : > { %v6882_v49 = vadd.f32 %v2265_v48, %v2153_v43  ;;  %v768_v43 = vld [vmem:[%s8639_s1 + $0x4c8] sm:$0xff] }
 0x332   : > { %2816 = vmatpush.msra.mxu0 %v768_v43 }
 0x333   : > { %8644 = vst [vmem:[#allocation2_spill] sm:$0xff] %v6882_v49  ;;  %2202 = vmatmul.f32.gmra.mxu2 %v445_v63  ;;  %2428 = vmatmul.f32.gmra.mxu0 %v4987_v27 }
 0x334   : > { %v6889_v46 = vpop.f32.mrf.mxu1 }
 0x335   : > { %2315 = vmatmul.f32.gmra.mxu3 %v446_v52  ;;  %v4992_v52 = vld [vmem:[%s5480_s10 + $0x728] sm:$0xff] }
 0x336   : > { %v2155_v8 = vpop.f32.mrf.mxu2 }
 0x337   : > { %v2156_v15 = vadd.f32 %v2155_v8, %v6479_v37  ;;  %2541 = vmatmul.f32.gmra.mxu1 %v4988_v38  ;;  %v4993_v38 = vld [vmem:[%s5480_s10 + $0x780] sm:$0xff] }
 0x338   : > { %v2268_v34 = vpop.f32.mrf.mxu3  ;;  %v6896_v41 = vpop.f32.mrf.mxu0 }
 0x339   : > { %v6899_v54 = vadd.f32 %v2268_v34, %v2156_v15  ;;  %v482_v15 = vld [vmem:[%s5480_s10 + $0x7d8] sm:$0xff] }
 0x33a   : > { %v686_v34 = vld [vmem:[%s8639_s1 + $0x238] sm:$0xff] }
 0x33b   : > { %8645 = vst [vmem:[#allocation3_spill] sm:$0xff] %v6899_v54  ;;  %2205 = vmatmul.f32.gmra.mxu2 %v457_v61  ;;  %2431 = vmatmul.f32.gmra.mxu0 %v4989_v50  ;;  %v718_v61 = vld [vmem:[%s8639_s1 + $0x338] sm:$0xff] }
 0x33c   : > { %v6906_v37 = vpop.f32.mrf.mxu1  ;;  %2599 = vmatpush.msra.mxu2 %v686_v34  ;;  %2712 = vmatpush.msra.mxu3 %v718_v61  ;;  %v684_v34 = vld [vmem:[%s8639_s1 + $0x228] sm:$0xff]  ;;  %v5031_v54 = vld [vmem:[%s5480_s10 + $0x138] sm:$0xff] }
 0x33d   : > { %2318 = vmatmul.f32.gmra.mxu3 %v458_v35  ;;  %v716_v61 = vld [vmem:[%s8639_s1 + $0x328] sm:$0xff] }
 0x33e   : > { %v2158_v57 = vpop.f32.mrf.mxu2  ;;  %2600 = vmatpush.msra.mxu2 %v684_v34  ;;  %2713 = vmatpush.msra.mxu3 %v716_v61  ;;  %v529_v34 = vld [vmem:[%s5480_s10 + $0x950] sm:$0xff] }
 0x33f   : > { %v2159_v32 = vadd.f32 %v2158_v57, %v6492_v25  ;;  %2544 = vmatmul.f32.gmra.mxu1 %v4990_v23 }
 0x340   : > { %v2271_v56 = vpop.f32.mrf.mxu3  ;;  %v6913_v0 = vpop.f32.mrf.mxu0 }
 0x341   : > { %v6916_v16 = vadd.f32 %v2271_v56, %v2159_v32  ;;  %v493_v32 = vld [vmem:[%s5480_s10 + $0x830] sm:$0xff]  ;;  %v494_v56 = vld [vmem:[%s5480_s10 + $0x838] sm:$0xff] }
 0x343   : > { %8646 = vst [vmem:[#allocation4_spill] sm:$0xff] %v6916_v16  ;;  %2208 = vmatmul.f32.gmra.mxu2 %v469_v22  ;;  %2434 = vmatmul.f32.gmra.mxu0 %v4991_v26  ;;  %v4995_v22 = vld [vmem:[%s5480_s10 + $0x7e0] sm:$0xff]  ;;  %v798_v26 = vld [vmem:[%s8639_s1 + $0x5b8] sm:$0xff] }
 0x344   : > { %v6923_v25 = vpop.f32.mrf.mxu1  ;;  %2930 = vmatpush.msra.mxu1 %v798_v26  ;;  %v4999_v26 = vld [vmem:[%s5480_s10 + $0x8a0] sm:$0xff] }
 0x345   : > { %2321 = vmatmul.f32.gmra.mxu3 %v470_v10  ;;  %v766_v10 = vld [vmem:[%s8639_s1 + $0x4b8] sm:$0xff] }
 0x346   : > { %v2161_v48 = vpop.f32.mrf.mxu2  ;;  %2817 = vmatpush.msra.mxu0 %v766_v10  ;;  %v518_v10 = vld [vmem:[%s5480_s10 + $0x8f8] sm:$0xff] }
 0x347   : > { %v2162_v63 = vadd.f32 %v2161_v48, %v6505_v9  ;;  %2547 = vmatmul.f32.gmra.mxu1 %v4992_v52  ;;  %v4996_v48 = vld [vmem:[%s5480_s10 + $0x7e8] sm:$0xff] }
 0x348   : > { %v2274_v27 = vpop.f32.mrf.mxu3  ;;  %v6930_v7 = vpop.f32.mrf.mxu0 }
 0x349   : > { %v6933_v8 = vadd.f32 %v2274_v27, %v2162_v63  ;;  %v505_v27 = vld [vmem:[%s5480_s10 + $0x890] sm:$0xff] }
 0x34b   : > { %8647 = vst [vmem:[#allocation5_spill] sm:$0xff] %v6933_v8  ;;  %2211 = vmatmul.f32.gmra.mxu2 %v481_v39  ;;  %2437 = vmatmul.f32.gmra.mxu0 %v4993_v38  ;;  %v4997_v38 = vld [vmem:[%s5480_s10 + $0x840] sm:$0xff]  ;;  %v5023_v8 = vld [vmem:[%s5480_s10 + $0x78] sm:$0xff] }
 0x34c   : > { %v6940_v9 = vpop.f32.mrf.mxu1 }
 0x34d   : > { %2324 = vmatmul.f32.gmra.mxu3 %v482_v15  ;;  %v506_v15 = vld [vmem:[%s5480_s10 + $0x898] sm:$0xff] }
 0x34e   : > { %v2164_v35 = vpop.f32.mrf.mxu2 }
 0x34f   : > { %v2165_v50 = vadd.f32 %v2164_v35, %v6518_v58  ;;  %2550 = vmatmul.f32.gmra.mxu1 %v4994_v28  ;;  %v4998_v28 = vld [vmem:[%s5480_s10 + $0x848] sm:$0xff] }
 0x350   : > { %v2277_v40 = vpop.f32.mrf.mxu3  ;;  %v6947_v57 = vpop.f32.mrf.mxu0 }
 0x351   : > { %v6950_v23 = vadd.f32 %v2277_v40, %v2165_v50 }
 0x353   : > { %8648 = vst [vmem:[#allocation6_spill] sm:$0xff] %v6950_v23  ;;  %2214 = vmatmul.f32.gmra.mxu2 %v493_v32  ;;  %2440 = vmatmul.f32.gmra.mxu0 %v4995_v22 }
 0x354   : > { %v6957_v58 = vpop.f32.mrf.mxu1 }
 0x355   : > { %2327 = vmatmul.f32.gmra.mxu3 %v494_v56  ;;  %v517_v56 = vld [vmem:[%s5480_s10 + $0x8f0] sm:$0xff] }
 0x356   : > { %v2167_v43 = vpop.f32.mrf.mxu2 }
 0x357   : > { %v2168_v3 = vadd.f32 %v2167_v43, %v6531_v29  ;;  %2553 = vmatmul.f32.gmra.mxu1 %v4996_v48  ;;  %v764_v43 = vld [vmem:[%s8639_s1 + $0x4a8] sm:$0xff] }
 0x358   : > { %v2280_v63 = vpop.f32.mrf.mxu3  ;;  %v6964_v52 = vpop.f32.mrf.mxu0  ;;  %2818 = vmatpush.msra.mxu0 %v764_v43 }
 0x359   : > { %v6967_v39 = vadd.f32 %v2280_v63, %v2168_v3  ;;  %v796_v3 = vld [vmem:[%s8639_s1 + $0x5a8] sm:$0xff] }
 0x35a   : > { %2931 = vmatpush.msra.mxu1 %v796_v3 }
 0x35b   : > { %8649 = vst [vmem:[#allocation7_spill] sm:$0xff] %v6967_v39  ;;  %2217 = vmatmul.f32.gmra.mxu2 %v505_v27  ;;  %2443 = vmatmul.f32.gmra.mxu0 %v4997_v38  ;;  %v5000_v27 = vld [vmem:[%s5480_s10 + $0x8a8] sm:$0xff] }
 0x35c   : > { %v6974_v29 = vpop.f32.mrf.mxu1 }
 0x35d   : > { %2330 = vmatmul.f32.gmra.mxu3 %v506_v15 }
 0x35e   : > { %v2170_v35 = vpop.f32.mrf.mxu2 }
 0x35f   : > { %v2171_v50 = vadd.f32 %v2170_v35, %v6544_v13  ;;  %2556 = vmatmul.f32.gmra.mxu1 %v4998_v28  ;;  %v530_v35 = vld [vmem:[%s5480_s10 + $0x958] sm:$0xff] }
 0x360   : > { %v2283_v40 = vpop.f32.mrf.mxu3  ;;  %v6981_v32 = vpop.f32.mrf.mxu0  ;;  %v682_v28 = vld [vmem:[%s8639_s1 + $0x218] sm:$0xff] }
 0x361   : > { %v6984_v22 = vadd.f32 %v2283_v40, %v2171_v50  ;;  %v5001_v50 = vld [vmem:[%s5480_s10 + $0x900] sm:$0xff]  ;;  %2601 = vmatpush.msra.mxu2 %v682_v28  ;;  %v714_v40 = vld [vmem:[%s8639_s1 + $0x318] sm:$0xff] }
 0x362   : > { %2714 = vmatpush.msra.mxu3 %v714_v40  ;;  %v5004_v40 = vld [vmem:[%s5480_s10 + $0x968] sm:$0xff] }
 0x363   : > { %8650 = vst [vmem:[#allocation8_spill] sm:$0xff] %v6984_v22  ;;  %2220 = vmatmul.f32.gmra.mxu2 %v517_v56  ;;  %2446 = vmatmul.f32.gmra.mxu0 %v4999_v26  ;;  %v5002_v26 = vld [vmem:[%s5480_s10 + $0x908] sm:$0xff]  ;;  %v602_v22 = vld [vmem:[%s5480_s10 + $0xb98] sm:$0xff] }
 0x364   : > { %v6991_v13 = vpop.f32.mrf.mxu1 }
 0x365   : > { %2333 = vmatmul.f32.gmra.mxu3 %v518_v10 }
 0x366   : > { %v2173_v48 = vpop.f32.mrf.mxu2 }
 0x367   : > { %v2174_v63 = vadd.f32 %v2173_v48, %v6557_v53  ;;  %2559 = vmatmul.f32.gmra.mxu1 %v5000_v27  ;;  %v541_v48 = vld [vmem:[%s5480_s10 + $0x9b0] sm:$0xff]  ;;  %v542_v27 = vld [vmem:[%s5480_s10 + $0x9b8] sm:$0xff] }
 0x368   : > { %v2286_v15 = vpop.f32.mrf.mxu3  ;;  %v6998_v38 = vpop.f32.mrf.mxu0 }
 0x369   : > { %v7001_v61 = vadd.f32 %v2286_v15, %v2174_v63  ;;  %v5003_v15 = vld [vmem:[%s5480_s10 + $0x960] sm:$0xff] }
 0x36b   : > { %8651 = vst [vmem:[#allocation9_spill] sm:$0xff] %v7001_v61  ;;  %2223 = vmatmul.f32.gmra.mxu2 %v529_v34  ;;  %2449 = vmatmul.f32.gmra.mxu0 %v5001_v50  ;;  %v762_v34 = vld [vmem:[%s8639_s1 + $0x498] sm:$0xff] }
 0x36c   : > { %v7008_v53 = vpop.f32.mrf.mxu1  ;;  %2819 = vmatpush.msra.mxu0 %v762_v34  ;;  %v758_v34 = vld [vmem:[%s8639_s1 + $0x478] sm:$0xff] }
 0x36d   : > { %2336 = vmatmul.f32.gmra.mxu3 %v530_v35  ;;  %v794_v35 = vld [vmem:[%s8639_s1 + $0x598] sm:$0xff] }
 0x36e   : > { %v2176_v56 = vpop.f32.mrf.mxu2  ;;  %2932 = vmatpush.msra.mxu1 %v794_v35 }
 0x36f   : > { %v2177_v10 = vadd.f32 %v2176_v56, %v6570_v42  ;;  %2562 = vmatmul.f32.gmra.mxu1 %v5002_v26  ;;  %v553_v26 = vld [vmem:[%s5480_s10 + $0xa10] sm:$0xff] }
 0x370   : > { %v2289_v43 = vpop.f32.mrf.mxu3  ;;  %v7015_v3 = vpop.f32.mrf.mxu0 }
 0x371   : > { %v7018_v63 = vadd.f32 %v2289_v43, %v2177_v10 }
 0x373   : > { %8652 = vst [vmem:[#allocation10_spill] sm:$0xff] %v7018_v63  ;;  %2226 = vmatmul.f32.gmra.mxu2 %v541_v48  ;;  %2452 = vmatmul.f32.gmra.mxu0 %v5003_v15  ;;  %v760_v48 = vld [vmem:[%s8639_s1 + $0x488] sm:$0xff]  ;;  %v5005_v15 = vld [vmem:[%s5480_s10 + $0x9c0] sm:$0xff] }
 0x374   : > { %v7025_v42 = vpop.f32.mrf.mxu1  ;;  %2820 = vmatpush.msra.mxu0 %v760_v48  ;;  %v754_v48 = vld [vmem:[%s8639_s1 + $0x458] sm:$0xff] }
 0x375   : > { %2339 = vmatmul.f32.gmra.mxu3 %v542_v27  ;;  %v554_v27 = vld [vmem:[%s5480_s10 + $0xa18] sm:$0xff] }
 0x376   : > { %v2179_v50 = vpop.f32.mrf.mxu2  ;;  %2821 = vmatpush.msra.mxu0 %v758_v34 }
 0x377   : > { %v2180_v28 = vadd.f32 %v2179_v50, %v6589_v59  ;;  %2565 = vmatmul.f32.gmra.mxu1 %v5004_v40  ;;  %v680_v59 = vld [vmem:[%s8639_s1 + $0x208] sm:$0xff] }
 0x378   : > { %v2292_v56 = vpop.f32.mrf.mxu3  ;;  %v7032_v10 = vpop.f32.mrf.mxu0  ;;  %2602 = vmatpush.msra.mxu2 %v680_v59  ;;  %v712_v50 = vld [vmem:[%s8639_s1 + $0x308] sm:$0xff]  ;;  %v565_v59 = vld [vmem:[%s5480_s10 + $0xa70] sm:$0xff] }
 0x379   : > { %v7035_v43 = vadd.f32 %v2292_v56, %v2180_v28  ;;  %v756_v28 = vld [vmem:[%s8639_s1 + $0x468] sm:$0xff]  ;;  %2715 = vmatpush.msra.mxu3 %v712_v50 }
 0x37a   : > { %2822 = vmatpush.msra.mxu0 %v756_v28  ;;  %v752_v50 = vld [vmem:[%s8639_s1 + $0x448] sm:$0xff]  ;;  %v566_v28 = vld [vmem:[%s5480_s10 + $0xa78] sm:$0xff] }
 0x37b   : > { %8653 = vst [vmem:[#allocation11_spill] sm:$0xff] %v7035_v43  ;;  %2229 = vmatmul.f32.gmra.mxu2 %v553_v26  ;;  %2455 = vmatmul.f32.gmra.mxu0 %v5005_v15  ;;  %v5006_v26 = vld [vmem:[%s5480_s10 + $0x9c8] sm:$0xff]  ;;  %v577_v43 = vld [vmem:[%s5480_s10 + $0xad0] sm:$0xff] }
 0x37c   : > { %v7048_v35 = vpop.f32.mrf.mxu1  ;;  %2823 = vmatpush.msra.mxu0 %v754_v48  ;;  %v748_v48 = vld [vmem:[%s8639_s1 + $0x428] sm:$0xff] }
 0x37d   : > { %2342 = vmatmul.f32.gmra.mxu3 %v554_v27 }
 0x37e   : > { %v2182_v40 = vpop.f32.mrf.mxu2  ;;  %2824 = vmatpush.msra.mxu0 %v752_v50  ;;  %v5008_v50 = vld [vmem:[%s5480_s10 + $0xa28] sm:$0xff] }
 0x37f   : > { %v2183_v56 = vadd.f32 %v2182_v40, %v6611_v55  ;;  %2568 = vmatmul.f32.gmra.mxu1 %v5006_v26  ;;  %v5007_v55 = vld [vmem:[%s5480_s10 + $0xa20] sm:$0xff]  ;;  %v750_v40 = vld [vmem:[%s8639_s1 + $0x438] sm:$0xff] }
 0x380   : > { %v2295_v27 = vpop.f32.mrf.mxu3  ;;  %v7061_v15 = vpop.f32.mrf.mxu0  ;;  %2825 = vmatpush.msra.mxu0 %v750_v40 }
 0x381   : > { %v7064_v34 = vadd.f32 %v2295_v27, %v2183_v56  ;;  %v792_v56 = vld [vmem:[%s8639_s1 + $0x588] sm:$0xff] }
 0x382   : > { %2933 = vmatpush.msra.mxu1 %v792_v56  ;;  %2826 = vmatpush.msra.mxu0 %v748_v48  ;;  %v788_v48 = vld [vmem:[%s8639_s1 + $0x568] sm:$0xff] }
 0x383   : > { %8654 = vst [vmem:[#allocation12_spill] sm:$0xff] %v7064_v34  ;;  %2232 = vmatmul.f32.gmra.mxu2 %v565_v59  ;;  %2458 = vmatmul.f32.gmra.mxu0 %v5007_v55  ;;  %v790_v55 = vld [vmem:[%s8639_s1 + $0x578] sm:$0xff] }
 0x384   : > { %v7074_v26 = vpop.f32.mrf.mxu1  ;;  %2934 = vmatpush.msra.mxu1 %v790_v55 }
 0x385   : > { %2345 = vmatmul.f32.gmra.mxu3 %v566_v28  ;;  %v746_v28 = vld [vmem:[%s8639_s1 + $0x418] sm:$0xff] }
 0x386   : > { %v2185_v27 = vpop.f32.mrf.mxu2  ;;  %2827 = vmatpush.msra.mxu0 %v746_v28  ;;  %2935 = vmatpush.msra.mxu1 %v788_v48  ;;  %v786_v28 = vld [vmem:[%s8639_s1 + $0x558] sm:$0xff] }
 0x387   : > { %v2186_v59 = vadd.f32 %v2185_v27, %v6642_v6  ;;  %2571 = vmatmul.f32.gmra.mxu1 %v5008_v50  ;;  %v744_v6 = vld [vmem:[%s8639_s1 + $0x408] sm:$0xff]  ;;  %v578_v27 = vld [vmem:[%s5480_s10 + $0xad8] sm:$0xff]  ;;  %v5009_v50 = vld [vmem:[%s5480_s10 + $0xa80] sm:$0xff] }
 0x388   : > { %v2298_v40 = vpop.f32.mrf.mxu3  ;;  %v7090_v34 = vpop.f32.mrf.mxu0  ;;  %2828 = vmatpush.msra.mxu0 %v744_v6  ;;  %2936 = vmatpush.msra.mxu1 %v786_v28 }
 0x389   : > { %v7093_v56 = vadd.f32 %v2298_v40, %v2186_v59  ;;  %v838_v59 = vld [vmem:[%s8639_s1 + $0x6f8] sm:$0xff]  ;;  %v784_v40 = vld [vmem:[%s8639_s1 + $0x548] sm:$0xff] }
 0x38a   : > { %3039 = vmatpush.msrb.mxu2 %v838_v59  ;;  %2937 = vmatpush.msra.mxu1 %v784_v40  ;;  %v590_v40 = vld [vmem:[%s5480_s10 + $0xb38] sm:$0xff] }
 0x38b   : > { %8655 = vst [vmem:[#allocation13_spill] sm:$0xff] %v7093_v56  ;;  %2235 = vmatmul.f32.gmra.mxu2 %v577_v43  ;;  %2461 = vmatmul.f32.gmra.mxu0 %v5009_v50  ;;  %v870_v43 = vld [vmem:[%s8639_s1 + $0x7f8] sm:$0xff]  ;;  %v5010_v50 = vld [vmem:[%s5480_s10 + $0xa88] sm:$0xff]  ;;  %v589_v56 = vld [vmem:[%s5480_s10 + $0xb30] sm:$0xff] }
 0x38c   : > { %v7109_v55 = vpop.f32.mrf.mxu1  ;;  %3152 = vmatpush.msrb.mxu3 %v870_v43  ;;  %v780_v43 = vld [vmem:[%s8639_s1 + $0x528] sm:$0xff] }
 0x38d   : > { %2348 = vmatmul.f32.gmra.mxu3 %v578_v27  ;;  %v782_v27 = vld [vmem:[%s8639_s1 + $0x538] sm:$0xff] }
 0x38e   : > { %v2188_v6 = vpop.f32.mrf.mxu2  ;;  %2938 = vmatpush.msra.mxu1 %v782_v27 }
 0x38f   : > { %v2189_v48 = vadd.f32 %v2188_v6, %v6664_v14  ;;  %2574 = vmatmul.f32.gmra.mxu1 %v5010_v50  ;;  %v5011_v14 = vld [vmem:[%s5480_s10 + $0xae0] sm:$0xff]  ;;  %v778_v6 = vld [vmem:[%s8639_s1 + $0x518] sm:$0xff] }
 0x390   : > { %v2301_v59 = vpop.f32.mrf.mxu3  ;;  %v7122_v28 = vpop.f32.mrf.mxu0  ;;  %2939 = vmatpush.msra.mxu1 %v780_v43 }
 0x391   : > { %v7125_v63 = vadd.f32 %v2301_v59, %v2189_v48  ;;  %v776_v48 = vld [vmem:[%s8639_s1 + $0x508] sm:$0xff] }
 0x392   : > { %2940 = vmatpush.msra.mxu1 %v778_v6  ;;  %v5012_v59 = vld [vmem:[%s5480_s10 + $0xae8] sm:$0xff] }
 0x393   : > { %8656 = vst [vmem:[#allocation14_spill] sm:$0xff] %v7125_v63  ;;  %2238 = vmatmul.f32.gmra.mxu2 %v589_v56  ;;  %2464 = vmatmul.f32.gmra.mxu0 %v5011_v14  ;;  %v601_v63 = vld [vmem:[%s5480_s10 + $0xb90] sm:$0xff]  ;;  %v836_v6 = vld [vmem:[%s8639_s1 + $0x6e8] sm:$0xff] }
 0x394   : > { %v7135_v50 = vpop.f32.mrf.mxu1  ;;  %2941 = vmatpush.msra.mxu1 %v776_v48  ;;  %3040 = vmatpush.msrb.mxu2 %v836_v6  ;;  %v868_v48 = vld [vmem:[%s8639_s1 + $0x7e8] sm:$0xff]  ;;  %v5015_v6 = vld [vmem:[%s5480_s10 + $0xba0] sm:$0xff] }
 0x395   : > { %2351 = vmatmul.f32.gmra.mxu3 %v590_v40  ;;  %v5013_v40 = vld [vmem:[%s5480_s10 + $0xb40] sm:$0xff] }
 0x396   : > { %v2191_v27 = vpop.f32.mrf.mxu2  ;;  %3153 = vmatpush.msrb.mxu3 %v868_v48 }
 0x397   : > { %v2192_v56 = vadd.f32 %v2191_v27, %v6677_v18  ;;  %2577 = vmatmul.f32.gmra.mxu1 %v5012_v59 }
 0x398   : > { %v2304_v43 = vpop.f32.mrf.mxu3  ;;  %v7142_v14 = vpop.f32.mrf.mxu0 }
 0x399   : > { %v7145_v61 = vadd.f32 %v2304_v43, %v2192_v56  ;;  %v5014_v56 = vld [vmem:[%s5480_s10 + $0xb48] sm:$0xff] }
 0x39b   : > { %8657 = vst [vmem:[#allocation15_spill] sm:$0xff] %v7145_v61  ;;  %2241 = vmatmul.f32.gmra.mxu2 %v601_v63  ;;  %2467 = vmatmul.f32.gmra.mxu0 %v5013_v40  ;;  %v613_v40 = vld [vmem:[%s5480_s10 + $0xbf0] sm:$0xff] }
 0x39c   : > { %v7152_v18 = vpop.f32.mrf.mxu1 }
 0x39d   : > { %2354 = vmatmul.f32.gmra.mxu3 %v602_v22  ;;  %v614_v22 = vld [vmem:[%s5480_s10 + $0xbf8] sm:$0xff] }
 0x39e   : > { %v2194_v27 = vpop.f32.mrf.mxu2 }
 0x39f   : > { %v2195_v63 = vadd.f32 %v2194_v27, %v6687_v1  ;;  %2580 = vmatmul.f32.gmra.mxu1 %v5014_v56  ;;  %v5016_v27 = vld [vmem:[%s5480_s10 + $0xba8] sm:$0xff] }
 0x3a0   : > { %v2307_v59 = vpop.f32.mrf.mxu3  ;;  %v7159_v43 = vpop.f32.mrf.mxu0 }
 0x3a1   : > { %v7162_v61 = vadd.f32 %v2307_v59, %v2195_v63  ;;  %v5017_v59 = vld [vmem:[%s5480_s10 + $0x10] sm:$0xff] }
 0x3a3   : > { %8658 = vst [vmem:[#allocation16_spill] sm:$0xff] %v7162_v61  ;;  %2244 = vmatmul.f32.gmra.mxu2 %v613_v40  ;;  %2470 = vmatmul.f32.gmra.mxu0 %v5015_v6  ;;  %v5018_v40 = vld [vmem:[%s5480_s10 + $0x20] sm:$0xff] }
 0x3a4   : > { %v7166_v39 = vpop.f32.mrf.mxu1 }
 0x3a5   : > { %2357 = vmatmul.f32.gmra.mxu3 %v614_v22  ;;  %v834_v22 = vld [vmem:[%s8639_s1 + $0x6d8] sm:$0xff] }
 0x3a6   : > { %v2197_v48 = vpop.f32.mrf.mxu2  ;;  %3041 = vmatpush.msrb.mxu2 %v834_v22  ;;  %v5021_v22 = vld [vmem:[%s5480_s10 + $0x70] sm:$0xff] }
 0x3a7   : > { %v2198_v1 = vadd.f32 %v2197_v48, %v6696_v19  ;;  %2583 = vmatmul.f32.gmra.mxu1 %v5016_v27  ;;  %v5019_v19 = vld [vmem:[%s5480_s10 + $0x18] sm:$0xff] }
 0x3a8   : > { %v2310_v56 = vpop.f32.mrf.mxu3  ;;  %v7170_v23 = vpop.f32.mrf.mxu0  ;;  %v866_v48 = vld [vmem:[%s8639_s1 + $0x7d8] sm:$0xff] }
 0x3a9   : > { %v7172_v63 = vadd.f32 %v2310_v56, %v2198_v1  ;;  %3154 = vmatpush.msrb.mxu3 %v866_v48  ;;  %v5020_v56 = vld [vmem:[%s5480_s10 + $0x28] sm:$0xff] }
 0x3ab   : > { %8659 = vst [vmem:[#allocation17_spill] sm:$0xff] %v7172_v63  ;;  %2603 = vmatmul.f32.vlgmr.msra.gmra.mxu2 %v5017_v59  ;;  %2829 = vmatmul.f32.vlgmr.msra.gmra.mxu0 %v5018_v40 }
 0x3ac   : > { %v7179_v6 = vpop.f32.mrf.mxu1 }
 0x3ad   : > { %2716 = vmatmul.f32.vlgmr.msra.gmra.mxu3 %v5019_v19  ;;  %v5022_v19 = vld [vmem:[%s5480_s10 + $0x80] sm:$0xff] }
 0x3ae   : > { %v2200_v1 = vpop.f32.mrf.mxu2 }
 0x3af   : > { %v2201_v27 = vadd.f32 %v2200_v1, %v6706_v12  ;;  %2942 = vmatmul.f32.vlgmr.msra.gmra.mxu1 %v5020_v56  ;;  %v5024_v1 = vld [vmem:[%s5480_s10 + $0x88] sm:$0xff] }
 0x3b0   : > { %v2313_v59 = vpop.f32.mrf.mxu3  ;;  %v7187_v40 = vpop.f32.mrf.mxu0 }
 0x3b1   : > { %v7189_v63 = vadd.f32 %v2313_v59, %v2201_v27  ;;  %v5025_v59 = vld [vmem:[%s5480_s10 + $0xd0] sm:$0xff] }
 0x3b3   : > { %8660 = vst [vmem:[#allocation18_spill] sm:$0xff] %v7189_v63  ;;  %2606 = vmatmul.f32.gmra.mxu2 %v5021_v22  ;;  %2832 = vmatmul.f32.gmra.mxu0 %v5022_v19  ;;  %v5026_v22 = vld [vmem:[%s5480_s10 + $0xe0] sm:$0xff] }
 0x3b4   : > { %v7193_v61 = vpop.f32.mrf.mxu1 }
 0x3b5   : > { %2719 = vmatmul.f32.gmra.mxu3 %v5023_v8  ;;  %v832_v8 = vld [vmem:[%s8639_s1 + $0x6c8] sm:$0xff] }
 0x3b6   : > { %v2203_v48 = vpop.f32.mrf.mxu2  ;;  %3042 = vmatpush.msrb.mxu2 %v832_v8  ;;  %v5029_v8 = vld [vmem:[%s5480_s10 + $0x130] sm:$0xff] }
 0x3b7   : > { %v2204_v12 = vadd.f32 %v2203_v48, %v6716_v62  ;;  %2945 = vmatmul.f32.gmra.mxu1 %v5024_v1  ;;  %v5027_v62 = vld [vmem:[%s5480_s10 + $0xd8] sm:$0xff]  ;;  %v864_v48 = vld [vmem:[%s8639_s1 + $0x7c8] sm:$0xff] }
 0x3b8   : > { %v2316_v56 = vpop.f32.mrf.mxu3  ;;  %v7198_v16 = vpop.f32.mrf.mxu0  ;;  %3155 = vmatpush.msrb.mxu3 %v864_v48 }
 0x3b9   : > { %v7200_v27 = vadd.f32 %v2316_v56, %v2204_v12  ;;  %v5028_v56 = vld [vmem:[%s5480_s10 + $0xe8] sm:$0xff] }
 0x3bb   : > { %8661 = vst [vmem:[#allocation19_spill] sm:$0xff] %v7200_v27  ;;  %2609 = vmatmul.f32.gmra.mxu2 %v5025_v59  ;;  %2835 = vmatmul.f32.gmra.mxu0 %v5026_v22 }
 0x3bc   : > { %v7207_v19 = vpop.f32.mrf.mxu1 }
 0x3bd   : > { %2722 = vmatmul.f32.gmra.mxu3 %v5027_v62  ;;  %v5030_v62 = vld [vmem:[%s5480_s10 + $0x140] sm:$0xff] }
 0x3be   : > { %v2206_v12 = vpop.f32.mrf.mxu2 }
 0x3bf   : > { %v2207_v1 = vadd.f32 %v2206_v12, %v6726_v33  ;;  %2948 = vmatmul.f32.gmra.mxu1 %v5028_v56  ;;  %v5032_v12 = vld [vmem:[%s5480_s10 + $0x148] sm:$0xff] }
 0x3c0   : > { %v2319_v59 = vpop.f32.mrf.mxu3  ;;  %v7215_v22 = vpop.f32.mrf.mxu0 }
 0x3c1   : > { %v7217_v27 = vadd.f32 %v2319_v59, %v2207_v1  ;;  %v5033_v59 = vld [vmem:[%s5480_s10 + $0x190] sm:$0xff] }
 0x3c3   : > { %8662 = vst [vmem:[#allocation20_spill] sm:$0xff] %v7217_v27  ;;  %2612 = vmatmul.f32.gmra.mxu2 %v5029_v8  ;;  %2838 = vmatmul.f32.gmra.mxu0 %v5030_v62  ;;  %v5034_v8 = vld [vmem:[%s5480_s10 + $0x1a0] sm:$0xff] }
 0x3c4   : > { %v7221_v63 = vpop.f32.mrf.mxu1 }
 0x3c5   : > { %2725 = vmatmul.f32.gmra.mxu3 %v5031_v54  ;;  %v830_v54 = vld [vmem:[%s8639_s1 + $0x6b8] sm:$0xff] }
 0x3c6   : > { %v2209_v48 = vpop.f32.mrf.mxu2  ;;  %3043 = vmatpush.msrb.mxu2 %v830_v54  ;;  %v5037_v54 = vld [vmem:[%s5480_s10 + $0x1f0] sm:$0xff] }
 0x3c7   : > { %v2210_v33 = vadd.f32 %v2209_v48, %v6736_v20  ;;  %2951 = vmatmul.f32.gmra.mxu1 %v5032_v12  ;;  %v5035_v20 = vld [vmem:[%s5480_s10 + $0x198] sm:$0xff] }
 0x3c8   : > { %v2322_v56 = vpop.f32.mrf.mxu3  ;;  %v7226_v49 = vpop.f32.mrf.mxu0  ;;  %v862_v48 = vld [vmem:[%s8639_s1 + $0x7b8] sm:$0xff] }
 0x3c9   : > { %v7228_v1 = vadd.f32 %v2322_v56, %v2210_v33  ;;  %3156 = vmatpush.msrb.mxu3 %v862_v48  ;;  %v5036_v56 = vld [vmem:[%s5480_s10 + $0x1a8] sm:$0xff] }
 0x3cb   : > { %8663 = vst [vmem:[#allocation21_spill] sm:$0xff] %v7228_v1  ;;  %2615 = vmatmul.f32.gmra.mxu2 %v5033_v59  ;;  %2841 = vmatmul.f32.gmra.mxu0 %v5034_v8 }
 0x3cc   : > { %v7235_v62 = vpop.f32.mrf.mxu1 }
 0x3cd   : > { %8664 = vst [vmem:[#allocation22_spill] sm:$0xff] %v7235_v62  ;;  %2728 = vmatmul.f32.gmra.mxu3 %v5035_v20  ;;  %v5038_v20 = vld [vmem:[%s5480_s10 + $0x200] sm:$0xff]  ;;  %v5039_v62 = vld [vmem:[%s5480_s10 + $0x1f8] sm:$0xff] }
 0x3ce   : > { %v2212_v33 = vpop.f32.mrf.mxu2 }
 0x3cf   : > { %v2213_v12 = vadd.f32 %v2212_v33, %v6746_v2  ;;  %2954 = vmatmul.f32.gmra.mxu1 %v5036_v56  ;;  %v5040_v33 = vld [vmem:[%s5480_s10 + $0x208] sm:$0xff] }
 0x3d0   : > { %v2325_v59 = vpop.f32.mrf.mxu3  ;;  %v7243_v8 = vpop.f32.mrf.mxu0 }
 0x3d1   : > { %8665 = vst [vmem:[#allocation23_spill] sm:$0xff] %v7243_v8  ;;  %v7245_v1 = vadd.f32 %v2325_v59, %v2213_v12  ;;  %v5041_v59 = vld [vmem:[%s5480_s10 + $0x250] sm:$0xff] }
 0x3d3   : > { %8666 = vst [vmem:[#allocation24_spill] sm:$0xff] %v7245_v1  ;;  %2618 = vmatmul.f32.gmra.mxu2 %v5037_v54  ;;  %2844 = vmatmul.f32.gmra.mxu0 %v5038_v20  ;;  %v5042_v54 = vld [vmem:[%s5480_s10 + $0x260] sm:$0xff] }
 0x3d4   : > { %v7249_v27 = vpop.f32.mrf.mxu1 }
 0x3d5   : > { %2731 = vmatmul.f32.gmra.mxu3 %v5039_v62  ;;  %v828_v62 = vld [vmem:[%s8639_s1 + $0x6a8] sm:$0xff] }
 0x3d6   : > { %v2215_v48 = vpop.f32.mrf.mxu2  ;;  %3044 = vmatpush.msrb.mxu2 %v828_v62  ;;  %v5045_v62 = vld [vmem:[%s5480_s10 + $0x2b0] sm:$0xff] }
 0x3d7   : > { %v2216_v2 = vadd.f32 %v2215_v48, %v6756_v45  ;;  %2957 = vmatmul.f32.gmra.mxu1 %v5040_v33  ;;  %v5043_v45 = vld [vmem:[%s5480_s10 + $0x258] sm:$0xff]  ;;  %v860_v48 = vld [vmem:[%s8639_s1 + $0x7a8] sm:$0xff] }
 0x3d8   : > { %v2328_v56 = vpop.f32.mrf.mxu3  ;;  %v7254_v8 = vpop.f32.mrf.mxu0  ;;  %3157 = vmatpush.msrb.mxu3 %v860_v48 }
 0x3d9   : > { %v7256_v12 = vadd.f32 %v2328_v56, %v2216_v2  ;;  %v5044_v56 = vld [vmem:[%s5480_s10 + $0x268] sm:$0xff] }
 0x3db   : > { %8667 = vst [vmem:[#allocation25_spill] sm:$0xff] %v7256_v12  ;;  %2621 = vmatmul.f32.gmra.mxu2 %v5041_v59  ;;  %2847 = vmatmul.f32.gmra.mxu0 %v5042_v54 }
 0x3dc   : > { %v7263_v20 = vpop.f32.mrf.mxu1 }
 0x3dd   : > { %8668 = vst [vmem:[#allocation26_spill] sm:$0xff] %v7263_v20  ;;  %2734 = vmatmul.f32.gmra.mxu3 %v5043_v45  ;;  %v5046_v45 = vld [vmem:[%s5480_s10 + $0x2c0] sm:$0xff]  ;;  %v5047_v20 = vld [vmem:[%s5480_s10 + $0x2b8] sm:$0xff] }
 0x3de   : > { %v2218_v2 = vpop.f32.mrf.mxu2 }
 0x3df   : > { %v2219_v33 = vadd.f32 %v2218_v2, %v6766_v36  ;;  %2960 = vmatmul.f32.gmra.mxu1 %v5044_v56  ;;  %v5048_v2 = vld [vmem:[%s5480_s10 + $0x2c8] sm:$0xff] }
 0x3e0   : > { %v2331_v59 = vpop.f32.mrf.mxu3  ;;  %v7271_v54 = vpop.f32.mrf.mxu0 }
 0x3e1   : > { %8669 = vst [vmem:[#allocation27_spill] sm:$0xff] %v7271_v54  ;;  %v7273_v12 = vadd.f32 %v2331_v59, %v2219_v33  ;;  %v5049_v59 = vld [vmem:[%s5480_s10 + $0x310] sm:$0xff] }
 0x3e3   : > { %8670 = vst [vmem:[#allocation28_spill] sm:$0xff] %v7273_v12  ;;  %2624 = vmatmul.f32.gmra.mxu2 %v5045_v62  ;;  %2850 = vmatmul.f32.gmra.mxu0 %v5046_v45  ;;  %v5050_v62 = vld [vmem:[%s5480_s10 + $0x320] sm:$0xff] }
 0x3e4   : > { %v7277_v1 = vpop.f32.mrf.mxu1 }
 0x3e5   : > { %2737 = vmatmul.f32.gmra.mxu3 %v5047_v20  ;;  %v826_v20 = vld [vmem:[%s8639_s1 + $0x698] sm:$0xff] }
 0x3e6   : > { %v2221_v48 = vpop.f32.mrf.mxu2  ;;  %3045 = vmatpush.msrb.mxu2 %v826_v20  ;;  %v5053_v20 = vld [vmem:[%s5480_s10 + $0x370] sm:$0xff] }
 0x3e7   : > { %v2222_v36 = vadd.f32 %v2221_v48, %v6776_v11  ;;  %2963 = vmatmul.f32.gmra.mxu1 %v5048_v2  ;;  %v5051_v11 = vld [vmem:[%s5480_s10 + $0x318] sm:$0xff] }
 0x3e8   : > { %v2334_v56 = vpop.f32.mrf.mxu3  ;;  %v7282_v54 = vpop.f32.mrf.mxu0  ;;  %v858_v48 = vld [vmem:[%s8639_s1 + $0x798] sm:$0xff] }
 0x3e9   : > { %v7284_v33 = vadd.f32 %v2334_v56, %v2222_v36  ;;  %3158 = vmatpush.msrb.mxu3 %v858_v48  ;;  %v5052_v56 = vld [vmem:[%s5480_s10 + $0x328] sm:$0xff] }
 0x3eb   : > { %8671 = vst [vmem:[#allocation29_spill] sm:$0xff] %v7284_v33  ;;  %2627 = vmatmul.f32.gmra.mxu2 %v5049_v59  ;;  %2853 = vmatmul.f32.gmra.mxu0 %v5050_v62 }
 0x3ec   : > { %v7291_v45 = vpop.f32.mrf.mxu1 }
 0x3ed   : > { %8672 = vst [vmem:[#allocation30_spill] sm:$0xff] %v7291_v45  ;;  %2740 = vmatmul.f32.gmra.mxu3 %v5051_v11  ;;  %v5054_v11 = vld [vmem:[%s5480_s10 + $0x380] sm:$0xff]  ;;  %v5055_v45 = vld [vmem:[%s5480_s10 + $0x378] sm:$0xff] }
 0x3ee   : > { %v2224_v36 = vpop.f32.mrf.mxu2 }
 0x3ef   : > { %v2225_v2 = vadd.f32 %v2224_v36, %v6786_v5  ;;  %2966 = vmatmul.f32.gmra.mxu1 %v5052_v56  ;;  %v5056_v36 = vld [vmem:[%s5480_s10 + $0x388] sm:$0xff] }
 0x3f0   : > { %v2337_v59 = vpop.f32.mrf.mxu3  ;;  %v7299_v62 = vpop.f32.mrf.mxu0 }
 0x3f1   : > { %8673 = vst [vmem:[#allocation31_spill] sm:$0xff] %v7299_v62  ;;  %v7301_v33 = vadd.f32 %v2337_v59, %v2225_v2  ;;  %v5057_v59 = vld [vmem:[%s5480_s10 + $0x3d0] sm:$0xff] }
 0x3f3   : > { %8674 = vst [vmem:[#allocation32_spill] sm:$0xff] %v7301_v33  ;;  %2630 = vmatmul.f32.gmra.mxu2 %v5053_v20  ;;  %2856 = vmatmul.f32.gmra.mxu0 %v5054_v11  ;;  %v5058_v20 = vld [vmem:[%s5480_s10 + $0x3e0] sm:$0xff] }
 0x3f4   : > { %v7305_v12 = vpop.f32.mrf.mxu1 }
 0x3f5   : > { %2743 = vmatmul.f32.gmra.mxu3 %v5055_v45  ;;  %v824_v45 = vld [vmem:[%s8639_s1 + $0x688] sm:$0xff] }
 0x3f6   : > { %v2227_v48 = vpop.f32.mrf.mxu2  ;;  %3046 = vmatpush.msrb.mxu2 %v824_v45  ;;  %v5061_v45 = vld [vmem:[%s5480_s10 + $0x430] sm:$0xff] }
 0x3f7   : > { %v2228_v5 = vadd.f32 %v2227_v48, %v6796_v44  ;;  %2969 = vmatmul.f32.gmra.mxu1 %v5056_v36  ;;  %v5059_v44 = vld [vmem:[%s5480_s10 + $0x3d8] sm:$0xff]  ;;  %v856_v48 = vld [vmem:[%s8639_s1 + $0x788] sm:$0xff] }
 0x3f8   : > { %v2340_v56 = vpop.f32.mrf.mxu3  ;;  %v7310_v62 = vpop.f32.mrf.mxu0  ;;  %3159 = vmatpush.msrb.mxu3 %v856_v48 }
 0x3f9   : > { %v7312_v2 = vadd.f32 %v2340_v56, %v2228_v5  ;;  %v5060_v56 = vld [vmem:[%s5480_s10 + $0x3e8] sm:$0xff] }
 0x3fb   : > { %8675 = vst [vmem:[#allocation33_spill] sm:$0xff] %v7312_v2  ;;  %2633 = vmatmul.f32.gmra.mxu2 %v5057_v59  ;;  %2859 = vmatmul.f32.gmra.mxu0 %v5058_v20 }
 0x3fc   : > { %v7319_v11 = vpop.f32.mrf.mxu1 }
 0x3fd   : > { %8676 = vst [vmem:[#allocation34_spill] sm:$0xff] %v7319_v11  ;;  %2746 = vmatmul.f32.gmra.mxu3 %v5059_v44  ;;  %v5062_v44 = vld [vmem:[%s5480_s10 + $0x440] sm:$0xff]  ;;  %v5063_v11 = vld [vmem:[%s5480_s10 + $0x438] sm:$0xff] }
 0x3fe   : > { %v2230_v5 = vpop.f32.mrf.mxu2 }
 0x3ff   : > { %v2231_v36 = vadd.f32 %v2230_v5, %v6806_v4  ;;  %2972 = vmatmul.f32.gmra.mxu1 %v5060_v56  ;;  %v5064_v5 = vld [vmem:[%s5480_s10 + $0x448] sm:$0xff] }
 0x400   : > { %v2343_v59 = vpop.f32.mrf.mxu3  ;;  %v7327_v20 = vpop.f32.mrf.mxu0 }
 0x401   : > { %8677 = vst [vmem:[#allocation35_spill] sm:$0xff] %v7327_v20  ;;  %v7329_v2 = vadd.f32 %v2343_v59, %v2231_v36  ;;  %v5065_v59 = vld [vmem:[%s5480_s10 + $0x490] sm:$0xff] }
 0x403   : > { %8678 = vst [vmem:[#allocation36_spill] sm:$0xff] %v7329_v2  ;;  %2636 = vmatmul.f32.gmra.mxu2 %v5061_v45  ;;  %2862 = vmatmul.f32.gmra.mxu0 %v5062_v44  ;;  %v5066_v45 = vld [vmem:[%s5480_s10 + $0x4a0] sm:$0xff]  ;;  %v902_v2 = vld [vmem:[%s8639_s1 + $0x8f8] sm:$0xff] }
 0x404   : > { %v7333_v33 = vpop.f32.mrf.mxu1  ;;  %3265 = vmatpush.msrb.mxu0 %v902_v2  ;;  %v5073_v2 = vld [vmem:[%s5480_s10 + $0x550] sm:$0xff] }
 0x405   : > { %2749 = vmatmul.f32.gmra.mxu3 %v5063_v11  ;;  %v822_v11 = vld [vmem:[%s8639_s1 + $0x678] sm:$0xff] }
 0x406   : > { %v2233_v48 = vpop.f32.mrf.mxu2  ;;  %3047 = vmatpush.msrb.mxu2 %v822_v11  ;;  %v5069_v11 = vld [vmem:[%s5480_s10 + $0x4f0] sm:$0xff] }
 0x407   : > { %v2234_v4 = vadd.f32 %v2233_v48, %v6816_v21  ;;  %2975 = vmatmul.f32.gmra.mxu1 %v5064_v5  ;;  %v5067_v21 = vld [vmem:[%s5480_s10 + $0x498] sm:$0xff] }
 0x408   : > { %v2346_v56 = vpop.f32.mrf.mxu3  ;;  %v7338_v20 = vpop.f32.mrf.mxu0  ;;  %v854_v48 = vld [vmem:[%s8639_s1 + $0x778] sm:$0xff] }
 0x409   : > { %v7340_v36 = vadd.f32 %v2346_v56, %v2234_v4  ;;  %3160 = vmatpush.msrb.mxu3 %v854_v48  ;;  %v5068_v56 = vld [vmem:[%s5480_s10 + $0x4a8] sm:$0xff] }
 0x40b   : > { %8679 = vst [vmem:[#allocation37_spill] sm:$0xff] %v7340_v36  ;;  %2639 = vmatmul.f32.gmra.mxu2 %v5065_v59  ;;  %2865 = vmatmul.f32.gmra.mxu0 %v5066_v45 }
 0x40c   : > { %v7347_v44 = vpop.f32.mrf.mxu1 }
 0x40d   : > { %2752 = vmatmul.f32.gmra.mxu3 %v5067_v21  ;;  %v5070_v21 = vld [vmem:[%s5480_s10 + $0x500] sm:$0xff] }
 0x40e   : > { %v2236_v4 = vpop.f32.mrf.mxu2 }
 0x40f   : > { %v2237_v5 = vadd.f32 %v2236_v4, %v6829_v47  ;;  %2978 = vmatmul.f32.gmra.mxu1 %v5068_v56  ;;  %v5071_v47 = vld [vmem:[%s5480_s10 + $0x4f8] sm:$0xff] }
 0x410   : > { %v2349_v59 = vpop.f32.mrf.mxu3  ;;  %v7355_v45 = vpop.f32.mrf.mxu0  ;;  %v934_v4 = vld [vmem:[%s8639_s1 + $0x9f8] sm:$0xff] }
 0x411   : > { %8680 = vst [vmem:[#allocation38_spill] sm:$0xff] %v7355_v45  ;;  %v7357_v36 = vadd.f32 %v2349_v59, %v2237_v5  ;;  %3378 = vmatpush.msrb.mxu1 %v934_v4  ;;  %v5072_v59 = vld [vmem:[%s5480_s10 + $0x508] sm:$0xff]  ;;  %v5086_v45 = vld [vmem:[%s5480_s10 + $0x670] sm:$0xff] }
 0x413   : > { %8681 = vst [vmem:[#allocation39_spill] sm:$0xff] %v7357_v36  ;;  %2642 = vmatmul.f32.gmra.mxu2 %v5069_v11  ;;  %2868 = vmatmul.f32.gmra.mxu0 %v5070_v21 }
 0x414   : > { %v7364_v48 = vpop.f32.mrf.mxu1 }
 0x415   : > { %8682 = vst [vmem:[#allocation40_spill] sm:$0xff] %v7364_v48  ;;  %2755 = vmatmul.f32.gmra.mxu3 %v5071_v47  ;;  %v5074_v47 = vld [vmem:[%s5480_s10 + $0x560] sm:$0xff]  ;;  %v820_v48 = vld [vmem:[%s8639_s1 + $0x668] sm:$0xff] }
 0x416   : > { %v2239_v5 = vpop.f32.mrf.mxu2  ;;  %3048 = vmatpush.msrb.mxu2 %v820_v48  ;;  %v5077_v48 = vld [vmem:[%s5480_s10 + $0x5b0] sm:$0xff] }
 0x417   : > { %v2240_v56 = vadd.f32 %v2239_v5, %v6842_v17  ;;  %2981 = vmatmul.f32.gmra.mxu1 %v5072_v59  ;;  %v5075_v17 = vld [vmem:[%s5480_s10 + $0x558] sm:$0xff]  ;;  %v852_v5 = vld [vmem:[%s8639_s1 + $0x768] sm:$0xff] }
 0x418   : > { %v2352_v11 = vpop.f32.mrf.mxu3  ;;  %v7372_v21 = vpop.f32.mrf.mxu0  ;;  %3161 = vmatpush.msrb.mxu3 %v852_v5 }
 0x419   : > { %8683 = vst [vmem:[#allocation41_spill] sm:$0xff] %v7372_v21  ;;  %v7374_v36 = vadd.f32 %v2352_v11, %v2240_v56  ;;  %v5076_v11 = vld [vmem:[%s5480_s10 + $0x568] sm:$0xff] }
 0x41b   : > { %8684 = vst [vmem:[#allocation42_spill] sm:$0xff] %v7374_v36  ;;  %2645 = vmatmul.f32.gmra.mxu2 %v5073_v2  ;;  %2871 = vmatmul.f32.gmra.mxu0 %v5074_v47 }
 0x41c   : > { %v7381_v4 = vpop.f32.mrf.mxu1 }
 0x41d   : > { %8685 = vst [vmem:[#allocation43_spill] sm:$0xff] %v7381_v4  ;;  %2758 = vmatmul.f32.gmra.mxu3 %v5075_v17  ;;  %v5078_v17 = vld [vmem:[%s5480_s10 + $0x5c0] sm:$0xff]  ;;  %v900_v4 = vld [vmem:[%s8639_s1 + $0x8e8] sm:$0xff] }
 0x41e   : > { %v2242_v56 = vpop.f32.mrf.mxu2  ;;  %3266 = vmatpush.msrb.mxu0 %v900_v4 }
 0x41f   : > { %v2243_v59 = vadd.f32 %v2242_v56, %v6855_v51  ;;  %2984 = vmatmul.f32.gmra.mxu1 %v5076_v11  ;;  %v5079_v51 = vld [vmem:[%s8640_s2] sm:$0x3]  ;;  %v932_v11 = vld [vmem:[%s8639_s1 + $0x9e8] sm:$0xff] }
 0x420   : > { %v2355_v2 = vpop.f32.mrf.mxu3  ;;  %v7389_v47 = vpop.f32.mrf.mxu0  ;;  %v7403_v56 = vperm.slane %v5079_v51, 1  ;;  %3379 = vmatpush.msrb.mxu1 %v932_v11  ;;  %v818_v11 = vld [vmem:[%s8639_s1 + $0x658] sm:$0xff] }
 0x421   : > { %8686 = vst [vmem:[#allocation44_spill] sm:$0xff] %v7389_v47  ;;  %v7391_v36 = vadd.f32 %v2355_v2, %v2243_v59  ;;  %v5080_v59 = vld [vmem:[%s5480_s10 + $0x5b8] sm:$0xff]  ;;  %v5083_v47 = vld [vmem:[%s5480_s10 + $0x620] sm:$0xff]  ;;  %3049 = vmatpush.msrb.mxu2 %v818_v11 }
 0x422   : > { %v2382_v11 = vadd.f32 %v6879_v24, %v7403_v56  ;;  %v5088_v24 = vld [vmem:[%s5480_s10 + $0x678] sm:$0xff] }
 0x423   : > { %8687 = vst [vmem:[#allocation45_spill] sm:$0xff] %v7391_v36  ;;  %2648 = vmatmul.f32.gmra.mxu2 %v5077_v48  ;;  %2874 = vmatmul.f32.gmra.mxu0 %v5078_v17  ;;  %v5081_v17 = vld [vmem:[%s5480_s10 + $0x5c8] sm:$0xff] }
 0x424   : > { %v7398_v5 = vpop.f32.mrf.mxu1 }
 0x425   : > { %8688 = vst [vmem:[#allocation46_spill] sm:$0xff] %v7398_v5  ;;  %2761 = vmatmul.f32.gmra.mxu3 %v5080_v59  ;;  %v2379_v5 = vadd.f32 %v6862_v60, %v7403_v56  ;;  %v5082_v59 = vld [vmem:[%s5480_s10 + $0x610] sm:$0xff]  ;;  %v850_v60 = vld [vmem:[%s8639_s1 + $0x758] sm:$0xff] }
 0x426   : > { %v2245_v2 = vpop.f32.mrf.mxu2  ;;  %3162 = vmatpush.msrb.mxu3 %v850_v60  ;;  %v2495_v60 = vadd.f32 %v6889_v46, %v2382_v11  ;;  %v2385_v46 = vadd.f32 %v6896_v41, %v7403_v56  ;;  %v5092_v41 = vld [vmem:[%s5480_s10 + $0x6d8] sm:$0xff] }
 0x427   : > { %v2246_v48 = vadd.f32 %v2245_v2, %v6872_v30  ;;  %2987 = vmatmul.f32.gmra.mxu1 %v5081_v17  ;;  %v2492_v2 = vadd.f32 %v6870_v31, %v2379_v5  ;;  %v5084_v17 = vld [vmem:[%s5480_s10 + $0x618] sm:$0xff]  ;;  %v5087_v31 = vld [vmem:[%s5480_s10 + $0x680] sm:$0xff] }
 0x428   : > { %v2358_v4 = vpop.f32.mrf.mxu3  ;;  %v2830_v36 = vpop.f32.mrf.mxu0 }
 0x429   : > { %v7413_v51 = vadd.f32 %v2358_v4, %v2246_v48 }
 0x42b   : > { %8689 = vst [vmem:[#allocation47_spill] sm:$0xff] %v7413_v51  ;;  %2651 = vmatmul.f32.gmra.mxu2 %v5082_v59  ;;  %2877 = vmatmul.f32.gmra.mxu0 %v5083_v47  ;;  %v5085_v47 = vld [vmem:[%s5480_s10 + $0x628] sm:$0xff] }
 0x42c   : > { %v2943_v30 = vpop.f32.mrf.mxu1 }
 0x42d   : > { %2764 = vmatmul.f32.gmra.mxu3 %v5084_v17  ;;  %v898_v17 = vld [vmem:[%s8639_s1 + $0x8d8] sm:$0xff] }
 0x42e   : > { %v2604_v48 = vpop.f32.mrf.mxu2  ;;  %3267 = vmatpush.msrb.mxu0 %v898_v17  ;;  %v816_v17 = vld [vmem:[%s8639_s1 + $0x648] sm:$0xff] }
 0x42f   : > { %v2605_v4 = vadd.f32 %v2604_v48, %v2492_v2  ;;  %2990 = vmatmul.f32.gmra.mxu1 %v5085_v47  ;;  %3050 = vmatpush.msrb.mxu2 %v816_v17 }
 0x430   : > { %v2717_v59 = vpop.f32.mrf.mxu3  ;;  %v2833_v51 = vpop.f32.mrf.mxu0 }
 0x431   : > { %v2718_v21 = vadd.f32 %v2717_v59, %v2605_v4 }
 0x433   : > { %2654 = vmatmul.f32.gmra.mxu2 %v5086_v45  ;;  %2880 = vmatmul.f32.gmra.mxu0 %v5087_v31  ;;  %v2831_v5 = vadd.f32 %v2830_v36, %v2718_v21  ;;  %v930_v45 = vld [vmem:[%s8639_s1 + $0x9d8] sm:$0xff]  ;;  %v5089_v21 = vld [vmem:[%s5480_s10 + $0x688] sm:$0xff]  ;;  %v5091_v31 = vld [vmem:[%s5480_s10 + $0x6e0] sm:$0xff] }
 0x434   : > { %v2946_v2 = vpop.f32.mrf.mxu1  ;;  %3380 = vmatpush.msrb.mxu1 %v930_v45 }
 0x435   : > { %v7434_v48 = vadd.f32 %v2943_v30, %v2831_v5  ;;  %2767 = vmatmul.f32.gmra.mxu3 %v5088_v24  ;;  %v5090_v30 = vld [vmem:[%s5480_s10 + $0x6d0] sm:$0xff]  ;;  %v2498_v24 = vadd.f32 %v6906_v37, %v2385_v46  ;;  %v2388_v37 = vadd.f32 %v6913_v0, %v7403_v56  ;;  %v5096_v0 = vld [vmem:[%s5480_s10 + $0x738] sm:$0xff] }
 0x436   : > { %v2607_v4 = vpop.f32.mrf.mxu2 }
 0x437   : > { %v2608_v36 = vadd.f32 %v2607_v4, %v2495_v60  ;;  %2993 = vmatmul.f32.gmra.mxu1 %v5089_v21  ;;  %v848_v4 = vld [vmem:[%s8639_s1 + $0x748] sm:$0xff] }
 0x438   : > { %v2720_v47 = vpop.f32.mrf.mxu3  ;;  %v2836_v59 = vpop.f32.mrf.mxu0  ;;  %3163 = vmatpush.msrb.mxu3 %v848_v4  ;;  %v5093_v21 = vld [vmem:[%s5480_s10 + $0x6e8] sm:$0xff] }
 0x439   : > { %v2721_v11 = vadd.f32 %v2720_v47, %v2608_v36  ;;  %v928_v4 = vld [vmem:[%s8639_s1 + $0x9c8] sm:$0xff] }
 0x43a   : > { %3381 = vmatpush.msrb.mxu1 %v928_v4 }
 0x43b   : > { %2657 = vmatmul.f32.gmra.mxu2 %v5090_v30  ;;  %2883 = vmatmul.f32.gmra.mxu0 %v5091_v31  ;;  %v2834_v5 = vadd.f32 %v2833_v51, %v2721_v11  ;;  %v5095_v30 = vld [vmem:[%s5480_s10 + $0x740] sm:$0xff] }
 0x43c   : > { %v2949_v60 = vpop.f32.mrf.mxu1 }
 0x43d   : > { %v7449_v45 = vadd.f32 %v2946_v2, %v2834_v5  ;;  %2770 = vmatmul.f32.gmra.mxu3 %v5092_v41  ;;  %v5094_v2 = vld [vmem:[%s5480_s10 + $0x730] sm:$0xff]  ;;  %v896_v5 = vld [vmem:[%s8639_s1 + $0x8c8] sm:$0xff] }
 0x43e   : > { %v2610_v36 = vpop.f32.mrf.mxu2  ;;  %3268 = vmatpush.msrb.mxu0 %v896_v5 }
 0x43f   : > { %v2611_v51 = vadd.f32 %v2610_v36, %v2498_v24  ;;  %2996 = vmatmul.f32.gmra.mxu1 %v5093_v21  ;;  %v2501_v24 = vadd.f32 %v6923_v25, %v2388_v37  ;;  %v2391_v25 = vadd.f32 %v6930_v7, %v7403_v56  ;;  %v5100_v7 = vld [vmem:[%s5480_s10 + $0x798] sm:$0xff] }
 0x440   : > { %v2723_v47 = vpop.f32.mrf.mxu3  ;;  %v2839_v11 = vpop.f32.mrf.mxu0 }
 0x441   : > { %v2724_v46 = vadd.f32 %v2723_v47, %v2611_v51  ;;  %v5097_v51 = vld [vmem:[%s5480_s10 + $0x748] sm:$0xff]  ;;  %v2504_v5 = vadd.f32 %v6940_v9, %v2391_v25  ;;  %v2394_v9 = vadd.f32 %v6947_v57, %v7403_v56  ;;  %v5103_v25 = vld [vmem:[%s5480_s10 + $0x800] sm:$0xff]  ;;  %v5104_v57 = vld [vmem:[%s5480_s10 + $0x7f8] sm:$0xff] }
 0x443   : > { %2660 = vmatmul.f32.gmra.mxu2 %v5094_v2  ;;  %2886 = vmatmul.f32.gmra.mxu0 %v5095_v30  ;;  %v2837_v31 = vadd.f32 %v2836_v59, %v2724_v46  ;;  %v5099_v46 = vld [vmem:[%s5480_s10 + $0x7a0] sm:$0xff]  ;;  %v814_v30 = vld [vmem:[%s8639_s1 + $0x638] sm:$0xff] }
 0x444   : > { %v2952_v17 = vpop.f32.mrf.mxu1  ;;  %3051 = vmatpush.msrb.mxu2 %v814_v30 }
 0x445   : > { %v7464_v41 = vadd.f32 %v2949_v60, %v2837_v31  ;;  %2773 = vmatmul.f32.gmra.mxu3 %v5096_v0  ;;  %v5098_v60 = vld [vmem:[%s5480_s10 + $0x790] sm:$0xff]  ;;  %v846_v0 = vld [vmem:[%s8639_s1 + $0x738] sm:$0xff] }
 0x446   : > { %v2613_v36 = vpop.f32.mrf.mxu2  ;;  %3164 = vmatpush.msrb.mxu3 %v846_v0  ;;  %v5105_v0 = vld [vmem:[%s5480_s10 + $0x808] sm:$0xff] }
 0x447   : > { %v2614_v59 = vadd.f32 %v2613_v36, %v2501_v24  ;;  %2999 = vmatmul.f32.gmra.mxu1 %v5097_v51  ;;  %v5101_v36 = vld [vmem:[%s5480_s10 + $0x7a8] sm:$0xff] }
 0x448   : > { %v2726_v21 = vpop.f32.mrf.mxu3  ;;  %v2842_v47 = vpop.f32.mrf.mxu0 }
 0x449   : > { %v2727_v37 = vadd.f32 %v2726_v21, %v2614_v59 }
 0x44b   : > { %2663 = vmatmul.f32.gmra.mxu2 %v5098_v60  ;;  %2889 = vmatmul.f32.gmra.mxu0 %v5099_v46  ;;  %v2840_v2 = vadd.f32 %v2839_v11, %v2727_v37  ;;  %v894_v60 = vld [vmem:[%s8639_s1 + $0x8b8] sm:$0xff] }
 0x44c   : > { %v2955_v31 = vpop.f32.mrf.mxu1  ;;  %3269 = vmatpush.msrb.mxu0 %v894_v60  ;;  %v844_v60 = vld [vmem:[%s8639_s1 + $0x728] sm:$0xff] }
 0x44d   : > { %v7479_v24 = vadd.f32 %v2952_v17, %v2840_v2  ;;  %2776 = vmatmul.f32.gmra.mxu3 %v5100_v7  ;;  %v5102_v17 = vld [vmem:[%s5480_s10 + $0x7f0] sm:$0xff]  ;;  %v2507_v2 = vadd.f32 %v6957_v58, %v2394_v9  ;;  %v2397_v58 = vadd.f32 %v6964_v52, %v7403_v56  ;;  %v5108_v52 = vld [vmem:[%s5480_s10 + $0x858] sm:$0xff] }
 0x44e   : > { %v2616_v4 = vpop.f32.mrf.mxu2  ;;  %3165 = vmatpush.msrb.mxu3 %v844_v60 }
 0x44f   : > { %v2617_v11 = vadd.f32 %v2616_v4, %v2504_v5  ;;  %3002 = vmatmul.f32.gmra.mxu1 %v5101_v36  ;;  %v926_v5 = vld [vmem:[%s8639_s1 + $0x9b8] sm:$0xff] }
 0x450   : > { %v2729_v59 = vpop.f32.mrf.mxu3  ;;  %v2845_v51 = vpop.f32.mrf.mxu0  ;;  %3382 = vmatpush.msrb.mxu1 %v926_v5 }
 0x451   : > { %v2730_v21 = vadd.f32 %v2729_v59, %v2617_v11  ;;  %v5107_v59 = vld [vmem:[%s5480_s10 + $0x860] sm:$0xff] }
 0x453   : > { %2666 = vmatmul.f32.gmra.mxu2 %v5102_v17  ;;  %2892 = vmatmul.f32.gmra.mxu0 %v5103_v25  ;;  %v2843_v37 = vadd.f32 %v2842_v47, %v2730_v21  ;;  %v812_v21 = vld [vmem:[%s8639_s1 + $0x628] sm:$0xff]  ;;  %v2510_v25 = vadd.f32 %v6974_v29, %v2397_v58  ;;  %v2400_v29 = vadd.f32 %v6981_v32, %v7403_v56  ;;  %v5112_v32 = vld [vmem:[%s5480_s10 + $0x8b8] sm:$0xff] }
 0x454   : > { %v2958_v46 = vpop.f32.mrf.mxu1  ;;  %3052 = vmatpush.msrb.mxu2 %v812_v21  ;;  %v892_v58 = vld [vmem:[%s8639_s1 + $0x8a8] sm:$0xff] }
 0x455   : > { %v7494_v30 = vadd.f32 %v2955_v31, %v2843_v37  ;;  %2779 = vmatmul.f32.gmra.mxu3 %v5104_v57  ;;  %v5106_v31 = vld [vmem:[%s5480_s10 + $0x850] sm:$0xff]  ;;  %v5109_v57 = vld [vmem:[%s5480_s10 + $0x868] sm:$0xff]  ;;  %3270 = vmatpush.msrb.mxu0 %v892_v58 }
 0x456   : > { %v2619_v7 = vpop.f32.mrf.mxu2  ;;  %v5117_v58 = vld [vmem:[%s5480_s10 + $0x928] sm:$0xff] }
 0x457   : > { %v2620_v47 = vadd.f32 %v2619_v7, %v2507_v2  ;;  %3005 = vmatmul.f32.gmra.mxu1 %v5105_v0  ;;  %v5111_v0 = vld [vmem:[%s5480_s10 + $0x8c0] sm:$0xff] }
 0x458   : > { %v2732_v4 = vpop.f32.mrf.mxu3  ;;  %v2848_v11 = vpop.f32.mrf.mxu0 }
 0x459   : > { %v2733_v36 = vadd.f32 %v2732_v4, %v2620_v47 }
 0x45b   : > { %2669 = vmatmul.f32.gmra.mxu2 %v5106_v31  ;;  %2895 = vmatmul.f32.gmra.mxu0 %v5107_v59  ;;  %v2846_v9 = vadd.f32 %v2845_v51, %v2733_v36  ;;  %v2513_v31 = vadd.f32 %v6991_v13, %v2400_v29  ;;  %v2403_v13 = vadd.f32 %v6998_v38, %v7403_v56  ;;  %v5116_v38 = vld [vmem:[%s5480_s10 + $0x918] sm:$0xff] }
 0x45c   : > { %v2961_v17 = vpop.f32.mrf.mxu1 }
 0x45d   : > { %v7509_v37 = vadd.f32 %v2958_v46, %v2846_v9  ;;  %2782 = vmatmul.f32.gmra.mxu3 %v5108_v52  ;;  %v5110_v46 = vld [vmem:[%s5480_s10 + $0x8b0] sm:$0xff]  ;;  %v924_v9 = vld [vmem:[%s8639_s1 + $0x9a8] sm:$0xff] }
 0x45e   : > { %v2622_v2 = vpop.f32.mrf.mxu2  ;;  %3383 = vmatpush.msrb.mxu1 %v924_v9 }
 0x45f   : > { %v2623_v51 = vadd.f32 %v2622_v2, %v2510_v25  ;;  %3008 = vmatmul.f32.gmra.mxu1 %v5109_v57  ;;  %v5113_v25 = vld [vmem:[%s5480_s10 + $0x8c8] sm:$0xff] }
 0x460   : > { %v2735_v5 = vpop.f32.mrf.mxu3  ;;  %v2851_v7 = vpop.f32.mrf.mxu0 }
 0x461   : > { %v2736_v47 = vadd.f32 %v2735_v5, %v2623_v51  ;;  %v5115_v51 = vld [vmem:[%s5480_s10 + $0x920] sm:$0xff]  ;;  %v810_v5 = vld [vmem:[%s8639_s1 + $0x618] sm:$0xff] }
 0x462   : > { %3053 = vmatpush.msrb.mxu2 %v810_v5 }
 0x463   : > { %2672 = vmatmul.f32.gmra.mxu2 %v5110_v46  ;;  %2898 = vmatmul.f32.gmra.mxu0 %v5111_v0  ;;  %v2849_v4 = vadd.f32 %v2848_v11, %v2736_v47  ;;  %v2516_v47 = vadd.f32 %v7008_v53, %v2403_v13  ;;  %v842_v0 = vld [vmem:[%s8639_s1 + $0x718] sm:$0xff]  ;;  %v2406_v53 = vadd.f32 %v7015_v3, %v7403_v56 }
 0x464   : > { %v2964_v36 = vpop.f32.mrf.mxu1  ;;  %3166 = vmatpush.msrb.mxu3 %v842_v0  ;;  %v922_v3 = vld [vmem:[%s8639_s1 + $0x998] sm:$0xff]  ;;  %v5122_v0 = vld [vmem:[%s5480_s10 + $0x9d0] sm:$0xff] }
 0x465   : > { %v7524_v59 = vadd.f32 %v2961_v17, %v2849_v4  ;;  %2785 = vmatmul.f32.gmra.mxu3 %v5112_v32  ;;  %v5114_v17 = vld [vmem:[%s5480_s10 + $0x910] sm:$0xff]  ;;  %v2519_v13 = vadd.f32 %v7025_v42, %v2406_v53  ;;  %3384 = vmatpush.msrb.mxu1 %v922_v3  ;;  %v2409_v42 = vadd.f32 %v7032_v10, %v7403_v56  ;;  %v886_v10 = vld [vmem:[%s8639_s1 + $0x878] sm:$0xff] }
 0x466   : > { %v2625_v21 = vpop.f32.mrf.mxu2  ;;  %v2412_v3 = vadd.f32 %v7061_v15, %v7403_v56 }
 0x467   : > { %v2626_v11 = vadd.f32 %v2625_v21, %v2513_v31  ;;  %3011 = vmatmul.f32.gmra.mxu1 %v5113_v25  ;;  %v5119_v21 = vld [vmem:[%s5480_s10 + $0x980] sm:$0xff]  ;;  %v890_v25 = vld [vmem:[%s8639_s1 + $0x898] sm:$0xff]  ;;  %v2522_v53 = vadd.f32 %v7048_v35, %v2409_v42 }
 0x468   : > { %v2738_v52 = vpop.f32.mrf.mxu3  ;;  %v2854_v60 = vpop.f32.mrf.mxu0  ;;  %3271 = vmatpush.msrb.mxu0 %v890_v25  ;;  %v882_v35 = vld [vmem:[%s8639_s1 + $0x858] sm:$0xff]  ;;  %v2525_v15 = vadd.f32 %v7074_v26, %v2412_v3 }
 0x469   : > { %v2739_v2 = vadd.f32 %v2738_v52, %v2626_v11  ;;  %v874_v26 = vld [vmem:[%s8639_s1 + $0x818] sm:$0xff] }
 0x46b   : > { %2675 = vmatmul.f32.gmra.mxu2 %v5114_v17  ;;  %2901 = vmatmul.f32.gmra.mxu0 %v5115_v51  ;;  %v2852_v57 = vadd.f32 %v2851_v7, %v2739_v2  ;;  %v5120_v17 = vld [vmem:[%s5480_s10 + $0x978] sm:$0xff] }
 0x46c   : > { %v2967_v29 = vpop.f32.mrf.mxu1 }
 0x46d   : > { %v7539_v46 = vadd.f32 %v2964_v36, %v2852_v57  ;;  %2788 = vmatmul.f32.gmra.mxu3 %v5116_v38  ;;  %v5118_v36 = vld [vmem:[%s5480_s10 + $0x970] sm:$0xff]  ;;  %v5121_v57 = vld [vmem:[%s5480_s10 + $0x988] sm:$0xff] }
 0x46e   : > { %v2628_v4 = vpop.f32.mrf.mxu2  ;;  %v888_v38 = vld [vmem:[%s8639_s1 + $0x888] sm:$0xff] }
 0x46f   : > { %v2629_v7 = vadd.f32 %v2628_v4, %v2516_v47  ;;  %3014 = vmatmul.f32.gmra.mxu1 %v5117_v58  ;;  %3272 = vmatpush.msrb.mxu0 %v888_v38  ;;  %v5123_v4 = vld [vmem:[%s5480_s10 + $0x9e0] sm:$0xff]  ;;  %v808_v58 = vld [vmem:[%s8639_s1 + $0x608] sm:$0xff] }
 0x470   : > { %v2741_v31 = vpop.f32.mrf.mxu3  ;;  %v2857_v32 = vpop.f32.mrf.mxu0  ;;  %3054 = vmatpush.msrb.mxu2 %v808_v58 }
 0x471   : > { %v2742_v9 = vadd.f32 %v2741_v31, %v2629_v7  ;;  %3273 = vmatpush.msrb.mxu0 %v886_v10 }
 0x473   : > { %2678 = vmatmul.f32.gmra.mxu2 %v5118_v36  ;;  %2904 = vmatmul.f32.gmra.mxu0 %v5119_v21  ;;  %v2855_v11 = vadd.f32 %v2854_v60, %v2742_v9  ;;  %v5124_v36 = vld [vmem:[%s5480_s10 + $0x9d8] sm:$0xff]  ;;  %v884_v21 = vld [vmem:[%s8639_s1 + $0x868] sm:$0xff] }
 0x474   : > { %v2970_v52 = vpop.f32.mrf.mxu1  ;;  %3274 = vmatpush.msrb.mxu0 %v884_v21  ;;  %v2415_v21 = vadd.f32 %v7090_v34, %v7403_v56  ;;  %v966_v34 = vld [vmem:[%s8639_s1 + $0xaf8] sm:$0xff] }
 0x475   : > { %v7554_v2 = vadd.f32 %v2967_v29, %v2855_v11  ;;  %2791 = vmatmul.f32.gmra.mxu3 %v5120_v17  ;;  %3491 = vmatpush.msra.mxu2 %v966_v34 }
 0x476   : > { %v2631_v51 = vpop.f32.mrf.mxu2  ;;  %3275 = vmatpush.msrb.mxu0 %v882_v35  ;;  %v5130_v35 = vld [vmem:[%s5480_s10 + $0xa90] sm:$0xff] }
 0x477   : > { %v2632_v60 = vadd.f32 %v2631_v51, %v2519_v13  ;;  %3017 = vmatmul.f32.gmra.mxu1 %v5121_v57  ;;  %v5125_v13 = vld [vmem:[%s5480_s10 + $0x9e8] sm:$0xff]  ;;  %v5126_v57 = vld [vmem:[%s5480_s10 + $0xa30] sm:$0xff] }
 0x478   : > { %v2744_v5 = vpop.f32.mrf.mxu3  ;;  %v2860_v47 = vpop.f32.mrf.mxu0 }
 0x479   : > { %v2745_v29 = vadd.f32 %v2744_v5, %v2632_v60  ;;  %v880_v60 = vld [vmem:[%s8639_s1 + $0x848] sm:$0xff]  ;;  %v5127_v5 = vld [vmem:[%s5480_s10 + $0xa40] sm:$0xff] }
 0x47a   : > { %3276 = vmatpush.msrb.mxu0 %v880_v60 }
 0x47b   : > { %2681 = vmatmul.f32.gmra.mxu2 %v5122_v0  ;;  %2907 = vmatmul.f32.gmra.mxu0 %v5123_v4  ;;  %v2858_v7 = vadd.f32 %v2857_v32, %v2745_v29  ;;  %v840_v32 = vld [vmem:[%s8639_s1 + $0x708] sm:$0xff]  ;;  %v878_v29 = vld [vmem:[%s8639_s1 + $0x838] sm:$0xff] }
 0x47c   : > { %v2973_v31 = vpop.f32.mrf.mxu1  ;;  %3167 = vmatpush.msrb.mxu3 %v840_v32  ;;  %3277 = vmatpush.msrb.mxu0 %v878_v29  ;;  %v5128_v4 = vld [vmem:[%s5480_s10 + $0xa38] sm:$0xff]  ;;  %v912_v29 = vld [vmem:[%s8639_s1 + $0x948] sm:$0xff] }
 0x47d   : > { %v7575_v9 = vadd.f32 %v2970_v52, %v2858_v7  ;;  %2794 = vmatmul.f32.gmra.mxu3 %v5124_v36  ;;  %v920_v7 = vld [vmem:[%s8639_s1 + $0x988] sm:$0xff] }
 0x47e   : > { %v2634_v11 = vpop.f32.mrf.mxu2  ;;  %3385 = vmatpush.msrb.mxu1 %v920_v7  ;;  %v5133_v7 = vld [vmem:[%s5480_s10 + $0xaa8] sm:$0xff] }
 0x47f   : > { %v2635_v25 = vadd.f32 %v2634_v11, %v2522_v53  ;;  %3020 = vmatmul.f32.gmra.mxu1 %v5125_v13  ;;  %v5129_v53 = vld [vmem:[%s5480_s10 + $0xa48] sm:$0xff] }
 0x480   : > { %v2747_v52 = vpop.f32.mrf.mxu3  ;;  %v2863_v17 = vpop.f32.mrf.mxu0  ;;  %v916_v13 = vld [vmem:[%s8639_s1 + $0x968] sm:$0xff] }
 0x481   : > { %v2748_v51 = vadd.f32 %v2747_v52, %v2635_v25  ;;  %v872_v25 = vld [vmem:[%s8639_s1 + $0x808] sm:$0xff]  ;;  %v5131_v52 = vld [vmem:[%s5480_s10 + $0xaa0] sm:$0xff] }
 0x483   : > { %2684 = vmatmul.f32.gmra.mxu2 %v5126_v57  ;;  %2910 = vmatmul.f32.gmra.mxu0 %v5127_v5  ;;  %v2861_v42 = vadd.f32 %v2860_v47, %v2748_v51  ;;  %v876_v47 = vld [vmem:[%s8639_s1 + $0x828] sm:$0xff]  ;;  %v914_v51 = vld [vmem:[%s8639_s1 + $0x958] sm:$0xff]  ;;  %v2528_v57 = vadd.f32 %v7109_v55, %v2415_v21 }
 0x484   : > { %v2976_v38 = vpop.f32.mrf.mxu1  ;;  %3278 = vmatpush.msrb.mxu0 %v876_v47  ;;  %v910_v55 = vld [vmem:[%s8639_s1 + $0x938] sm:$0xff] }
 0x485   : > { %v7599_v0 = vadd.f32 %v2973_v31, %v2861_v42  ;;  %2797 = vmatmul.f32.gmra.mxu3 %v5128_v4  ;;  %v918_v31 = vld [vmem:[%s8639_s1 + $0x978] sm:$0xff] }
 0x486   : > { %v2637_v58 = vpop.f32.mrf.mxu2  ;;  %3279 = vmatpush.msrb.mxu0 %v874_v26  ;;  %3386 = vmatpush.msrb.mxu1 %v918_v31  ;;  %v5132_v42 = vld [vmem:[%s5480_s10 + $0xa98] sm:$0xff]  ;;  %v5134_v26 = vld [vmem:[%s5480_s10 + $0xaf0] sm:$0xff]  ;;  %v5135_v31 = vld [vmem:[%s5480_s10 + $0xb00] sm:$0xff] }
 0x487   : > { %v2638_v10 = vadd.f32 %v2637_v58, %v2525_v15  ;;  %3023 = vmatmul.f32.gmra.mxu1 %v5129_v53  ;;  %v2418_v58 = vadd.f32 %v7122_v28, %v7403_v56  ;;  %v908_v53 = vld [vmem:[%s8639_s1 + $0x928] sm:$0xff]  ;;  %v906_v21 = vld [vmem:[%s8639_s1 + $0x918] sm:$0xff] }
 0x488   : > { %v2750_v36 = vpop.f32.mrf.mxu3  ;;  %v2866_v32 = vpop.f32.mrf.mxu0  ;;  %3280 = vmatpush.msrb.mxu0 %v872_v25  ;;  %3387 = vmatpush.msrb.mxu1 %v916_v13  ;;  %v5136_v13 = vld [vmem:[%s5480_s10 + $0xaf8] sm:$0xff] }
 0x489   : > { %v2751_v11 = vadd.f32 %v2750_v36, %v2638_v10  ;;  %v2531_v28 = vadd.f32 %v7135_v50, %v2418_v58  ;;  %v2421_v50 = vadd.f32 %v7142_v14, %v7403_v56  ;;  %v5140_v14 = vld [vmem:[%s5480_s10 + $0xb58] sm:$0xff]  ;;  %v5141_v58 = vld [vmem:[%s5480_s10 + $0xb68] sm:$0xff] }
 0x48a   : > { %3388 = vmatpush.msrb.mxu1 %v914_v51 }
 0x48b   : > { %2687 = vmatmul.f32.gmra.mxu2 %v5130_v35  ;;  %2913 = vmatmul.f32.gmra.mxu0 %v5131_v52  ;;  %v2864_v3 = vadd.f32 %v2863_v17, %v2751_v11  ;;  %v998_v17 = vld [vmem:[%s8639_s1 + $0xbf8] sm:$0xff]  ;;  %v904_v35 = vld [vmem:[%s8639_s1 + $0x908] sm:$0xff] }
 0x48c   : > { %v2979_v60 = vpop.f32.mrf.mxu1  ;;  %3604 = vmatpush.msra.mxu3 %v998_v17  ;;  %3389 = vmatpush.msrb.mxu1 %v912_v29  ;;  %v964_v29 = vld [vmem:[%s8639_s1 + $0xae8] sm:$0xff] }
 0x48d   : > { %v7632_v5 = vadd.f32 %v2976_v38, %v2864_v3  ;;  %2800 = vmatmul.f32.gmra.mxu3 %v5132_v42  ;;  %v5137_v3 = vld [vmem:[%s5480_s10 + $0xb08] sm:$0xff]  ;;  %v5139_v42 = vld [vmem:[%s5480_s10 + $0xb60] sm:$0xff]  ;;  %3492 = vmatpush.msra.mxu2 %v964_v29 }
 0x48e   : > { %v2640_v15 = vpop.f32.mrf.mxu2  ;;  %3390 = vmatpush.msrb.mxu1 %v910_v55  ;;  %v996_v55 = vld [vmem:[%s8639_s1 + $0xbe8] sm:$0xff] }
 0x48f   : > { %v2641_v4 = vadd.f32 %v2640_v15, %v2528_v57  ;;  %3026 = vmatmul.f32.gmra.mxu1 %v5133_v7  ;;  %3605 = vmatpush.msra.mxu3 %v996_v55 }
 0x490   : > { %v2753_v38 = vpop.f32.mrf.mxu3  ;;  %v2869_v47 = vpop.f32.mrf.mxu0  ;;  %3391 = vmatpush.msrb.mxu1 %v908_v53 }
 0x491   : > { %v2754_v10 = vadd.f32 %v2753_v38, %v2641_v4  ;;  %v2534_v4 = vadd.f32 %v7152_v18, %v2421_v50  ;;  %v2424_v18 = vadd.f32 %v7159_v43, %v7403_v56  ;;  %v2427_v50 = vadd.f32 %v7170_v23, %v7403_v56  ;;  %v5148_v23 = vld [vmem:[%s5480_s10 + $0x38] sm:$0xff] }
 0x492   : > { %3392 = vmatpush.msrb.mxu1 %v906_v21 }
 0x493   : > { %2690 = vmatmul.f32.gmra.mxu2 %v5134_v26  ;;  %2916 = vmatmul.f32.gmra.mxu0 %v5135_v31  ;;  %v2867_v36 = vadd.f32 %v2866_v32, %v2754_v10  ;;  %v5142_v31 = vld [vmem:[%s5480_s10 + $0xbb0] sm:$0xff]  ;;  %v2540_v29 = vadd.f32 %v7179_v6, %v2427_v50  ;;  %v2430_v6 = vadd.f32 %v7187_v40, %v7403_v56  ;;  %v5155_v50 = vld [vmem:[%s5480_s10 + $0x100] sm:$0xff] }
 0x494   : > { %v2982_v11 = vpop.f32.mrf.mxu1  ;;  %3393 = vmatpush.msrb.mxu1 %v904_v35  ;;  %v5144_v35 = vld [vmem:[%s5480_s10 + $0xbb8] sm:$0xff] }
 0x495   : > { %v7656_v25 = vadd.f32 %v2979_v60, %v2867_v36  ;;  %2803 = vmatmul.f32.gmra.mxu3 %v5136_v13  ;;  %v5138_v60 = vld [vmem:[%s5480_s10 + $0xb50] sm:$0xff]  ;;  %v5143_v36 = vld [vmem:[%s5480_s10 + $0xbc0] sm:$0xff] }
 0x496   : > { %v2643_v52 = vpop.f32.mrf.mxu2 }
 0x497   : > { %v2644_v32 = vadd.f32 %v2643_v52, %v2531_v28  ;;  %3029 = vmatmul.f32.gmra.mxu1 %v5137_v3  ;;  %v2537_v28 = vadd.f32 %v7166_v39, %v2424_v18  ;;  %v5145_v3 = vld [vmem:[%s5480_s10 + $0xbc8] sm:$0xff]  ;;  %v5151_v18 = vld [vmem:[%s5480_s10 + $0xa0] sm:$0xff] }
 0x498   : > { %v2756_v34 = vpop.f32.mrf.mxu3  ;;  %v2872_v51 = vpop.f32.mrf.mxu0 }
 0x499   : > { %v2757_v57 = vadd.f32 %v2756_v34, %v2644_v32 }
 0x49b   : > { %2693 = vmatmul.f32.gmra.mxu2 %v5138_v60  ;;  %2919 = vmatmul.f32.gmra.mxu0 %v5139_v42  ;;  %v2870_v17 = vadd.f32 %v2869_v47, %v2757_v57  ;;  %v5147_v60 = vld [vmem:[%s5480_s10 + $0x40] sm:$0xff]  ;;  %v962_v42 = vld [vmem:[%s8639_s1 + $0xad8] sm:$0xff] }
 0x49c   : > { %v2985_v15 = vpop.f32.mrf.mxu1  ;;  %3493 = vmatpush.msra.mxu2 %v962_v42  ;;  %v992_v42 = vld [vmem:[%s8639_s1 + $0xbc8] sm:$0xff] }
 0x49d   : > { %v7671_v7 = vadd.f32 %v2982_v11, %v2870_v17  ;;  %2806 = vmatmul.f32.gmra.mxu3 %v5140_v14 }
 0x49e   : > { %v2646_v38 = vpop.f32.mrf.mxu2 }
 0x49f   : > { %v2647_v47 = vadd.f32 %v2646_v38, %v2534_v4  ;;  %3032 = vmatmul.f32.gmra.mxu1 %v5141_v58  ;;  %v994_v4 = vld [vmem:[%s8639_s1 + $0xbd8] sm:$0xff]  ;;  %v5149_v38 = vld [vmem:[%s5480_s10 + $0x48] sm:$0xff] }
 0x4a0   : > { %v2759_v10 = vpop.f32.mrf.mxu3  ;;  %v2875_v53 = vpop.f32.mrf.mxu0  ;;  %3606 = vmatpush.msra.mxu3 %v994_v4 }
 0x4a1   : > { %v2760_v26 = vadd.f32 %v2759_v10, %v2647_v47 }
 0x4a2   : > { %3607 = vmatpush.msra.mxu3 %v992_v42 }
 0x4a3   : > { %2696 = vmatmul.f32.gmra.mxu2 %v5142_v31  ;;  %2922 = vmatmul.f32.gmra.mxu0 %v5143_v36  ;;  %v2873_v21 = vadd.f32 %v2872_v51, %v2760_v26  ;;  %v5146_v51 = vld [vmem:[%s5480_s10 + $0x30] sm:$0xff]  ;;  %v2543_v36 = vadd.f32 %v7193_v61, %v2430_v6 }
 0x4a4   : > { %v2988_v11 = vpop.f32.mrf.mxu1 }
 0x4a5   : > { %v7683_v13 = vadd.f32 %v2985_v15, %v2873_v21  ;;  %2809 = vmatmul.f32.gmra.mxu3 %v5144_v35 }
 0x4a6   : > { %v2649_v52 = vpop.f32.mrf.mxu2 }
 0x4a7   : > { %v2650_v32 = vadd.f32 %v2649_v52, %v2537_v28  ;;  %3035 = vmatmul.f32.gmra.mxu1 %v5145_v3  ;;  %v5153_v52 = vld [vmem:[%s5480_s10 + $0xa8] sm:$0xff]  ;;  %v2433_v3 = vadd.f32 %v7198_v16, %v7403_v56  ;;  %v5156_v16 = vld [vmem:[%s5480_s10 + $0xf8] sm:$0xff] }
 0x4a8   : > { %v2762_v43 = vpop.f32.mrf.mxu3  ;;  %v2878_v34 = vpop.f32.mrf.mxu0 }
 0x4a9   : > { %v2763_v57 = vadd.f32 %v2762_v43, %v2650_v32 }
 0x4ab   : > { %3055 = vmatmul.f32.vlgmr.msrb.gmra.mxu2 %v5146_v51  ;;  %3281 = vmatmul.f32.vlgmr.msrb.gmra.mxu0 %v5147_v60  ;;  %v2876_v39 = vadd.f32 %v2875_v53, %v2763_v57  ;;  %v5150_v53 = vld [vmem:[%s5480_s10 + $0x90] sm:$0xff]  ;;  %v960_v57 = vld [vmem:[%s8639_s1 + $0xac8] sm:$0xff]  ;;  %v2546_v60 = vadd.f32 %v7207_v19, %v2433_v3  ;;  %v2436_v19 = vadd.f32 %v7215_v22, %v7403_v56 }
 0x4ac   : > { %v2991_v17 = vpop.f32.mrf.mxu1  ;;  %3494 = vmatpush.msra.mxu2 %v960_v57 }
 0x4ad   : > { %v7695_v15 = vadd.f32 %v2988_v11, %v2876_v39  ;;  %3168 = vmatmul.f32.vlgmr.msrb.gmra.mxu3 %v5148_v23  ;;  %v5152_v11 = vld [vmem:[%s5480_s10 + $0x98] sm:$0xff]  ;;  %v5157_v23 = vld [vmem:[%s5480_s10 + $0x108] sm:$0xff] }
 0x4ae   : > { %v2652_v14 = vpop.f32.mrf.mxu2 }
 0x4af   : > { %v2653_v55 = vadd.f32 %v2652_v14, %v2540_v29  ;;  %3394 = vmatmul.f32.vlgmr.msrb.gmra.mxu1 %v5149_v38  ;;  %v5158_v38 = vld [vmem:[%s5480_s10 + $0x150] sm:$0xff] }
 0x4b0   : > { %v2765_v47 = vpop.f32.mrf.mxu3  ;;  %v2881_v58 = vpop.f32.mrf.mxu0 }
 0x4b1   : > { %v2766_v10 = vadd.f32 %v2765_v47, %v2653_v55  ;;  %v5159_v47 = vld [vmem:[%s5480_s10 + $0x160] sm:$0xff] }
 0x4b3   : > { %3058 = vmatmul.f32.gmra.mxu2 %v5150_v53  ;;  %3284 = vmatmul.f32.gmra.mxu0 %v5151_v18  ;;  %v2879_v26 = vadd.f32 %v2878_v34, %v2766_v10  ;;  %v5154_v34 = vld [vmem:[%s5480_s10 + $0xf0] sm:$0xff]  ;;  %v2549_v10 = vadd.f32 %v7221_v63, %v2436_v19  ;;  %v5160_v18 = vld [vmem:[%s5480_s10 + $0x158] sm:$0xff] }
 0x4b4   : > { %v2994_v31 = vpop.f32.mrf.mxu1 }
 0x4b5   : > { %v7707_v21 = vadd.f32 %v2991_v17, %v2879_v26  ;;  %3171 = vmatmul.f32.gmra.mxu3 %v5152_v11 }
 0x4b6   : > { %v2655_v28 = vpop.f32.mrf.mxu2 }
 0x4b7   : > { %v2656_v35 = vadd.f32 %v2655_v28, %v2543_v36  ;;  %3397 = vmatmul.f32.gmra.mxu1 %v5153_v52  ;;  %v5161_v36 = vld [vmem:[%s5480_s10 + $0x168] sm:$0xff]  ;;  %v2439_v28 = vadd.f32 %v7226_v49, %v7403_v56  ;;  %v5162_v52 = vld [vmem:[%s5480_s10 + $0x1b0] sm:$0xff]  ;;  %v5164_v49 = vld [vmem:[%s5480_s10 + $0x1b8] sm:$0xff] }
 0x4b8   : > { %v2768_v40 = vpop.f32.mrf.mxu3  ;;  %v2884_v32 = vpop.f32.mrf.mxu0 }
 0x4b9   : > { %v2769_v43 = vadd.f32 %v2768_v40, %v2656_v35  ;;  %v5163_v40 = vld [vmem:[%s5480_s10 + $0x1c0] sm:$0xff] }
 0x4bb   : > { %3061 = vmatmul.f32.gmra.mxu2 %v5154_v34  ;;  %3287 = vmatmul.f32.gmra.mxu0 %v5155_v50  ;;  %v2882_v61 = vadd.f32 %v2881_v58, %v2769_v43  ;;  %v8690_v43 = vld [vmem:[#allocation22_spill] sm:$0xff] }
 0x4bc   : > { %v2997_v51 = vpop.f32.mrf.mxu1  ;;  %v2552_v34 = vadd.f32 %v8690_v43, %v2439_v28  ;;  %v5171_v28 = vld [vmem:[%s5480_s10 + $0x280] sm:$0xff] }
 0x4bd   : > { %v7719_v39 = vadd.f32 %v2994_v31, %v2882_v61  ;;  %3174 = vmatmul.f32.gmra.mxu3 %v5156_v16  ;;  %v990_v61 = vld [vmem:[%s8639_s1 + $0xbb8] sm:$0xff] }
 0x4be   : > { %v2658_v17 = vpop.f32.mrf.mxu2  ;;  %3608 = vmatpush.msra.mxu3 %v990_v61 }
 0x4bf   : > { %v2659_v29 = vadd.f32 %v2658_v17, %v2546_v60  ;;  %3400 = vmatmul.f32.gmra.mxu1 %v5157_v23  ;;  %v5165_v60 = vld [vmem:[%s5480_s10 + $0x1c8] sm:$0xff] }
 0x4c0   : > { %v2771_v4 = vpop.f32.mrf.mxu3  ;;  %v2887_v14 = vpop.f32.mrf.mxu0  ;;  %v8691_v17 = vld [vmem:[#allocation23_spill] sm:$0xff] }
 0x4c1   : > { %v2772_v55 = vadd.f32 %v2771_v4, %v2659_v29  ;;  %v2442_v29 = vadd.f32 %v8691_v17, %v7403_v56  ;;  %v5166_v4 = vld [vmem:[%s5480_s10 + $0x210] sm:$0xff]  ;;  %v5175_v17 = vld [vmem:[%s5480_s10 + $0x2e0] sm:$0xff] }
 0x4c3   : > { %3064 = vmatmul.f32.gmra.mxu2 %v5158_v38  ;;  %3290 = vmatmul.f32.gmra.mxu0 %v5159_v47  ;;  %v2885_v58 = vadd.f32 %v2884_v32, %v2772_v55  ;;  %v958_v32 = vld [vmem:[%s8639_s1 + $0xab8] sm:$0xff]  ;;  %v2555_v38 = vadd.f32 %v7249_v27, %v2442_v29 }
 0x4c4   : > { %v3000_v6 = vpop.f32.mrf.mxu1  ;;  %3495 = vmatpush.msra.mxu2 %v958_v32 }
 0x4c5   : > { %v7731_v53 = vadd.f32 %v2997_v51, %v2885_v58  ;;  %3177 = vmatmul.f32.gmra.mxu3 %v5160_v18  ;;  %v5168_v58 = vld [vmem:[%s5480_s10 + $0x218] sm:$0xff]  ;;  %v5169_v18 = vld [vmem:[%s5480_s10 + $0x228] sm:$0xff] }
 0x4c6   : > { %v2661_v26 = vpop.f32.mrf.mxu2 }
 0x4c7   : > { %v2662_v31 = vadd.f32 %v2661_v26, %v2549_v10  ;;  %3403 = vmatmul.f32.gmra.mxu1 %v5161_v36  ;;  %v2445_v36 = vadd.f32 %v7254_v8, %v7403_v56  ;;  %v5172_v8 = vld [vmem:[%s5480_s10 + $0x278] sm:$0xff] }
 0x4c8   : > { %v2774_v22 = vpop.f32.mrf.mxu3  ;;  %v2890_v11 = vpop.f32.mrf.mxu0 }
 0x4c9   : > { %v2775_v35 = vadd.f32 %v2774_v22, %v2662_v31 }
 0x4cb   : > { %3067 = vmatmul.f32.gmra.mxu2 %v5162_v52  ;;  %3293 = vmatmul.f32.gmra.mxu0 %v5163_v40  ;;  %v2888_v63 = vadd.f32 %v2887_v14, %v2775_v35  ;;  %v5167_v14 = vld [vmem:[%s5480_s10 + $0x220] sm:$0xff]  ;;  %v956_v35 = vld [vmem:[%s8639_s1 + $0xaa8] sm:$0xff] }
 0x4cc   : > { %v3003_v3 = vpop.f32.mrf.mxu1  ;;  %3496 = vmatpush.msra.mxu2 %v956_v35  ;;  %v8692_v40 = vld [vmem:[#allocation26_spill] sm:$0xff] }
 0x4cd   : > { %v7743_v50 = vadd.f32 %v3000_v6, %v2888_v63  ;;  %3180 = vmatmul.f32.gmra.mxu3 %v5164_v49  ;;  %v2558_v63 = vadd.f32 %v8692_v40, %v2445_v36  ;;  %v5173_v49 = vld [vmem:[%s5480_s10 + $0x288] sm:$0xff]  ;;  %v5179_v36 = vld [vmem:[%s5480_s10 + $0x340] sm:$0xff] }
 0x4ce   : > { %v2664_v57 = vpop.f32.mrf.mxu2 }
 0x4cf   : > { %v2665_v51 = vadd.f32 %v2664_v57, %v2552_v34  ;;  %3406 = vmatmul.f32.gmra.mxu1 %v5165_v60 }
 0x4d0   : > { %v2777_v16 = vpop.f32.mrf.mxu3  ;;  %v2893_v42 = vpop.f32.mrf.mxu0 }
 0x4d1   : > { %v2778_v23 = vadd.f32 %v2777_v16, %v2665_v51  ;;  %v8693_v51 = vld [vmem:[#allocation27_spill] sm:$0xff] }
 0x4d2   : > { %v2448_v60 = vadd.f32 %v8693_v51, %v7403_v56  ;;  %v5183_v51 = vld [vmem:[%s5480_s10 + $0x3a0] sm:$0xff] }
 0x4d3   : > { %3070 = vmatmul.f32.gmra.mxu2 %v5166_v4  ;;  %3296 = vmatmul.f32.gmra.mxu0 %v5167_v14  ;;  %v2891_v19 = vadd.f32 %v2890_v11, %v2778_v23  ;;  %v5170_v11 = vld [vmem:[%s5480_s10 + $0x270] sm:$0xff] }
 0x4d4   : > { %v3006_v55 = vpop.f32.mrf.mxu1  ;;  %v2561_v4 = vadd.f32 %v7277_v1, %v2448_v60 }
 0x4d5   : > { %v7755_v47 = vadd.f32 %v3003_v3, %v2891_v19  ;;  %3183 = vmatmul.f32.gmra.mxu3 %v5168_v58  ;;  %v988_v3 = vld [vmem:[%s8639_s1 + $0xba8] sm:$0xff]  ;;  %v5176_v19 = vld [vmem:[%s5480_s10 + $0x2d8] sm:$0xff] }
 0x4d6   : > { %v2667_v6 = vpop.f32.mrf.mxu2  ;;  %3609 = vmatpush.msra.mxu3 %v988_v3  ;;  %v5177_v58 = vld [vmem:[%s5480_s10 + $0x2e8] sm:$0xff] }
 0x4d7   : > { %v2668_v10 = vadd.f32 %v2667_v6, %v2555_v38  ;;  %3409 = vmatmul.f32.gmra.mxu1 %v5169_v18  ;;  %v2451_v18 = vadd.f32 %v7282_v54, %v7403_v56  ;;  %v5180_v54 = vld [vmem:[%s5480_s10 + $0x338] sm:$0xff] }
 0x4d8   : > { %v2780_v26 = vpop.f32.mrf.mxu3  ;;  %v2896_v31 = vpop.f32.mrf.mxu0 }
 0x4d9   : > { %v2781_v22 = vadd.f32 %v2780_v26, %v2668_v10 }
 0x4db   : > { %3073 = vmatmul.f32.gmra.mxu2 %v5170_v11  ;;  %3299 = vmatmul.f32.gmra.mxu0 %v5171_v28  ;;  %v2894_v27 = vadd.f32 %v2893_v42, %v2781_v22  ;;  %v5174_v42 = vld [vmem:[%s5480_s10 + $0x2d0] sm:$0xff]  ;;  %v954_v22 = vld [vmem:[%s8639_s1 + $0xa98] sm:$0xff]  ;;  %v8694_v28 = vld [vmem:[#allocation30_spill] sm:$0xff] }
 0x4dc   : > { %v3009_v52 = vpop.f32.mrf.mxu1  ;;  %3497 = vmatpush.msra.mxu2 %v954_v22 }
 0x4dd   : > { %v7767_v32 = vadd.f32 %v3006_v55, %v2894_v27  ;;  %3186 = vmatmul.f32.gmra.mxu3 %v5172_v8  ;;  %v2564_v27 = vadd.f32 %v8694_v28, %v2451_v18  ;;  %v5181_v8 = vld [vmem:[%s5480_s10 + $0x348] sm:$0xff]  ;;  %v5187_v18 = vld [vmem:[%s5480_s10 + $0x400] sm:$0xff] }
 0x4de   : > { %v2670_v43 = vpop.f32.mrf.mxu2 }
 0x4df   : > { %v2671_v34 = vadd.f32 %v2670_v43, %v2558_v63  ;;  %3412 = vmatmul.f32.gmra.mxu1 %v5173_v49 }
 0x4e0   : > { %v2783_v61 = vpop.f32.mrf.mxu3  ;;  %v2899_v57 = vpop.f32.mrf.mxu0 }
 0x4e1   : > { %v2784_v16 = vadd.f32 %v2783_v61, %v2671_v34  ;;  %v8695_v34 = vld [vmem:[#allocation31_spill] sm:$0xff] }
 0x4e2   : > { %v2454_v49 = vadd.f32 %v8695_v34, %v7403_v56  ;;  %v5191_v34 = vld [vmem:[%s5480_s10 + $0x460] sm:$0xff] }
 0x4e3   : > { %3076 = vmatmul.f32.gmra.mxu2 %v5174_v42  ;;  %3302 = vmatmul.f32.gmra.mxu0 %v5175_v17  ;;  %v2897_v29 = vadd.f32 %v2896_v31, %v2784_v16  ;;  %v5178_v31 = vld [vmem:[%s5480_s10 + $0x330] sm:$0xff] }
 0x4e4   : > { %v3012_v23 = vpop.f32.mrf.mxu1  ;;  %v2567_v42 = vadd.f32 %v7305_v12, %v2454_v49 }
 0x4e5   : > { %v7779_v14 = vadd.f32 %v3009_v52, %v2897_v29  ;;  %3189 = vmatmul.f32.gmra.mxu3 %v5176_v19  ;;  %v986_v52 = vld [vmem:[%s8639_s1 + $0xb98] sm:$0xff]  ;;  %v5185_v19 = vld [vmem:[%s5480_s10 + $0x3a8] sm:$0xff] }
 0x4e6   : > { %v2673_v55 = vpop.f32.mrf.mxu2  ;;  %3610 = vmatpush.msra.mxu3 %v986_v52  ;;  %v5184_v29 = vld [vmem:[%s5480_s10 + $0x398] sm:$0xff] }
 0x4e7   : > { %v2674_v38 = vadd.f32 %v2673_v55, %v2561_v4  ;;  %3415 = vmatmul.f32.gmra.mxu1 %v5177_v58  ;;  %v2457_v58 = vadd.f32 %v7310_v62, %v7403_v56  ;;  %v5188_v62 = vld [vmem:[%s5480_s10 + $0x3f8] sm:$0xff] }
 0x4e8   : > { %v2786_v6 = vpop.f32.mrf.mxu3  ;;  %v2902_v10 = vpop.f32.mrf.mxu0 }
 0x4e9   : > { %v2787_v26 = vadd.f32 %v2786_v6, %v2674_v38 }
 0x4eb   : > { %3079 = vmatmul.f32.gmra.mxu2 %v5178_v31  ;;  %3305 = vmatmul.f32.gmra.mxu0 %v5179_v36  ;;  %v2900_v1 = vadd.f32 %v2899_v57, %v2787_v26  ;;  %v5182_v57 = vld [vmem:[%s5480_s10 + $0x390] sm:$0xff]  ;;  %v952_v26 = vld [vmem:[%s8639_s1 + $0xa88] sm:$0xff]  ;;  %v8696_v36 = vld [vmem:[#allocation34_spill] sm:$0xff] }
 0x4ec   : > { %v3015_v11 = vpop.f32.mrf.mxu1  ;;  %3498 = vmatpush.msra.mxu2 %v952_v26  ;;  %v982_v26 = vld [vmem:[%s8639_s1 + $0xb78] sm:$0xff] }
 0x4ed   : > { %v7791_v35 = vadd.f32 %v3012_v23, %v2900_v1  ;;  %3192 = vmatmul.f32.gmra.mxu3 %v5180_v54  ;;  %v2570_v1 = vadd.f32 %v8696_v36, %v2457_v58  ;;  %v5189_v54 = vld [vmem:[%s5480_s10 + $0x408] sm:$0xff]  ;;  %v5195_v58 = vld [vmem:[%s5480_s10 + $0x4c0] sm:$0xff] }
 0x4ee   : > { %v2676_v40 = vpop.f32.mrf.mxu2 }
 0x4ef   : > { %v2677_v63 = vadd.f32 %v2676_v40, %v2564_v27  ;;  %3418 = vmatmul.f32.gmra.mxu1 %v5181_v8 }
 0x4f0   : > { %v2789_v3 = vpop.f32.mrf.mxu3  ;;  %v2905_v43 = vpop.f32.mrf.mxu0 }
 0x4f1   : > { %v2790_v61 = vadd.f32 %v2789_v3, %v2677_v63  ;;  %v8697_v63 = vld [vmem:[#allocation35_spill] sm:$0xff] }
 0x4f2   : > { %v2460_v8 = vadd.f32 %v8697_v63, %v7403_v56  ;;  %v3796_v63 = vld [vmem:[%s8641_s3 + $0x78] sm:$0xff] }
 0x4f3   : > { %3082 = vmatmul.f32.gmra.mxu2 %v5182_v57  ;;  %3308 = vmatmul.f32.gmra.mxu0 %v5183_v51  ;;  %v2903_v60 = vadd.f32 %v2902_v10, %v2790_v61  ;;  %v5186_v10 = vld [vmem:[%s5480_s10 + $0x3f0] sm:$0xff] }
 0x4f4   : > { %v3018_v16 = vpop.f32.mrf.mxu1  ;;  %v2573_v57 = vadd.f32 %v7333_v33, %v2460_v8  ;;  %3817 = vmatpush.msra.mxu0 %v3796_v63 }
 0x4f5   : > { %v7803_v17 = vadd.f32 %v3015_v11, %v2903_v60  ;;  %3195 = vmatmul.f32.gmra.mxu3 %v5184_v29  ;;  %v984_v11 = vld [vmem:[%s8639_s1 + $0xb88] sm:$0xff]  ;;  %v5192_v60 = vld [vmem:[%s5480_s10 + $0x458] sm:$0xff] }
 0x4f6   : > { %v2679_v23 = vpop.f32.mrf.mxu2  ;;  %3611 = vmatpush.msra.mxu3 %v984_v11  ;;  %v5193_v29 = vld [vmem:[%s5480_s10 + $0x468] sm:$0xff] }
 0x4f7   : > { %v2680_v4 = vadd.f32 %v2679_v23, %v2567_v42  ;;  %3421 = vmatmul.f32.gmra.mxu1 %v5185_v19  ;;  %v2463_v19 = vadd.f32 %v7338_v20, %v7403_v56  ;;  %v5196_v20 = vld [vmem:[%s5480_s10 + $0x4b8] sm:$0xff] }
 0x4f8   : > { %v2792_v55 = vpop.f32.mrf.mxu3  ;;  %v2908_v38 = vpop.f32.mrf.mxu0  ;;  %3612 = vmatpush.msra.mxu3 %v982_v26  ;;  %v5204_v26 = vld [vmem:[%s5480_s10 + $0x578] sm:$0xff] }
 0x4f9   : > { %v2793_v6 = vadd.f32 %v2792_v55, %v2680_v4 }
 0x4fb   : > { %3085 = vmatmul.f32.gmra.mxu2 %v5186_v10  ;;  %3311 = vmatmul.f32.gmra.mxu0 %v5187_v18  ;;  %v2906_v12 = vadd.f32 %v2905_v43, %v2793_v6  ;;  %v5190_v43 = vld [vmem:[%s5480_s10 + $0x450] sm:$0xff]  ;;  %v950_v6 = vld [vmem:[%s8639_s1 + $0xa78] sm:$0xff]  ;;  %v2576_v18 = vadd.f32 %v7347_v44, %v2463_v19 }
 0x4fc   : > { %v3021_v31 = vpop.f32.mrf.mxu1  ;;  %3499 = vmatpush.msra.mxu2 %v950_v6 }
 0x4fd   : > { %v7815_v22 = vadd.f32 %v3018_v16, %v2906_v12  ;;  %3198 = vmatmul.f32.gmra.mxu3 %v5188_v62 }
 0x4fe   : > { %v2682_v28 = vpop.f32.mrf.mxu2 }
 0x4ff   : > { %v2683_v27 = vadd.f32 %v2682_v28, %v2570_v1  ;;  %3424 = vmatmul.f32.gmra.mxu1 %v5189_v54  ;;  %v5197_v1 = vld [vmem:[%s5480_s10 + $0x4c8] sm:$0xff]  ;;  %v8698_v28 = vld [vmem:[#allocation38_spill] sm:$0xff]  ;;  %v5198_v54 = vld [vmem:[%s5480_s10 + $0x510] sm:$0xff] }
 0x500   : > { %v2795_v52 = vpop.f32.mrf.mxu3  ;;  %v2911_v40 = vpop.f32.mrf.mxu0  ;;  %v2466_v44 = vadd.f32 %v8698_v28, %v7403_v56 }
 0x501   : > { %v2796_v3 = vadd.f32 %v2795_v52, %v2683_v27  ;;  %v5199_v52 = vld [vmem:[%s5480_s10 + $0x520] sm:$0xff] }
 0x503   : > { %3088 = vmatmul.f32.gmra.mxu2 %v5190_v43  ;;  %3314 = vmatmul.f32.gmra.mxu0 %v5191_v34  ;;  %v2909_v49 = vadd.f32 %v2908_v38, %v2796_v3  ;;  %v5194_v38 = vld [vmem:[%s5480_s10 + $0x4b0] sm:$0xff] }
 0x504   : > { %v3024_v61 = vpop.f32.mrf.mxu1  ;;  %v8699_v3 = vld [vmem:[#allocation40_spill] sm:$0xff] }
 0x505   : > { %v7827_v51 = vadd.f32 %v3021_v31, %v2909_v49  ;;  %3201 = vmatmul.f32.gmra.mxu3 %v5192_v60  ;;  %v2579_v43 = vadd.f32 %v8699_v3, %v2466_v44  ;;  %v5200_v49 = vld [vmem:[%s5480_s10 + $0x518] sm:$0xff]  ;;  %v8702_v44 = vld [vmem:[#allocation44_spill] sm:$0xff] }
 0x506   : > { %v2685_v16 = vpop.f32.mrf.mxu2 }
 0x507   : > { %v2686_v42 = vadd.f32 %v2685_v16, %v2573_v57  ;;  %3427 = vmatmul.f32.gmra.mxu1 %v5193_v29  ;;  %v5201_v16 = vld [vmem:[%s5480_s10 + $0x528] sm:$0xff] }
 0x508   : > { %v2798_v23 = vpop.f32.mrf.mxu3  ;;  %v2914_v4 = vpop.f32.mrf.mxu0 }
 0x509   : > { %v2799_v55 = vadd.f32 %v2798_v23, %v2686_v42  ;;  %v8700_v23 = vld [vmem:[#allocation41_spill] sm:$0xff] }
 0x50b   : > { %3091 = vmatmul.f32.gmra.mxu2 %v5194_v38  ;;  %3317 = vmatmul.f32.gmra.mxu0 %v5195_v58  ;;  %v2912_v33 = vadd.f32 %v2911_v40, %v2799_v55  ;;  %v5202_v55 = vld [vmem:[%s5480_s10 + $0x570] sm:$0xff]  ;;  %v5203_v38 = vld [vmem:[%s5480_s10 + $0x580] sm:$0xff] }
 0x50c   : > { %v3027_v10 = vpop.f32.mrf.mxu1 }
 0x50d   : > { %v7839_v12 = vadd.f32 %v3024_v61, %v2912_v33  ;;  %3204 = vmatmul.f32.gmra.mxu3 %v5196_v20  ;;  %v3812_v61 = vld [vmem:[%s8641_s3 + $0xf8] sm:$0xff]  ;;  %v948_v33 = vld [vmem:[%s8639_s1 + $0xa68] sm:$0xff] }
 0x50e   : > { %v2688_v31 = vpop.f32.mrf.mxu2  ;;  %3930 = vmatpush.msra.mxu1 %v3812_v61  ;;  %3500 = vmatpush.msra.mxu2 %v948_v33 }
 0x50f   : > { %v2689_v36 = vadd.f32 %v2688_v31, %v2576_v18  ;;  %3430 = vmatmul.f32.gmra.mxu1 %v5197_v1  ;;  %v980_v31 = vld [vmem:[%s8639_s1 + $0xb68] sm:$0xff] }
 0x510   : > { %v2801_v62 = vpop.f32.mrf.mxu3  ;;  %v2917_v11 = vpop.f32.mrf.mxu0  ;;  %3613 = vmatpush.msra.mxu3 %v980_v31 }
 0x511   : > { %v2802_v27 = vadd.f32 %v2801_v62, %v2689_v36  ;;  %v5205_v62 = vld [vmem:[%s5480_s10 + $0x588] sm:$0xff] }
 0x513   : > { %3094 = vmatmul.f32.gmra.mxu2 %v5198_v54  ;;  %3320 = vmatmul.f32.gmra.mxu0 %v5199_v52  ;;  %v2915_v40 = vadd.f32 %v2914_v4, %v2802_v27  ;;  %v2469_v4 = vadd.f32 %v8700_v23, %v7403_v56  ;;  %v2472_v27 = vadd.f32 %v8702_v44, %v7403_v56  ;;  %v5206_v52 = vld [vmem:[%s5480_s10 + $0x5d0] sm:$0xff]  ;;  %v5208_v56 = vld [vmem:[%s5480_s10 + $0x5d8] sm:$0xff]  ;;  %v5215_v44 = vld [vmem:[%s5480_s10 + $0x6a0] sm:$0xff] }
 0x514   : > { %v3030_v8 = vpop.f32.mrf.mxu1 }
 0x515   : > { %v7854_v34 = vadd.f32 %v3027_v10, %v2915_v40  ;;  %3207 = vmatmul.f32.gmra.mxu3 %v5200_v49  ;;  %v8701_v10 = vld [vmem:[#allocation43_spill] sm:$0xff]  ;;  %v5207_v40 = vld [vmem:[%s5480_s10 + $0x5e0] sm:$0xff] }
 0x516   : > { %v2691_v57 = vpop.f32.mrf.mxu2  ;;  %v2582_v18 = vadd.f32 %v8701_v10, %v2469_v4  ;;  %v5212_v10 = vld [vmem:[%s5480_s10 + $0x638] sm:$0xff] }
 0x517   : > { %v2692_v60 = vadd.f32 %v2691_v57, %v2579_v43  ;;  %3433 = vmatmul.f32.gmra.mxu1 %v5201_v16  ;;  %v8703_v43 = vld [vmem:[#allocation46_spill] sm:$0xff]  ;;  %v3811_v57 = vld [vmem:[%s8641_s3 + $0xf0] sm:$0xff] }
 0x518   : > { %v2804_v42 = vpop.f32.mrf.mxu3  ;;  %v2920_v29 = vpop.f32.mrf.mxu0  ;;  %v2585_v49 = vadd.f32 %v8703_v43, %v2472_v27  ;;  %3931 = vmatpush.msra.mxu1 %v3811_v57  ;;  %v5217_v43 = vld [vmem:[%s5480_s10 + $0x6a8] sm:$0xff] }
 0x519   : > { %v2805_v19 = vadd.f32 %v2804_v42, %v2692_v60  ;;  %v5209_v42 = vld [vmem:[%s5480_s10 + $0x5e8] sm:$0xff] }
 0x51b   : > { %3097 = vmatmul.f32.gmra.mxu2 %v5202_v55  ;;  %3323 = vmatmul.f32.gmra.mxu0 %v5203_v38  ;;  %v2918_v58 = vadd.f32 %v2917_v11, %v2805_v19  ;;  %v5210_v19 = vld [vmem:[%s5480_s10 + $0x630] sm:$0xff]  ;;  %v5211_v55 = vld [vmem:[%s5480_s10 + $0x640] sm:$0xff] }
 0x51c   : > { %v3033_v6 = vpop.f32.mrf.mxu1 }
 0x51d   : > { %v7869_v20 = vadd.f32 %v3030_v8, %v2918_v58  ;;  %3210 = vmatmul.f32.gmra.mxu3 %v5204_v26  ;;  %v3795_v8 = vld [vmem:[%s8641_s3 + $0x70] sm:$0xff]  ;;  %v946_v58 = vld [vmem:[%s8639_s1 + $0xa58] sm:$0xff] }
 0x51e   : > { %v2694_v36 = vpop.f32.mrf.mxu2  ;;  %3818 = vmatpush.msra.mxu0 %v3795_v8  ;;  %3501 = vmatpush.msra.mxu2 %v946_v58  ;;  %v5221_v58 = vld [vmem:[%s5480_s10 + $0x708] sm:$0xff] }
 0x51f   : > { %v2695_v1 = vadd.f32 %v2694_v36, %v2582_v18  ;;  %3436 = vmatmul.f32.gmra.mxu1 %v5205_v62  ;;  %v978_v18 = vld [vmem:[%s8639_s1 + $0xb58] sm:$0xff]  ;;  %v5213_v36 = vld [vmem:[%s5480_s10 + $0x648] sm:$0xff] }
 0x520   : > { %v2807_v11 = vpop.f32.mrf.mxu3  ;;  %v2923_v28 = vpop.f32.mrf.mxu0  ;;  %3614 = vmatpush.msra.mxu3 %v978_v18 }
 0x521   : > { %v2808_v54 = vadd.f32 %v2807_v11, %v2695_v1 }
 0x523   : > { %3100 = vmatmul.f32.gmra.mxu2 %v5206_v52  ;;  %3326 = vmatmul.f32.gmra.mxu0 %v5207_v40  ;;  %v2921_v63 = vadd.f32 %v2920_v29, %v2808_v54  ;;  %v3794_v54 = vld [vmem:[%s8641_s3 + $0x68] sm:$0xff]  ;;  %v5216_v40 = vld [vmem:[%s5480_s10 + $0x698] sm:$0xff] }
 0x524   : > { %v3036_v3 = vpop.f32.mrf.mxu1  ;;  %3819 = vmatpush.msra.mxu0 %v3794_v54  ;;  %v5225_v54 = vld [vmem:[%s5480_s10 + $0x768] sm:$0xff] }
 0x525   : > { %v7884_v61 = vadd.f32 %v3033_v6, %v2921_v63  ;;  %3213 = vmatmul.f32.gmra.mxu3 %v5208_v56  ;;  %v3810_v63 = vld [vmem:[%s8641_s3 + $0xe8] sm:$0xff] }
 0x526   : > { %v2697_v60 = vpop.f32.mrf.mxu2  ;;  %3932 = vmatpush.msra.mxu1 %v3810_v63 }
 0x527   : > { %v2698_v16 = vadd.f32 %v2697_v60, %v2585_v49  ;;  %3439 = vmatmul.f32.gmra.mxu1 %v5209_v42  ;;  %v5218_v60 = vld [vmem:[%s5480_s10 + $0x6f0] sm:$0xff] }
 0x528   : > { %v2810_v29 = vpop.f32.mrf.mxu3  ;;  %v3282_v23 = vpop.f32.mrf.mxu0 }
 0x529   : > { %v2811_v4 = vadd.f32 %v2810_v29, %v2698_v16  ;;  %v5219_v16 = vld [vmem:[%s5480_s10 + $0x700] sm:$0xff]  ;;  %v944_v29 = vld [vmem:[%s8639_s1 + $0xa48] sm:$0xff] }
 0x52a   : > { %3502 = vmatpush.msra.mxu2 %v944_v29  ;;  %v5229_v29 = vld [vmem:[%s5480_s10 + $0x7c8] sm:$0xff] }
 0x52b   : > { %3103 = vmatmul.f32.gmra.mxu2 %v5210_v19  ;;  %3329 = vmatmul.f32.gmra.mxu0 %v5211_v55  ;;  %v2924_v38 = vadd.f32 %v2923_v28, %v2811_v4  ;;  %v5214_v28 = vld [vmem:[%s5480_s10 + $0x690] sm:$0xff]  ;;  %v5220_v4 = vld [vmem:[%s5480_s10 + $0x6f8] sm:$0xff]  ;;  %v976_v19 = vld [vmem:[%s8639_s1 + $0xb48] sm:$0xff] }
 0x52c   : > { %v3395_v33 = vpop.f32.mrf.mxu1  ;;  %3615 = vmatpush.msra.mxu3 %v976_v19 }
 0x52d   : > { %v7896_v6 = vadd.f32 %v3036_v3, %v2924_v38  ;;  %3216 = vmatmul.f32.gmra.mxu3 %v5212_v10 }
 0x52e   : > { %v3056_v26 = vpop.f32.mrf.mxu2 }
 0x52f   : > { %v3057_v31 = vadd.f32 %v3056_v26, %v7434_v48  ;;  %3442 = vmatmul.f32.gmra.mxu1 %v5213_v36  ;;  %v5222_v26 = vld [vmem:[%s5480_s10 + $0x750] sm:$0xff] }
 0x530   : > { %v3169_v1 = vpop.f32.mrf.mxu3  ;;  %v3285_v62 = vpop.f32.mrf.mxu0 }
 0x531   : > { %v3170_v11 = vadd.f32 %v3169_v1, %v3057_v31  ;;  %v5223_v31 = vld [vmem:[%s5480_s10 + $0x760] sm:$0xff] }
 0x532   : > { %v3793_v1 = vld [vmem:[%s8641_s3 + $0x60] sm:$0xff] }
 0x533   : > { %3106 = vmatmul.f32.gmra.mxu2 %v5214_v28  ;;  %3332 = vmatmul.f32.gmra.mxu0 %v5215_v44  ;;  %v3283_v27 = vadd.f32 %v3282_v23, %v3170_v11  ;;  %v5224_v11 = vld [vmem:[%s5480_s10 + $0x758] sm:$0xff]  ;;  %v3809_v28 = vld [vmem:[%s8641_s3 + $0xe0] sm:$0xff] }
 0x534   : > { %v3398_v52 = vpop.f32.mrf.mxu1  ;;  %3820 = vmatpush.msra.mxu0 %v3793_v1  ;;  %3933 = vmatpush.msra.mxu1 %v3809_v28  ;;  %v5233_v1 = vld [vmem:[%s5480_s10 + $0x828] sm:$0xff] }
 0x535   : > { %v7909_v48 = vadd.f32 %v3395_v33, %v3283_v27  ;;  %3219 = vmatmul.f32.gmra.mxu3 %v5216_v40 }
 0x536   : > { %v3059_v8 = vpop.f32.mrf.mxu2 }
 0x537   : > { %v3060_v3 = vadd.f32 %v3059_v8, %v7449_v45  ;;  %3445 = vmatmul.f32.gmra.mxu1 %v5217_v43  ;;  %v5226_v8 = vld [vmem:[%s5480_s10 + $0x7b0] sm:$0xff] }
 0x538   : > { %v3172_v49 = vpop.f32.mrf.mxu3  ;;  %v3288_v56 = vpop.f32.mrf.mxu0 }
 0x539   : > { %v3173_v57 = vadd.f32 %v3172_v49, %v3060_v3  ;;  %v5227_v3 = vld [vmem:[%s5480_s10 + $0x7c0] sm:$0xff]  ;;  %v942_v49 = vld [vmem:[%s8639_s1 + $0xa38] sm:$0xff] }
 0x53a   : > { %3503 = vmatpush.msra.mxu2 %v942_v49  ;;  %v5237_v49 = vld [vmem:[%s5480_s10 + $0x888] sm:$0xff] }
 0x53b   : > { %3109 = vmatmul.f32.gmra.mxu2 %v5218_v60  ;;  %3335 = vmatmul.f32.gmra.mxu0 %v5219_v16  ;;  %v3286_v42 = vadd.f32 %v3285_v62, %v3173_v57  ;;  %v5228_v57 = vld [vmem:[%s5480_s10 + $0x7b8] sm:$0xff] }
 0x53c   : > { %v3401_v23 = vpop.f32.mrf.mxu1  ;;  %v974_v60 = vld [vmem:[%s8639_s1 + $0xb38] sm:$0xff] }
 0x53d   : > { %v7922_v45 = vadd.f32 %v3398_v52, %v3286_v42  ;;  %3222 = vmatmul.f32.gmra.mxu3 %v5220_v4 }
 0x53e   : > { %v3062_v55 = vpop.f32.mrf.mxu2  ;;  %3616 = vmatpush.msra.mxu3 %v974_v60 }
 0x53f   : > { %v3063_v38 = vadd.f32 %v3062_v55, %v7464_v41  ;;  %3448 = vmatmul.f32.gmra.mxu1 %v5221_v58  ;;  %v5230_v55 = vld [vmem:[%s5480_s10 + $0x810] sm:$0xff] }
 0x540   : > { %v3175_v33 = vpop.f32.mrf.mxu3  ;;  %v3291_v10 = vpop.f32.mrf.mxu0 }
 0x541   : > { %v3176_v18 = vadd.f32 %v3175_v33, %v3063_v38  ;;  %v5231_v38 = vld [vmem:[%s5480_s10 + $0x820] sm:$0xff]  ;;  %v3792_v33 = vld [vmem:[%s8641_s3 + $0x58] sm:$0xff] }
 0x542   : > { %3821 = vmatpush.msra.mxu0 %v3792_v33 }
 0x543   : > { %3112 = vmatmul.f32.gmra.mxu2 %v5222_v26  ;;  %3338 = vmatmul.f32.gmra.mxu0 %v5223_v31  ;;  %v3289_v36 = vadd.f32 %v3288_v56, %v3176_v18  ;;  %v3808_v26 = vld [vmem:[%s8641_s3 + $0xd8] sm:$0xff] }
 0x544   : > { %v3404_v62 = vpop.f32.mrf.mxu1  ;;  %3934 = vmatpush.msra.mxu1 %v3808_v26 }
 0x545   : > { %v7935_v41 = vadd.f32 %v3401_v23, %v3289_v36  ;;  %3225 = vmatmul.f32.gmra.mxu3 %v5224_v11 }
 0x546   : > { %v3065_v44 = vpop.f32.mrf.mxu2 }
 0x547   : > { %v3066_v27 = vadd.f32 %v3065_v44, %v7479_v24  ;;  %3451 = vmatmul.f32.gmra.mxu1 %v5225_v54  ;;  %v5234_v44 = vld [vmem:[%s5480_s10 + $0x870] sm:$0xff] }
 0x548   : > { %v3178_v52 = vpop.f32.mrf.mxu3  ;;  %v3294_v40 = vpop.f32.mrf.mxu0 }
 0x549   : > { %v3179_v63 = vadd.f32 %v3178_v52, %v3066_v27  ;;  %v5235_v27 = vld [vmem:[%s5480_s10 + $0x880] sm:$0xff]  ;;  %v940_v52 = vld [vmem:[%s8639_s1 + $0xa28] sm:$0xff] }
 0x54a   : > { %3504 = vmatpush.msra.mxu2 %v940_v52 }
 0x54b   : > { %3115 = vmatmul.f32.gmra.mxu2 %v5226_v8  ;;  %3341 = vmatmul.f32.gmra.mxu0 %v5227_v3  ;;  %v3292_v43 = vadd.f32 %v3291_v10, %v3179_v63  ;;  %v972_v63 = vld [vmem:[%s8639_s1 + $0xb28] sm:$0xff] }
 0x54c   : > { %v3407_v56 = vpop.f32.mrf.mxu1  ;;  %3617 = vmatpush.msra.mxu3 %v972_v63 }
 0x54d   : > { %v7948_v24 = vadd.f32 %v3404_v62, %v3292_v43  ;;  %3228 = vmatmul.f32.gmra.mxu3 %v5228_v57 }
 0x54e   : > { %v3068_v16 = vpop.f32.mrf.mxu2 }
 0x54f   : > { %v3069_v42 = vadd.f32 %v3068_v16, %v7494_v30  ;;  %3454 = vmatmul.f32.gmra.mxu1 %v5229_v29  ;;  %v5232_v30 = vld [vmem:[%s5480_s10 + $0x818] sm:$0xff]  ;;  %v5238_v16 = vld [vmem:[%s5480_s10 + $0x8d0] sm:$0xff] }
 0x550   : > { %v3181_v23 = vpop.f32.mrf.mxu3  ;;  %v3297_v4 = vpop.f32.mrf.mxu0 }
 0x551   : > { %v3182_v19 = vadd.f32 %v3181_v23, %v3069_v42  ;;  %v5239_v42 = vld [vmem:[%s5480_s10 + $0x8e0] sm:$0xff]  ;;  %v3791_v23 = vld [vmem:[%s8641_s3 + $0x50] sm:$0xff] }
 0x552   : > { %3822 = vmatpush.msra.mxu0 %v3791_v23 }
 0x553   : > { %3118 = vmatmul.f32.gmra.mxu2 %v5230_v55  ;;  %3344 = vmatmul.f32.gmra.mxu0 %v5231_v38  ;;  %v3295_v58 = vadd.f32 %v3294_v40, %v3182_v19  ;;  %v3807_v19 = vld [vmem:[%s8641_s3 + $0xd0] sm:$0xff] }
 0x554   : > { %v3410_v18 = vpop.f32.mrf.mxu1  ;;  %3935 = vmatpush.msra.mxu1 %v3807_v19  ;;  %v5250_v19 = vld [vmem:[%s5480_s10 + $0x9f0] sm:$0xff] }
 0x555   : > { %v7961_v10 = vadd.f32 %v3407_v56, %v3295_v58  ;;  %3231 = vmatmul.f32.gmra.mxu3 %v5232_v30  ;;  %v5241_v58 = vld [vmem:[%s5480_s10 + $0x8e8] sm:$0xff] }
 0x556   : > { %v3071_v31 = vpop.f32.mrf.mxu2 }
 0x557   : > { %v3072_v36 = vadd.f32 %v3071_v31, %v7509_v37  ;;  %3457 = vmatmul.f32.gmra.mxu1 %v5233_v1  ;;  %v5236_v37 = vld [vmem:[%s5480_s10 + $0x878] sm:$0xff]  ;;  %v5242_v31 = vld [vmem:[%s5480_s10 + $0x930] sm:$0xff] }
 0x558   : > { %v3184_v62 = vpop.f32.mrf.mxu3  ;;  %v3300_v11 = vpop.f32.mrf.mxu0 }
 0x559   : > { %v3185_v28 = vadd.f32 %v3184_v62, %v3072_v36  ;;  %v5243_v36 = vld [vmem:[%s5480_s10 + $0x940] sm:$0xff]  ;;  %v938_v62 = vld [vmem:[%s8639_s1 + $0xa18] sm:$0xff] }
 0x55a   : > { %3505 = vmatpush.msra.mxu2 %v938_v62 }
 0x55b   : > { %3121 = vmatmul.f32.gmra.mxu2 %v5234_v44  ;;  %3347 = vmatmul.f32.gmra.mxu0 %v5235_v27  ;;  %v3298_v54 = vadd.f32 %v3297_v4, %v3185_v28  ;;  %v5240_v4 = vld [vmem:[%s5480_s10 + $0x8d8] sm:$0xff] }
 0x55c   : > { %v3413_v43 = vpop.f32.mrf.mxu1  ;;  %v970_v28 = vld [vmem:[%s8639_s1 + $0xb18] sm:$0xff] }
 0x55d   : > { %v7974_v40 = vadd.f32 %v3410_v18, %v3298_v54  ;;  %3234 = vmatmul.f32.gmra.mxu3 %v5236_v37  ;;  %v5245_v54 = vld [vmem:[%s5480_s10 + $0x948] sm:$0xff] }
 0x55e   : > { %v3074_v8 = vpop.f32.mrf.mxu2  ;;  %3618 = vmatpush.msra.mxu3 %v970_v28 }
 0x55f   : > { %v3075_v3 = vadd.f32 %v3074_v8, %v7524_v59  ;;  %3460 = vmatmul.f32.gmra.mxu1 %v5237_v49  ;;  %v5246_v8 = vld [vmem:[%s5480_s10 + $0x990] sm:$0xff]  ;;  %v3790_v49 = vld [vmem:[%s8641_s3 + $0x48] sm:$0xff] }
 0x560   : > { %v3187_v56 = vpop.f32.mrf.mxu3  ;;  %v3303_v57 = vpop.f32.mrf.mxu0  ;;  %3823 = vmatpush.msra.mxu0 %v3790_v49 }
 0x561   : > { %v3188_v60 = vadd.f32 %v3187_v56, %v3075_v3  ;;  %v5247_v3 = vld [vmem:[%s5480_s10 + $0x9a0] sm:$0xff]  ;;  %v3806_v56 = vld [vmem:[%s8641_s3 + $0xc8] sm:$0xff] }
 0x562   : > { %3936 = vmatpush.msra.mxu1 %v3806_v56  ;;  %v3782_v56 = vld [vmem:[%s8641_s3 + $0x8] sm:$0xff] }
 0x563   : > { %3124 = vmatmul.f32.gmra.mxu2 %v5238_v16  ;;  %3350 = vmatmul.f32.gmra.mxu0 %v5239_v42  ;;  %v3301_v29 = vadd.f32 %v3300_v11, %v3188_v60  ;;  %v5244_v11 = vld [vmem:[%s5480_s10 + $0x938] sm:$0xff]  ;;  %v5249_v16 = vld [vmem:[%s5480_s10 + $0x9a8] sm:$0xff] }
 0x564   : > { %v3416_v26 = vpop.f32.mrf.mxu1 }
 0x565   : > { %v7987_v59 = vadd.f32 %v3413_v43, %v3301_v29  ;;  %3237 = vmatmul.f32.gmra.mxu3 %v5240_v4  ;;  %v3789_v4 = vld [vmem:[%s8641_s3 + $0x40] sm:$0xff] }
 0x566   : > { %v3077_v55 = vpop.f32.mrf.mxu2  ;;  %3824 = vmatpush.msra.mxu0 %v3789_v4  ;;  %v5260_v4 = vld [vmem:[%s5480_s10 + $0xab8] sm:$0xff] }
 0x567   : > { %v3078_v38 = vadd.f32 %v3077_v55, %v7539_v46  ;;  %3463 = vmatmul.f32.gmra.mxu1 %v5241_v58  ;;  %v5251_v55 = vld [vmem:[%s5480_s10 + $0xa00] sm:$0xff]  ;;  %v3788_v58 = vld [vmem:[%s8641_s3 + $0x38] sm:$0xff] }
 0x568   : > { %v3190_v33 = vpop.f32.mrf.mxu3  ;;  %v3306_v30 = vpop.f32.mrf.mxu0  ;;  %3825 = vmatpush.msra.mxu0 %v3788_v58 }
 0x569   : > { %v3191_v18 = vadd.f32 %v3190_v33, %v3078_v38  ;;  %v5252_v33 = vld [vmem:[%s5480_s10 + $0x9f8] sm:$0xff] }
 0x56b   : > { %3127 = vmatmul.f32.gmra.mxu2 %v5242_v31  ;;  %3353 = vmatmul.f32.gmra.mxu0 %v5243_v36  ;;  %v3304_v1 = vadd.f32 %v3303_v57, %v3191_v18  ;;  %v3787_v18 = vld [vmem:[%s8641_s3 + $0x30] sm:$0xff]  ;;  %v5253_v36 = vld [vmem:[%s5480_s10 + $0xa08] sm:$0xff] }
 0x56c   : > { %3826 = vmatpush.msra.mxu0 %v3787_v18  ;;  %v5262_v18 = vld [vmem:[%s5480_s10 + $0xb10] sm:$0xff] }
 0x56d   : > { %v8000_v46 = vadd.f32 %v3416_v26, %v3304_v1  ;;  %3240 = vmatmul.f32.gmra.mxu3 %v5244_v11  ;;  %v3786_v1 = vld [vmem:[%s8641_s3 + $0x28] sm:$0xff] }
 0x56e   : > { %v3080_v44 = vpop.f32.mrf.mxu2  ;;  %3827 = vmatpush.msra.mxu0 %v3786_v1 }
 0x56f   : > { %v3081_v27 = vadd.f32 %v3080_v44, %v7554_v2  ;;  %3466 = vmatmul.f32.gmra.mxu1 %v5245_v54  ;;  %v5248_v2 = vld [vmem:[%s5480_s10 + $0x998] sm:$0xff]  ;;  %v3785_v44 = vld [vmem:[%s8641_s3 + $0x20] sm:$0xff] }
 0x570   : > { %v3193_v52 = vpop.f32.mrf.mxu3  ;;  %v3309_v37 = vpop.f32.mrf.mxu0  ;;  %3828 = vmatpush.msra.mxu0 %v3785_v44 }
 0x571   : > { %v3194_v63 = vadd.f32 %v3193_v52, %v3081_v27  ;;  %v5254_v27 = vld [vmem:[%s5480_s10 + $0xa50] sm:$0xff]  ;;  %v3784_v52 = vld [vmem:[%s8641_s3 + $0x18] sm:$0xff] }
 0x572   : > { %3829 = vmatpush.msra.mxu0 %v3784_v52  ;;  %v5267_v52 = vld [vmem:[%s5480_s10 + $0xb80] sm:$0xff] }
 0x573   : > { %3130 = vmatmul.f32.gmra.mxu2 %v5246_v8  ;;  %3356 = vmatmul.f32.gmra.mxu0 %v5247_v3  ;;  %v8010_v43 = vadd.f32 %v3306_v30, %v3194_v63  ;;  %v968_v30 = vld [vmem:[%s8639_s1 + $0xb08] sm:$0xff]  ;;  %v3805_v63 = vld [vmem:[%s8641_s3 + $0xc0] sm:$0xff]  ;;  %v3783_v8 = vld [vmem:[%s8641_s3 + $0x10] sm:$0xff] }
 0x574   : > { %3619 = vmatpush.msra.mxu3 %v968_v30  ;;  %3937 = vmatpush.msra.mxu1 %v3805_v63  ;;  %v5268_v63 = vld [vmem:[%s5480_s10 + $0xb78] sm:$0xff] }
 0x575   : > { %3243 = vmatmul.f32.gmra.mxu3 %v5248_v2  ;;  %3830 = vmatpush.msra.mxu0 %v3783_v8  ;;  %v5257_v2 = vld [vmem:[%s5480_s10 + $0xa68] sm:$0xff] }
 0x576   : > { %v3083_v57 = vpop.f32.mrf.mxu2 }
 0x577   : > { %v3084_v60 = vadd.f32 %v3083_v57, %v7575_v9  ;;  %3469 = vmatmul.f32.gmra.mxu1 %v5249_v16  ;;  %v936_v9 = vld [vmem:[%s8639_s1 + $0xa08] sm:$0xff]  ;;  %3831 = vmatpush.msra.mxu0 %v3782_v56 }
 0x578   : > { %v3196_v42 = vpop.f32.mrf.mxu3  ;;  %v3312_v29 = vpop.f32.mrf.mxu0  ;;  %3506 = vmatpush.msra.mxu2 %v936_v9  ;;  %v5261_v9 = vld [vmem:[%s5480_s10 + $0xac8] sm:$0xff] }
 0x579   : > { %v3197_v23 = vadd.f32 %v3196_v42, %v3084_v60  ;;  %v3781_v42 = vld [vmem:[%s8641_s3] sm:$0xff] }
 0x57a   : > { %3832 = vmatpush.msra.mxu0 %v3781_v42  ;;  %v5272_v42 = vld [vmem:[%s5480_s10 + $0xbd8] sm:$0xff] }
 0x57b   : > { %3133 = vmatmul.f32.gmra.mxu2 %v5250_v19  ;;  %3359 = vmatmul.f32.gmra.mxu0 %v5251_v55  ;;  %v8026_v38 = vadd.f32 %v3309_v37, %v3197_v23  ;;  %v5256_v37 = vld [vmem:[%s5480_s10 + $0xa58] sm:$0xff] }
 0x57d   : > { %3246 = vmatmul.f32.gmra.mxu3 %v5252_v33 }
 0x57e   : > { %v3086_v26 = vpop.f32.mrf.mxu2 }
 0x57f   : > { %v3087_v31 = vadd.f32 %v3086_v26, %v7599_v0  ;;  %3472 = vmatmul.f32.gmra.mxu1 %v5253_v36  ;;  %v5255_v0 = vld [vmem:[%s5480_s10 + $0xa60] sm:$0xff]  ;;  %v5264_v36 = vld [vmem:[%s5480_s10 + $0xb18] sm:$0xff] }
 0x580   : > { %v3199_v62 = vpop.f32.mrf.mxu3  ;;  %v3315_v11 = vpop.f32.mrf.mxu0  ;;  %v5263_v26 = vld [vmem:[%s5480_s10 + $0xb20] sm:$0xff] }
 0x581   : > { %v3200_v28 = vadd.f32 %v3199_v62, %v3087_v31 }
 0x583   : > { %3136 = vmatmul.f32.gmra.mxu2 %v5254_v27  ;;  %3362 = vmatmul.f32.gmra.mxu0 %v5255_v0  ;;  %v8051_v54 = vadd.f32 %v3312_v29, %v3200_v28  ;;  %v5258_v29 = vld [vmem:[%s5480_s10 + $0xab0] sm:$0xff] }
 0x584   : > { %v5266_v0 = vld [vmem:[%s5480_s10 + $0xb70] sm:$0xff] }
 0x585   : > { %3249 = vmatmul.f32.gmra.mxu3 %v5256_v37 }
 0x586   : > { %v3089_v3 = vpop.f32.mrf.mxu2 }
 0x587   : > { %v3090_v49 = vadd.f32 %v3089_v3, %v7632_v5  ;;  %3475 = vmatmul.f32.gmra.mxu1 %v5257_v2  ;;  %v5259_v5 = vld [vmem:[%s5480_s10 + $0xac0] sm:$0xff] }
 0x588   : > { %v3202_v57 = vpop.f32.mrf.mxu3  ;;  %v3318_v60 = vpop.f32.mrf.mxu0 }
 0x589   : > { %v3203_v16 = vadd.f32 %v3202_v57, %v3090_v49  ;;  %v5270_v57 = vld [vmem:[%s5480_s10 + $0xbd0] sm:$0xff] }
 0x58b   : > { %3139 = vmatmul.f32.gmra.mxu2 %v5258_v29  ;;  %3365 = vmatmul.f32.gmra.mxu0 %v5259_v5  ;;  %v8073_v23 = vadd.f32 %v3315_v11, %v3203_v16  ;;  %v5265_v11 = vld [vmem:[%s5480_s10 + $0xb28] sm:$0xff] }
 0x58d   : > { %3252 = vmatmul.f32.gmra.mxu3 %v5260_v4  ;;  %v5273_v4 = vld [vmem:[%s5480_s10 + $0xbe8] sm:$0xff] }
 0x58e   : > { %v3092_v19 = vpop.f32.mrf.mxu2 }
 0x58f   : > { %v3093_v55 = vadd.f32 %v3092_v19, %v7656_v25  ;;  %3478 = vmatmul.f32.gmra.mxu1 %v5261_v9  ;;  %v3804_v25 = vld [vmem:[%s8641_s3 + $0xb8] sm:$0xff]  ;;  %v8704_v9 = vld [vmem:[#allocation2_spill] sm:$0xff] }
 0x590   : > { %v3205_v58 = vpop.f32.mrf.mxu3  ;;  %v3321_v33 = vpop.f32.mrf.mxu0  ;;  %3938 = vmatpush.msra.mxu1 %v3804_v25 }
 0x591   : > { %v3206_v30 = vadd.f32 %v3205_v58, %v3093_v55  ;;  %v3717_v58 = vmax.f32 %v8704_v9, 0.0  ;;  %v5280_v9 = vld [vmem:[%s5480_s10 + $0x170] sm:$0xff] }
 0x593   : > { %3142 = vmatmul.f32.gmra.mxu2 %v5262_v18  ;;  %3368 = vmatmul.f32.gmra.mxu0 %v5263_v26  ;;  %v8080_v31 = vadd.f32 %v3318_v60, %v3206_v30  ;;  %v5271_v60 = vld [vmem:[%s5480_s10 + $0xbe0] sm:$0xff]  ;;  %v5274_v30 = vld [vmem:[%s5480_s10 + $0x50] sm:$0xff]  ;;  %v5275_v26 = vld [vmem:[%s5480_s10 + $0x58] sm:$0xff] }
 0x595   : > { %3255 = vmatmul.f32.gmra.mxu3 %v5264_v36 }
 0x596   : > { %v3095_v1 = vpop.f32.mrf.mxu2 }
 0x597   : > { %v3096_v62 = vadd.f32 %v3095_v1, %v7671_v7  ;;  %3481 = vmatmul.f32.gmra.mxu1 %v5265_v11  ;;  %v5269_v7 = vld [vmem:[%s5480_s10 + $0xb88] sm:$0xff] }
 0x598   : > { %v3208_v28 = vpop.f32.mrf.mxu3  ;;  %v3324_v44 = vpop.f32.mrf.mxu0 }
 0x599   : > { %v3209_v27 = vadd.f32 %v3208_v28, %v3096_v62  ;;  %v8705_v62 = vld [vmem:[#allocation3_spill] sm:$0xff] }
 0x59a   : > { %v3719_v11 = vmax.f32 %v8705_v62, 0.0 }
 0x59b   : > { %3145 = vmatmul.f32.gmra.mxu2 %v5266_v0  ;;  %3371 = vmatmul.f32.gmra.mxu0 %v5267_v52  ;;  %v8090_v37 = vadd.f32 %v3321_v33, %v3209_v27  ;;  %v5277_v0 = vld [vmem:[%s5480_s10 + $0xb8] sm:$0xff]  ;;  %v3802_v52 = vld [vmem:[%s8641_s3 + $0xa8] sm:$0xff] }
 0x59d   : > { %3258 = vmatmul.f32.gmra.mxu3 %v5268_v63 }
 0x59e   : > { %v3098_v8 = vpop.f32.mrf.mxu2 }
 0x59f   : > { %v3099_v3 = vadd.f32 %v3098_v8, %v7683_v13  ;;  %3484 = vmatmul.f32.gmra.mxu1 %v5269_v7  ;;  %v3803_v13 = vld [vmem:[%s8641_s3 + $0xb0] sm:$0xff] }
 0x5a0   : > { %v3211_v49 = vpop.f32.mrf.mxu3  ;;  %v3327_v2 = vpop.f32.mrf.mxu0  ;;  %3939 = vmatpush.msra.mxu1 %v3803_v13  ;;  %v8706_v7 = vld [vmem:[#allocation4_spill] sm:$0xff] }
 0x5a1   : > { %v3212_v56 = vadd.f32 %v3211_v49, %v3099_v3  ;;  %v3721_v49 = vmax.f32 %v8706_v7, 0.0 }
 0x5a2   : > { %3940 = vmatpush.msra.mxu1 %v3802_v52 }
 0x5a3   : > { %3148 = vmatmul.f32.gmra.mxu2 %v5270_v57  ;;  %3374 = vmatmul.f32.gmra.mxu0 %v5271_v60  ;;  %v8097_v16 = vadd.f32 %v3324_v44, %v3212_v56  ;;  %v5276_v44 = vld [vmem:[%s5480_s10 + $0xb0] sm:$0xff]  ;;  %v5279_v60 = vld [vmem:[%s5480_s10 + $0x118] sm:$0xff] }
 0x5a4   : > { %v5278_v56 = vld [vmem:[%s5480_s10 + $0x110] sm:$0xff] }
 0x5a5   : > { %3261 = vmatmul.f32.gmra.mxu3 %v5272_v42 }
 0x5a6   : > { %v3101_v29 = vpop.f32.mrf.mxu2 }
 0x5a7   : > { %v3102_v5 = vadd.f32 %v3101_v29, %v7695_v15  ;;  %3487 = vmatmul.f32.gmra.mxu1 %v5273_v4 }
 0x5a8   : > { %v3214_v19 = vpop.f32.mrf.mxu3  ;;  %v3330_v55 = vpop.f32.mrf.mxu0 }
 0x5a9   : > { %v3215_v33 = vadd.f32 %v3214_v19, %v3102_v5 }
 0x5ab   : > { %3507 = vmatmul.f32.vlgmr.msra.gmra.mxu2 %v5274_v30  ;;  %3833 = vmatmul.f32.vlgmr.msra.gmra.mxu0 %v3717_v58  ;;  %v8107_v18 = vadd.f32 %v3327_v2, %v3215_v33  ;;  %v5281_v33 = vld [vmem:[%s5480_s10 + $0x178] sm:$0xff] }
 0x5ad   : > { %3620 = vmatmul.f32.vlgmr.msra.gmra.mxu3 %v5275_v26 }
 0x5ae   : > { %v3104_v36 = vpop.f32.mrf.mxu2 }
 0x5af   : > { %v3105_v25 = vadd.f32 %v3104_v36, %v7707_v21 }
 0x5b0   : > { %v3217_v15 = vpop.f32.mrf.mxu3  ;;  %v3333_v1 = vpop.f32.mrf.mxu0 }
 0x5b1   : > { %v3218_v28 = vadd.f32 %v3217_v15, %v3105_v25  ;;  %v8708_v15 = vld [vmem:[#allocation6_spill] sm:$0xff] }
 0x5b3   : > { %3510 = vmatmul.f32.gmra.mxu2 %v5276_v44  ;;  %3836 = vmatmul.f32.gmra.mxu0 %v3719_v11  ;;  %v8113_v27 = vadd.f32 %v3330_v55, %v3218_v28  ;;  %v8127_v55 = vpop.f32.mrf.mxu1  ;;  %v5282_v11 = vld [vmem:[%s5480_s10 + $0x1d0] sm:$0xff] }
 0x5b5   : > { %3623 = vmatmul.f32.gmra.mxu3 %v5277_v0  ;;  %v5283_v0 = vld [vmem:[%s5480_s10 + $0x1d8] sm:$0xff] }
 0x5b6   : > { %v3107_v63 = vpop.f32.mrf.mxu2 }
 0x5b7   : > { %v3108_v21 = vadd.f32 %v3107_v63, %v7719_v39  ;;  %v8707_v39 = vld [vmem:[#allocation5_spill] sm:$0xff] }
 0x5b8   : > { %v3220_v8 = vpop.f32.mrf.mxu3  ;;  %v3336_v3 = vpop.f32.mrf.mxu0  ;;  %v3723_v4 = vmax.f32 %v8707_v39, 0.0  ;;  %v8710_v39 = vld [vmem:[#allocation8_spill] sm:$0xff] }
 0x5b9   : > { %v3221_v2 = vadd.f32 %v3220_v8, %v3108_v21  ;;  %v8709_v8 = vld [vmem:[#allocation7_spill] sm:$0xff] }
 0x5bb   : > { %3513 = vmatmul.f32.gmra.mxu2 %v5278_v56  ;;  %3839 = vmatmul.f32.gmra.mxu0 %v3721_v49  ;;  %v8122_v57 = vadd.f32 %v3333_v1, %v3221_v2  ;;  %v3725_v1 = vmax.f32 %v8708_v15, 0.0  ;;  %v8141_v44 = vpop.f32.mrf.mxu1  ;;  %v5284_v49 = vld [vmem:[%s5480_s10 + $0x230] sm:$0xff]  ;;  %v5285_v56 = vld [vmem:[%s5480_s10 + $0x238] sm:$0xff] }
 0x5bd   : > { %3626 = vmatmul.f32.gmra.mxu3 %v5279_v60  ;;  %v3800_v60 = vld [vmem:[%s8641_s3 + $0x98] sm:$0xff] }
 0x5be   : > { %v3110_v42 = vpop.f32.mrf.mxu2 }
 0x5bf   : > { %v3111_v13 = vadd.f32 %v3110_v42, %v7731_v53  ;;  %v3801_v53 = vld [vmem:[%s8641_s3 + $0xa0] sm:$0xff] }
 0x5c0   : > { %v3223_v29 = vpop.f32.mrf.mxu3  ;;  %v3339_v5 = vpop.f32.mrf.mxu0  ;;  %3941 = vmatpush.msra.mxu1 %v3801_v53  ;;  %v5287_v53 = vld [vmem:[%s5480_s10 + $0x298] sm:$0xff] }
 0x5c1   : > { %v3224_v19 = vadd.f32 %v3223_v29, %v3111_v13 }
 0x5c2   : > { %3942 = vmatpush.msra.mxu1 %v3800_v60 }
 0x5c3   : > { %3516 = vmatmul.f32.gmra.mxu2 %v5280_v9  ;;  %3842 = vmatmul.f32.gmra.mxu0 %v3723_v4  ;;  %v8130_v58 = vadd.f32 %v3336_v3, %v3224_v19  ;;  %v3727_v3 = vmax.f32 %v8709_v8, 0.0  ;;  %v3729_v4 = vmax.f32 %v8710_v39, 0.0  ;;  %v5286_v9 = vld [vmem:[%s5480_s10 + $0x290] sm:$0xff] }
 0x5c5   : > { %3629 = vmatmul.f32.gmra.mxu3 %v5281_v33 }
 0x5c6   : > { %v3113_v30 = vpop.f32.mrf.mxu2 }
 0x5c7   : > { %v3114_v26 = vadd.f32 %v3113_v30, %v7743_v50 }
 0x5c8   : > { %v3226_v36 = vpop.f32.mrf.mxu3  ;;  %v3342_v25 = vpop.f32.mrf.mxu0 }
 0x5c9   : > { %v3227_v62 = vadd.f32 %v3226_v36, %v3114_v26 }
 0x5cb   : > { %3519 = vmatmul.f32.gmra.mxu2 %v5282_v11  ;;  %3845 = vmatmul.f32.gmra.mxu0 %v3725_v1  ;;  %v8139_v28 = vadd.f32 %v3339_v5, %v3227_v62  ;;  %v5288_v11 = vld [vmem:[%s5480_s10 + $0x2f0] sm:$0xff] }
 0x5cd   : > { %3632 = vmatmul.f32.gmra.mxu3 %v5283_v0 }
 0x5ce   : > { %v3116_v52 = vpop.f32.mrf.mxu2 }
 0x5cf   : > { %v3117_v63 = vadd.f32 %v3116_v52, %v7755_v47  ;;  %v8153_v47 = vpop.f32.mrf.mxu1  ;;  %v5289_v52 = vld [vmem:[%s5480_s10 + $0x2f8] sm:$0xff] }
 0x5d0   : > { %v3229_v50 = vpop.f32.mrf.mxu3  ;;  %v3345_v21 = vpop.f32.mrf.mxu0 }
 0x5d1   : > { %v3230_v7 = vadd.f32 %v3229_v50, %v3117_v63 }
 0x5d3   : > { %3522 = vmatmul.f32.gmra.mxu2 %v5284_v49  ;;  %3848 = vmatmul.f32.gmra.mxu0 %v3727_v3  ;;  %v8147_v2 = vadd.f32 %v3342_v25, %v3230_v7  ;;  %v8712_v3 = vld [vmem:[#allocation10_spill] sm:$0xff] }
 0x5d4   : > { %v3733_v7 = vmax.f32 %v8712_v3, 0.0 }
 0x5d5   : > { %3635 = vmatmul.f32.gmra.mxu3 %v5285_v56  ;;  %v5290_v56 = vld [vmem:[%s5480_s10 + $0x350] sm:$0xff] }
 0x5d6   : > { %v3119_v42 = vpop.f32.mrf.mxu2 }
 0x5d7   : > { %v3120_v13 = vadd.f32 %v3119_v42, %v7767_v32  ;;  %v8711_v32 = vld [vmem:[#allocation9_spill] sm:$0xff]  ;;  %v8163_v62 = vpop.f32.mrf.mxu1 }
 0x5d8   : > { %v3232_v29 = vpop.f32.mrf.mxu3  ;;  %v3348_v5 = vpop.f32.mrf.mxu0  ;;  %v3731_v15 = vmax.f32 %v8711_v32, 0.0 }
 0x5d9   : > { %v3233_v19 = vadd.f32 %v3232_v29, %v3120_v13  ;;  %v5291_v13 = vld [vmem:[%s5480_s10 + $0x358] sm:$0xff] }
 0x5db   : > { %3525 = vmatmul.f32.gmra.mxu2 %v5286_v9  ;;  %3851 = vmatmul.f32.gmra.mxu0 %v3729_v4  ;;  %v8158_v33 = vadd.f32 %v3345_v21, %v3233_v19  ;;  %v8713_v4 = vld [vmem:[#allocation11_spill] sm:$0xff] }
 0x5dc   : > { %v3735_v19 = vmax.f32 %v8713_v4, 0.0 }
 0x5dd   : > { %3638 = vmatmul.f32.gmra.mxu3 %v5287_v53  ;;  %v5292_v53 = vld [vmem:[%s5480_s10 + $0x3b0] sm:$0xff] }
 0x5de   : > { %v3122_v30 = vpop.f32.mrf.mxu2 }
 0x5df   : > { %v3123_v26 = vadd.f32 %v3122_v30, %v7779_v14  ;;  %v3799_v14 = vld [vmem:[%s8641_s3 + $0x90] sm:$0xff]  ;;  %v8177_v42 = vpop.f32.mrf.mxu1 }
 0x5e0   : > { %v3235_v36 = vpop.f32.mrf.mxu3  ;;  %v3351_v25 = vpop.f32.mrf.mxu0  ;;  %3943 = vmatpush.msra.mxu1 %v3799_v14 }
 0x5e1   : > { %v3236_v1 = vadd.f32 %v3235_v36, %v3123_v26  ;;  %v5293_v26 = vld [vmem:[%s5480_s10 + $0x3b8] sm:$0xff]  ;;  %v3798_v36 = vld [vmem:[%s8641_s3 + $0x88] sm:$0xff] }
 0x5e2   : > { %3944 = vmatpush.msra.mxu1 %v3798_v36 }
 0x5e3   : > { %3528 = vmatmul.f32.gmra.mxu2 %v5288_v11  ;;  %3854 = vmatmul.f32.gmra.mxu0 %v3731_v15  ;;  %v8166_v0 = vadd.f32 %v3348_v5, %v3236_v1  ;;  %v8714_v11 = vld [vmem:[#allocation12_spill] sm:$0xff] }
 0x5e5   : > { %3641 = vmatmul.f32.gmra.mxu3 %v5289_v52  ;;  %v3737_v52 = vmax.f32 %v8714_v11, 0.0  ;;  %v5299_v11 = vld [vmem:[%s5480_s10 + $0x4d8] sm:$0xff] }
 0x5e6   : > { %v3125_v63 = vpop.f32.mrf.mxu2 }
 0x5e7   : > { %v3126_v50 = vadd.f32 %v3125_v63, %v7791_v35  ;;  %v5294_v63 = vld [vmem:[%s5480_s10 + $0x410] sm:$0xff] }
 0x5e8   : > { %v3238_v21 = vpop.f32.mrf.mxu3  ;;  %v3354_v8 = vpop.f32.mrf.mxu0 }
 0x5e9   : > { %v3239_v49 = vadd.f32 %v3238_v21, %v3126_v50  ;;  %v5295_v21 = vld [vmem:[%s5480_s10 + $0x418] sm:$0xff] }
 0x5eb   : > { %3531 = vmatmul.f32.gmra.mxu2 %v5290_v56  ;;  %3857 = vmatmul.f32.gmra.mxu0 %v3733_v7  ;;  %v8175_v60 = vadd.f32 %v3351_v25, %v3239_v49  ;;  %v8189_v25 = vpop.f32.mrf.mxu1  ;;  %v8715_v49 = vld [vmem:[#allocation13_spill] sm:$0xff] }
 0x5ec   : > { %v3739_v56 = vmax.f32 %v8715_v49, 0.0 }
 0x5ed   : > { %3644 = vmatmul.f32.gmra.mxu3 %v5291_v13 }
 0x5ee   : > { %v3128_v29 = vpop.f32.mrf.mxu2 }
 0x5ef   : > { %v3129_v5 = vadd.f32 %v3128_v29, %v7803_v17 }
 0x5f0   : > { %v3241_v35 = vpop.f32.mrf.mxu3  ;;  %v3357_v39 = vpop.f32.mrf.mxu0 }
 0x5f1   : > { %v3242_v9 = vadd.f32 %v3241_v35, %v3129_v5  ;;  %v5296_v5 = vld [vmem:[%s5480_s10 + $0x470] sm:$0xff] }
 0x5f3   : > { %3534 = vmatmul.f32.gmra.mxu2 %v5292_v53  ;;  %3860 = vmatmul.f32.gmra.mxu0 %v3735_v19  ;;  %v8183_v30 = vadd.f32 %v3354_v8, %v3242_v9  ;;  %v8198_v7 = vpop.f32.mrf.mxu1  ;;  %v8716_v53 = vld [vmem:[#allocation14_spill] sm:$0xff] }
 0x5f5   : > { %3647 = vmatmul.f32.gmra.mxu3 %v5293_v26  ;;  %v3741_v26 = vmax.f32 %v8716_v53, 0.0  ;;  %v5303_v53 = vld [vmem:[%s5480_s10 + $0x598] sm:$0xff] }
 0x5f6   : > { %v3131_v17 = vpop.f32.mrf.mxu2 }
 0x5f7   : > { %v3132_v32 = vadd.f32 %v3131_v17, %v7815_v22 }
 0x5f8   : > { %v3244_v15 = vpop.f32.mrf.mxu3  ;;  %v3360_v1 = vpop.f32.mrf.mxu0 }
 0x5f9   : > { %v3245_v14 = vadd.f32 %v3244_v15, %v3132_v32  ;;  %v5298_v32 = vld [vmem:[%s5480_s10 + $0x4d0] sm:$0xff] }
 0x5fb   : > { %3537 = vmatmul.f32.gmra.mxu2 %v5294_v63  ;;  %3863 = vmatmul.f32.gmra.mxu0 %v3737_v52  ;;  %v8194_v50 = vadd.f32 %v3357_v39, %v3245_v14  ;;  %v5297_v39 = vld [vmem:[%s5480_s10 + $0x478] sm:$0xff]  ;;  %v8210_v17 = vpop.f32.mrf.mxu1  ;;  %v8717_v63 = vld [vmem:[#allocation15_spill] sm:$0xff] }
 0x5fd   : > { %3650 = vmatmul.f32.gmra.mxu3 %v5295_v21  ;;  %v3743_v21 = vmax.f32 %v8717_v63, 0.0 }
 0x5fe   : > { %v3134_v8 = vpop.f32.mrf.mxu2 }
 0x5ff   : > { %v3135_v3 = vadd.f32 %v3134_v8, %v7827_v51  ;;  %v3797_v51 = vld [vmem:[%s8641_s3 + $0x80] sm:$0xff] }
 0x600   : > { %v3247_v22 = vpop.f32.mrf.mxu3  ;;  %v3363_v29 = vpop.f32.mrf.mxu0  ;;  %3945 = vmatpush.msra.mxu1 %v3797_v51 }
 0x601   : > { %v3248_v13 = vadd.f32 %v3247_v22, %v3135_v3  ;;  %v5300_v3 = vld [vmem:[%s5480_s10 + $0x530] sm:$0xff] }
 0x603   : > { %3540 = vmatmul.f32.gmra.mxu2 %v5296_v5  ;;  %3866 = vmatmul.f32.gmra.mxu0 %v3739_v56  ;;  %v8202_v35 = vadd.f32 %v3360_v1, %v3248_v13  ;;  %v8221_v49 = vpop.f32.mrf.mxu1  ;;  %v5301_v56 = vld [vmem:[%s5480_s10 + $0x538] sm:$0xff] }
 0x605   : > { %3653 = vmatmul.f32.gmra.mxu3 %v5297_v39  ;;  %v8718_v39 = vld [vmem:[#allocation16_spill] sm:$0xff] }
 0x606   : > { %v3137_v4 = vpop.f32.mrf.mxu2  ;;  %v3745_v51 = vmax.f32 %v8718_v39, 0.0  ;;  %v5306_v39 = vld [vmem:[%s5480_s10 + $0x650] sm:$0xff] }
 0x607   : > { %v3138_v19 = vadd.f32 %v3137_v4, %v7839_v12 }
 0x608   : > { %v3250_v9 = vpop.f32.mrf.mxu3  ;;  %v3366_v1 = vpop.f32.mrf.mxu0 }
 0x609   : > { %v3251_v36 = vadd.f32 %v3250_v9, %v3138_v19  ;;  %v5302_v19 = vld [vmem:[%s5480_s10 + $0x590] sm:$0xff] }
 0x60b   : > { %3543 = vmatmul.f32.gmra.mxu2 %v5298_v32  ;;  %3869 = vmatmul.f32.gmra.mxu0 %v3741_v26  ;;  %v8213_v15 = vadd.f32 %v3363_v29, %v3251_v36  ;;  %v8230_v26 = vpop.f32.mrf.mxu1 }
 0x60d   : > { %3656 = vmatmul.f32.gmra.mxu3 %v5299_v11  ;;  %v8719_v11 = vld [vmem:[#allocation17_spill] sm:$0xff] }
 0x60e   : > { %v3140_v52 = vpop.f32.mrf.mxu2 }
 0x60f   : > { %v3141_v14 = vadd.f32 %v3140_v52, %v7854_v34  ;;  %v3747_v52 = vmax.f32 %v8719_v11, 0.0 }
 0x610   : > { %v3253_v12 = vpop.f32.mrf.mxu3  ;;  %v3369_v13 = vpop.f32.mrf.mxu0 }
 0x611   : > { %v3254_v8 = vadd.f32 %v3253_v12, %v3141_v14  ;;  %v5304_v12 = vld [vmem:[%s5480_s10 + $0x5f0] sm:$0xff] }
 0x613   : > { %3546 = vmatmul.f32.gmra.mxu2 %v5300_v3  ;;  %3872 = vmatmul.f32.gmra.mxu0 %v3743_v21  ;;  %v8219_v22 = vadd.f32 %v3366_v1, %v3254_v8  ;;  %v5305_v21 = vld [vmem:[%s5480_s10 + $0x5f8] sm:$0xff] }
 0x615   : > { %3659 = vmatmul.f32.gmra.mxu3 %v5301_v56  ;;  %v8239_v56 = vpop.f32.mrf.mxu1 }
 0x616   : > { %v3143_v29 = vpop.f32.mrf.mxu2 }
 0x617   : > { %v3144_v5 = vadd.f32 %v3143_v29, %v7869_v20 }
 0x618   : > { %v3256_v34 = vpop.f32.mrf.mxu3  ;;  %v3372_v1 = vpop.f32.mrf.mxu0 }
 0x619   : > { %v3257_v4 = vadd.f32 %v3256_v34, %v3144_v5 }
 0x61b   : > { %3549 = vmatmul.f32.gmra.mxu2 %v5302_v19  ;;  %3875 = vmatmul.f32.gmra.mxu0 %v3745_v51  ;;  %v8227_v9 = vadd.f32 %v3369_v13, %v3257_v4  ;;  %v8720_v13 = vld [vmem:[#allocation18_spill] sm:$0xff]  ;;  %v5307_v4 = vld [vmem:[%s5480_s10 + $0x658] sm:$0xff] }
 0x61c   : > { %v3749_v29 = vmax.f32 %v8720_v13, 0.0 }
 0x61d   : > { %3662 = vmatmul.f32.gmra.mxu3 %v5303_v53 }
 0x61e   : > { %v3146_v36 = vpop.f32.mrf.mxu2 }
 0x61f   : > { %v3147_v32 = vadd.f32 %v3146_v36, %v7884_v61  ;;  %v8721_v36 = vld [vmem:[#allocation19_spill] sm:$0xff] }
 0x620   : > { %v3259_v20 = vpop.f32.mrf.mxu3  ;;  %v3375_v34 = vpop.f32.mrf.mxu0 }
 0x621   : > { %v3260_v14 = vadd.f32 %v3259_v20, %v3147_v32  ;;  %v3751_v32 = vmax.f32 %v8721_v36, 0.0  ;;  %v8248_v20 = vpop.f32.mrf.mxu1 }
 0x623   : > { %3552 = vmatmul.f32.gmra.mxu2 %v5304_v12  ;;  %3878 = vmatmul.f32.gmra.mxu0 %v3747_v52  ;;  %v8235_v63 = vadd.f32 %v3372_v1, %v3260_v14  ;;  %v5308_v52 = vld [vmem:[%s5480_s10 + $0x6b0] sm:$0xff]  ;;  %v5309_v14 = vld [vmem:[%s5480_s10 + $0x6b8] sm:$0xff] }
 0x625   : > { %3665 = vmatmul.f32.gmra.mxu3 %v5305_v21 }
 0x626   : > { %v3149_v8 = vpop.f32.mrf.mxu2 }
 0x627   : > { %v3150_v3 = vadd.f32 %v3149_v8, %v7896_v6 }
 0x628   : > { %v3262_v61 = vpop.f32.mrf.mxu3 }
 0x629   : > { %v3263_v5 = vadd.f32 %v3262_v61, %v3150_v3 }
 0x62b   : > { %3555 = vmatmul.f32.gmra.mxu2 %v5306_v39  ;;  %3881 = vmatmul.f32.gmra.mxu0 %v3749_v29  ;;  %v8243_v51 = vadd.f32 %v3375_v34, %v3263_v5  ;;  %v5310_v29 = vld [vmem:[%s5480_s10 + $0x710] sm:$0xff]  ;;  %v8255_v5 = vpop.f32.mrf.mxu1  ;;  %v5311_v34 = vld [vmem:[%s5480_s10 + $0x718] sm:$0xff] }
 0x62d   : > { %3668 = vmatmul.f32.gmra.mxu3 %v5307_v4 }
 0x62e   : > { %v3508_v19 = vpop.f32.mrf.mxu2 }
 0x62f   : > { %v3509_v53 = vadd.f32 %v3508_v19, %v7909_v48  ;;  %v8722_v48 = vld [vmem:[#allocation20_spill] sm:$0xff] }
 0x630   : > { %v3621_v6 = vpop.f32.mrf.mxu3  ;;  %v3753_v3 = vmax.f32 %v8722_v48, 0.0 }
 0x631   : > { %v3622_v1 = vadd.f32 %v3621_v6, %v3509_v53 }
 0x633   : > { %v3718_v11 = vmax.f32 %v3622_v1, 0.0  ;;  %3558 = vmatmul.f32.gmra.mxu2 %v5308_v52  ;;  %3884 = vmatmul.f32.gmra.mxu0 %v3751_v32  ;;  %v5312_v32 = vld [vmem:[%s5480_s10 + $0x770] sm:$0xff]  ;;  %v5313_v1 = vld [vmem:[%s5480_s10 + $0x778] sm:$0xff] }
 0x635   : > { %3671 = vmatmul.f32.gmra.mxu3 %v5309_v14  ;;  %3946 = vmatmul.f32.vlgmr.msra.gmra.mxu1 %v3718_v11  ;;  %v8262_v11 = vpop.f32.mrf.mxu1 }
 0x636   : > { %v3511_v12 = vpop.f32.mrf.mxu2 }
 0x637   : > { %v3512_v21 = vadd.f32 %v3511_v12, %v7922_v45  ;;  %v8723_v45 = vld [vmem:[#allocation21_spill] sm:$0xff] }
 0x638   : > { %v3624_v8 = vpop.f32.mrf.mxu3  ;;  %v3755_v53 = vmax.f32 %v8723_v45, 0.0 }
 0x639   : > { %v3625_v61 = vadd.f32 %v3624_v8, %v3512_v21 }
 0x63b   : > { %v3720_v13 = vmax.f32 %v3625_v61, 0.0  ;;  %3561 = vmatmul.f32.gmra.mxu2 %v5310_v29  ;;  %3887 = vmatmul.f32.gmra.mxu0 %v3753_v3  ;;  %v5314_v3 = vld [vmem:[%s5480_s10 + $0x7d0] sm:$0xff]  ;;  %v5315_v61 = vld [vmem:[%s5480_s10 + $0x7d8] sm:$0xff] }
 0x63d   : > { %3674 = vmatmul.f32.gmra.mxu3 %v5311_v34  ;;  %3949 = vmatmul.f32.gmra.mxu1 %v3720_v13  ;;  %v8269_v34 = vpop.f32.mrf.mxu1 }
 0x63e   : > { %v3514_v39 = vpop.f32.mrf.mxu2 }
 0x63f   : > { %v3515_v4 = vadd.f32 %v3514_v39, %v7935_v41  ;;  %v8724_v41 = vld [vmem:[#allocation24_spill] sm:$0xff] }
 0x640   : > { %v3627_v19 = vpop.f32.mrf.mxu3  ;;  %v3757_v21 = vmax.f32 %v8724_v41, 0.0 }
 0x641   : > { %v3628_v6 = vadd.f32 %v3627_v19, %v3515_v4 }
 0x643   : > { %v3722_v36 = vmax.f32 %v3628_v6, 0.0  ;;  %3564 = vmatmul.f32.gmra.mxu2 %v5312_v32  ;;  %3890 = vmatmul.f32.gmra.mxu0 %v3755_v53  ;;  %v5316_v53 = vld [vmem:[%s5480_s10 + $0x830] sm:$0xff]  ;;  %v5317_v6 = vld [vmem:[%s5480_s10 + $0x838] sm:$0xff] }
 0x645   : > { %3677 = vmatmul.f32.gmra.mxu3 %v5313_v1  ;;  %3952 = vmatmul.f32.gmra.mxu1 %v3722_v36 }
 0x646   : > { %v3517_v52 = vpop.f32.mrf.mxu2 }
 0x647   : > { %v3518_v14 = vadd.f32 %v3517_v52, %v7948_v24  ;;  %v8725_v24 = vld [vmem:[#allocation25_spill] sm:$0xff] }
 0x648   : > { %v3630_v12 = vpop.f32.mrf.mxu3  ;;  %v3759_v4 = vmax.f32 %v8725_v24, 0.0 }
 0x649   : > { %v3631_v8 = vadd.f32 %v3630_v12, %v3518_v14  ;;  %v8276_v12 = vpop.f32.mrf.mxu1 }
 0x64b   : > { %v3724_v48 = vmax.f32 %v3631_v8, 0.0  ;;  %3567 = vmatmul.f32.gmra.mxu2 %v5314_v3  ;;  %3893 = vmatmul.f32.gmra.mxu0 %v3757_v21  ;;  %v5318_v21 = vld [vmem:[%s5480_s10 + $0x890] sm:$0xff]  ;;  %v8279_v8 = vpop.f32.mrf.mxu0 }
 0x64d   : > { %3680 = vmatmul.f32.gmra.mxu3 %v5315_v61  ;;  %3955 = vmatmul.f32.gmra.mxu1 %v3724_v48  ;;  %v5319_v48 = vld [vmem:[%s5480_s10 + $0x898] sm:$0xff] }
 0x64e   : > { %v3520_v13 = vpop.f32.mrf.mxu2 }
 0x64f   : > { %v3521_v29 = vadd.f32 %v3520_v13, %v7961_v10  ;;  %v8726_v10 = vld [vmem:[#allocation28_spill] sm:$0xff]  ;;  %v8727_v13 = vld [vmem:[#allocation29_spill] sm:$0xff] }
 0x650   : > { %v3633_v39 = vpop.f32.mrf.mxu3  ;;  %v3761_v52 = vmax.f32 %v8726_v10, 0.0 }
 0x651   : > { %v3634_v19 = vadd.f32 %v3633_v39, %v3521_v29  ;;  %v3763_v29 = vmax.f32 %v8727_v13, 0.0 }
 0x653   : > { %v3726_v45 = vmax.f32 %v3634_v19, 0.0  ;;  %3570 = vmatmul.f32.gmra.mxu2 %v5316_v53  ;;  %3896 = vmatmul.f32.gmra.mxu0 %v3759_v4  ;;  %v5320_v4 = vld [vmem:[%s5480_s10 + $0x8f0] sm:$0xff]  ;;  %v8285_v19 = vpop.f32.mrf.mxu1 }
 0x655   : > { %3683 = vmatmul.f32.gmra.mxu3 %v5317_v6  ;;  %3958 = vmatmul.f32.gmra.mxu1 %v3726_v45  ;;  %v5321_v45 = vld [vmem:[%s5480_s10 + $0x8f8] sm:$0xff]  ;;  %v8288_v6 = vpop.f32.mrf.mxu0 }
 0x656   : > { %v3523_v36 = vpop.f32.mrf.mxu2 }
 0x657   : > { %v3524_v32 = vadd.f32 %v3523_v36, %v7974_v40 }
 0x658   : > { %v3636_v1 = vpop.f32.mrf.mxu3 }
 0x659   : > { %v3637_v14 = vadd.f32 %v3636_v1, %v3524_v32  ;;  %v8728_v32 = vld [vmem:[#allocation32_spill] sm:$0xff] }
 0x65a   : > { %v3765_v1 = vmax.f32 %v8728_v32, 0.0  ;;  %v8730_v32 = vld [vmem:[#allocation36_spill] sm:$0xff] }
 0x65b   : > { %v3728_v41 = vmax.f32 %v3637_v14, 0.0  ;;  %3573 = vmatmul.f32.gmra.mxu2 %v5318_v21  ;;  %3899 = vmatmul.f32.gmra.mxu0 %v3761_v52  ;;  %v5322_v14 = vld [vmem:[%s5480_s10 + $0x950] sm:$0xff]  ;;  %v5323_v21 = vld [vmem:[%s5480_s10 + $0x958] sm:$0xff] }
 0x65d   : > { %3686 = vmatmul.f32.gmra.mxu3 %v5319_v48  ;;  %3961 = vmatmul.f32.gmra.mxu1 %v3728_v41  ;;  %v3420_v41 = vadd.f32 %v8127_v55, %v8010_v43  ;;  %v8296_v48 = vpop.f32.mrf.mxu1  ;;  %v3423_v43 = vadd.f32 %v8141_v44, %v8026_v38  ;;  %v5325_v55 = vld [vmem:[%s5480_s10 + $0x9b8] sm:$0xff]  ;;  %v3426_v38 = vadd.f32 %v8153_v47, %v8051_v54 }
 0x65e   : > { %v3526_v3 = vpop.f32.mrf.mxu2  ;;  %v5327_v44 = vld [vmem:[%s5480_s10 + $0xa18] sm:$0xff]  ;;  %v3429_v54 = vadd.f32 %v8163_v62, %v8073_v23  ;;  %v3432_v23 = vadd.f32 %v8177_v42, %v8080_v31 }
 0x65f   : > { %v3527_v40 = vadd.f32 %v3526_v3, %v7987_v59  ;;  %v5331_v62 = vld [vmem:[%s5480_s10 + $0xad8] sm:$0xff] }
 0x660   : > { %v3639_v61 = vpop.f32.mrf.mxu3  ;;  %v5333_v31 = vld [vmem:[%s5480_s10 + $0xb38] sm:$0xff] }
 0x661   : > { %v3640_v39 = vadd.f32 %v3639_v61, %v3527_v40  ;;  %v8729_v61 = vld [vmem:[#allocation33_spill] sm:$0xff] }
 0x662   : > { %v3767_v13 = vmax.f32 %v8729_v61, 0.0 }
 0x663   : > { %v3730_v24 = vmax.f32 %v3640_v39, 0.0  ;;  %3576 = vmatmul.f32.gmra.mxu2 %v5320_v4  ;;  %3902 = vmatmul.f32.gmra.mxu0 %v3763_v29  ;;  %v8299_v29 = vpop.f32.mrf.mxu0  ;;  %v5324_v4 = vld [vmem:[%s5480_s10 + $0x9b0] sm:$0xff] }
 0x665   : > { %3689 = vmatmul.f32.gmra.mxu3 %v5321_v45  ;;  %3964 = vmatmul.f32.gmra.mxu1 %v3730_v24 }
 0x666   : > { %v3529_v53 = vpop.f32.mrf.mxu2 }
 0x667   : > { %v3530_v59 = vadd.f32 %v3529_v53, %v8000_v46 }
 0x668   : > { %v3642_v36 = vpop.f32.mrf.mxu3 }
 0x669   : > { %v3643_v10 = vadd.f32 %v3642_v36, %v3530_v59  ;;  %v8305_v59 = vpop.f32.mrf.mxu1 }
 0x66b   : > { %v3732_v52 = vmax.f32 %v3643_v10, 0.0  ;;  %3579 = vmatmul.f32.gmra.mxu2 %v5322_v14  ;;  %3905 = vmatmul.f32.gmra.mxu0 %v3765_v1  ;;  %v3769_v1 = vmax.f32 %v8730_v32, 0.0 }
 0x66d   : > { %3692 = vmatmul.f32.gmra.mxu3 %v5323_v21  ;;  %3967 = vmatmul.f32.gmra.mxu1 %v3732_v52  ;;  %v8308_v52 = vpop.f32.mrf.mxu0 }
 0x66e   : > { %v3532_v3 = vpop.f32.mrf.mxu2 }
 0x66f   : > { %v3533_v46 = vadd.f32 %v3532_v3, %v3420_v41  ;;  %v5326_v41 = vld [vmem:[%s5480_s10 + $0xa10] sm:$0xff] }
 0x670   : > { %v3645_v40 = vpop.f32.mrf.mxu3 }
 0x671   : > { %v3646_v39 = vadd.f32 %v3645_v40, %v3533_v46  ;;  %v8731_v40 = vld [vmem:[#allocation37_spill] sm:$0xff] }
 0x672   : > { %v3771_v61 = vmax.f32 %v8731_v40, 0.0 }
 0x673   : > { %v3734_v24 = vmax.f32 %v3646_v39, 0.0  ;;  %3582 = vmatmul.f32.gmra.mxu2 %v5324_v4  ;;  %3908 = vmatmul.f32.gmra.mxu0 %v3767_v13  ;;  %v8315_v39 = vpop.f32.mrf.mxu1  ;;  %v5328_v4 = vld [vmem:[%s5480_s10 + $0xa70] sm:$0xff] }
 0x675   : > { %3695 = vmatmul.f32.gmra.mxu3 %v5325_v55  ;;  %3970 = vmatmul.f32.gmra.mxu1 %v3734_v24  ;;  %v8320_v47 = vpop.f32.mrf.mxu0 }
 0x676   : > { %v3535_v45 = vpop.f32.mrf.mxu2 }
 0x677   : > { %v3536_v53 = vadd.f32 %v3535_v45, %v3423_v43  ;;  %v5329_v43 = vld [vmem:[%s5480_s10 + $0xa78] sm:$0xff] }
 0x678   : > { %v3648_v36 = vpop.f32.mrf.mxu3 }
 0x679   : > { %v3649_v10 = vadd.f32 %v3648_v36, %v3536_v53  ;;  %v8732_v36 = vld [vmem:[#allocation39_spill] sm:$0xff] }
 0x67a   : > { %v3773_v32 = vmax.f32 %v8732_v36, 0.0 }
 0x67b   : > { %v3736_v14 = vmax.f32 %v3649_v10, 0.0  ;;  %3585 = vmatmul.f32.gmra.mxu2 %v5326_v41  ;;  %3911 = vmatmul.f32.gmra.mxu0 %v3769_v1  ;;  %v8325_v41 = vpop.f32.mrf.mxu1 }
 0x67d   : > { %3698 = vmatmul.f32.gmra.mxu3 %v5327_v44  ;;  %3973 = vmatmul.f32.gmra.mxu1 %v3736_v14  ;;  %v5330_v14 = vld [vmem:[%s5480_s10 + $0xad0] sm:$0xff]  ;;  %v8330_v44 = vpop.f32.mrf.mxu0 }
 0x67e   : > { %v3538_v21 = vpop.f32.mrf.mxu2 }
 0x67f   : > { %v3539_v3 = vadd.f32 %v3538_v21, %v3426_v38 }
 0x680   : > { %v3651_v46 = vpop.f32.mrf.mxu3 }
 0x681   : > { %v3652_v13 = vadd.f32 %v3651_v46, %v3539_v3  ;;  %v8733_v46 = vld [vmem:[#allocation42_spill] sm:$0xff] }
 0x682   : > { %v3775_v40 = vmax.f32 %v8733_v46, 0.0 }
 0x683   : > { %v3738_v24 = vmax.f32 %v3652_v13, 0.0  ;;  %3588 = vmatmul.f32.gmra.mxu2 %v5328_v4  ;;  %3914 = vmatmul.f32.gmra.mxu0 %v3771_v61  ;;  %v3435_v4 = vadd.f32 %v8189_v25, %v8090_v37  ;;  %v8337_v42 = vpop.f32.mrf.mxu1  ;;  %v3438_v37 = vadd.f32 %v8198_v7, %v8097_v16  ;;  %v5335_v25 = vld [vmem:[%s5480_s10 + $0xb98] sm:$0xff]  ;;  %v3441_v16 = vadd.f32 %v8210_v17, %v8107_v18 }
 0x684   : > { %v5337_v7 = vld [vmem:[%s5480_s10 + $0xbf8] sm:$0xff] }
 0x685   : > { %3701 = vmatmul.f32.gmra.mxu3 %v5329_v43  ;;  %3976 = vmatmul.f32.gmra.mxu1 %v3738_v24  ;;  %v5332_v24 = vld [vmem:[%s5480_s10 + $0xb30] sm:$0xff]  ;;  %v8340_v36 = vpop.f32.mrf.mxu0 }
 0x686   : > { %v3541_v55 = vpop.f32.mrf.mxu2 }
 0x687   : > { %v3542_v45 = vadd.f32 %v3541_v55, %v3429_v54 }
 0x688   : > { %v3654_v53 = vpop.f32.mrf.mxu3 }
 0x689   : > { %v3655_v1 = vadd.f32 %v3654_v53, %v3542_v45  ;;  %v8734_v45 = vld [vmem:[#allocation45_spill] sm:$0xff] }
 0x68a   : > { %v3777_v53 = vmax.f32 %v8734_v45, 0.0  ;;  %v3444_v45 = vadd.f32 %v8221_v49, %v8113_v27 }
 0x68b   : > { %v3740_v10 = vmax.f32 %v3655_v1, 0.0  ;;  %3591 = vmatmul.f32.gmra.mxu2 %v5330_v14  ;;  %3917 = vmatmul.f32.gmra.mxu0 %v3773_v32 }
 0x68d   : > { %3704 = vmatmul.f32.gmra.mxu3 %v5331_v62  ;;  %3979 = vmatmul.f32.gmra.mxu1 %v3740_v10  ;;  %v5334_v10 = vld [vmem:[%s5480_s10 + $0xb90] sm:$0xff]  ;;  %v8346_v62 = vpop.f32.mrf.mxu1 }
 0x68e   : > { %v3544_v38 = vpop.f32.mrf.mxu2 }
 0x68f   : > { %v3545_v21 = vadd.f32 %v3544_v38, %v3432_v23 }
 0x690   : > { %v3657_v3 = vpop.f32.mrf.mxu3 }
 0x691   : > { %v3658_v61 = vadd.f32 %v3657_v3, %v3545_v21  ;;  %v8735_v21 = vld [vmem:[#allocation47_spill] sm:$0xff] }
 0x692   : > { %v3779_v3 = vmax.f32 %v8735_v21, 0.0 }
 0x693   : > { %v3742_v13 = vmax.f32 %v3658_v61, 0.0  ;;  %3594 = vmatmul.f32.gmra.mxu2 %v5332_v24  ;;  %3920 = vmatmul.f32.gmra.mxu0 %v3775_v40  ;;  %v8349_v40 = vpop.f32.mrf.mxu0 }
 0x695   : > { %3707 = vmatmul.f32.gmra.mxu3 %v5333_v31  ;;  %3982 = vmatmul.f32.gmra.mxu1 %v3742_v13  ;;  %v5336_v13 = vld [vmem:[%s5480_s10 + $0xbf0] sm:$0xff]  ;;  %s4748_s10 = sshll.u32 %s8737_s25, 3 }
 0x696   : > { %v3547_v54 = vpop.f32.mrf.mxu2  ;;  %s8391_s26 = scalar_lea.vmem %s8643_s5, %s4748_s10 }
 0x697   : > { %v3548_v43 = vadd.f32 %v3547_v54, %v3435_v4 }
 0x698   : > { %v3660_v55 = vpop.f32.mrf.mxu3 }
 0x699   : > { %v3661_v32 = vadd.f32 %v3660_v55, %v3548_v43  ;;  %v8355_v43 = vpop.f32.mrf.mxu1 }
 0x69b   : > { %v3744_v1 = vmax.f32 %v3661_v32, 0.0  ;;  %3597 = vmatmul.f32.gmra.mxu2 %v5334_v10  ;;  %3923 = vmatmul.f32.gmra.mxu0 %v3777_v53  ;;  %v8362_v53 = vld [vmem:[%s8642_s4] ss:$0 sm:$0xff] }
 0x69d   : > { %3710 = vmatmul.f32.gmra.mxu3 %v5335_v25  ;;  %3985 = vmatmul.f32.gmra.mxu1 %v3744_v1  ;;  %v3835_v1 = vadd.f32 %v8362_v53, %v8279_v8 }
 0x69e   : > { %v3550_v14 = vpop.f32.mrf.mxu2 }
 0x69f   : > { %v3551_v23 = vadd.f32 %v3550_v14, %v3438_v37 }
 0x6a0   : > { %v3663_v38 = vpop.f32.mrf.mxu3 }
 0x6a1   : > { %v3664_v46 = vadd.f32 %v3663_v38, %v3551_v23  ;;  %v3447_v23 = vadd.f32 %v8230_v26, %v8122_v57 }
 0x6a3   : > { %v3746_v61 = vmax.f32 %v3664_v46, 0.0  ;;  %3600 = vmatmul.f32.gmra.mxu2 %v5336_v13  ;;  %3926 = vmatmul.f32.gmra.mxu0 %v3779_v3  ;;  %v3838_v3 = vadd.f32 %v8362_v53, %v8288_v6 }
 0x6a5   : > { %3713 = vmatmul.f32.gmra.mxu3 %v5337_v7  ;;  %3988 = vmatmul.f32.gmra.mxu1 %v3746_v61  ;;  %v3450_v7 = vadd.f32 %v8239_v56, %v8130_v58  ;;  %v3453_v58 = vadd.f32 %v8248_v20, %v8139_v28 }
 0x6a6   : > { %v3553_v24 = vpop.f32.mrf.mxu2 }
 0x6a7   : > { %v3554_v4 = vadd.f32 %v3553_v24, %v3441_v16 }
 0x6a8   : > { %v3666_v31 = vpop.f32.mrf.mxu3 }
 0x6a9   : > { %v3667_v54 = vadd.f32 %v3666_v31, %v3554_v4 }
 0x6ab   : > { %v3748_v55 = vmax.f32 %v3667_v54, 0.0  ;;  %v3841_v54 = vadd.f32 %v8362_v53, %v8299_v29 }
 0x6ad   : > { %3991 = vmatmul.f32.gmra.mxu1 %v3748_v55  ;;  %v8374_v55 = vpop.f32.mrf.mxu0 }
 0x6ae   : > { %v3556_v18 = vpop.f32.mrf.mxu2 }
 0x6af   : > { %v3557_v17 = vadd.f32 %v3556_v18, %v3444_v45 }
 0x6b0   : > { %v3669_v32 = vpop.f32.mrf.mxu3 }
 0x6b1   : > { %v3670_v10 = vadd.f32 %v3669_v32, %v3557_v17 }
 0x6b2   : > { %v3947_v37 = vpop.f32.mrf.mxu1 }
 0x6b3   : > { %v3750_v25 = vmax.f32 %v3670_v10, 0.0  ;;  %v3948_v14 = vadd.f32 %v3947_v37, %v3835_v1 }
 0x6b5   : > { %v4749_v27 = vmul.f32 -1.442695, %v3948_v14  ;;  %3994 = vmatmul.f32.gmra.mxu1 %v3750_v25 }
 0x6b6   : > { %v3559_v49 = vpop.f32.mrf.mxu2 }
 0x6b7   : > { %4825 = vpow2.f32 %v4749_v27  ;;  %v3560_v38 = vadd.f32 %v3559_v49, %v3447_v23  ;;  %v3844_v23 = vadd.f32 %v8362_v53, %v8308_v52  ;;  %v3456_v52 = vadd.f32 %v8255_v5, %v8147_v2 }
 0x6b8   : > { %v3672_v21 = vpop.f32.mrf.mxu3  ;;  %v3847_v5 = vadd.f32 %v8362_v53, %v8320_v47 }
 0x6b9   : > { %v3673_v46 = vadd.f32 %v3672_v21, %v3560_v38 }
 0x6ba   : > { %v3950_v61 = vpop.f32.mrf.mxu1 }
 0x6bb   : > { %v3752_v13 = vmax.f32 %v3673_v46, 0.0  ;;  %v3951_v8 = vadd.f32 %v3950_v61, %v3838_v3  ;;  %v8384_v61 = vpop.f32.mrf.mxu0 }
 0x6bd   : > { %v4826_v16 = vpop.eup %4825  ;;  %v4750_v24 = vmul.f32 -1.442695, %v3951_v8  ;;  %3997 = vmatmul.f32.gmra.mxu1 %v3752_v13 }
 0x6be   : > { %v4139_v57 = vadd.f32 1.0, %v4826_v16  ;;  %v3562_v26 = vpop.f32.mrf.mxu2 }
 0x6bf   : > { %4827 = vpow2.f32 %v4750_v24  ;;  %v3563_v4 = vadd.f32 %v3562_v26, %v3450_v7 }
 0x6c0   : > { %4829 = vrcp.f32 %v4139_v57  ;;  %v3675_v31 = vpop.f32.mrf.mxu3  ;;  %v4180_v38 = vand.u32 2147483647, %v4139_v57  ;;  %v4182_v28 = vand.u32 2147483648, %v4139_v57  ;;  %vm4176_vm1 = vweird.f32 %v4139_v57 }
 0x6c1   : > { %v3676_v6 = vadd.f32 %v3675_v31, %v3563_v4 }
 0x6c2   : > { %v3953_v45 = vpop.f32.mrf.mxu1  ;;  %v4183_v24 = vor.u32 1.1754944e-38, %v4182_v28  ;;  %vm4181_vm4 = vcmp.eq.f32.partialorder %v4180_v38, 8.507059e+37 }
 0x6c3   : > { %v3754_v18 = vmax.f32 %v3676_v6, 0.0  ;;  %v3954_v17 = vadd.f32 %v3953_v45, %v3841_v54 }
 0x6c5   : > { %v4828_v32 = vpop.eup %4827  ;;  %v4751_v56 = vmul.f32 -1.442695, %v3954_v17  ;;  %4000 = vmatmul.f32.gmra.mxu1 %v3754_v18 }
 0x6c6   : > { %v4830_v1 = vpop.eup %4829  ;;  %v8378_v10 = vadd.f32 1.0, %v4828_v32  ;;  %v3565_v37 = vpop.f32.mrf.mxu2 }
 0x6c7   : > { %v4172_v25 = vmul.f32 %v4830_v1, %v4139_v57  ;;  %4831 = vpow2.f32 %v4751_v56  ;;  %v3566_v29 = vadd.f32 %v3565_v37, %v3453_v58  ;;  %vm4177_vm0 = vweird.f32 %v4830_v1 }
 0x6c8   : > { %4833 = vrcp.f32 %v8378_v10  ;;  %v3678_v14 = vpop.f32.mrf.mxu3  ;;  %vm4178_vm2 = vmor %vm4176_vm1, %vm4177_vm0  ;;  %v4195_v18 = vand.u32 2147483647, %v8378_v10  ;;  %v4197_v17 = vand.u32 2147483648, %v8378_v10  ;;  %vm4191_vm6 = vweird.f32 %v8378_v10 }
 0x6c9   : > { %v4173_v27 = vsub.f32 1.0, %v4172_v25  ;;  %v3679_v49 = vadd.f32 %v3678_v14, %v3566_v29 }
 0x6ca   : > { %v3956_v20 = vpop.f32.mrf.mxu1  ;;  %vm4196_vm8 = vcmp.eq.f32.partialorder %v4195_v18, 8.507059e+37 }
 0x6cb   : > { %v4174_v21 = vmul.f32 %v4830_v1, %v4173_v27  ;;  %v3756_v3 = vmax.f32 %v3679_v49, 0.0  ;;  %v3957_v46 = vadd.f32 %v3956_v20, %v3844_v23  ;;  %v3459_v23 = vadd.f32 %v8262_v11, %v8158_v33  ;;  %v8406_v27 = vpop.f32.mrf.mxu0 }
 0x6cc   : > { %v4198_v49 = vor.u32 1.1754944e-38, %v4197_v17  ;;  %v3850_v33 = vadd.f32 %v8362_v53, %v8330_v44 }
 0x6cd   : > { %v4832_v13 = vpop.eup %4831  ;;  %v4175_v8 = vadd.f32 %v4830_v1, %v4174_v21  ;;  %v4752_v16 = vmul.f32 -1.442695, %v3957_v46  ;;  %4003 = vmatmul.f32.gmra.mxu1 %v3756_v3 }
 0x6ce   : > { %v4834_v7 = vpop.eup %4833  ;;  %v8393_v26 = vadd.f32 1.0, %v4832_v13  ;;  %v3568_v4 = vpop.f32.mrf.mxu2 }
 0x6cf   : > { %v4179_v31 = vsel %vm4178_vm2, %v4830_v1, %v4175_v8  ;;  %v4187_v57 = vmul.f32 %v4834_v7, %v8378_v10  ;;  %4835 = vpow2.f32 %v4752_v16  ;;  %v3569_v45 = vadd.f32 %v3568_v4, %v3456_v52 }
 0x6d0   : > { %v4184_v54 = vsel %vm4181_vm4, %v4183_v24, %v4179_v31  ;;  %4837 = vrcp.f32 %v8393_v26  ;;  %v3681_v2 = vpop.f32.mrf.mxu3  ;;  %vm4192_vm5 = vweird.f32 %v4834_v7  ;;  %v4210_v13 = vand.u32 2147483647, %v8393_v26 }
 0x6d1   : > { %4652 = vst.msk [vmem:[%s8391_s26] sm:$0xff] %vm4651_vm3, %v4184_v54  ;;  %v4188_v6 = vsub.f32 1.0, %v4187_v57  ;;  %v3682_v56 = vadd.f32 %v3681_v2, %v3569_v45  ;;  %vm4193_vm7 = vmor %vm4191_vm6, %vm4192_vm5  ;;  %v4212_v8 = vand.u32 2147483648, %v8393_v26  ;;  %vm4206_vm10 = vweird.f32 %v8393_v26 }
 0x6d2   : > { %v3959_v32 = vpop.f32.mrf.mxu1  ;;  %v3462_v2 = vadd.f32 %v8269_v34, %v8166_v0  ;;  %vm4211_vm12 = vcmp.eq.f32.partialorder %v4210_v13, 8.507059e+37  ;;  %v3853_v0 = vadd.f32 %v8362_v53, %v8340_v36 }
 0x6d3   : > { %v4189_v58 = vmul.f32 %v4834_v7, %v4188_v6  ;;  %v3960_v1 = vadd.f32 %v3959_v32, %v3847_v5  ;;  %v3758_v29 = vmax.f32 %v3682_v56, 0.0  ;;  %v4213_v5 = vor.u32 1.1754944e-38, %v4212_v8  ;;  %v8424_v32 = vpop.f32.mrf.mxu0 }
 0x6d4   : > { %v3856_v8 = vadd.f32 %v8362_v53, %v8349_v40 }
 0x6d5   : > { %v4836_v37 = vpop.eup %4835  ;;  %v4190_v25 = vadd.f32 %v4834_v7, %v4189_v58  ;;  %v4753_v14 = vmul.f32 -1.442695, %v3960_v1  ;;  %4006 = vmatmul.f32.gmra.mxu1 %v3758_v29 }
 0x6d6   : > { %v4838_v47 = vpop.eup %4837  ;;  %v8408_v38 = vadd.f32 1.0, %v4836_v37  ;;  %v3571_v28 = vpop.f32.mrf.mxu2 }
 0x6d7   : > { %v4194_v20 = vsel %vm4193_vm7, %v4834_v7, %v4190_v25  ;;  %v4202_v21 = vmul.f32 %v4838_v47, %v8393_v26  ;;  %4839 = vpow2.f32 %v4753_v14  ;;  %v3572_v46 = vadd.f32 %v3571_v28, %v3459_v23 }
 0x6d8   : > { %v4199_v10 = vsel %vm4196_vm8, %v4198_v49, %v4194_v20  ;;  %4841 = vrcp.f32 %v8408_v38  ;;  %v3684_v3 = vpop.f32.mrf.mxu3  ;;  %vm4207_vm9 = vweird.f32 %v4838_v47  ;;  %v4225_v1 = vand.u32 2147483647, %v8408_v38 }
 0x6d9   : > { %4653 = vst.msk [vmem:[%s8391_s26 + $0x8] sm:$0xff] %vm4651_vm3, %v4199_v10  ;;  %v4203_v11 = vsub.f32 1.0, %v4202_v21  ;;  %v3685_v52 = vadd.f32 %v3684_v3, %v3572_v46  ;;  %vm4208_vm11 = vmor %vm4206_vm10, %vm4207_vm9  ;;  %v4227_v37 = vand.u32 2147483648, %v8408_v38  ;;  %vm4221_vm14 = vweird.f32 %v8408_v38 }
 0x6da   : > { %v3962_v16 = vpop.f32.mrf.mxu1  ;;  %v3465_v21 = vadd.f32 %v8276_v12, %v8175_v60  ;;  %vm4226_vm0 = vcmp.eq.f32.partialorder %v4225_v1, 8.507059e+37 }
 0x6db   : > { %v4204_v7 = vmul.f32 %v4838_v47, %v4203_v11  ;;  %v3963_v24 = vadd.f32 %v3962_v16, %v3850_v33  ;;  %v3760_v57 = vmax.f32 %v3685_v52, 0.0  ;;  %v4228_v10 = vor.u32 1.1754944e-38, %v4227_v37  ;;  %v8444_v16 = vpop.f32.mrf.mxu0 }
 0x6dd   : > { %v4840_v4 = vpop.eup %4839  ;;  %v4205_v31 = vadd.f32 %v4838_v47, %v4204_v7  ;;  %v4754_v54 = vmul.f32 -1.442695, %v3963_v24  ;;  %4009 = vmatmul.f32.gmra.mxu1 %v3760_v57 }
 0x6de   : > { %v4842_v44 = vpop.eup %4841  ;;  %v8421_v6 = vadd.f32 1.0, %v4840_v4  ;;  %v3574_v45 = vpop.f32.mrf.mxu2 }
 0x6df   : > { %v4209_v18 = vsel %vm4208_vm11, %v4838_v47, %v4205_v31  ;;  %v4217_v17 = vmul.f32 %v4842_v44, %v8408_v38  ;;  %4843 = vpow2.f32 %v4754_v54  ;;  %v3575_v56 = vadd.f32 %v3574_v45, %v3462_v2 }
 0x6e0   : > { %v4214_v26 = vsel %vm4211_vm12, %v4213_v5, %v4209_v18  ;;  %4845 = vrcp.f32 %v8421_v6  ;;  %v3687_v58 = vpop.f32.mrf.mxu3  ;;  %vm4222_vm13 = vweird.f32 %v4842_v44  ;;  %v4240_v7 = vand.u32 2147483647, %v8421_v6 }
 0x6e1   : > { %4654 = vst.msk [vmem:[%s8391_s26 + $0x10] sm:$0xff] %vm4651_vm3, %v4214_v26  ;;  %v4218_v34 = vsub.f32 1.0, %v4217_v17  ;;  %v3688_v14 = vadd.f32 %v3687_v58, %v3575_v56  ;;  %vm4223_vm15 = vmor %vm4221_vm14, %vm4222_vm13  ;;  %v4242_v52 = vand.u32 2147483648, %v8421_v6  ;;  %vm4236_vm2 = vweird.f32 %v8421_v6 }
 0x6e2   : > { %v3965_v25 = vpop.f32.mrf.mxu1  ;;  %v3468_v45 = vadd.f32 %v8285_v19, %v8183_v30  ;;  %vm4241_vm5 = vcmp.eq.f32.partialorder %v4240_v7, 8.507059e+37  ;;  %v3859_v56 = vadd.f32 %v8362_v53, %v8374_v55 }
 0x6e3   : > { %v4219_v29 = vmul.f32 %v4842_v44, %v4218_v34  ;;  %v3966_v47 = vadd.f32 %v3965_v25, %v3853_v0  ;;  %v3762_v28 = vmax.f32 %v3688_v14, 0.0  ;;  %v4243_v18 = vor.u32 1.1754944e-38, %v4242_v52 }
 0x6e5   : > { %v4844_v23 = vpop.eup %4843  ;;  %v4220_v49 = vadd.f32 %v4842_v44, %v4219_v29  ;;  %v4755_v20 = vmul.f32 -1.442695, %v3966_v47  ;;  %4012 = vmatmul.f32.gmra.mxu1 %v3762_v28 }
 0x6e6   : > { %v4846_v36 = vpop.eup %4845  ;;  %v8436_v3 = vadd.f32 1.0, %v4844_v23  ;;  %v3577_v33 = vpop.f32.mrf.mxu2 }
 0x6e7   : > { %v4224_v11 = vsel %vm4223_vm15, %v4842_v44, %v4220_v49  ;;  %v4232_v46 = vmul.f32 %v4846_v36, %v8421_v6  ;;  %4847 = vpow2.f32 %v4755_v20  ;;  %v3578_v12 = vadd.f32 %v3577_v33, %v3465_v21  ;;  %v8461_v23 = vpop.f32.mrf.mxu0 }
 0x6e8   : > { %v4229_v13 = vsel %vm4226_vm0, %v4228_v10, %v4224_v11  ;;  %4849 = vrcp.f32 %v8436_v3  ;;  %v3690_v38 = vpop.f32.mrf.mxu3  ;;  %vm4237_vm1 = vweird.f32 %v4846_v36  ;;  %v4255_v1 = vand.u32 2147483647, %v8436_v3 }
 0x6e9   : > { %4655 = vst.msk [vmem:[%s8391_s26 + $0x18] sm:$0xff] %vm4651_vm3, %v4229_v13  ;;  %v4233_v60 = vsub.f32 1.0, %v4232_v46  ;;  %v3691_v31 = vadd.f32 %v3690_v38, %v3578_v12  ;;  %vm4238_vm4 = vmor %vm4236_vm2, %vm4237_vm1  ;;  %v4257_v37 = vand.u32 2147483648, %v8436_v3  ;;  %vm4251_vm7 = vweird.f32 %v8436_v3 }
 0x6ea   : > { %v3968_v24 = vpop.f32.mrf.mxu1  ;;  %v3471_v21 = vadd.f32 %v8296_v48, %v8194_v50  ;;  %vm4256_vm9 = vcmp.eq.f32.partialorder %v4255_v1, 8.507059e+37 }
 0x6eb   : > { %v4234_v4 = vmul.f32 %v4846_v36, %v4233_v60  ;;  %v3969_v57 = vadd.f32 %v3968_v24, %v3856_v8  ;;  %v3764_v40 = vmax.f32 %v3691_v31, 0.0  ;;  %v4258_v10 = vor.u32 1.1754944e-38, %v4257_v37 }
 0x6ec   : > { %v3862_v8 = vadd.f32 %v8362_v53, %v8384_v61 }
 0x6ed   : > { %v4848_v54 = vpop.eup %4847  ;;  %v4235_v44 = vadd.f32 %v4846_v36, %v4234_v4  ;;  %v4756_v2 = vmul.f32 -1.442695, %v3969_v57  ;;  %4015 = vmatmul.f32.gmra.mxu1 %v3764_v40  ;;  %v3474_v40 = vadd.f32 %v8305_v59, %v8202_v35  ;;  %v3865_v35 = vadd.f32 %v8362_v53, %v8406_v27 }
 0x6ee   : > { %v4850_v5 = vpop.eup %4849  ;;  %v8451_v17 = vadd.f32 1.0, %v4848_v54  ;;  %v3580_v26 = vpop.f32.mrf.mxu2 }
 0x6ef   : > { %v4239_v58 = vsel %vm4238_vm4, %v4846_v36, %v4235_v44  ;;  %v4247_v0 = vmul.f32 %v4850_v5, %v8436_v3  ;;  %4851 = vpow2.f32 %v4756_v2  ;;  %v3581_v19 = vadd.f32 %v3580_v26, %v3468_v45  ;;  %v8479_v2 = vpop.f32.mrf.mxu0 }
 0x6f0   : > { %v4244_v34 = vsel %vm4241_vm5, %v4243_v18, %v4239_v58  ;;  %4853 = vrcp.f32 %v8451_v17  ;;  %v3693_v6 = vpop.f32.mrf.mxu3  ;;  %vm4252_vm6 = vweird.f32 %v4850_v5  ;;  %v4270_v60 = vand.u32 2147483647, %v8451_v17 }
 0x6f1   : > { %4656 = vst.msk [vmem:[%s8391_s26 + $0x20] sm:$0xff] %vm4651_vm3, %v4244_v34  ;;  %v4248_v30 = vsub.f32 1.0, %v4247_v0  ;;  %v3694_v14 = vadd.f32 %v3693_v6, %v3581_v19  ;;  %vm4253_vm8 = vmor %vm4251_vm7, %vm4252_vm6  ;;  %v4272_v12 = vand.u32 2147483648, %v8451_v17  ;;  %vm4266_vm11 = vweird.f32 %v8451_v17 }
 0x6f2   : > { %v3971_v25 = vpop.f32.mrf.mxu1  ;;  %vm4271_vm13 = vcmp.eq.f32.partialorder %v4270_v60, 8.507059e+37 }
 0x6f3   : > { %v4249_v29 = vmul.f32 %v4850_v5, %v4248_v30  ;;  %v3972_v47 = vadd.f32 %v3971_v25, %v3859_v56  ;;  %v3766_v55 = vmax.f32 %v3694_v14, 0.0 }
 0x6f5   : > { %v4852_v49 = vpop.eup %4851  ;;  %v4250_v28 = vadd.f32 %v4850_v5, %v4249_v29  ;;  %v4757_v20 = vmul.f32 -1.442695, %v3972_v47  ;;  %4018 = vmatmul.f32.gmra.mxu1 %v3766_v55 }
 0x6f6   : > { %v4854_v36 = vpop.eup %4853  ;;  %v8466_v33 = vadd.f32 1.0, %v4852_v49  ;;  %v3583_v11 = vpop.f32.mrf.mxu2  ;;  %v3477_v49 = vadd.f32 %v8315_v39, %v8213_v15  ;;  %v3868_v15 = vadd.f32 %v8362_v53, %v8424_v32 }
 0x6f7   : > { %v4254_v46 = vsel %vm4253_vm8, %v4850_v5, %v4250_v28  ;;  %v4262_v13 = vmul.f32 %v4854_v36, %v8451_v17  ;;  %4855 = vpow2.f32 %v4757_v20  ;;  %v3584_v48 = vadd.f32 %v3583_v11, %v3471_v21 }
 0x6f8   : > { %v4259_v38 = vsel %vm4256_vm9, %v4258_v10, %v4254_v46  ;;  %4857 = vrcp.f32 %v8466_v33  ;;  %v3696_v3 = vpop.f32.mrf.mxu3  ;;  %vm4267_vm10 = vweird.f32 %v4854_v36  ;;  %v4273_v5 = vor.u32 1.1754944e-38, %v4272_v12  ;;  %v8497_v10 = vpop.f32.mrf.mxu0 }
 0x6f9   : > { %4657 = vst.msk [vmem:[%s8391_s26 + $0x28] sm:$0xff] %vm4651_vm3, %v4259_v38  ;;  %v4263_v50 = vsub.f32 1.0, %v4262_v13  ;;  %v3697_v24 = vadd.f32 %v3696_v3, %v3584_v48  ;;  %vm4268_vm12 = vmor %vm4266_vm11, %vm4267_vm10  ;;  %v4285_v6 = vand.u32 2147483647, %v8466_v33  ;;  %v4287_v56 = vand.u32 2147483648, %v8466_v33 }
 0x6fa   : > { %v3974_v7 = vpop.f32.mrf.mxu1  ;;  %vm4281_vm15 = vweird.f32 %v8466_v33 }
 0x6fb   : > { %v4264_v52 = vmul.f32 %v4854_v36, %v4263_v50  ;;  %v3975_v4 = vadd.f32 %v3974_v7, %v3862_v8  ;;  %v3768_v54 = vmax.f32 %v3697_v24, 0.0  ;;  %v4288_v28 = vor.u32 1.1754944e-38, %v4287_v56 }
 0x6fc   : > { %vm4286_vm1 = vcmp.eq.f32.partialorder %v4285_v6, 8.507059e+37  ;;  %v3480_v24 = vadd.f32 %v8325_v41, %v8219_v22 }
 0x6fd   : > { %v4856_v31 = vpop.eup %4855  ;;  %v4265_v57 = vadd.f32 %v4854_v36, %v4264_v52  ;;  %v4758_v44 = vmul.f32 -1.442695, %v3975_v4  ;;  %4021 = vmatmul.f32.gmra.mxu1 %v3768_v54 }
 0x6fe   : > { %v4858_v61 = vpop.eup %4857  ;;  %v8481_v45 = vadd.f32 1.0, %v4856_v31  ;;  %v3586_v18 = vpop.f32.mrf.mxu2 }
 0x6ff   : > { %v4269_v26 = vsel %vm4268_vm12, %v4854_v36, %v4265_v57  ;;  %v4277_v58 = vmul.f32 %v4858_v61, %v8466_v33  ;;  %4859 = vpow2.f32 %v4758_v44  ;;  %v3587_v34 = vadd.f32 %v3586_v18, %v3474_v40 }
 0x700   : > { %v4274_v17 = vsel %vm4271_vm13, %v4273_v5, %v4269_v26  ;;  %4861 = vrcp.f32 %v8481_v45  ;;  %v3699_v0 = vpop.f32.mrf.mxu3  ;;  %vm4282_vm14 = vweird.f32 %v4858_v61  ;;  %v4300_v13 = vand.u32 2147483647, %v8481_v45 }
 0x701   : > { %4658 = vst.msk [vmem:[%s8391_s26 + $0x30] sm:$0xff] %vm4651_vm3, %v4274_v17  ;;  %v4278_v59 = vsub.f32 1.0, %v4277_v58  ;;  %v3700_v1 = vadd.f32 %v3699_v0, %v3587_v34  ;;  %vm4283_vm0 = vmor %vm4281_vm15, %vm4282_vm14  ;;  %v4302_v38 = vand.u32 2147483648, %v8481_v45  ;;  %vm4296_vm4 = vweird.f32 %v8481_v45 }
 0x702   : > { %v3977_v30 = vpop.f32.mrf.mxu1  ;;  %vm4301_vm6 = vcmp.eq.f32.partialorder %v4300_v13, 8.507059e+37  ;;  %v3871_v5 = vadd.f32 %v8362_v53, %v8444_v16  ;;  %v3486_v13 = vadd.f32 %v8346_v62, %v8235_v63 }
 0x703   : > { %v4279_v19 = vmul.f32 %v4858_v61, %v4278_v59  ;;  %v3978_v37 = vadd.f32 %v3977_v30, %v3865_v35  ;;  %v3770_v14 = vmax.f32 %v3700_v1, 0.0  ;;  %v4303_v4 = vor.u32 1.1754944e-38, %v4302_v38 }
 0x704   : > { %v3483_v30 = vadd.f32 %v8337_v42, %v8227_v9 }
 0x705   : > { %v4860_v25 = vpop.eup %4859  ;;  %v4280_v29 = vadd.f32 %v4858_v61, %v4279_v19  ;;  %v4759_v47 = vmul.f32 -1.442695, %v3978_v37  ;;  %4024 = vmatmul.f32.gmra.mxu1 %v3770_v14 }
 0x706   : > { %v4862_v27 = vpop.eup %4861  ;;  %v8494_v55 = vadd.f32 1.0, %v4860_v25  ;;  %v3589_v20 = vpop.f32.mrf.mxu2 }
 0x707   : > { %v4284_v36 = vsel %vm4283_vm0, %v4858_v61, %v4280_v29  ;;  %v4292_v21 = vmul.f32 %v4862_v27, %v8481_v45  ;;  %4863 = vpow2.f32 %v4759_v47  ;;  %v3590_v46 = vadd.f32 %v3589_v20, %v3477_v49  ;;  %v8517_v45 = vpop.f32.mrf.mxu0 }
 0x708   : > { %v4289_v33 = vsel %vm4286_vm1, %v4288_v28, %v4284_v36  ;;  %4865 = vrcp.f32 %v8494_v55  ;;  %v3702_v11 = vpop.f32.mrf.mxu3  ;;  %vm4297_vm2 = vweird.f32 %v4862_v27  ;;  %v4315_v18 = vand.u32 2147483647, %v8494_v55 }
 0x709   : > { %4659 = vst.msk [vmem:[%s8391_s26 + $0x38] sm:$0xff] %vm4651_vm3, %v4289_v33  ;;  %v4293_v39 = vsub.f32 1.0, %v4292_v21  ;;  %v3703_v50 = vadd.f32 %v3702_v11, %v3590_v46  ;;  %vm4298_vm5 = vmor %vm4296_vm4, %vm4297_vm2  ;;  %v4317_v26 = vand.u32 2147483648, %v8494_v55  ;;  %vm4311_vm8 = vweird.f32 %v8494_v55 }
 0x70a   : > { %v3980_v3 = vpop.f32.mrf.mxu1  ;;  %vm4316_vm10 = vcmp.eq.f32.partialorder %v4315_v18, 8.507059e+37 }
 0x70b   : > { %v4294_v8 = vmul.f32 %v4862_v27, %v4293_v39  ;;  %v3981_v48 = vadd.f32 %v3980_v3, %v3868_v15  ;;  %v3772_v7 = vmax.f32 %v3703_v50, 0.0  ;;  %v4318_v19 = vor.u32 1.1754944e-38, %v4317_v26 }
 0x70d   : > { %v4864_v60 = vpop.eup %4863  ;;  %v4295_v12 = vadd.f32 %v4862_v27, %v4294_v8  ;;  %v4760_v52 = vmul.f32 -1.442695, %v3981_v48  ;;  %4027 = vmatmul.f32.gmra.mxu1 %v3772_v7  ;;  %v3877_v7 = vadd.f32 %v8362_v53, %v8479_v2 }
 0x70e   : > { %v4866_v32 = vpop.eup %4865  ;;  %v8509_v31 = vadd.f32 1.0, %v4864_v60  ;;  %v3592_v57 = vpop.f32.mrf.mxu2 }
 0x70f   : > { %v4299_v54 = vsel %vm4298_vm5, %v4862_v27, %v4295_v12  ;;  %v4307_v44 = vmul.f32 %v4866_v32, %v8494_v55  ;;  %4867 = vpow2.f32 %v4760_v52  ;;  %v3593_v41 = vadd.f32 %v3592_v57, %v3480_v24  ;;  %v8534_v33 = vpop.f32.mrf.mxu0 }
 0x710   : > { %v4304_v61 = vsel %vm4301_vm6, %v4303_v4, %v4299_v54  ;;  %4869 = vrcp.f32 %v8509_v31  ;;  %v3705_v40 = vpop.f32.mrf.mxu3  ;;  %vm4312_vm7 = vweird.f32 %v4866_v32  ;;  %v3874_v27 = vadd.f32 %v8362_v53, %v8461_v23 }
 0x711   : > { %4660 = vst.msk [vmem:[%s8391_s26 + $0x40] sm:$0xff] %vm4651_vm3, %v4304_v61  ;;  %v4308_v22 = vsub.f32 1.0, %v4307_v44  ;;  %v3706_v0 = vadd.f32 %v3705_v40, %v3593_v41  ;;  %vm4313_vm9 = vmor %vm4311_vm8, %vm4312_vm7  ;;  %v4330_v49 = vand.u32 2147483647, %v8509_v31  ;;  %v4332_v28 = vand.u32 2147483648, %v8509_v31 }
 0x712   : > { %v3983_v58 = vpop.f32.mrf.mxu1  ;;  %vm4326_vm12 = vweird.f32 %v8509_v31 }
 0x713   : > { %v4309_v17 = vmul.f32 %v4866_v32, %v4308_v22  ;;  %v3984_v35 = vadd.f32 %v3983_v58, %v3871_v5  ;;  %v3774_v16 = vmax.f32 %v3706_v0, 0.0  ;;  %v4333_v38 = vor.u32 1.1754944e-38, %v4332_v28 }
 0x714   : > { %vm4331_vm14 = vcmp.eq.f32.partialorder %v4330_v49, 8.507059e+37  ;;  %v3489_v5 = vadd.f32 %v8355_v43, %v8243_v51  ;;  %v3883_v28 = vadd.f32 %v8362_v53, %v8517_v45 }
 0x715   : > { %v4868_v59 = vpop.eup %4867  ;;  %v4310_v34 = vadd.f32 %v4866_v32, %v4309_v17  ;;  %v4761_v6 = vmul.f32 -1.442695, %v3984_v35  ;;  %4030 = vmatmul.f32.gmra.mxu1 %v3774_v16 }
 0x716   : > { %v4870_v56 = vpop.eup %4869  ;;  %v8524_v1 = vadd.f32 1.0, %v4868_v59  ;;  %v3595_v37 = vpop.f32.mrf.mxu2  ;;  %v3880_v59 = vadd.f32 %v8362_v53, %v8497_v10 }
 0x717   : > { %v4314_v25 = vsel %vm4313_vm9, %v4866_v32, %v4310_v34  ;;  %v4322_v29 = vmul.f32 %v4870_v56, %v8509_v31  ;;  %4871 = vpow2.f32 %v4761_v6  ;;  %v3596_v42 = vadd.f32 %v3595_v37, %v3483_v30  ;;  %v8552_v22 = vpop.f32.mrf.mxu0 }
 0x718   : > { %v4319_v14 = vsel %vm4316_vm10, %v4318_v19, %v4314_v25  ;;  %4873 = vrcp.f32 %v8524_v1  ;;  %v3708_v47 = vpop.f32.mrf.mxu3  ;;  %vm4327_vm11 = vweird.f32 %v4870_v56  ;;  %v4345_v52 = vand.u32 2147483647, %v8524_v1 }
 0x719   : > { %4661 = vst.msk [vmem:[%s8391_s26 + $0x48] sm:$0xff] %vm4651_vm3, %v4319_v14  ;;  %v4323_v9 = vsub.f32 1.0, %v4322_v29  ;;  %v3709_v36 = vadd.f32 %v3708_v47, %v3596_v42  ;;  %vm4328_vm13 = vmor %vm4326_vm12, %vm4327_vm11  ;;  %v4347_v32 = vand.u32 2147483648, %v8524_v1  ;;  %vm4341_vm0 = vweird.f32 %v8524_v1 }
 0x71a   : > { %v3986_v55 = vpop.f32.mrf.mxu1  ;;  %vm4346_vm2 = vcmp.eq.f32.partialorder %v4345_v52, 8.507059e+37 }
 0x71b   : > { %v4324_v20 = vmul.f32 %v4870_v56, %v4323_v9  ;;  %v3987_v21 = vadd.f32 %v3986_v55, %v3874_v27  ;;  %v3776_v23 = vmax.f32 %v3709_v36, 0.0  ;;  %v4348_v41 = vor.u32 1.1754944e-38, %v4347_v32 }
 0x71d   : > { %v4872_v11 = vpop.eup %4871  ;;  %v4325_v15 = vadd.f32 %v4870_v56, %v4324_v20  ;;  %v4762_v39 = vmul.f32 -1.442695, %v3987_v21  ;;  %4033 = vmatmul.f32.gmra.mxu1 %v3776_v23 }
 0x71e   : > { %v4874_v46 = vpop.eup %4873  ;;  %v8539_v3 = vadd.f32 1.0, %v4872_v11  ;;  %v3598_v8 = vpop.f32.mrf.mxu2 }
 0x71f   : > { %v4329_v50 = vsel %vm4328_vm13, %v4870_v56, %v4325_v15  ;;  %v4337_v48 = vmul.f32 %v4874_v46, %v8524_v1  ;;  %4875 = vpow2.f32 %v4762_v39  ;;  %v3599_v62 = vadd.f32 %v3598_v8, %v3486_v13  ;;  %v8562_v42 = vpop.f32.mrf.mxu0 }
 0x720   : > { %v4334_v60 = vsel %vm4331_vm14, %v4333_v38, %v4329_v50  ;;  %4877 = vrcp.f32 %v8539_v3  ;;  %v3711_v12 = vpop.f32.mrf.mxu3  ;;  %vm4342_vm15 = vweird.f32 %v4874_v46  ;;  %v4360_v34 = vand.u32 2147483647, %v8539_v3 }
 0x721   : > { %4662 = vst.msk [vmem:[%s8391_s26 + $0x50] sm:$0xff] %vm4651_vm3, %v4334_v60  ;;  %v4338_v63 = vsub.f32 1.0, %v4337_v48  ;;  %v3712_v31 = vadd.f32 %v3711_v12, %v3599_v62  ;;  %vm4343_vm1 = vmor %vm4341_vm0, %vm4342_vm15  ;;  %v4362_v16 = vand.u32 2147483648, %v8539_v3  ;;  %vm4356_vm5 = vweird.f32 %v8539_v3 }
 0x722   : > { %v3989_v24 = vpop.f32.mrf.mxu1  ;;  %vm4361_vm7 = vcmp.eq.f32.partialorder %v4360_v34, 8.507059e+37  ;;  %v3886_v48 = vadd.f32 %v8362_v53, %v8534_v33 }
 0x723   : > { %v4339_v4 = vmul.f32 %v4874_v46, %v4338_v63  ;;  %v3990_v57 = vadd.f32 %v3989_v24, %v3877_v7  ;;  %v3778_v61 = vmax.f32 %v3712_v31, 0.0  ;;  %v4363_v14 = vor.u32 1.1754944e-38, %v4362_v16 }
 0x725   : > { %v4876_v54 = vpop.eup %4875  ;;  %v4340_v44 = vadd.f32 %v4874_v46, %v4339_v4  ;;  %v4763_v40 = vmul.f32 -1.442695, %v3990_v57  ;;  %4036 = vmatmul.f32.gmra.mxu1 %v3778_v61 }
 0x726   : > { %v4878_v2 = vpop.eup %4877  ;;  %v4152_v18 = vadd.f32 1.0, %v4876_v54  ;;  %v3601_v26 = vpop.f32.mrf.mxu2 }
 0x727   : > { %v4344_v58 = vsel %vm4343_vm1, %v4874_v46, %v4340_v44  ;;  %v4352_v17 = vmul.f32 %v4878_v2, %v8539_v3  ;;  %4879 = vpow2.f32 %v4763_v40  ;;  %v3602_v43 = vadd.f32 %v3601_v26, %v3489_v5  ;;  %v8572_v12 = vpop.f32.mrf.mxu0 }
 0x728   : > { %v4349_v0 = vsel %vm4346_vm2, %v4348_v41, %v4344_v58  ;;  %4881 = vrcp.f32 %v4152_v18  ;;  %v3714_v35 = vpop.f32.mrf.mxu3  ;;  %vm4357_vm4 = vweird.f32 %v4878_v2  ;;  %v4377_v20 = vand.u32 2147483648, %v4152_v18 }
 0x729   : > { %4663 = vst.msk [vmem:[%s8391_s26 + $0x58] sm:$0xff] %vm4651_vm3, %v4349_v0  ;;  %v4353_v51 = vsub.f32 1.0, %v4352_v17  ;;  %v3715_v30 = vadd.f32 %v3714_v35, %v3602_v43  ;;  %vm4358_vm6 = vmor %vm4356_vm5, %vm4357_vm4  ;;  %v4375_v11 = vand.u32 2147483647, %v4152_v18  ;;  %vm4371_vm9 = vweird.f32 %v4152_v18 }
 0x72a   : > { %v3992_v6 = vpop.f32.mrf.mxu1  ;;  %v4378_v38 = vor.u32 1.1754944e-38, %v4377_v20 }
 0x72b   : > { %v4354_v56 = vmul.f32 %v4878_v2, %v4353_v51  ;;  %v3993_v19 = vadd.f32 %v3992_v6, %v3880_v59  ;;  %v3780_v25 = vmax.f32 %v3715_v30, 0.0  ;;  %vm4376_vm11 = vcmp.eq.f32.partialorder %v4375_v11, 8.507059e+37 }
 0x72d   : > { %v4880_v1 = vpop.eup %4879  ;;  %v4355_v37 = vadd.f32 %v4878_v2, %v4354_v56  ;;  %v4764_v10 = vmul.f32 -1.442695, %v3993_v19  ;;  %4039 = vmatmul.f32.gmra.mxu1 %v3780_v25  ;;  %v8583_v56 = vld [vmem:[%s8642_s4] ss:$0 sm:$0xff] }
 0x72e   : > { %v4882_v29 = vpop.eup %4881  ;;  %v4153_v47 = vadd.f32 1.0, %v4880_v1  ;;  %v3892_v30 = vadd.f32 %v8583_v56, %v8562_v42 }
 0x72f   : > { %v4359_v27 = vsel %vm4358_vm6, %v4878_v2, %v4355_v37  ;;  %v4367_v9 = vmul.f32 %v4882_v29, %v4152_v18  ;;  %4883 = vpow2.f32 %v4764_v10  ;;  %vm4372_vm8 = vweird.f32 %v4882_v29  ;;  %v8578_v0 = vpop.f32.mrf.mxu0 }
 0x730   : > { %v4364_v49 = vsel %vm4361_vm7, %v4363_v14, %v4359_v27  ;;  %4885 = vrcp.f32 %v4153_v47  ;;  %vm4373_vm10 = vmor %vm4371_vm9, %vm4372_vm8  ;;  %v4392_v7 = vand.u32 2147483648, %v4153_v47  ;;  %v4390_v52 = vand.u32 2147483647, %v4153_v47 }
 0x731   : > { %4664 = vst.msk [vmem:[%s8391_s26 + $0x60] sm:$0xff] %vm4651_vm3, %v4364_v49  ;;  %v4368_v55 = vsub.f32 1.0, %v4367_v9  ;;  %vm4386_vm13 = vweird.f32 %v4153_v47  ;;  %v3889_v2 = vadd.f32 %v8362_v53, %v8552_v22 }
 0x732   : > { %v3995_v36 = vpop.f32.mrf.mxu1  ;;  %v4393_v54 = vor.u32 1.1754944e-38, %v4392_v7  ;;  %vm4391_vm15 = vcmp.eq.f32.partialorder %v4390_v52, 8.507059e+37 }
 0x733   : > { %v4369_v21 = vmul.f32 %v4882_v29, %v4368_v55  ;;  %v3996_v15 = vadd.f32 %v3995_v36, %v3883_v28 }
 0x735   : > { %v4884_v23 = vpop.eup %4883  ;;  %v4370_v39 = vadd.f32 %v4882_v29, %v4369_v21  ;;  %v4765_v46 = vmul.f32 -1.442695, %v3996_v15  ;;  %v3895_v15 = vadd.f32 %v8583_v56, %v8572_v12 }
 0x736   : > { %v4886_v13 = vpop.eup %4885  ;;  %v4154_v3 = vadd.f32 1.0, %v4884_v23 }
 0x737   : > { %v4374_v8 = vsel %vm4373_vm10, %v4882_v29, %v4370_v39  ;;  %v4382_v45 = vmul.f32 %v4886_v13, %v4153_v47  ;;  %4887 = vpow2.f32 %v4765_v46  ;;  %vm4387_vm12 = vweird.f32 %v4886_v13  ;;  %v3900_v49 = vpop.f32.mrf.mxu0 }
 0x738   : > { %v4379_v50 = vsel %vm4376_vm11, %v4378_v38, %v4374_v8  ;;  %4889 = vrcp.f32 %v4154_v3  ;;  %vm4388_vm14 = vmor %vm4386_vm13, %vm4387_vm12  ;;  %v4407_v41 = vand.u32 2147483648, %v4154_v3  ;;  %v4405_v58 = vand.u32 2147483647, %v4154_v3 }
 0x739   : > { %4665 = vst.msk [vmem:[%s8391_s26 + $0x68] sm:$0xff] %vm4651_vm3, %v4379_v50  ;;  %v4383_v60 = vsub.f32 1.0, %v4382_v45  ;;  %vm4401_vm1 = vweird.f32 %v4154_v3 }
 0x73a   : > { %v3998_v63 = vpop.f32.mrf.mxu1  ;;  %v4408_v34 = vor.u32 1.1754944e-38, %v4407_v41  ;;  %vm4406_vm4 = vcmp.eq.f32.partialorder %v4405_v58, 8.507059e+37 }
 0x73b   : > { %v4384_v62 = vmul.f32 %v4886_v13, %v4383_v60  ;;  %v3999_v32 = vadd.f32 %v3998_v63, %v3886_v48 }
 0x73d   : > { %v4888_v24 = vpop.eup %4887  ;;  %v4385_v4 = vadd.f32 %v4886_v13, %v4384_v62  ;;  %v4766_v31 = vmul.f32 -1.442695, %v3999_v32  ;;  %v3898_v32 = vadd.f32 %v8583_v56, %v8578_v0  ;;  %v3901_v0 = vadd.f32 %v8583_v56, %v3900_v49 }
 0x73e   : > { %v4890_v57 = vpop.eup %4889  ;;  %v4155_v33 = vadd.f32 1.0, %v4888_v24 }
 0x73f   : > { %v4389_v44 = vsel %vm4388_vm14, %v4886_v13, %v4385_v4  ;;  %v4397_v61 = vmul.f32 %v4890_v57, %v4154_v3  ;;  %4891 = vpow2.f32 %v4766_v31  ;;  %vm4402_vm0 = vweird.f32 %v4890_v57  ;;  %v3903_v63 = vpop.f32.mrf.mxu0 }
 0x740   : > { %v4394_v40 = vsel %vm4391_vm15, %v4393_v54, %v4389_v44  ;;  %4893 = vrcp.f32 %v4155_v33  ;;  %vm4403_vm2 = vmor %vm4401_vm1, %vm4402_vm0  ;;  %v4422_v1 = vand.u32 2147483648, %v4155_v33  ;;  %v4420_v10 = vand.u32 2147483647, %v4155_v33 }
 0x741   : > { %4666 = vst.msk [vmem:[%s8391_s26 + $0x70] sm:$0xff] %vm4651_vm3, %v4394_v40  ;;  %v4398_v5 = vsub.f32 1.0, %v4397_v61  ;;  %vm4416_vm6 = vweird.f32 %v4155_v33 }
 0x742   : > { %v4001_v18 = vpop.f32.mrf.mxu1  ;;  %v4423_v28 = vor.u32 1.1754944e-38, %v4422_v1  ;;  %vm4421_vm8 = vcmp.eq.f32.partialorder %v4420_v10, 8.507059e+37 }
 0x743   : > { %v4399_v26 = vmul.f32 %v4890_v57, %v4398_v5  ;;  %v4002_v17 = vadd.f32 %v4001_v18, %v3889_v2 }
 0x745   : > { %v4892_v35 = vpop.eup %4891  ;;  %v4400_v59 = vadd.f32 %v4890_v57, %v4399_v26  ;;  %v4767_v51 = vmul.f32 -1.442695, %v4002_v17 }
 0x746   : > { %v4894_v43 = vpop.eup %4893  ;;  %v4156_v53 = vadd.f32 1.0, %v4892_v35 }
 0x747   : > { %v4404_v22 = vsel %vm4403_vm2, %v4890_v57, %v4400_v59  ;;  %v4412_v16 = vmul.f32 %v4894_v43, %v4155_v33  ;;  %4895 = vpow2.f32 %v4767_v51  ;;  %vm4417_vm5 = vweird.f32 %v4894_v43  ;;  %v3906_v58 = vpop.f32.mrf.mxu0 }
 0x748   : > { %v4409_v6 = vsel %vm4406_vm4, %v4408_v34, %v4404_v22  ;;  %4897 = vrcp.f32 %v4156_v53  ;;  %vm4418_vm7 = vmor %vm4416_vm6, %vm4417_vm5  ;;  %v4437_v11 = vand.u32 2147483648, %v4156_v53  ;;  %v4435_v39 = vand.u32 2147483647, %v4156_v53 }
 0x749   : > { %4667 = vst.msk [vmem:[%s8391_s26 + $0x78] sm:$0xff] %vm4651_vm3, %v4409_v6  ;;  %v4413_v19 = vsub.f32 1.0, %v4412_v16  ;;  %vm4431_vm10 = vweird.f32 %v4156_v53 }
 0x74a   : > { %v4004_v37 = vpop.f32.mrf.mxu1  ;;  %v4438_v45 = vor.u32 1.1754944e-38, %v4437_v11  ;;  %vm4436_vm12 = vcmp.eq.f32.partialorder %v4435_v39, 8.507059e+37  ;;  %v3907_v39 = vadd.f32 %v8583_v56, %v3906_v58 }
 0x74b   : > { %v4414_v25 = vmul.f32 %v4894_v43, %v4413_v19  ;;  %v4005_v29 = vadd.f32 %v4004_v37, %v3892_v30 }
 0x74d   : > { %v4896_v14 = vpop.eup %4895  ;;  %v4415_v47 = vadd.f32 %v4894_v43, %v4414_v25  ;;  %v4768_v27 = vmul.f32 -1.442695, %v4005_v29  ;;  %v3904_v25 = vadd.f32 %v8583_v56, %v3903_v63 }
 0x74e   : > { %v4898_v9 = vpop.eup %4897  ;;  %v4157_v55 = vadd.f32 1.0, %v4896_v14 }
 0x74f   : > { %v4419_v42 = vsel %vm4418_vm7, %v4894_v43, %v4415_v47  ;;  %v4427_v20 = vmul.f32 %v4898_v9, %v4156_v53  ;;  %4899 = vpow2.f32 %v4768_v27  ;;  %vm4432_vm9 = vweird.f32 %v4898_v9  ;;  %v3909_v29 = vpop.f32.mrf.mxu0 }
 0x750   : > { %v4424_v36 = vsel %vm4421_vm8, %v4423_v28, %v4419_v42  ;;  %4901 = vrcp.f32 %v4157_v55  ;;  %vm4433_vm11 = vmor %vm4431_vm10, %vm4432_vm9  ;;  %v4452_v52 = vand.u32 2147483648, %v4157_v55  ;;  %v4450_v4 = vand.u32 2147483647, %v4157_v55 }
 0x751   : > { %4668 = vst.msk [vmem:[%s8391_s26 + $0x80] sm:$0xff] %vm4651_vm3, %v4424_v36  ;;  %v4428_v21 = vsub.f32 1.0, %v4427_v20  ;;  %vm4446_vm14 = vweird.f32 %v4157_v55 }
 0x752   : > { %v4007_v46 = vpop.f32.mrf.mxu1  ;;  %v4453_v44 = vor.u32 1.1754944e-38, %v4452_v52  ;;  %vm4451_vm0 = vcmp.eq.f32.partialorder %v4450_v4, 8.507059e+37  ;;  %v3910_v4 = vadd.f32 %v8583_v56, %v3909_v29 }
 0x753   : > { %v4429_v23 = vmul.f32 %v4898_v9, %v4428_v21  ;;  %v4008_v3 = vadd.f32 %v4007_v46, %v3895_v15 }
 0x755   : > { %v4900_v13 = vpop.eup %4899  ;;  %v4430_v38 = vadd.f32 %v4898_v9, %v4429_v23  ;;  %v4769_v7 = vmul.f32 -1.442695, %v4008_v3 }
 0x756   : > { %v4902_v8 = vpop.eup %4901  ;;  %v4158_v50 = vadd.f32 1.0, %v4900_v13 }
 0x757   : > { %v4434_v48 = vsel %vm4433_vm11, %v4898_v9, %v4430_v38  ;;  %v4442_v60 = vmul.f32 %v4902_v8, %v4157_v55  ;;  %vm4447_vm13 = vweird.f32 %v4902_v8 }
 0x758   : > { %v4439_v62 = vsel %vm4436_vm12, %v4438_v45, %v4434_v48  ;;  %4903 = vrcp.f32 %v4158_v50  ;;  %vm4448_vm15 = vmor %vm4446_vm14, %vm4447_vm13  ;;  %v4467_v17 = vand.u32 2147483648, %v4158_v50  ;;  %v4465_v59 = vand.u32 2147483647, %v4158_v50 }
 0x759   : > { %4669 = vst.msk [vmem:[%s8391_s26 + $0x88] sm:$0xff] %vm4651_vm3, %v4439_v62  ;;  %v4443_v12 = vsub.f32 1.0, %v4442_v60  ;;  %4905 = vpow2.f32 %v4769_v7  ;;  %vm4461_vm2 = vweird.f32 %v4158_v50 }
 0x75a   : > { %v4010_v31 = vpop.f32.mrf.mxu1  ;;  %v4468_v53 = vor.u32 1.1754944e-38, %v4467_v17  ;;  %vm4466_vm5 = vcmp.eq.f32.partialorder %v4465_v59, 8.507059e+37 }
 0x75b   : > { %v4444_v24 = vmul.f32 %v4902_v8, %v4443_v12  ;;  %v4011_v54 = vadd.f32 %v4010_v31, %v3898_v32 }
 0x75d   : > { %v4445_v57 = vadd.f32 %v4902_v8, %v4444_v24  ;;  %v4770_v5 = vmul.f32 -1.442695, %v4011_v54 }
 0x75e   : > { %v4904_v33 = vpop.eup %4903 }
 0x75f   : > { %v4906_v61 = vpop.eup %4905  ;;  %v4449_v40 = vsel %vm4448_vm15, %v4902_v8, %v4445_v57  ;;  %v4457_v2 = vmul.f32 %v4904_v33, %v4158_v50  ;;  %4907 = vpow2.f32 %v4770_v5  ;;  %vm4462_vm1 = vweird.f32 %v4904_v33  ;;  %v3912_v50 = vpop.f32.mrf.mxu0 }
 0x760   : > { %v4454_v41 = vsel %vm4451_vm0, %v4453_v44, %v4449_v40  ;;  %v4159_v18 = vadd.f32 1.0, %v4906_v61  ;;  %vm4463_vm4 = vmor %vm4461_vm2, %vm4462_vm1  ;;  %v3913_v59 = vadd.f32 %v8583_v56, %v3912_v50 }
 0x761   : > { %4670 = vst.msk [vmem:[%s8391_s26 + $0x90] sm:$0xff] %vm4651_vm3, %v4454_v41  ;;  %v4458_v26 = vsub.f32 1.0, %v4457_v2 }
 0x762   : > { %4909 = vrcp.f32 %v4159_v18  ;;  %v4013_v51 = vpop.f32.mrf.mxu1  ;;  %v4482_v14 = vand.u32 2147483648, %v4159_v18  ;;  %v4480_v9 = vand.u32 2147483647, %v4159_v18  ;;  %vm4476_vm7 = vweird.f32 %v4159_v18 }
 0x763   : > { %v4459_v35 = vmul.f32 %v4904_v33, %v4458_v26  ;;  %v4014_v34 = vadd.f32 %v4013_v51, %v3901_v0 }
 0x764   : > { %v4483_v36 = vor.u32 1.1754944e-38, %v4482_v14  ;;  %vm4481_vm9 = vcmp.eq.f32.partialorder %v4480_v9, 8.507059e+37 }
 0x765   : > { %v4460_v43 = vadd.f32 %v4904_v33, %v4459_v35  ;;  %v4908_v22 = vpop.eup %4907  ;;  %v4771_v6 = vmul.f32 -1.442695, %v4014_v34 }
 0x766   : > { %v4160_v1 = vadd.f32 1.0, %v4908_v22 }
 0x767   : > { %v4464_v16 = vsel %vm4463_vm4, %v4904_v33, %v4460_v43  ;;  %4911 = vpow2.f32 %v4771_v6 }
 0x768   : > { %v4910_v30 = vpop.eup %4909  ;;  %v4469_v19 = vsel %vm4466_vm5, %v4468_v53, %v4464_v16  ;;  %4913 = vrcp.f32 %v4160_v1  ;;  %v4497_v13 = vand.u32 2147483648, %v4160_v1  ;;  %v4495_v8 = vand.u32 2147483647, %v4160_v1 }
 0x769   : > { %4671 = vst.msk [vmem:[%s8391_s26 + $0x98] sm:$0xff] %vm4651_vm3, %v4469_v19  ;;  %v4472_v37 = vmul.f32 %v4910_v30, %v4159_v18  ;;  %vm4477_vm6 = vweird.f32 %v4910_v30  ;;  %vm4491_vm11 = vweird.f32 %v4160_v1  ;;  %v3915_v18 = vpop.f32.mrf.mxu0 }
 0x76a   : > { %v4016_v47 = vpop.f32.mrf.mxu1  ;;  %vm4478_vm8 = vmor %vm4476_vm7, %vm4477_vm6  ;;  %v4498_v62 = vor.u32 1.1754944e-38, %v4497_v13  ;;  %vm4496_vm13 = vcmp.eq.f32.partialorder %v4495_v8, 8.507059e+37 }
 0x76b   : > { %v4473_v10 = vsub.f32 1.0, %v4472_v37  ;;  %v4017_v49 = vadd.f32 %v4016_v47, %v3904_v25 }
 0x76d   : > { %v4474_v27 = vmul.f32 %v4910_v30, %v4473_v10  ;;  %v4912_v28 = vpop.eup %4911  ;;  %v4772_v42 = vmul.f32 -1.442695, %v4017_v49 }
 0x76e   : > { %v4914_v20 = vpop.eup %4913  ;;  %v4161_v21 = vadd.f32 1.0, %v4912_v28 }
 0x76f   : > { %v4475_v55 = vadd.f32 %v4910_v30, %v4474_v27  ;;  %v4487_v15 = vmul.f32 %v4914_v20, %v4160_v1  ;;  %4915 = vpow2.f32 %v4772_v42  ;;  %vm4492_vm10 = vweird.f32 %v4914_v20 }
 0x770   : > { %4917 = vrcp.f32 %v4161_v21  ;;  %vm4493_vm12 = vmor %vm4491_vm11, %vm4492_vm10  ;;  %v4512_v57 = vand.u32 2147483648, %v4161_v21  ;;  %v4510_v44 = vand.u32 2147483647, %v4161_v21  ;;  %vm4506_vm15 = vweird.f32 %v4161_v21 }
 0x771   : > { %v4479_v11 = vsel %vm4478_vm8, %v4910_v30, %v4475_v55  ;;  %v4488_v46 = vsub.f32 1.0, %v4487_v15  ;;  %v3918_v14 = vpop.f32.mrf.mxu0  ;;  %v3916_v27 = vadd.f32 %v8583_v56, %v3915_v18 }
 0x772   : > { %v4484_v23 = vsel %vm4481_vm9, %v4483_v36, %v4479_v11  ;;  %v4019_v38 = vpop.f32.mrf.mxu1  ;;  %v4513_v26 = vor.u32 1.1754944e-38, %v4512_v57  ;;  %vm4511_vm1 = vcmp.eq.f32.partialorder %v4510_v44, 8.507059e+37 }
 0x773   : > { %4672 = vst.msk [vmem:[%s8391_s26 + $0xa0] sm:$0xff] %vm4651_vm3, %v4484_v23  ;;  %v4489_v3 = vmul.f32 %v4914_v20, %v4488_v46  ;;  %v4020_v45 = vadd.f32 %v4019_v38, %v3907_v39 }
 0x775   : > { %v4916_v48 = vpop.eup %4915  ;;  %v4490_v60 = vadd.f32 %v4914_v20, %v4489_v3  ;;  %v4773_v7 = vmul.f32 -1.442695, %v4020_v45  ;;  %v3919_v3 = vadd.f32 %v8583_v56, %v3918_v14 }
 0x776   : > { %v4918_v63 = vpop.eup %4917  ;;  %v4162_v12 = vadd.f32 1.0, %v4916_v48 }
 0x777   : > { %v4494_v52 = vsel %vm4493_vm12, %v4914_v20, %v4490_v60  ;;  %v4502_v32 = vmul.f32 %v4918_v63, %v4161_v21  ;;  %4919 = vpow2.f32 %v4773_v7  ;;  %vm4507_vm14 = vweird.f32 %v4918_v63 }
 0x778   : > { %v4499_v24 = vsel %vm4496_vm13, %v4498_v62, %v4494_v52  ;;  %4921 = vrcp.f32 %v4162_v12  ;;  %vm4508_vm0 = vmor %vm4506_vm15, %vm4507_vm14  ;;  %v4527_v43 = vand.u32 2147483648, %v4162_v12  ;;  %v4525_v22 = vand.u32 2147483647, %v4162_v12 }
 0x779   : > { %4673 = vst.msk [vmem:[%s8391_s26 + $0xa8] sm:$0xff] %vm4651_vm3, %v4499_v24  ;;  %v4503_v31 = vsub.f32 1.0, %v4502_v32  ;;  %vm4521_vm4 = vweird.f32 %v4162_v12  ;;  %v3921_v45 = vpop.f32.mrf.mxu0 }
 0x77a   : > { %v4022_v54 = vpop.f32.mrf.mxu1  ;;  %v4528_v37 = vor.u32 1.1754944e-38, %v4527_v43  ;;  %vm4526_vm6 = vcmp.eq.f32.partialorder %v4525_v22, 8.507059e+37 }
 0x77b   : > { %v4504_v33 = vmul.f32 %v4918_v63, %v4503_v31  ;;  %v4023_v61 = vadd.f32 %v4022_v54, %v3910_v4 }
 0x77d   : > { %v4920_v40 = vpop.eup %4919  ;;  %v4505_v2 = vadd.f32 %v4918_v63, %v4504_v33  ;;  %v4774_v5 = vmul.f32 -1.442695, %v4023_v61  ;;  %v3922_v33 = vadd.f32 %v8583_v56, %v3921_v45 }
 0x77e   : > { %v4922_v41 = vpop.eup %4921  ;;  %v4163_v58 = vadd.f32 1.0, %v4920_v40 }
 0x77f   : > { %v4509_v17 = vsel %vm4508_vm0, %v4918_v63, %v4505_v2  ;;  %v4517_v0 = vmul.f32 %v4922_v41, %v4162_v12  ;;  %4923 = vpow2.f32 %v4774_v5  ;;  %vm4522_vm2 = vweird.f32 %v4922_v41 }
 0x780   : > { %v4514_v35 = vsel %vm4511_vm1, %v4513_v26, %v4509_v17  ;;  %4925 = vrcp.f32 %v4163_v58  ;;  %vm4523_vm5 = vmor %vm4521_vm4, %vm4522_vm2  ;;  %v4542_v49 = vand.u32 2147483648, %v4163_v58  ;;  %v4540_v42 = vand.u32 2147483647, %v4163_v58 }
 0x781   : > { %4674 = vst.msk [vmem:[%s8391_s26 + $0xb0] sm:$0xff] %vm4651_vm3, %v4514_v35  ;;  %v4518_v51 = vsub.f32 1.0, %v4517_v0  ;;  %vm4536_vm8 = vweird.f32 %v4163_v58  ;;  %v3924_v18 = vpop.f32.mrf.mxu0 }
 0x782   : > { %v4025_v34 = vpop.f32.mrf.mxu1  ;;  %v4543_v23 = vor.u32 1.1754944e-38, %v4542_v49  ;;  %vm4541_vm10 = vcmp.eq.f32.partialorder %v4540_v42, 8.507059e+37 }
 0x783   : > { %v4519_v53 = vmul.f32 %v4922_v41, %v4518_v51  ;;  %v4026_v16 = vadd.f32 %v4025_v34, %v3913_v59 }
 0x785   : > { %v4924_v6 = vpop.eup %4923  ;;  %v4520_v30 = vadd.f32 %v4922_v41, %v4519_v53  ;;  %v4775_v19 = vmul.f32 -1.442695, %v4026_v16  ;;  %v3925_v53 = vadd.f32 %v8583_v56, %v3924_v18 }
 0x786   : > { %v4926_v1 = vpop.eup %4925  ;;  %v4164_v25 = vadd.f32 1.0, %v4924_v6 }
 0x787   : > { %v4524_v10 = vsel %vm4523_vm5, %v4922_v41, %v4520_v30  ;;  %v4532_v29 = vmul.f32 %v4926_v1, %v4163_v58  ;;  %4927 = vpow2.f32 %v4775_v19  ;;  %vm4537_vm7 = vweird.f32 %v4926_v1 }
 0x788   : > { %v4529_v47 = vsel %vm4526_vm6, %v4528_v37, %v4524_v10  ;;  %4929 = vrcp.f32 %v4164_v25  ;;  %vm4538_vm9 = vmor %vm4536_vm8, %vm4537_vm7  ;;  %v4557_v50 = vand.u32 2147483648, %v4164_v25  ;;  %v4555_v7 = vand.u32 2147483647, %v4164_v25 }
 0x789   : > { %4675 = vst.msk [vmem:[%s8391_s26 + $0xb8] sm:$0xff] %vm4651_vm3, %v4529_v47  ;;  %v4533_v9 = vsub.f32 1.0, %v4532_v29  ;;  %vm4551_vm12 = vweird.f32 %v4164_v25  ;;  %v3927_v14 = vpop.f32.mrf.mxu0 }
 0x78a   : > { %v4028_v28 = vpop.f32.mrf.mxu1  ;;  %v4558_v24 = vor.u32 1.1754944e-38, %v4557_v50  ;;  %vm4556_vm14 = vcmp.eq.f32.partialorder %v4555_v7, 8.507059e+37 }
 0x78b   : > { %v4534_v55 = vmul.f32 %v4926_v1, %v4533_v9  ;;  %v4029_v20 = vadd.f32 %v4028_v28, %v3916_v27 }
 0x78d   : > { %v4928_v36 = vpop.eup %4927  ;;  %v4535_v21 = vadd.f32 %v4926_v1, %v4534_v55  ;;  %v4776_v11 = vmul.f32 -1.442695, %v4029_v20  ;;  %v3928_v55 = vadd.f32 %v8583_v56, %v3927_v14 }
 0x78e   : > { %v4930_v15 = vpop.eup %4929  ;;  %v4165_v39 = vadd.f32 1.0, %v4928_v36 }
 0x78f   : > { %v4539_v46 = vsel %vm4538_vm9, %v4926_v1, %v4535_v21  ;;  %v4547_v13 = vmul.f32 %v4930_v15, %v4164_v25  ;;  %4931 = vpow2.f32 %v4776_v11  ;;  %vm4552_vm11 = vweird.f32 %v4930_v15 }
 0x790   : > { %v4544_v38 = vsel %vm4541_vm10, %v4543_v23, %v4539_v46  ;;  %4933 = vrcp.f32 %v4165_v39  ;;  %vm4553_vm13 = vmor %vm4551_vm12, %vm4552_vm11  ;;  %v4572_v61 = vand.u32 2147483648, %v4165_v39  ;;  %v4570_v5 = vand.u32 2147483647, %v4165_v39 }
 0x791   : > { %4676 = vst.msk [vmem:[%s8391_s26 + $0xc0] sm:$0xff] %vm4651_vm3, %v4544_v38  ;;  %v4548_v8 = vsub.f32 1.0, %v4547_v13  ;;  %vm4566_vm0 = vweird.f32 %v4165_v39 }
 0x792   : > { %v4031_v48 = vpop.f32.mrf.mxu1  ;;  %v4573_v35 = vor.u32 1.1754944e-38, %v4572_v61  ;;  %vm4571_vm2 = vcmp.eq.f32.partialorder %v4570_v5, 8.507059e+37 }
 0x793   : > { %v4549_v60 = vmul.f32 %v4930_v15, %v4548_v8  ;;  %v4032_v63 = vadd.f32 %v4031_v48, %v3919_v3 }
 0x795   : > { %v4932_v62 = vpop.eup %4931  ;;  %v4550_v12 = vadd.f32 %v4930_v15, %v4549_v60  ;;  %v4777_v52 = vmul.f32 -1.442695, %v4032_v63 }
 0x796   : > { %v4934_v32 = vpop.eup %4933  ;;  %v4166_v4 = vadd.f32 1.0, %v4932_v62 }
 0x797   : > { %v4554_v31 = vsel %vm4553_vm13, %v4930_v15, %v4550_v12  ;;  %v4562_v57 = vmul.f32 %v4934_v32, %v4165_v39  ;;  %4935 = vpow2.f32 %v4777_v52  ;;  %vm4567_vm15 = vweird.f32 %v4934_v32 }
 0x798   : > { %v4559_v54 = vsel %vm4556_vm14, %v4558_v24, %v4554_v31  ;;  %4937 = vrcp.f32 %v4166_v4  ;;  %vm4568_vm1 = vmor %vm4566_vm0, %vm4567_vm15  ;;  %v4587_v16 = vand.u32 2147483648, %v4166_v4  ;;  %v4585_v19 = vand.u32 2147483647, %v4166_v4 }
 0x799   : > { %4677 = vst.msk [vmem:[%s8391_s26 + $0xc8] sm:$0xff] %vm4651_vm3, %v4559_v54  ;;  %v4563_v44 = vsub.f32 1.0, %v4562_v57  ;;  %vm4581_vm5 = vweird.f32 %v4166_v4 }
 0x79a   : > { %v4034_v40 = vpop.f32.mrf.mxu1  ;;  %v4588_v47 = vor.u32 1.1754944e-38, %v4587_v16  ;;  %vm4586_vm7 = vcmp.eq.f32.partialorder %v4585_v19, 8.507059e+37 }
 0x79b   : > { %v4564_v2 = vmul.f32 %v4934_v32, %v4563_v44  ;;  %v4035_v41 = vadd.f32 %v4034_v40, %v3922_v33 }
 0x79d   : > { %v4936_v26 = vpop.eup %4935  ;;  %v4565_v58 = vadd.f32 %v4934_v32, %v4564_v2  ;;  %v4778_v17 = vmul.f32 -1.442695, %v4035_v41 }
 0x79e   : > { %v4938_v0 = vpop.eup %4937  ;;  %v4167_v59 = vadd.f32 1.0, %v4936_v26 }
 0x79f   : > { %v4569_v51 = vsel %vm4568_vm1, %v4934_v32, %v4565_v58  ;;  %v4577_v43 = vmul.f32 %v4938_v0, %v4166_v4  ;;  %4939 = vpow2.f32 %v4778_v17  ;;  %vm4582_vm4 = vweird.f32 %v4938_v0 }
 0x7a0   : > { %v4574_v34 = vsel %vm4571_vm2, %v4573_v35, %v4569_v51  ;;  %4941 = vrcp.f32 %v4167_v59  ;;  %vm4583_vm6 = vmor %vm4581_vm5, %vm4582_vm4  ;;  %v4602_v20 = vand.u32 2147483648, %v4167_v59  ;;  %v4600_v11 = vand.u32 2147483647, %v4167_v59 }
 0x7a1   : > { %4678 = vst.msk [vmem:[%s8391_s26 + $0xd0] sm:$0xff] %vm4651_vm3, %v4574_v34  ;;  %v4578_v22 = vsub.f32 1.0, %v4577_v43  ;;  %vm4596_vm9 = vweird.f32 %v4167_v59 }
 0x7a2   : > { %v4037_v6 = vpop.f32.mrf.mxu1  ;;  %v4603_v38 = vor.u32 1.1754944e-38, %v4602_v20  ;;  %vm4601_vm11 = vcmp.eq.f32.partialorder %v4600_v11, 8.507059e+37 }
 0x7a3   : > { %v4579_v30 = vmul.f32 %v4938_v0, %v4578_v22  ;;  %v4038_v1 = vadd.f32 %v4037_v6, %v3925_v53 }
 0x7a5   : > { %v4940_v37 = vpop.eup %4939  ;;  %v4580_v25 = vadd.f32 %v4938_v0, %v4579_v30  ;;  %v4779_v10 = vmul.f32 -1.442695, %v4038_v1 }
 0x7a6   : > { %v4942_v29 = vpop.eup %4941  ;;  %v4168_v27 = vadd.f32 1.0, %v4940_v37 }
 0x7a7   : > { %v4584_v9 = vsel %vm4583_vm6, %v4938_v0, %v4580_v25  ;;  %v4592_v49 = vmul.f32 %v4942_v29, %v4167_v59  ;;  %4943 = vpow2.f32 %v4779_v10  ;;  %vm4597_vm8 = vweird.f32 %v4942_v29 }
 0x7a8   : > { %v4589_v28 = vsel %vm4586_vm7, %v4588_v47, %v4584_v9  ;;  %4945 = vrcp.f32 %v4168_v27  ;;  %vm4598_vm10 = vmor %vm4596_vm9, %vm4597_vm8  ;;  %v4617_v48 = vand.u32 2147483648, %v4168_v27  ;;  %v4615_v7 = vand.u32 2147483647, %v4168_v27 }
 0x7a9   : > { %4679 = vst.msk [vmem:[%s8391_s26 + $0xd8] sm:$0xff] %vm4651_vm3, %v4589_v28  ;;  %v4593_v42 = vsub.f32 1.0, %v4592_v49  ;;  %vm4611_vm13 = vweird.f32 %v4168_v27 }
 0x7aa   : > { %v4040_v36 = vpop.f32.mrf.mxu1  ;;  %v4618_v52 = vor.u32 1.1754944e-38, %v4617_v48  ;;  %vm4616_vm15 = vcmp.eq.f32.partialorder %v4615_v7, 8.507059e+37 }
 0x7ab   : > { %v4594_v21 = vmul.f32 %v4942_v29, %v4593_v42  ;;  %v4041_v15 = vadd.f32 %v4040_v36, %v3928_v55 }
 0x7ad   : > { %v4944_v23 = vpop.eup %4943  ;;  %v4595_v39 = vadd.f32 %v4942_v29, %v4594_v21  ;;  %v4780_v46 = vmul.f32 -1.442695, %v4041_v15 }
 0x7ae   : > { %v4946_v13 = vpop.eup %4945  ;;  %v4169_v3 = vadd.f32 1.0, %v4944_v23 }
 0x7af   : > { %v4599_v8 = vsel %vm4598_vm10, %v4942_v29, %v4595_v39  ;;  %v4607_v56 = vmul.f32 %v4946_v13, %v4168_v27  ;;  %4947 = vpow2.f32 %v4780_v46  ;;  %vm4612_vm12 = vweird.f32 %v4946_v13 }
 0x7b0   : > { %v4604_v45 = vsel %vm4601_vm11, %v4603_v38, %v4599_v8  ;;  %4949 = vrcp.f32 %v4169_v3  ;;  %vm4613_vm14 = vmor %vm4611_vm13, %vm4612_vm12  ;;  %v4632_v54 = vand.u32 2147483648, %v4169_v3  ;;  %v4630_v44 = vand.u32 2147483647, %v4169_v3 }
 0x7b1   : > { %4680 = vst.msk [vmem:[%s8391_s26 + $0xe0] sm:$0xff] %vm4651_vm3, %v4604_v45  ;;  %v4608_v50 = vsub.f32 1.0, %v4607_v56  ;;  %vm4626_vm1 = vweird.f32 %v4169_v3 }
 0x7b2   : > { %v4633_v2 = vor.u32 1.1754944e-38, %v4632_v54  ;;  %vm4631_vm4 = vcmp.eq.f32.partialorder %v4630_v44, 8.507059e+37 }
 0x7b3   : > { %v4609_v60 = vmul.f32 %v4946_v13, %v4608_v50 }
 0x7b5   : > { %v4948_v63 = vpop.eup %4947  ;;  %v4610_v62 = vadd.f32 %v4946_v13, %v4609_v60 }
 0x7b6   : > { %v4950_v12 = vpop.eup %4949  ;;  %v4170_v32 = vadd.f32 1.0, %v4948_v63 }
 0x7b7   : > { %v4614_v24 = vsel %vm4613_vm14, %v4946_v13, %v4610_v62  ;;  %v4622_v4 = vmul.f32 %v4950_v12, %v4169_v3  ;;  %vm4627_vm0 = vweird.f32 %v4950_v12 }
 0x7b8   : > { %v4619_v31 = vsel %vm4616_vm15, %v4618_v52, %v4614_v24  ;;  %4951 = vrcp.f32 %v4170_v32  ;;  %vm4628_vm2 = vmor %vm4626_vm1, %vm4627_vm0  ;;  %v4647_v58 = vand.u32 2147483648, %v4170_v32  ;;  %v4645_v0 = vand.u32 2147483647, %v4170_v32 }
 0x7b9   : > { %4681 = vst.msk [vmem:[%s8391_s26 + $0xe8] sm:$0xff] %vm4651_vm3, %v4619_v31  ;;  %v4623_v57 = vsub.f32 1.0, %v4622_v4  ;;  %vm4641_vm6 = vweird.f32 %v4170_v32 }
 0x7ba   : > { %v4648_v59 = vor.u32 1.1754944e-38, %v4647_v58  ;;  %vm4646_vm8 = vcmp.eq.f32.partialorder %v4645_v0, 8.507059e+37 }
 0x7bb   : > { %v4624_v33 = vmul.f32 %v4950_v12, %v4623_v57 }
 0x7bd   : > { %v4625_v61 = vadd.f32 %v4950_v12, %v4624_v33 }
 0x7be   : > { %v4952_v40 = vpop.eup %4951 }
 0x7bf   : > { %v4629_v5 = vsel %vm4628_vm2, %v4950_v12, %v4625_v61  ;;  %v4637_v41 = vmul.f32 %v4952_v40, %v4170_v32  ;;  %vm4642_vm5 = vweird.f32 %v4952_v40 }
 0x7c0   : > { %v4634_v18 = vsel %vm4631_vm4, %v4633_v2, %v4629_v5  ;;  %vm4643_vm7 = vmor %vm4641_vm6, %vm4642_vm5 }
 0x7c1   : > { %4682 = vst.msk [vmem:[%s8391_s26 + $0xf0] sm:$0xff] %vm4651_vm3, %v4634_v18  ;;  %v4638_v26 = vsub.f32 1.0, %v4637_v41 }
 0x7c3   : > { %v4639_v17 = vmul.f32 %v4952_v40, %v4638_v26 }
 0x7c5   : > { %v4640_v35 = vadd.f32 %v4952_v40, %v4639_v17 }
 0x7c7   : > { %v4644_v51 = vsel %vm4643_vm7, %v4952_v40, %v4640_v35 }
 0x7c8   : > { %v4649_v43 = vsel %vm4646_vm8, %v4648_v59, %v4644_v51 }
 0x7c9   : > { %4683 = vst.msk [vmem:[%s8391_s26 + $0xf8] sm:$0xff] %vm4651_vm3, %v4649_v43 }
 0x7ca PF: > { %s15_s18 = sadd.s32 1, %s5345_s18  }
 0x7cb   : > { %p12_p4 = scmp.ge.s32.totalorder %s15_s18, 4  }
 0x7cd   :  { %14 = sbr.rel (!%p12_p4) target bundleno = 1 (0x1), region = 70 }

</bundles_post_ra>
